<compile_context>
chip_gen: v7x
topology: tpu7x:2x2x1
jax: 0.10.0
libtpu: 0.0.40
codegen_flags: <defaults>
</compile_context>

<pallas_src>
import jax
import jax.numpy as jnp
from jax import lax
from jax.experimental import pallas as pl
from jax.experimental.pallas import tpu as pltpu

EPS = 1e-5  # nn.BatchNorm2d default eps


# ---------------------------------------------------------------------------
# Fused kernel: conv1(3x3)+BN1+ReLU -> conv2(3x3)+BN2, 1x1 shortcut, add+ReLU
# ---------------------------------------------------------------------------
def _residual_fused_kernel(x_ref, w1_ref, g1_ref, beta1_ref,
                           w2_ref, g2_ref, beta2_ref,
                           w3_ref, b3_ref, out_ref,
                           xp_scr, y1p_scr):
    N, H, W, Cp = x_ref.shape            # channels already padded to 128 lanes
    M = N * H * W
    inv_m = jnp.float32(1.0 / M)

    def conv3x3_patches(src_scr):
        # 9 shifted windows, concatenated on the lane axis -> one im2col matrix
        cols = []
        for k in range(9):
            dh, dw = k // 3, k % 3
            cols.append(src_scr[:, dh:dh + H, dw:dw + W, :].reshape(M, Cp))
        return jnp.concatenate(cols, axis=-1)               # (M, 9*Cp)

    def batchnorm(acc, g, b):
        # single-pass batch stats: var = E[x^2] - E[x]^2 (biased, training mode)
        mean = jnp.sum(acc, axis=0, keepdims=True) * inv_m
        msq = jnp.sum(acc * acc, axis=0, keepdims=True) * inv_m
        var = msq - mean * mean
        return (acc - mean) * lax.rsqrt(var + EPS) * g + b

    # ---- stage 1: zero-pad X spatially in VMEM (halo handled in-kernel) ----
    xp_scr[...] = jnp.zeros_like(xp_scr)
    xp_scr[:, 1:1 + H, 1:1 + W, :] = x_ref[...]

    patches1 = conv3x3_patches(xp_scr)
    # conv1 bias intentionally omitted: it is exactly cancelled by BN1's mean.
    acc1 = jnp.dot(patches1, w1_ref[...], preferred_element_type=jnp.float32)
    y1 = jnp.maximum(batchnorm(acc1, g1_ref[...], beta1_ref[...]), 0.0)

    # ---- stage 2: conv2 on padded Y1 (stays in VMEM, no HBM round-trip) ----
    y1p_scr[...] = jnp.zeros_like(y1p_scr)
    y1p_scr[:, 1:1 + H, 1:1 + W, :] = y1.reshape(N, H, W, Cp)

    patches2 = conv3x3_patches(y1p_scr)
    # conv2 bias intentionally omitted: cancelled by BN2's mean.
    acc2 = jnp.dot(patches2, w2_ref[...], preferred_element_type=jnp.float32)
    y2 = batchnorm(acc2, g2_ref[...], beta2_ref[...])

    # ---- 1x1 projection shortcut: reuse channel-padded X resident in VMEM ----
    x_flat = x_ref[...].reshape(M, Cp)
    shortcut = jnp.dot(x_flat, w3_ref[...],
                       preferred_element_type=jnp.float32) + b3_ref[...]

    out = jnp.maximum(y2 + shortcut, 0.0)
    out_ref[...] = out.reshape(N, H, W, Cp).astype(out_ref.dtype)


# ---------------------------------------------------------------------------
# Wrapper: layout transposes, channel padding to 128 lanes, weight repacking
# ---------------------------------------------------------------------------
def residual_forward(x_nchw, p):
    N, Cin, H, W = x_nchw.shape
    Cout = p["w1"].shape[0]
    Cp = -(-max(Cin, Cout) // 128) * 128               # pad channels to 128 lanes

    # NCHW -> NHWC, channel-pad only (spatial halo is built inside the kernel).
    x = jnp.transpose(x_nchw, (0, 2, 3, 1)).astype(jnp.float32)
    x = jnp.pad(x, ((0, 0), (0, 0), (0, 0), (0, Cp - Cin)))

    def pack3x3(w):
        # OIHW -> (kh*kw*Cin_p, Cout_p); row k*Cp+c is tap k=(kh*3+kw), in-ch c.
        o, i = w.shape[0], w.shape[1]
        wk = jnp.transpose(w, (2, 3, 1, 0)).reshape(9, i, o)
        wk = jnp.pad(wk, ((0, 0), (0, Cp - i), (0, Cp - o)))
        return wk.reshape(9 * Cp, Cp).astype(jnp.float32)

    def row(v):
        return jnp.pad(v.reshape(1, -1), ((0, 0), (0, Cp - v.shape[0]))
                       ).astype(jnp.float32)

    w1 = pack3x3(p["w1"])
    w2 = pack3x3(p["w2"])
    w3 = jnp.pad(jnp.transpose(p["w3"][:, :, 0, 0], (1, 0)),
                 ((0, Cp - Cin), (0, Cp - Cout))).astype(jnp.float32)

    vmem = pl.BlockSpec(memory_space=pltpu.MemorySpace.VMEM)

    out_p = pl.pallas_call(
        _residual_fused_kernel,
        out_shape=jax.ShapeDtypeStruct((N, H, W, Cp), jnp.float32),
        in_specs=[vmem] * 9,
        out_specs=vmem,
        scratch_shapes=[
            pltpu.VMEM((N, H + 2, W + 2, Cp), jnp.float32),   # padded X
            pltpu.VMEM((N, H + 2, W + 2, Cp), jnp.float32),   # padded Y1
        ],
        compiler_params=pltpu.CompilerParams(
            vmem_limit_bytes=64 * 1024 * 1024),
    )(x, w1, row(p["g1"]), row(p["beta1"]),
      w2, row(p["g2"]), row(p["beta2"]),
      w3, row(p["b3"]))

    # strip channel padding, back to NCHW
    return jnp.transpose(out_p[..., :Cout], (0, 3, 1, 2))


# ---------------------------------------------------------------------------
# Pure-JAX reference (NCHW, same as PyTorch) for correctness checking
# ---------------------------------------------------------------------------
def residual_reference(x, p):
    dn = ("NCHW", "OIHW", "NCHW")

    def bn(y, g, b):
        mean = jnp.mean(y, axis=(0, 2, 3), keepdims=True)
        var = jnp.var(y, axis=(0, 2, 3), keepdims=True)   # biased, like PyTorch train
        return ((y - mean) * lax.rsqrt(var + EPS) * g[None, :, None, None]
                + b[None, :, None, None])

    y = lax.conv_general_dilated(x, p["w1"], (1, 1), ((1, 1), (1, 1)),
                                 dimension_numbers=dn) + p["b1"][None, :, None, None]
    y = jnp.maximum(bn(y, p["g1"], p["beta1"]), 0.0)
    y = lax.conv_general_dilated(y, p["w2"], (1, 1), ((1, 1), (1, 1)),
                                 dimension_numbers=dn) + p["b2"][None, :, None, None]
    y = bn(y, p["g2"], p["beta2"])
    sc = lax.conv_general_dilated(x, p["w3"], (1, 1), ((0, 0), (0, 0)),
                                  dimension_numbers=dn) + p["b3"][None, :, None, None]
    return jnp.maximum(y + sc, 0.0)


if __name__ == "__main__":
    N, Cin, Cout, H, W = 2, 4, 8, 16, 16

    key = jax.random.PRNGKey(0)
    ks = jax.random.split(key, 11)
    p = {
        "w1": 0.1 * jax.random.normal(ks[0], (Cout, Cin, 3, 3), jnp.float32),
        "b1": 0.1 * jax.random.normal(ks[1], (Cout,), jnp.float32),
        "w2": 0.1 * jax.random.normal(ks[2], (Cout, Cout, 3, 3), jnp.float32),
        "b2": 0.1 * jax.random.normal(ks[3], (Cout,), jnp.float32),
        "w3": 0.1 * jax.random.normal(ks[4], (Cout, Cin, 1, 1), jnp.float32),
        "b3": 0.1 * jax.random.normal(ks[5], (Cout,), jnp.float32),
        "g1": 1.0 + 0.1 * jax.random.normal(ks[6], (Cout,), jnp.float32),
        "beta1": 0.1 * jax.random.normal(ks[7], (Cout,), jnp.float32),
        "g2": 1.0 + 0.1 * jax.random.normal(ks[8], (Cout,), jnp.float32),
        "beta2": 0.1 * jax.random.normal(ks[9], (Cout,), jnp.float32),
    }
    x = jax.random.normal(ks[10], (N, Cin, H, W), jnp.float32)

    out = jax.block_until_ready(residual_forward(x, p))
    ref = jax.block_until_ready(residual_reference(x, p))

    err = float(jnp.max(jnp.abs(out - ref)))
    assert out.shape == (N, Cout, H, W), out.shape
    assert err < 1e-4, f"max abs error {err}"
    print("KERNEL_OK")
</pallas_src>

<mosaic_0001>
module attributes {stable_mosaic.version = 11 : i64} {
  func.func @_residual_fused_kernel(%arg0: memref<2x16x16x128xf32, #tpu.memory_space<vmem>>, %arg1: memref<1152x128xf32, #tpu.memory_space<vmem>>, %arg2: memref<1x128xf32, #tpu.memory_space<vmem>>, %arg3: memref<1x128xf32, #tpu.memory_space<vmem>>, %arg4: memref<1152x128xf32, #tpu.memory_space<vmem>>, %arg5: memref<1x128xf32, #tpu.memory_space<vmem>>, %arg6: memref<1x128xf32, #tpu.memory_space<vmem>>, %arg7: memref<128x128xf32, #tpu.memory_space<vmem>>, %arg8: memref<1x128xf32, #tpu.memory_space<vmem>>, %arg9: memref<2x16x16x128xf32, #tpu.memory_space<vmem>>, %arg10: memref<2x18x18x128xf32, #tpu.memory_space<vmem>>, %arg11: memref<2x18x18x128xf32, #tpu.memory_space<vmem>>) attributes {dimension_semantics = [], scalar_prefetch = 0 : i64, scratch_operands = 2 : i64, tpu.core_type = #tpu.core_type<tc>} {
    %cst = arith.constant 0.000000e+00 : f32
    %0 = vector.broadcast %cst : f32 to vector<2x18x18x128xf32>
    %c0 = arith.constant 0 : index
    %c0_0 = arith.constant 0 : index
    %c0_1 = arith.constant 0 : index
    %c0_2 = arith.constant 0 : index
    %1 = vector.load %arg10[%c0, %c0_0, %c0_1, %c0_2] : memref<2x18x18x128xf32, #tpu.memory_space<vmem>>, vector<2x18x18x128xf32>
    tpu.vector_store %arg10[%c0, %c0_0, %c0_1, %c0_2], %0 {strides = array<i32>} : memref<2x18x18x128xf32, #tpu.memory_space<vmem>>, vector<2x18x18x128xf32>,
    %c0_3 = arith.constant 0 : index
    %c0_4 = arith.constant 0 : index
    %c0_5 = arith.constant 0 : index
    %c0_6 = arith.constant 0 : index
    %2 = vector.load %arg0[%c0_3, %c0_4, %c0_5, %c0_6] : memref<2x16x16x128xf32, #tpu.memory_space<vmem>>, vector<2x16x16x128xf32>
    %c0_7 = arith.constant 0 : index
    %c1 = arith.constant 1 : index
    %c1_8 = arith.constant 1 : index
    %c0_9 = arith.constant 0 : index
    %3 = vector.load %arg10[%c0_7, %c1, %c1_8, %c0_9] : memref<2x18x18x128xf32, #tpu.memory_space<vmem>>, vector<2x16x16x128xf32>
    tpu.vector_store %arg10[%c0_7, %c1, %c1_8, %c0_9], %2 {strides = array<i32>} : memref<2x18x18x128xf32, #tpu.memory_space<vmem>>, vector<2x16x16x128xf32>,
    %c0_10 = arith.constant 0 : index
    %c0_11 = arith.constant 0 : index
    %c0_12 = arith.constant 0 : index
    %c0_13 = arith.constant 0 : index
    %4 = vector.load %arg10[%c0_10, %c0_11, %c0_12, %c0_13] : memref<2x18x18x128xf32, #tpu.memory_space<vmem>>, vector<2x16x16x128xf32>
    %5 = vector.shape_cast %4 : vector<2x16x16x128xf32> to vector<512x128xf32>
    %c0_14 = arith.constant 0 : index
    %c0_15 = arith.constant 0 : index
    %c1_16 = arith.constant 1 : index
    %c0_17 = arith.constant 0 : index
    %6 = vector.load %arg10[%c0_14, %c0_15, %c1_16, %c0_17] : memref<2x18x18x128xf32, #tpu.memory_space<vmem>>, vector<2x16x16x128xf32>
    %7 = vector.shape_cast %6 : vector<2x16x16x128xf32> to vector<512x128xf32>
    %c0_18 = arith.constant 0 : index
    %c0_19 = arith.constant 0 : index
    %c2 = arith.constant 2 : index
    %c0_20 = arith.constant 0 : index
    %8 = vector.load %arg10[%c0_18, %c0_19, %c2, %c0_20] : memref<2x18x18x128xf32, #tpu.memory_space<vmem>>, vector<2x16x16x128xf32>
    %9 = vector.shape_cast %8 : vector<2x16x16x128xf32> to vector<512x128xf32>
    %c0_21 = arith.constant 0 : index
    %c1_22 = arith.constant 1 : index
    %c0_23 = arith.constant 0 : index
    %c0_24 = arith.constant 0 : index
    %10 = vector.load %arg10[%c0_21, %c1_22, %c0_23, %c0_24] : memref<2x18x18x128xf32, #tpu.memory_space<vmem>>, vector<2x16x16x128xf32>
    %11 = vector.shape_cast %10 : vector<2x16x16x128xf32> to vector<512x128xf32>
    %c0_25 = arith.constant 0 : index
    %c1_26 = arith.constant 1 : index
    %c1_27 = arith.constant 1 : index
    %c0_28 = arith.constant 0 : index
    %12 = vector.load %arg10[%c0_25, %c1_26, %c1_27, %c0_28] : memref<2x18x18x128xf32, #tpu.memory_space<vmem>>, vector<2x16x16x128xf32>
    %13 = vector.shape_cast %12 : vector<2x16x16x128xf32> to vector<512x128xf32>
    %c0_29 = arith.constant 0 : index
    %c1_30 = arith.constant 1 : index
    %c2_31 = arith.constant 2 : index
    %c0_32 = arith.constant 0 : index
    %14 = vector.load %arg10[%c0_29, %c1_30, %c2_31, %c0_32] : memref<2x18x18x128xf32, #tpu.memory_space<vmem>>, vector<2x16x16x128xf32>
    %15 = vector.shape_cast %14 : vector<2x16x16x128xf32> to vector<512x128xf32>
    %c0_33 = arith.constant 0 : index
    %c2_34 = arith.constant 2 : index
    %c0_35 = arith.constant 0 : index
    %c0_36 = arith.constant 0 : index
    %16 = vector.load %arg10[%c0_33, %c2_34, %c0_35, %c0_36] : memref<2x18x18x128xf32, #tpu.memory_space<vmem>>, vector<2x16x16x128xf32>
    %17 = vector.shape_cast %16 : vector<2x16x16x128xf32> to vector<512x128xf32>
    %c0_37 = arith.constant 0 : index
    %c2_38 = arith.constant 2 : index
    %c1_39 = arith.constant 1 : index
    %c0_40 = arith.constant 0 : index
    %18 = vector.load %arg10[%c0_37, %c2_38, %c1_39, %c0_40] : memref<2x18x18x128xf32, #tpu.memory_space<vmem>>, vector<2x16x16x128xf32>
    %19 = vector.shape_cast %18 : vector<2x16x16x128xf32> to vector<512x128xf32>
    %c0_41 = arith.constant 0 : index
    %c2_42 = arith.constant 2 : index
    %c2_43 = arith.constant 2 : index
    %c0_44 = arith.constant 0 : index
    %20 = vector.load %arg10[%c0_41, %c2_42, %c2_43, %c0_44] : memref<2x18x18x128xf32, #tpu.memory_space<vmem>>, vector<2x16x16x128xf32>
    %21 = vector.shape_cast %20 : vector<2x16x16x128xf32> to vector<512x128xf32>
    %22 = tpu.concatenate %5, %7, %9, %11, %13, %15, %17, %19, %21 in 1 : vector<512x128xf32>, vector<512x128xf32>, vector<512x128xf32>, vector<512x128xf32>, vector<512x128xf32>, vector<512x128xf32>, vector<512x128xf32>, vector<512x128xf32>, vector<512x128xf32> -> vector<512x1152xf32>
    %c0_45 = arith.constant 0 : index
    %c0_46 = arith.constant 0 : index
    %23 = vector.load %arg1[%c0_45, %c0_46] : memref<1152x128xf32, #tpu.memory_space<vmem>>, vector<1152x128xf32>
    %cst_47 = arith.constant dense<0.000000e+00> : vector<512x128xf32>
    %24 = tpu.matmul %22, %23, %cst_47 {dimension_numbers = #tpu.dot_dimension_numbers<[1], [0], [0], [1], [0, 0, 1, 1], [], []>} : vector<512x1152xf32>, vector<1152x128xf32>, vector<512x128xf32> -> vector<512x128xf32>
    %c0_48 = arith.constant 0 : index
    %c0_49 = arith.constant 0 : index
    %25 = vector.load %arg2[%c0_48, %c0_49] : memref<1x128xf32, #tpu.memory_space<vmem>>, vector<1x128xf32>
    %c0_50 = arith.constant 0 : index
    %c0_51 = arith.constant 0 : index
    %26 = vector.load %arg3[%c0_50, %c0_51] : memref<1x128xf32, #tpu.memory_space<vmem>>, vector<1x128xf32>
    %cst_52 = arith.constant dense<0.000000e+00> : vector<128xf32>
    %27 = vector.multi_reduction <add>, %24, %cst_52 [0] : vector<512x128xf32> to vector<128xf32>
    %28 = vector.shape_cast %27 : vector<128xf32> to vector<1x128xf32>
    %cst_53 = arith.constant 0.001953125 : f32
    %29 = vector.broadcast %cst_53 : f32 to vector<1x128xf32>
    %30 = arith.mulf %28, %29 : vector<1x128xf32>
    %31 = arith.mulf %24, %24 : vector<512x128xf32>
    %cst_54 = arith.constant dense<0.000000e+00> : vector<128xf32>
    %32 = vector.multi_reduction <add>, %31, %cst_54 [0] : vector<512x128xf32> to vector<128xf32>
    %33 = vector.shape_cast %32 : vector<128xf32> to vector<1x128xf32>
    %cst_55 = arith.constant 0.001953125 : f32
    %34 = vector.broadcast %cst_55 : f32 to vector<1x128xf32>
    %35 = arith.mulf %33, %34 : vector<1x128xf32>
    %36 = arith.mulf %30, %30 : vector<1x128xf32>
    %37 = arith.subf %35, %36 : vector<1x128xf32>
    %38 = vector.broadcast %30 : vector<1x128xf32> to vector<512x128xf32>
    %39 = arith.subf %24, %38 : vector<512x128xf32>
    %cst_56 = arith.constant 9.99999974E-6 : f32
    %40 = vector.broadcast %cst_56 : f32 to vector<1x128xf32>
    %41 = arith.addf %37, %40 : vector<1x128xf32>
    %42 = math.rsqrt %41 : vector<1x128xf32>
    %43 = vector.broadcast %42 : vector<1x128xf32> to vector<512x128xf32>
    %44 = arith.mulf %39, %43 : vector<512x128xf32>
    %45 = vector.broadcast %25 : vector<1x128xf32> to vector<512x128xf32>
    %46 = arith.mulf %44, %45 : vector<512x128xf32>
    %47 = vector.broadcast %26 : vector<1x128xf32> to vector<512x128xf32>
    %48 = arith.addf %46, %47 : vector<512x128xf32>
    %cst_57 = arith.constant 0.000000e+00 : f32
    %49 = vector.broadcast %cst_57 : f32 to vector<512x128xf32>
    %50 = arith.maximumf %48, %49 : vector<512x128xf32>
    %cst_58 = arith.constant 0.000000e+00 : f32
    %51 = vector.broadcast %cst_58 : f32 to vector<2x18x18x128xf32>
    %c0_59 = arith.constant 0 : index
    %c0_60 = arith.constant 0 : index
    %c0_61 = arith.constant 0 : index
    %c0_62 = arith.constant 0 : index
    %52 = vector.load %arg11[%c0_59, %c0_60, %c0_61, %c0_62] : memref<2x18x18x128xf32, #tpu.memory_space<vmem>>, vector<2x18x18x128xf32>
    tpu.vector_store %arg11[%c0_59, %c0_60, %c0_61, %c0_62], %51 {strides = array<i32>} : memref<2x18x18x128xf32, #tpu.memory_space<vmem>>, vector<2x18x18x128xf32>,
    %53 = vector.shape_cast %50 : vector<512x128xf32> to vector<2x16x16x128xf32>
    %c0_63 = arith.constant 0 : index
    %c1_64 = arith.constant 1 : index
    %c1_65 = arith.constant 1 : index
    %c0_66 = arith.constant 0 : index
    %54 = vector.load %arg11[%c0_63, %c1_64, %c1_65, %c0_66] : memref<2x18x18x128xf32, #tpu.memory_space<vmem>>, vector<2x16x16x128xf32>
    tpu.vector_store %arg11[%c0_63, %c1_64, %c1_65, %c0_66], %53 {strides = array<i32>} : memref<2x18x18x128xf32, #tpu.memory_space<vmem>>, vector<2x16x16x128xf32>,
    %c0_67 = arith.constant 0 : index
    %c0_68 = arith.constant 0 : index
    %c0_69 = arith.constant 0 : index
    %c0_70 = arith.constant 0 : index
    %55 = vector.load %arg11[%c0_67, %c0_68, %c0_69, %c0_70] : memref<2x18x18x128xf32, #tpu.memory_space<vmem>>, vector<2x16x16x128xf32>
    %56 = vector.shape_cast %55 : vector<2x16x16x128xf32> to vector<512x128xf32>
    %c0_71 = arith.constant 0 : index
    %c0_72 = arith.constant 0 : index
    %c1_73 = arith.constant 1 : index
    %c0_74 = arith.constant 0 : index
    %57 = vector.load %arg11[%c0_71, %c0_72, %c1_73, %c0_74] : memref<2x18x18x128xf32, #tpu.memory_space<vmem>>, vector<2x16x16x128xf32>
    %58 = vector.shape_cast %57 : vector<2x16x16x128xf32> to vector<512x128xf32>
    %c0_75 = arith.constant 0 : index
    %c0_76 = arith.constant 0 : index
    %c2_77 = arith.constant 2 : index
    %c0_78 = arith.constant 0 : index
    %59 = vector.load %arg11[%c0_75, %c0_76, %c2_77, %c0_78] : memref<2x18x18x128xf32, #tpu.memory_space<vmem>>, vector<2x16x16x128xf32>
    %60 = vector.shape_cast %59 : vector<2x16x16x128xf32> to vector<512x128xf32>
    %c0_79 = arith.constant 0 : index
    %c1_80 = arith.constant 1 : index
    %c0_81 = arith.constant 0 : index
    %c0_82 = arith.constant 0 : index
    %61 = vector.load %arg11[%c0_79, %c1_80, %c0_81, %c0_82] : memref<2x18x18x128xf32, #tpu.memory_space<vmem>>, vector<2x16x16x128xf32>
    %62 = vector.shape_cast %61 : vector<2x16x16x128xf32> to vector<512x128xf32>
    %c0_83 = arith.constant 0 : index
    %c1_84 = arith.constant 1 : index
    %c1_85 = arith.constant 1 : index
    %c0_86 = arith.constant 0 : index
    %63 = vector.load %arg11[%c0_83, %c1_84, %c1_85, %c0_86] : memref<2x18x18x128xf32, #tpu.memory_space<vmem>>, vector<2x16x16x128xf32>
    %64 = vector.shape_cast %63 : vector<2x16x16x128xf32> to vector<512x128xf32>
    %c0_87 = arith.constant 0 : index
    %c1_88 = arith.constant 1 : index
    %c2_89 = arith.constant 2 : index
    %c0_90 = arith.constant 0 : index
    %65 = vector.load %arg11[%c0_87, %c1_88, %c2_89, %c0_90] : memref<2x18x18x128xf32, #tpu.memory_space<vmem>>, vector<2x16x16x128xf32>
    %66 = vector.shape_cast %65 : vector<2x16x16x128xf32> to vector<512x128xf32>
    %c0_91 = arith.constant 0 : index
    %c2_92 = arith.constant 2 : index
    %c0_93 = arith.constant 0 : index
    %c0_94 = arith.constant 0 : index
    %67 = vector.load %arg11[%c0_91, %c2_92, %c0_93, %c0_94] : memref<2x18x18x128xf32, #tpu.memory_space<vmem>>, vector<2x16x16x128xf32>
    %68 = vector.shape_cast %67 : vector<2x16x16x128xf32> to vector<512x128xf32>
    %c0_95 = arith.constant 0 : index
    %c2_96 = arith.constant 2 : index
    %c1_97 = arith.constant 1 : index
    %c0_98 = arith.constant 0 : index
    %69 = vector.load %arg11[%c0_95, %c2_96, %c1_97, %c0_98] : memref<2x18x18x128xf32, #tpu.memory_space<vmem>>, vector<2x16x16x128xf32>
    %70 = vector.shape_cast %69 : vector<2x16x16x128xf32> to vector<512x128xf32>
    %c0_99 = arith.constant 0 : index
    %c2_100 = arith.constant 2 : index
    %c2_101 = arith.constant 2 : index
    %c0_102 = arith.constant 0 : index
    %71 = vector.load %arg11[%c0_99, %c2_100, %c2_101, %c0_102] : memref<2x18x18x128xf32, #tpu.memory_space<vmem>>, vector<2x16x16x128xf32>
    %72 = vector.shape_cast %71 : vector<2x16x16x128xf32> to vector<512x128xf32>
    %73 = tpu.concatenate %56, %58, %60, %62, %64, %66, %68, %70, %72 in 1 : vector<512x128xf32>, vector<512x128xf32>, vector<512x128xf32>, vector<512x128xf32>, vector<512x128xf32>, vector<512x128xf32>, vector<512x128xf32>, vector<512x128xf32>, vector<512x128xf32> -> vector<512x1152xf32>
    %c0_103 = arith.constant 0 : index
    %c0_104 = arith.constant 0 : index
    %74 = vector.load %arg4[%c0_103, %c0_104] : memref<1152x128xf32, #tpu.memory_space<vmem>>, vector<1152x128xf32>
    %cst_105 = arith.constant dense<0.000000e+00> : vector<512x128xf32>
    %75 = tpu.matmul %73, %74, %cst_105 {dimension_numbers = #tpu.dot_dimension_numbers<[1], [0], [0], [1], [0, 0, 1, 1], [], []>} : vector<512x1152xf32>, vector<1152x128xf32>, vector<512x128xf32> -> vector<512x128xf32>
    %c0_106 = arith.constant 0 : index
    %c0_107 = arith.constant 0 : index
    %76 = vector.load %arg5[%c0_106, %c0_107] : memref<1x128xf32, #tpu.memory_space<vmem>>, vector<1x128xf32>
    %c0_108 = arith.constant 0 : index
    %c0_109 = arith.constant 0 : index
    %77 = vector.load %arg6[%c0_108, %c0_109] : memref<1x128xf32, #tpu.memory_space<vmem>>, vector<1x128xf32>
    %cst_110 = arith.constant dense<0.000000e+00> : vector<128xf32>
    %78 = vector.multi_reduction <add>, %75, %cst_110 [0] : vector<512x128xf32> to vector<128xf32>
    %79 = vector.shape_cast %78 : vector<128xf32> to vector<1x128xf32>
    %cst_111 = arith.constant 0.001953125 : f32
    %80 = vector.broadcast %cst_111 : f32 to vector<1x128xf32>
    %81 = arith.mulf %79, %80 : vector<1x128xf32>
    %82 = arith.mulf %75, %75 : vector<512x128xf32>
    %cst_112 = arith.constant dense<0.000000e+00> : vector<128xf32>
    %83 = vector.multi_reduction <add>, %82, %cst_112 [0] : vector<512x128xf32> to vector<128xf32>
    %84 = vector.shape_cast %83 : vector<128xf32> to vector<1x128xf32>
    %cst_113 = arith.constant 0.001953125 : f32
    %85 = vector.broadcast %cst_113 : f32 to vector<1x128xf32>
    %86 = arith.mulf %84, %85 : vector<1x128xf32>
    %87 = arith.mulf %81, %81 : vector<1x128xf32>
    %88 = arith.subf %86, %87 : vector<1x128xf32>
    %89 = vector.broadcast %81 : vector<1x128xf32> to vector<512x128xf32>
    %90 = arith.subf %75, %89 : vector<512x128xf32>
    %cst_114 = arith.constant 9.99999974E-6 : f32
    %91 = vector.broadcast %cst_114 : f32 to vector<1x128xf32>
    %92 = arith.addf %88, %91 : vector<1x128xf32>
    %93 = math.rsqrt %92 : vector<1x128xf32>
    %94 = vector.broadcast %93 : vector<1x128xf32> to vector<512x128xf32>
    %95 = arith.mulf %90, %94 : vector<512x128xf32>
    %96 = vector.broadcast %76 : vector<1x128xf32> to vector<512x128xf32>
    %97 = arith.mulf %95, %96 : vector<512x128xf32>
    %98 = vector.broadcast %77 : vector<1x128xf32> to vector<512x128xf32>
    %99 = arith.addf %97, %98 : vector<512x128xf32>
    %c0_115 = arith.constant 0 : index
    %c0_116 = arith.constant 0 : index
    %c0_117 = arith.constant 0 : index
    %c0_118 = arith.constant 0 : index
    %100 = vector.load %arg0[%c0_115, %c0_116, %c0_117, %c0_118] : memref<2x16x16x128xf32, #tpu.memory_space<vmem>>, vector<2x16x16x128xf32>
    %101 = vector.shape_cast %100 : vector<2x16x16x128xf32> to vector<512x128xf32>
    %c0_119 = arith.constant 0 : index
    %c0_120 = arith.constant 0 : index
    %102 = vector.load %arg7[%c0_119, %c0_120] : memref<128x128xf32, #tpu.memory_space<vmem>>, vector<128x128xf32>
    %cst_121 = arith.constant dense<0.000000e+00> : vector<512x128xf32>
    %103 = tpu.matmul %101, %102, %cst_121 {dimension_numbers = #tpu.dot_dimension_numbers<[1], [0], [0], [1], [0, 0, 1, 1], [], []>} : vector<512x128xf32>, vector<128x128xf32>, vector<512x128xf32> -> vector<512x128xf32>
    %c0_122 = arith.constant 0 : index
    %c0_123 = arith.constant 0 : index
    %104 = vector.load %arg8[%c0_122, %c0_123] : memref<1x128xf32, #tpu.memory_space<vmem>>, vector<1x128xf32>
    %105 = vector.broadcast %104 : vector<1x128xf32> to vector<512x128xf32>
    %106 = arith.addf %103, %105 : vector<512x128xf32>
    %107 = arith.addf %99, %106 : vector<512x128xf32>
    %cst_124 = arith.constant 0.000000e+00 : f32
    %108 = vector.broadcast %cst_124 : f32 to vector<512x128xf32>
    %109 = arith.maximumf %107, %108 : vector<512x128xf32>
    %110 = vector.shape_cast %109 : vector<512x128xf32> to vector<2x16x16x128xf32>
    %c0_125 = arith.constant 0 : index
    %c0_126 = arith.constant 0 : index
    %c0_127 = arith.constant 0 : index
    %c0_128 = arith.constant 0 : index
    %111 = vector.load %arg9[%c0_125, %c0_126, %c0_127, %c0_128] : memref<2x16x16x128xf32, #tpu.memory_space<vmem>>, vector<2x16x16x128xf32>
    tpu.vector_store %arg9[%c0_125, %c0_126, %c0_127, %c0_128], %110 {strides = array<i32>} : memref<2x16x16x128xf32, #tpu.memory_space<vmem>>, vector<2x16x16x128xf32>,
    return
  }
}

</mosaic_0001>

<bundles_post_ra>
// kernel: tpu_custom_call.1
= control target key start
LH: loop header
LB: loop body
LE: loop exit
PB: predicated region body
PF: predicated region fallthrough
CT: control target
= control target key end

     0   :  { %14 = vsyncpa [#allocation5], 0  ;;  %s15219_s0 = inlined_call_operand.hbm [shape: f32[2,16,16,128], index: 0, kind: input, shape index: {}]   ;;  %s15220_s1 = inlined_call_operand.hbm [shape: f32[1152,128], index: 1, kind: input, shape index: {}]   ;;  %s15221_s2 = inlined_call_operand.hbm [shape: f32[1,128], index: 2, kind: input, shape index: {}]   ;;  %s15222_s3 = inlined_call_operand.hbm [shape: f32[1,128], index: 3, kind: input, shape index: {}]   ;;  %s15223_s4 = inlined_call_operand.hbm [shape: f32[1152,128], index: 4, kind: input, shape index: {}]   ;;  %s15224_s5 = inlined_call_operand.hbm [shape: f32[1,128], index: 5, kind: input, shape index: {}]   ;;  %s15225_s6 = inlined_call_operand.hbm [shape: f32[1,128], index: 6, kind: input, shape index: {}]   ;;  %s15226_s7 = inlined_call_operand.hbm [shape: f32[128,128], index: 7, kind: input, shape index: {}]   ;;  %s15227_s8 = inlined_call_operand.hbm [shape: f32[1,128], index: 8, kind: input, shape index: {}]   ;;  %s15228_s9 = inlined_call_operand.hbm [shape: f32[2,16,16,128], index: 9, kind: output, shape index: {}]  }
   0x1   :  { %15 = vsyncpa [#allocation8], 0 }
   0x2   :  { %16 = vsyncpa [#allocation11], 0 }
   0x3   :  { %17 = vsyncpa [#allocation14], 0 }
   0x4   :  { %18 = vsyncpa [#allocation17], 0 }
   0x5   :  { %19 = vsyncpa [#allocation6], 0  ;;  %s9701_s30 = smov [#allocation7]   ;;  %s9702_s11 = smov [#allocation10]  }
   0x6   :  { %s37_s10 = sshll.u32 %s9701_s30, 4  ;;  %s60_s12 = sshll.u32 %s9702_s11, 4  ;;  %s38_s10 = int_to_ptr.vmem [resolvable:$true] %s37_s10  ;;  %s9765_s12 = int_to_ptr.vmem [resolvable:$true] %s60_s12 }
   0x7   :  { %s9469_s15 = scalar_lea.hbm %s15220_s1, 18432 }
   0x8   :  { %p9470_p0 = scmp.ne.s32.totalorder %s15220_s1, %s9469_s15  ;;  %p9473_p1 = scmp.lt.u32.totalorder %s9469_s15, %s15220_s1 }
   0xa   :  { %p9475_p2 = pnand %p9473_p1, %p9470_p0 }
   0xc   :  { %9478 = shalt.err (!%p9475_p2)
}
   0xd   :  { %s9479_s20 = scalar_lea.vmem %s38_s10, 18432  ;;  %p9484_p4 = scmp.lt.s32.totalorder %s38_s10, %s38_s10 }
   0xe   :  { %p9480_p3 = scmp.ne.s32.totalorder %s38_s10, %s9479_s20  ;;  %p9485_p5 = scmp.lt.s32.totalorder %s9479_s20, %s9479_s20 }
  0x10   :  { %p9486_p6 = por %p9485_p5, %p9484_p4 }
  0x12   :  { %p9487_p7 = pnand %p9486_p6, %p9480_p3 }
  0x14   :  { %9490 = shalt.err (!%p9487_p7)
}
  0x15   :  { %s9703_s21 = smov 128   ;;  %s9704_s22 = smov 8  }
  0x16   :  { %43 = dma.hbm_to_vmem [thread:$0]  %s15220_s1, 18432, %s38_s10, [#allocation8], %s9703_s21, %s9703_s21, %s9704_s22  }
  0x17   :  { %s9491_s27 = scalar_lea.hbm %s15222_s3, 16 }
  0x18   :  { %p9492_p8 = scmp.ne.s32.totalorder %s15222_s3, %s9491_s27  ;;  %p9495_p9 = scmp.lt.u32.totalorder %s9491_s27, %s15222_s3 }
  0x1a   :  { %p9497_p10 = pnand %p9495_p9, %p9492_p8 }
  0x1c   :  { %9500 = shalt.err (!%p9497_p10)
}
  0x1d   :  { %s9501_s13 = scalar_lea.vmem %s9765_s12, 16  ;;  %s9505_s1 = scalar_lea.vmem %s9765_s12, 32 }
  0x1e   :  { %p9502_p11 = scmp.ne.s32.totalorder %s9765_s12, %s9501_s13  ;;  %p9506_p12 = scmp.lt.s32.totalorder %s9765_s12, %s9765_s12 }
  0x1f   :  { %p9507_p13 = scmp.lt.s32.totalorder %s9505_s1, %s9501_s13 }
  0x21   :  { %p9508_p0 = por %p9507_p13, %p9506_p12 }
  0x23   :  { %p9509_p1 = pnand %p9508_p0, %p9502_p11 }
  0x25   :  { %9512 = shalt.err (!%p9509_p1)
}
  0x26   :  { %63 = dma.hbm_to_vmem [thread:$0]  %s15222_s3, 16, %s9765_s12, [#allocation11]  }
  0x27   :  { %s9705_s15 = smov [#allocation13]   ;;  %s9706_s17 = smov [#allocation16]  }
  0x28   :  { %s82_s16 = sshll.u32 %s9705_s15, 4  ;;  %s101_s18 = sshll.u32 %s9706_s17, 4  ;;  %s83_s16 = int_to_ptr.vmem [resolvable:$true] %s82_s16  ;;  %s9800_s18 = int_to_ptr.vmem [resolvable:$true] %s101_s18 }
  0x29   :  { %s9513_s23 = scalar_lea.hbm %s15224_s5, 16 }
  0x2a   :  { %p9514_p2 = scmp.ne.s32.totalorder %s15224_s5, %s9513_s23  ;;  %p9517_p3 = scmp.lt.u32.totalorder %s9513_s23, %s15224_s5 }
  0x2c   :  { %p9519_p4 = pnand %p9517_p3, %p9514_p2 }
  0x2e   :  { %9522 = shalt.err (!%p9519_p4)
}
  0x2f   :  { %s9523_s3 = scalar_lea.vmem %s83_s16, 16  ;;  %s9527_s12 = scalar_lea.vmem %s83_s16, 32 }
  0x30   :  { %p9524_p5 = scmp.ne.s32.totalorder %s83_s16, %s9523_s3  ;;  %p9528_p6 = scmp.lt.s32.totalorder %s83_s16, %s83_s16 }
  0x31   :  { %p9529_p7 = scmp.lt.s32.totalorder %s9527_s12, %s9523_s3 }
  0x33   :  { %p9530_p8 = por %p9529_p7, %p9528_p6 }
  0x35   :  { %p9531_p9 = pnand %p9530_p8, %p9524_p5 }
  0x37   :  { %9534 = shalt.err (!%p9531_p9)
}
  0x38   :  { %85 = dma.hbm_to_vmem [thread:$0]  %s15224_s5, 16, %s83_s16, [#allocation14]  }
  0x39   :  { %s9535_s13 = scalar_lea.hbm %s15226_s7, 2048 }
  0x3a   :  { %p9536_p10 = scmp.ne.s32.totalorder %s15226_s7, %s9535_s13  ;;  %p9539_p11 = scmp.lt.u32.totalorder %s9535_s13, %s15226_s7 }
  0x3c   :  { %p9541_p12 = pnand %p9539_p11, %p9536_p10 }
  0x3e   :  { %9544 = shalt.err (!%p9541_p12)
}
  0x3f   :  { %s9545_s17 = scalar_lea.vmem %s9800_s18, 2048  ;;  %p9550_p0 = scmp.lt.s32.totalorder %s9800_s18, %s9800_s18 }
  0x40   :  { %p9546_p13 = scmp.ne.s32.totalorder %s9800_s18, %s9545_s17  ;;  %p9551_p1 = scmp.lt.s32.totalorder %s9545_s17, %s9545_s17 }
  0x42   :  { %p9552_p2 = por %p9551_p1, %p9550_p0 }
  0x44   :  { %p9553_p3 = pnand %p9552_p2, %p9546_p13 }
  0x46   :  { %9556 = shalt.err (!%p9553_p3)
}
  0x47   :  { %107 = dma.hbm_to_vmem [thread:$0]  %s15226_s7, 2048, %s9800_s18, [#allocation17], %s9703_s21, %s9703_s21, %s9704_s22  }
  0x48   :  { %s9707_s19 = smov [#allocation4]   ;;  %s9708_s23 = smov [#allocation9]  }
  0x49   :  { %s25_s20 = sshll.u32 %s9707_s19, 4  ;;  %s50_s24 = sshll.u32 %s9708_s23, 4  ;;  %s26_s20 = int_to_ptr.vmem [resolvable:$true] %s25_s20  ;;  %s51_s24 = int_to_ptr.vmem [resolvable:$true] %s50_s24 }
  0x4a   :  { %s9557_s27 = scalar_lea.hbm %s15219_s0, 8192 }
  0x4b   :  { %p9558_p4 = scmp.ne.s32.totalorder %s15219_s0, %s9557_s27  ;;  %p9561_p5 = scmp.lt.u32.totalorder %s9557_s27, %s15219_s0 }
  0x4d   :  { %p9563_p6 = pnand %p9561_p5, %p9558_p4 }
  0x4f   :  { %9566 = shalt.err (!%p9563_p6)
}
  0x50   :  { %s9567_s7 = scalar_lea.vmem %s26_s20, 8192  ;;  %p9572_p8 = scmp.lt.s32.totalorder %s26_s20, %s26_s20 }
  0x51   :  { %p9568_p7 = scmp.ne.s32.totalorder %s26_s20, %s9567_s7  ;;  %p9573_p9 = scmp.lt.s32.totalorder %s9567_s7, %s9567_s7 }
  0x53   :  { %p9574_p10 = por %p9573_p9, %p9572_p8 }
  0x55   :  { %p9575_p11 = pnand %p9574_p10, %p9568_p7 }
  0x57   :  { %9578 = shalt.err (!%p9575_p11)
}
  0x58   :  { %31 = dma.hbm_to_vmem [thread:$0]  %s15219_s0, 8192, %s26_s20, [#allocation5], %s9703_s21, %s9703_s21, %s9704_s22  }
  0x59   :  { %s9579_s1 = scalar_lea.hbm %s15221_s2, 16 }
  0x5a   :  { %p9580_p12 = scmp.ne.s32.totalorder %s15221_s2, %s9579_s1  ;;  %p9583_p13 = scmp.lt.u32.totalorder %s9579_s1, %s15221_s2 }
  0x5c   :  { %p9585_p0 = pnand %p9583_p13, %p9580_p12 }
  0x5e   :  { %9588 = shalt.err (!%p9585_p0)
}
  0x5f   :  { %s9589_s5 = scalar_lea.vmem %s51_s24, 16  ;;  %s9593_s16 = scalar_lea.vmem %s51_s24, 32 }
  0x60   :  { %p9590_p1 = scmp.ne.s32.totalorder %s51_s24, %s9589_s5  ;;  %p9594_p2 = scmp.lt.s32.totalorder %s51_s24, %s51_s24 }
  0x61   :  { %p9595_p3 = scmp.lt.s32.totalorder %s9593_s16, %s9589_s5 }
  0x63   :  { %p9596_p4 = por %p9595_p3, %p9594_p2 }
  0x65   :  { %p9597_p5 = pnand %p9596_p4, %p9590_p1 }
  0x67   :  { %9600 = shalt.err (!%p9597_p5)
}
  0x68   :  { %53 = dma.hbm_to_vmem [thread:$0]  %s15221_s2, 16, %s51_s24, [#allocation8]  }
  0x69   :  { %s9709_s20 = smov [#allocation12]   ;;  %s9710_s25 = smov [#allocation15]  }
  0x6a   :  { %s69_s23 = sshll.u32 %s9709_s20, 4  ;;  %s92_s26 = sshll.u32 %s9710_s25, 4  ;;  %s70_s23 = int_to_ptr.vmem [resolvable:$true] %s69_s23  ;;  %s93_s26 = int_to_ptr.vmem [resolvable:$true] %s92_s26 }
  0x6b   :  { %s9601_s12 = scalar_lea.hbm %s15223_s4, 18432 }
  0x6c   :  { %p9602_p6 = scmp.ne.s32.totalorder %s15223_s4, %s9601_s12  ;;  %p9605_p7 = scmp.lt.u32.totalorder %s9601_s12, %s15223_s4 }
  0x6e   :  { %p9607_p8 = pnand %p9605_p7, %p9602_p6 }
  0x70   :  { %9610 = shalt.err (!%p9607_p8)
}
  0x71   :  { %s9611_s2 = scalar_lea.vmem %s70_s23, 18432  ;;  %p9616_p10 = scmp.lt.s32.totalorder %s70_s23, %s70_s23 }
  0x72   :  { %p9612_p9 = scmp.ne.s32.totalorder %s70_s23, %s9611_s2  ;;  %p9617_p11 = scmp.lt.s32.totalorder %s9611_s2, %s9611_s2 }
  0x74   :  { %p9618_p12 = por %p9617_p11, %p9616_p10 }
  0x76   :  { %p9619_p13 = pnand %p9618_p12, %p9612_p9 }
  0x78   :  { %9622 = shalt.err (!%p9619_p13)
}
  0x79   :  { %75 = dma.hbm_to_vmem [thread:$0]  %s15223_s4, 18432, %s70_s23, [#allocation11], %s9703_s21, %s9703_s21, %s9704_s22  }
  0x7a   :  { %s9623_s1 = scalar_lea.hbm %s15225_s6, 16 }
  0x7b   :  { %p9624_p0 = scmp.ne.s32.totalorder %s15225_s6, %s9623_s1  ;;  %p9627_p1 = scmp.lt.u32.totalorder %s9623_s1, %s15225_s6 }
  0x7d   :  { %p9629_p2 = pnand %p9627_p1, %p9624_p0 }
  0x7f   :  { %9632 = shalt.err (!%p9629_p2)
}
  0x80   :  { %s9633_s5 = scalar_lea.vmem %s93_s26, 16  ;;  %s9637_s16 = scalar_lea.vmem %s93_s26, 32 }
  0x81   :  { %p9634_p3 = scmp.ne.s32.totalorder %s93_s26, %s9633_s5  ;;  %p9638_p4 = scmp.lt.s32.totalorder %s93_s26, %s93_s26 }
  0x82   :  { %p9639_p5 = scmp.lt.s32.totalorder %s9637_s16, %s9633_s5 }
  0x84   :  { %p9640_p6 = por %p9639_p5, %p9638_p4 }
  0x86   :  { %p9641_p7 = pnand %p9640_p6, %p9634_p3 }
  0x88   :  { %9644 = shalt.err (!%p9641_p7)
}
  0x89   :  { %95 = dma.hbm_to_vmem [thread:$0]  %s15225_s6, 16, %s93_s26, [#allocation14]  }
  0x8a   :  { %s9711_s19 = smov [#allocation18]   ;;  %s9645_s27 = scalar_lea.hbm %s15227_s8, 16 }
  0x8b   :  { %s114_s20 = sshll.u32 %s9711_s19, 4  ;;  %p9646_p8 = scmp.ne.s32.totalorder %s15227_s8, %s9645_s27  ;;  %s115_s20 = int_to_ptr.vmem [resolvable:$true] %s114_s20 }
  0x8c   :  { %p9649_p9 = scmp.lt.u32.totalorder %s9645_s27, %s15227_s8 }
  0x8e   :  { %p9651_p10 = pnand %p9649_p9, %p9646_p8 }
  0x90   :  { %9654 = shalt.err (!%p9651_p10)
}
  0x91   :  { %s9655_s7 = scalar_lea.vmem %s115_s20, 16  ;;  %s9659_s6 = scalar_lea.vmem %s115_s20, 32 }
  0x92   :  { %p9656_p11 = scmp.ne.s32.totalorder %s115_s20, %s9655_s7  ;;  %p9660_p12 = scmp.lt.s32.totalorder %s115_s20, %s115_s20 }
  0x93   :  { %p9661_p13 = scmp.lt.s32.totalorder %s9659_s6, %s9655_s7 }
  0x95   :  { %p9662_p0 = por %p9661_p13, %p9660_p12 }
  0x97   :  { %p9663_p1 = pnand %p9662_p0, %p9656_p11 }
  0x99   :  { %9666 = shalt.err (!%p9663_p1)
}
  0x9a   :  { %117 = dma.hbm_to_vmem [thread:$0]  %s15227_s8, 16, %s115_s20, [#allocation17]  }
  0x9b   :  { %9689 = dma.done.wait [#allocation5], 8192  }
  0x9c   :  { %9690 = vsyncadd [#allocation5], 4294959104 }
  0x9d   :  { %9691 = dma.done.wait [#allocation8], 18448  }
  0x9e   :  { %9692 = vsyncadd [#allocation8], 4294948848 }
  0x9f   :  { %9693 = dma.done.wait [#allocation11], 18448  }
  0xa0   :  { %9694 = vsyncadd [#allocation11], 4294948848 }
  0xa1   :  { %9695 = dma.done.wait [#allocation14], 32  }
  0xa2   :  { %9696 = vsyncadd [#allocation14], 4294967264 }
  0xa3   :  { %9697 = dma.done.wait [#allocation17], 2064  }
  0xa4   :  { %9698 = vsyncadd [#allocation17], 4294965232  ;;  %v15229_v0 = vmov 0.0|0.0   ;;  %v9713_v1 = vmov 0.0   ;;  %v959_v2 = vld [vmem:[#allocation7] sm:$0xff]  ;;  %v960_v3 = vld [vmem:[#allocation7 + $0x8] sm:$0xff] }
  0xa5   :  { %8181 = vmatprep.subr.bf16.mxu0 %v15229_v0  ;;  %145 = vst [vmem:[#allocation2] sm:$0xff] %v9713_v1  ;;  %146 = vst [vmem:[#allocation2 + $0x8] sm:$0xff] %v9713_v1  ;;  %v961_v4 = vld [vmem:[#allocation7 + $0x10] sm:$0xff]  ;;  %v8182_v5 = vpack.c.bf16 %v960_v3, %v959_v2  ;;  %v962_v6 = vld [vmem:[#allocation7 + $0x18] sm:$0xff]  ;;  %s9714_s8 = smov [#allocation19]  }
  0xa6   :  { %147 = vst [vmem:[#allocation2 + $0x10] sm:$0x3] %v9713_v1  ;;  %148 = vst [vmem:[#allocation2 + $0x18] sm:$0xff] %v9713_v1  ;;  %v8185_v7 = vpack.c.bf16 %v962_v6, %v961_v4  ;;  %v963_v8 = vld [vmem:[#allocation7 + $0x20] sm:$0xff]  ;;  %v964_v9 = vld [vmem:[#allocation7 + $0x28] sm:$0xff]  ;;  %s7536_s2 = sshll.u32 %s9714_s8, 4  ;;  %s7537_s2 = int_to_ptr.vmem [resolvable:$true] %s7536_s2 }
  0xa7   :  { %149 = vst [vmem:[#allocation2 + $0x20] sm:$0xff] %v9713_v1  ;;  %150 = vst [vmem:[#allocation2 + $0x28] sm:$0x3] %v9713_v1  ;;  %8183 = vmatpush1.bf16.msra.mxu0 %v8182_v5  ;;  %v8188_v10 = vpack.c.bf16 %v964_v9, %v963_v8  ;;  %v965_v11 = vld [vmem:[#allocation7 + $0x30] sm:$0xff]  ;;  %v966_v12 = vld [vmem:[#allocation7 + $0x38] sm:$0xff]  ;;  %s9667_s24 = scalar_lea.vmem %s7537_s2, 8192  ;;  %p9672_p3 = scmp.lt.s32.totalorder %s7537_s2, %s7537_s2 }
  0xa8   :  { %151 = vst [vmem:[#allocation2 + $0x30] sm:$0xff] %v9713_v1  ;;  %152 = vst [vmem:[#allocation2 + $0x38] sm:$0xff] %v9713_v1  ;;  %8184 = vmatprep.subr.bf16.mxu0 %v15229_v0  ;;  %v8191_v14 = vpack.c.bf16 %v966_v12, %v965_v11  ;;  %v967_v15 = vld [vmem:[#allocation7 + $0x40] sm:$0xff]  ;;  %v968_v16 = vld [vmem:[#allocation7 + $0x48] sm:$0xff]  ;;  %p9668_p2 = scmp.ne.s32.totalorder %s7537_s2, %s9667_s24  ;;  %p9673_p4 = scmp.lt.s32.totalorder %s9667_s24, %s9667_s24 }
  0xa9   :  { %153 = vst [vmem:[#allocation2 + $0x40] sm:$0x3] %v9713_v1  ;;  %154 = vst [vmem:[#allocation2 + $0x48] sm:$0xff] %v9713_v1  ;;  %v10120_v17 = vld [vmem:[#allocation4] sm:$0xff]  ;;  %v10122_v18 = vld [vmem:[#allocation4 + $0x8] sm:$0xff]  ;;  %v8194_v24 = vpack.c.bf16 %v968_v16, %v967_v15 }
  0xaa   :  { %155 = vst [vmem:[#allocation2 + $0x50] sm:$0xff] %v9713_v1  ;;  %156 = vst [vmem:[#allocation2 + $0x58] sm:$0x3] %v9713_v1  ;;  %v10124_v19 = vld [vmem:[#allocation4 + $0x10] sm:$0xff]  ;;  %v10129_v20 = vld [vmem:[#allocation4 + $0x18] sm:$0xff]  ;;  %p9674_p5 = por %p9673_p4, %p9672_p3 }
  0xab   :  { %157 = vst [vmem:[#allocation2 + $0x60] sm:$0xff] %v9713_v1  ;;  %158 = vst [vmem:[#allocation2 + $0x68] sm:$0xff] %v9713_v1  ;;  %8186 = vmatpush1.bf16.msra.mxu0 %v8185_v7  ;;  %v10132_v21 = vld [vmem:[#allocation4 + $0x20] sm:$0xff]  ;;  %v10134_v22 = vld [vmem:[#allocation4 + $0x28] sm:$0xff] }
  0xac   :  { %159 = vst [vmem:[#allocation2 + $0x70] sm:$0x3] %v9713_v1  ;;  %160 = vst [vmem:[#allocation2 + $0x78] sm:$0xff] %v9713_v1  ;;  %8187 = vmatprep.subr.bf16.mxu0 %v15229_v0  ;;  %v446_v13 = vld [vmem:[#allocation2 + $0x1] sm:$0xff]  ;;  %v10136_v23 = vld [vmem:[#allocation4 + $0x30] sm:$0xff]  ;;  %p9675_p6 = pnand %p9674_p5, %p9668_p2 }
  0xad   :  { %161 = vst [vmem:[#allocation2 + $0x80] sm:$0xff] %v9713_v1  ;;  %162 = vst [vmem:[#allocation2 + $0x88] sm:$0x3] %v9713_v1  ;;  %1167 = vmatprep.mubr.f32.mxu0 %v446_v13  ;;  %v969_v25 = vld [vmem:[#allocation7 + $0x50] sm:$0xff]  ;;  %v970_v26 = vld [vmem:[#allocation7 + $0x58] sm:$0xff] }
  0xae   :  { %163 = vst [vmem:[#allocation2 + $0x90] sm:$0xff] %v9713_v1  ;;  %164 = vst [vmem:[#allocation2 + $0x98] sm:$0xff] %v9713_v1  ;;  %v10141_v27 = vld [vmem:[#allocation4 + $0x38] sm:$0xff]  ;;  %v10145_v28 = vld [vmem:[#allocation4 + $0x40] sm:$0xff]  ;;  %v8197_v35 = vpack.c.bf16 %v970_v26, %v969_v25 }
  0xaf   :  { %165 = vst [vmem:[#allocation2 + $0xa0] sm:$0x3] %v9713_v1  ;;  %166 = vst [vmem:[#allocation2 + $0xa8] sm:$0xff] %v9713_v1  ;;  %8189 = vmatpush1.bf16.msra.mxu0 %v8188_v10  ;;  %v10147_v29 = vld [vmem:[#allocation4 + $0x48] sm:$0xff]  ;;  %v10149_v30 = vld [vmem:[#allocation4 + $0x50] sm:$0xff] }
  0xb0   :  { %167 = vst [vmem:[#allocation2 + $0xb0] sm:$0xff] %v9713_v1  ;;  %168 = vst [vmem:[#allocation2 + $0xb8] sm:$0x3] %v9713_v1  ;;  %8190 = vmatprep.subr.bf16.mxu0 %v15229_v0  ;;  %v10154_v31 = vld [vmem:[#allocation4 + $0x58] sm:$0xff]  ;;  %v10157_v32 = vld [vmem:[#allocation4 + $0x60] sm:$0xff] }
  0xb1   :  { %169 = vst [vmem:[#allocation2 + $0xc0] sm:$0xff] %v9713_v1  ;;  %170 = vst [vmem:[#allocation2 + $0xc8] sm:$0xff] %v9713_v1  ;;  %v10159_v33 = vld [vmem:[#allocation4 + $0x68] sm:$0xff]  ;;  %v10161_v34 = vld [vmem:[#allocation4 + $0x70] sm:$0xff] }
  0xb2   :  { %171 = vst [vmem:[#allocation2 + $0xd0] sm:$0x3] %v9713_v1  ;;  %172 = vst [vmem:[#allocation2 + $0xd8] sm:$0xff] %v9713_v1  ;;  %v10166_v36 = vld [vmem:[#allocation4 + $0x78] sm:$0xff]  ;;  %v971_v37 = vld [vmem:[#allocation7 + $0x60] sm:$0xff] }
  0xb3   :  { %173 = vst [vmem:[#allocation2 + $0xe0] sm:$0xff] %v9713_v1  ;;  %174 = vst [vmem:[#allocation2 + $0xe8] sm:$0x3] %v9713_v1  ;;  %8192 = vmatpush1.bf16.msra.mxu0 %v8191_v14  ;;  %v972_v38 = vld [vmem:[#allocation7 + $0x68] sm:$0xff]  ;;  %v10170_v39 = vld [vmem:[#allocation4 + $0x80] sm:$0xff] }
  0xb4   :  { %175 = vst [vmem:[#allocation2 + $0xf0] sm:$0xff] %v9713_v1  ;;  %176 = vst [vmem:[#allocation2 + $0xf8] sm:$0xff] %v9713_v1  ;;  %8193 = vmatprep.subr.bf16.mxu0 %v15229_v0  ;;  %v10172_v40 = vld [vmem:[#allocation4 + $0x88] sm:$0xff]  ;;  %v8200_v41 = vpack.c.bf16 %v972_v38, %v971_v37  ;;  %v10176_v42 = vld [vmem:[#allocation4 + $0x90] sm:$0xff] }
  0xb5   :  { %177 = vst [vmem:[#allocation2 + $0x100] sm:$0x3] %v9713_v1  ;;  %178 = vst [vmem:[#allocation2 + $0x108] sm:$0xff] %v9713_v1  ;;  %v973_v43 = vld [vmem:[#allocation7 + $0x70] sm:$0xff]  ;;  %v974_v44 = vld [vmem:[#allocation7 + $0x78] sm:$0xff] }
  0xb6   :  { %179 = vst [vmem:[#allocation2 + $0x110] sm:$0xff] %v9713_v1  ;;  %180 = vst [vmem:[#allocation2 + $0x118] sm:$0x3] %v9713_v1  ;;  %v10180_v45 = vld [vmem:[#allocation4 + $0x98] sm:$0xff]  ;;  %v8203_v46 = vpack.c.bf16 %v974_v44, %v973_v43  ;;  %v10183_v47 = vld [vmem:[#allocation4 + $0xa0] sm:$0xff] }
  0xb7   :  { %181 = vst [vmem:[#allocation2 + $0x120] sm:$0xff] %v9713_v1  ;;  %182 = vst [vmem:[#allocation2 + $0x128] sm:$0xff] %v9713_v1  ;;  %8195 = vmatpush1.bf16.msra.mxu0 %v8194_v24  ;;  %v10185_v48 = vld [vmem:[#allocation4 + $0xa8] sm:$0xff]  ;;  %v975_v49 = vld [vmem:[#allocation7 + $0x80] sm:$0xff] }
  0xb8   :  { %183 = vst [vmem:[#allocation2 + $0x130] sm:$0x3] %v9713_v1  ;;  %184 = vst [vmem:[#allocation2 + $0x138] sm:$0xff] %v9713_v1  ;;  %8196 = vmatprep.subr.bf16.mxu0 %v15229_v0  ;;  %v976_v50 = vld [vmem:[#allocation7 + $0x88] sm:$0xff]  ;;  %v10190_v51 = vld [vmem:[#allocation4 + $0xb0] sm:$0xff] }
  0xb9   :  { %185 = vst [vmem:[#allocation2 + $0x140] sm:$0xff] %v9713_v1  ;;  %186 = vst [vmem:[#allocation2 + $0x148] sm:$0x3] %v9713_v1  ;;  %v10193_v52 = vld [vmem:[#allocation4 + $0xb8] sm:$0xff]  ;;  %v8206_v53 = vpack.c.bf16 %v976_v50, %v975_v49  ;;  %v977_v54 = vld [vmem:[#allocation7 + $0x90] sm:$0xff] }
  0xba   :  { %187 = vst [vmem:[#allocation2 + $0x150] sm:$0xff] %v9713_v1  ;;  %188 = vst [vmem:[#allocation2 + $0x158] sm:$0xff] %v9713_v1  ;;  %v978_v55 = vld [vmem:[#allocation7 + $0x98] sm:$0xff]  ;;  %v10197_v56 = vld [vmem:[#allocation4 + $0xc0] sm:$0xff] }
  0xbb   :  { %189 = vst [vmem:[#allocation2 + $0x160] sm:$0x3] %v9713_v1  ;;  %190 = vst [vmem:[#allocation2 + $0x168] sm:$0xff] %v9713_v1  ;;  %8198 = vmatpush1.bf16.msra.mxu0 %v8197_v35  ;;  %v8209_v57 = vpack.c.bf16 %v978_v55, %v977_v54  ;;  %v979_v58 = vld [vmem:[#allocation7 + $0xa0] sm:$0xff]  ;;  %v980_v59 = vld [vmem:[#allocation7 + $0xa8] sm:$0xff] }
  0xbc   :  { %191 = vst [vmem:[#allocation2 + $0x170] sm:$0xff] %v9713_v1  ;;  %192 = vst [vmem:[#allocation2 + $0x178] sm:$0x3] %v9713_v1  ;;  %8199 = vmatprep.subr.bf16.mxu0 %v15229_v0  ;;  %v10201_v60 = vld [vmem:[#allocation4 + $0xc8] sm:$0xff]  ;;  %v8212_v61 = vpack.c.bf16 %v980_v59, %v979_v58  ;;  %v981_v62 = vld [vmem:[#allocation7 + $0xb0] sm:$0xff] }
  0xbd   :  { %193 = vst [vmem:[#allocation2 + $0x180] sm:$0xff] %v9713_v1  ;;  %194 = vst [vmem:[#allocation2 + $0x188] sm:$0xff] %v9713_v1  ;;  %v982_v63 = vld [vmem:[#allocation7 + $0xb8] sm:$0xff]  ;;  %v10205_v2 = vld [vmem:[#allocation4 + $0xd0] sm:$0xff] }
  0xbe   :  { %195 = vst [vmem:[#allocation2 + $0x190] sm:$0x3] %v9713_v1  ;;  %196 = vst [vmem:[#allocation2 + $0x198] sm:$0xff] %v9713_v1  ;;  %v8215_v3 = vpack.c.bf16 %v982_v63, %v981_v62  ;;  %v983_v4 = vld [vmem:[#allocation7 + $0xc0] sm:$0xff]  ;;  %v984_v5 = vld [vmem:[#allocation7 + $0xc8] sm:$0xff] }
  0xbf   :  { %197 = vst [vmem:[#allocation2 + $0x1a0] sm:$0xff] %v9713_v1  ;;  %198 = vst [vmem:[#allocation2 + $0x1a8] sm:$0x3] %v9713_v1  ;;  %8201 = vmatpush1.bf16.msra.mxu0 %v8200_v41  ;;  %v10209_v6 = vld [vmem:[#allocation4 + $0xd8] sm:$0xff]  ;;  %v8218_v7 = vpack.c.bf16 %v984_v5, %v983_v4  ;;  %v985_v8 = vld [vmem:[#allocation7 + $0xd0] sm:$0xff] }
  0xc0   :  { %199 = vst [vmem:[#allocation2 + $0x1b0] sm:$0xff] %v9713_v1  ;;  %200 = vst [vmem:[#allocation2 + $0x1b8] sm:$0xff] %v9713_v1  ;;  %8202 = vmatprep.subr.bf16.mxu0 %v15229_v0  ;;  %v986_v9 = vld [vmem:[#allocation7 + $0xd8] sm:$0xff]  ;;  %v10213_v10 = vld [vmem:[#allocation4 + $0xe0] sm:$0xff] }
  0xc1   :  { %201 = vst [vmem:[#allocation2 + $0x1c0] sm:$0x3] %v9713_v1  ;;  %202 = vst [vmem:[#allocation2 + $0x1c8] sm:$0xff] %v9713_v1  ;;  %v8221_v11 = vpack.c.bf16 %v986_v9, %v985_v8  ;;  %v987_v12 = vld [vmem:[#allocation7 + $0xe0] sm:$0xff]  ;;  %v988_v13 = vld [vmem:[#allocation7 + $0xe8] sm:$0xff] }
  0xc2   :  { %203 = vst [vmem:[#allocation2 + $0x1d0] sm:$0xff] %v9713_v1  ;;  %204 = vst [vmem:[#allocation2 + $0x1d8] sm:$0x3] %v9713_v1  ;;  %v10217_v14 = vld [vmem:[#allocation4 + $0xe8] sm:$0xff]  ;;  %v8224_v15 = vpack.c.bf16 %v988_v13, %v987_v12  ;;  %v989_v16 = vld [vmem:[#allocation7 + $0xf0] sm:$0xff] }
  0xc3   :  { %205 = vst [vmem:[#allocation2 + $0x1e0] sm:$0xff] %v9713_v1  ;;  %206 = vst [vmem:[#allocation2 + $0x1e8] sm:$0xff] %v9713_v1  ;;  %8204 = vmatpush1.bf16.msra.mxu0 %v8203_v46  ;;  %v990_v24 = vld [vmem:[#allocation7 + $0xf8] sm:$0xff]  ;;  %v991_v26 = vld [vmem:[#allocation7 + $0x100] sm:$0xff] }
  0xc4   :  { %207 = vst [vmem:[#allocation2 + $0x1f0] sm:$0x3] %v9713_v1  ;;  %208 = vst [vmem:[#allocation2 + $0x1f8] sm:$0xff] %v9713_v1  ;;  %8205 = vmatprep.subr.bf16.mxu0 %v15229_v0  ;;  %v8227_v25 = vpack.c.bf16 %v990_v24, %v989_v16  ;;  %v992_v35 = vld [vmem:[#allocation7 + $0x108] sm:$0xff]  ;;  %v993_v41 = vld [vmem:[#allocation7 + $0x110] sm:$0xff] }
  0xc5   :  { %209 = vst [vmem:[#allocation2 + $0x200] sm:$0xff] %v9713_v1  ;;  %210 = vst [vmem:[#allocation2 + $0x208] sm:$0x3] %v9713_v1  ;;  %v8230_v37 = vpack.c.bf16 %v992_v35, %v991_v26  ;;  %v447_v38 = vld [vmem:[#allocation2 + $0x9] sm:$0xff]  ;;  %v994_v43 = vld [vmem:[#allocation7 + $0x118] sm:$0xff] }
  0xc6   :  { %211 = vst [vmem:[#allocation2 + $0x210] sm:$0xff] %v9713_v1  ;;  %212 = vst [vmem:[#allocation2 + $0x218] sm:$0xff] %v9713_v1  ;;  %v10223_v44 = vld [vmem:[#allocation4 + $0x100] sm:$0xff]  ;;  %v8233_v46 = vpack.c.bf16 %v994_v43, %v993_v41  ;;  %v996_v50 = vld [vmem:[#allocation7 + $0x128] sm:$0xff] }
  0xc7   :  { %213 = vst [vmem:[#allocation2 + $0x220] sm:$0x3] %v9713_v1  ;;  %214 = vst [vmem:[#allocation2 + $0x228] sm:$0xff] %v9713_v1  ;;  %8207 = vmatpush1.bf16.msra.mxu0 %v8206_v53  ;;  %v995_v49 = vld [vmem:[#allocation7 + $0x120] sm:$0xff]  ;;  %v10228_v53 = vld [vmem:[#allocation4 + $0x108] sm:$0xff] }
  0xc8   :  { %215 = vst [vmem:[#allocation2 + $0x230] sm:$0xff] %v9713_v1  ;;  %216 = vst [vmem:[#allocation2 + $0x238] sm:$0x3] %v9713_v1  ;;  %8208 = vmatprep.subr.bf16.mxu0 %v15229_v0  ;;  %v8236_v55 = vpack.c.bf16 %v996_v50, %v995_v49  ;;  %v998_v58 = vld [vmem:[#allocation7 + $0x138] sm:$0xff]  ;;  %v10236_v59 = vld [vmem:[#allocation4 + $0x110] sm:$0xff] }
  0xc9   :  { %217 = vst [vmem:[#allocation2 + $0x240] sm:$0xff] %v9713_v1  ;;  %218 = vst [vmem:[#allocation2 + $0x248] sm:$0xff] %v9713_v1  ;;  %v1000_v62 = vld [vmem:[#allocation7 + $0x148] sm:$0xff]  ;;  %v10244_v63 = vld [vmem:[#allocation4 + $0x118] sm:$0xff] }
  0xca   :  { %219 = vst [vmem:[#allocation2 + $0x250] sm:$0x3] %v9713_v1  ;;  %220 = vst [vmem:[#allocation2 + $0x258] sm:$0xff] %v9713_v1  ;;  %v1001_v4 = vld [vmem:[#allocation7 + $0x150] sm:$0xff]  ;;  %v1002_v5 = vld [vmem:[#allocation7 + $0x158] sm:$0xff] }
  0xcb   :  { %221 = vst [vmem:[#allocation2 + $0x260] sm:$0xff] %v9713_v1  ;;  %222 = vst [vmem:[#allocation2 + $0x268] sm:$0x3] %v9713_v1  ;;  %8210 = vmatpush1.bf16.msra.mxu0 %v8209_v57  ;;  %v997_v57 = vld [vmem:[#allocation7 + $0x130] sm:$0xff]  ;;  %v1003_v9 = vld [vmem:[#allocation7 + $0x160] sm:$0xff] }
  0xcc   :  { %223 = vst [vmem:[#allocation2 + $0x270] sm:$0xff] %v9713_v1  ;;  %224 = vst [vmem:[#allocation2 + $0x278] sm:$0xff] %v9713_v1  ;;  %8211 = vmatprep.subr.bf16.mxu0 %v15229_v0  ;;  %v10260_v12 = vld [vmem:[#allocation4 + $0x128] sm:$0xff]  ;;  %v1006_v16 = vld [vmem:[#allocation7 + $0x178] sm:$0xff] }
  0xcd   :  { %225 = vst [vmem:[#allocation2 + $0x280] sm:$0x3] %v9713_v1  ;;  %226 = vst [vmem:[#allocation2 + $0x288] sm:$0xff] %v9713_v1  ;;  %v10268_v24 = vld [vmem:[#allocation4 + $0x130] sm:$0xff]  ;;  %v1007_v26 = vld [vmem:[#allocation7 + $0x180] sm:$0xff] }
  0xce   :  { %227 = vst [vmem:[#allocation2 + $0x290] sm:$0xff] %v9713_v1  ;;  %228 = vst [vmem:[#allocation2 + $0x298] sm:$0x3] %v9713_v1  ;;  %v1008_v35 = vld [vmem:[#allocation7 + $0x188] sm:$0xff]  ;;  %v1009_v41 = vld [vmem:[#allocation7 + $0x190] sm:$0xff] }
  0xcf   :  { %229 = vst [vmem:[#allocation2 + $0x2a0] sm:$0xff] %v9713_v1  ;;  %230 = vst [vmem:[#allocation2 + $0x2a8] sm:$0xff] %v9713_v1  ;;  %8213 = vmatpush1.bf16.msra.mxu0 %v8212_v61  ;;  %v999_v61 = vld [vmem:[#allocation7 + $0x140] sm:$0xff]  ;;  %v1010_v43 = vld [vmem:[#allocation7 + $0x198] sm:$0xff] }
  0xd0   :  { %231 = vst [vmem:[#allocation2 + $0x2b0] sm:$0x3] %v9713_v1  ;;  %232 = vst [vmem:[#allocation2 + $0x2b8] sm:$0xff] %v9713_v1  ;;  %8214 = vmatprep.subr.bf16.mxu0 %v15229_v0  ;;  %v1011_v50 = vld [vmem:[#allocation7 + $0x1a0] sm:$0xff] }
  0xd1   :  { %233 = vst [vmem:[#allocation2 + $0x2c0] sm:$0xff] %v9713_v1  ;;  %234 = vst [vmem:[#allocation2 + $0x2c8] sm:$0x3] %v9713_v1 }
  0xd2   :  { %235 = vst [vmem:[#allocation2 + $0x2d0] sm:$0xff] %v9713_v1  ;;  %236 = vst [vmem:[#allocation2 + $0x2d8] sm:$0xff] %v9713_v1 }
  0xd3   :  { %237 = vst [vmem:[#allocation2 + $0x2e0] sm:$0x3] %v9713_v1  ;;  %238 = vst [vmem:[#allocation2 + $0x2e8] sm:$0xff] %v9713_v1  ;;  %8216 = vmatpush1.bf16.msra.mxu0 %v8215_v3 }
  0xd4   :  { %239 = vst [vmem:[#allocation2 + $0x2f0] sm:$0xff] %v9713_v1  ;;  %240 = vst [vmem:[#allocation2 + $0x2f8] sm:$0x3] %v9713_v1  ;;  %8217 = vmatprep.subr.bf16.mxu0 %v15229_v0 }
  0xd5   :  { %241 = vst [vmem:[#allocation2 + $0x300] sm:$0xff] %v9713_v1  ;;  %242 = vst [vmem:[#allocation2 + $0x308] sm:$0xff] %v9713_v1 }
  0xd6   :  { %243 = vst [vmem:[#allocation2 + $0x310] sm:$0x3] %v9713_v1  ;;  %244 = vst [vmem:[#allocation2 + $0x318] sm:$0xff] %v9713_v1 }
  0xd7   :  { %245 = vst [vmem:[#allocation2 + $0x320] sm:$0xff] %v9713_v1  ;;  %246 = vst [vmem:[#allocation2 + $0x328] sm:$0x3] %v9713_v1  ;;  %8219 = vmatpush1.bf16.msra.mxu0 %v8218_v7  ;;  %v10252_v7 = vld [vmem:[#allocation4 + $0x120] sm:$0xff] }
  0xd8   :  { %247 = vst [vmem:[#allocation2 + $0x330] sm:$0xff] %v9713_v1  ;;  %248 = vst [vmem:[#allocation2 + $0x338] sm:$0xff] %v9713_v1  ;;  %8220 = vmatprep.subr.bf16.mxu0 %v15229_v0 }
  0xd9   :  { %249 = vst [vmem:[#allocation2 + $0x340] sm:$0x3] %v9713_v1  ;;  %250 = vst [vmem:[#allocation2 + $0x348] sm:$0xff] %v9713_v1 }
  0xda   :  { %251 = vst [vmem:[#allocation2 + $0x350] sm:$0xff] %v9713_v1  ;;  %252 = vst [vmem:[#allocation2 + $0x358] sm:$0x3] %v9713_v1 }
  0xdb   :  { %3570 = vst [vmem:[#allocation3] sm:$0xff] %v9713_v1  ;;  %3571 = vst [vmem:[#allocation3 + $0x8] sm:$0xff] %v9713_v1  ;;  %8222 = vmatpush1.bf16.msra.mxu0 %v8221_v11  ;;  %v1004_v11 = vld [vmem:[#allocation7 + $0x168] sm:$0xff] }
  0xdc   :  { %3572 = vst [vmem:[#allocation3 + $0x10] sm:$0x3] %v9713_v1  ;;  %3573 = vst [vmem:[#allocation3 + $0x18] sm:$0xff] %v9713_v1  ;;  %8223 = vmatprep.subr.bf16.mxu0 %v15229_v0 }
  0xdd   :  { %3574 = vst [vmem:[#allocation3 + $0x20] sm:$0xff] %v9713_v1  ;;  %3575 = vst [vmem:[#allocation3 + $0x28] sm:$0x3] %v9713_v1 }
  0xde   :  { %3576 = vst [vmem:[#allocation3 + $0x30] sm:$0xff] %v9713_v1  ;;  %3577 = vst [vmem:[#allocation3 + $0x38] sm:$0xff] %v9713_v1 }
  0xdf   :  { %3578 = vst [vmem:[#allocation3 + $0x40] sm:$0x3] %v9713_v1  ;;  %3579 = vst [vmem:[#allocation3 + $0x48] sm:$0xff] %v9713_v1  ;;  %8225 = vmatpush1.bf16.msra.mxu0 %v8224_v15  ;;  %v1005_v15 = vld [vmem:[#allocation7 + $0x170] sm:$0xff] }
  0xe0   :  { %3580 = vst [vmem:[#allocation3 + $0x50] sm:$0xff] %v9713_v1  ;;  %3581 = vst [vmem:[#allocation3 + $0x58] sm:$0x3] %v9713_v1  ;;  %8226 = vmatprep.subr.bf16.mxu0 %v15229_v0 }
  0xe1   :  { %3582 = vst [vmem:[#allocation3 + $0x60] sm:$0xff] %v9713_v1  ;;  %3583 = vst [vmem:[#allocation3 + $0x68] sm:$0xff] %v9713_v1 }
  0xe2   :  { %3584 = vst [vmem:[#allocation3 + $0x70] sm:$0x3] %v9713_v1  ;;  %3585 = vst [vmem:[#allocation3 + $0x78] sm:$0xff] %v9713_v1 }
  0xe3   :  { %3586 = vst [vmem:[#allocation3 + $0x80] sm:$0xff] %v9713_v1  ;;  %3587 = vst [vmem:[#allocation3 + $0x88] sm:$0x3] %v9713_v1  ;;  %8228 = vmatpush1.bf16.msra.mxu0 %v8227_v25 }
  0xe4   :  { %3588 = vst [vmem:[#allocation3 + $0x90] sm:$0xff] %v9713_v1  ;;  %3589 = vst [vmem:[#allocation3 + $0x98] sm:$0xff] %v9713_v1  ;;  %8229 = vmatprep.subr.bf16.mxu0 %v15229_v0 }
  0xe5   :  { %3590 = vst [vmem:[#allocation3 + $0xa0] sm:$0x3] %v9713_v1  ;;  %3591 = vst [vmem:[#allocation3 + $0xa8] sm:$0xff] %v9713_v1 }
  0xe6   :  { %3592 = vst [vmem:[#allocation3 + $0xb0] sm:$0xff] %v9713_v1  ;;  %3593 = vst [vmem:[#allocation3 + $0xb8] sm:$0x3] %v9713_v1  ;;  %1168 = vmatmul.mubr.f32.vlgmr.msra.gmra.mrb[0].mxu0 %v9713_v1 }
  0xe7   :  { %3594 = vst [vmem:[#allocation3 + $0xc0] sm:$0xff] %v9713_v1  ;;  %3595 = vst [vmem:[#allocation3 + $0xc8] sm:$0xff] %v9713_v1  ;;  %8231 = vmatpush1.bf16.msra.mxu0 %v8230_v37  ;;  %1172 = vmatprep.mubr.f32.mxu0 %v447_v38  ;;  %v10276_v37 = vld [vmem:[#allocation4 + $0x138] sm:$0xff] }
  0xe8   :  { %3596 = vst [vmem:[#allocation3 + $0xd0] sm:$0x3] %v9713_v1  ;;  %3597 = vst [vmem:[#allocation3 + $0xd8] sm:$0xff] %v9713_v1  ;;  %8232 = vmatprep.subr.bf16.mxu0 %v15229_v0 }
  0xe9   :  { %3598 = vst [vmem:[#allocation3 + $0xe0] sm:$0xff] %v9713_v1  ;;  %3599 = vst [vmem:[#allocation3 + $0xe8] sm:$0x3] %v9713_v1 }
  0xea   :  { %3600 = vst [vmem:[#allocation3 + $0xf0] sm:$0xff] %v9713_v1  ;;  %3601 = vst [vmem:[#allocation3 + $0xf8] sm:$0xff] %v9713_v1  ;;  %1173 = vmatmul.mubr.f32.gmra.mrb[2].mxu0 %v9713_v1 }
  0xeb   :  { %3602 = vst [vmem:[#allocation3 + $0x100] sm:$0x3] %v9713_v1  ;;  %3603 = vst [vmem:[#allocation3 + $0x108] sm:$0xff] %v9713_v1  ;;  %1177 = vmatprep.mubr.f32.mxu0 %v10120_v17  ;;  %8234 = vmatpush1.bf16.msra.mxu0 %v8233_v46  ;;  %v10284_v46 = vld [vmem:[#allocation4 + $0x140] sm:$0xff] }
  0xec   :  { %3604 = vst [vmem:[#allocation3 + $0x110] sm:$0xff] %v9713_v1  ;;  %3605 = vst [vmem:[#allocation3 + $0x118] sm:$0x3] %v9713_v1  ;;  %8235 = vmatprep.subr.bf16.mxu0 %v15229_v0 }
  0xed   :  { %3606 = vst [vmem:[#allocation3 + $0x120] sm:$0xff] %v9713_v1  ;;  %3607 = vst [vmem:[#allocation3 + $0x128] sm:$0xff] %v9713_v1 }
  0xee   :  { %3608 = vst [vmem:[#allocation3 + $0x130] sm:$0x3] %v9713_v1  ;;  %3609 = vst [vmem:[#allocation3 + $0x138] sm:$0xff] %v9713_v1 }
  0xef   :  { %3610 = vst [vmem:[#allocation3 + $0x140] sm:$0xff] %v9713_v1  ;;  %3611 = vst [vmem:[#allocation3 + $0x148] sm:$0x3] %v9713_v1  ;;  %8237 = vmatpush1.bf16.msra.mxu0 %v8236_v55  ;;  %v1012_v55 = vld [vmem:[#allocation7 + $0x1a8] sm:$0xff] }
  0xf0   :  { %3612 = vst [vmem:[#allocation3 + $0x150] sm:$0xff] %v9713_v1  ;;  %3613 = vst [vmem:[#allocation3 + $0x158] sm:$0xff] %v9713_v1  ;;  %8238 = vmatprep.subr.bf16.mxu0 %v15229_v0 }
  0xf1   :  { %3614 = vst [vmem:[#allocation3 + $0x160] sm:$0x3] %v9713_v1  ;;  %3615 = vst [vmem:[#allocation3 + $0x168] sm:$0xff] %v9713_v1 }
  0xf2   :  { %3616 = vst [vmem:[#allocation3 + $0x170] sm:$0xff] %v9713_v1  ;;  %3617 = vst [vmem:[#allocation3 + $0x178] sm:$0x3] %v9713_v1 }
  0xf3   :  { %3618 = vst [vmem:[#allocation3 + $0x180] sm:$0xff] %v9713_v1  ;;  %3619 = vst [vmem:[#allocation3 + $0x188] sm:$0xff] %v9713_v1 }
  0xf4   :  { %3620 = vst [vmem:[#allocation3 + $0x190] sm:$0x3] %v9713_v1  ;;  %3621 = vst [vmem:[#allocation3 + $0x198] sm:$0xff] %v9713_v1 }
  0xf5   :  { %3622 = vst [vmem:[#allocation3 + $0x1a0] sm:$0xff] %v9713_v1  ;;  %3623 = vst [vmem:[#allocation3 + $0x1a8] sm:$0x3] %v9713_v1 }
  0xf6   :  { %3624 = vst [vmem:[#allocation3 + $0x1b0] sm:$0xff] %v9713_v1  ;;  %3625 = vst [vmem:[#allocation3 + $0x1b8] sm:$0xff] %v9713_v1 }
  0xf7   :  { %3626 = vst [vmem:[#allocation3 + $0x1c0] sm:$0x3] %v9713_v1  ;;  %3627 = vst [vmem:[#allocation3 + $0x1c8] sm:$0xff] %v9713_v1 }
  0xf8   :  { %3628 = vst [vmem:[#allocation3 + $0x1d0] sm:$0xff] %v9713_v1  ;;  %3629 = vst [vmem:[#allocation3 + $0x1d8] sm:$0x3] %v9713_v1 }
  0xf9   :  { %3630 = vst [vmem:[#allocation3 + $0x1e0] sm:$0xff] %v9713_v1  ;;  %3631 = vst [vmem:[#allocation3 + $0x1e8] sm:$0xff] %v9713_v1 }
  0xfa   :  { %3632 = vst [vmem:[#allocation3 + $0x1f0] sm:$0x3] %v9713_v1  ;;  %3633 = vst [vmem:[#allocation3 + $0x1f8] sm:$0xff] %v9713_v1 }
  0xfb   :  { %3634 = vst [vmem:[#allocation3 + $0x200] sm:$0xff] %v9713_v1  ;;  %3635 = vst [vmem:[#allocation3 + $0x208] sm:$0x3] %v9713_v1 }
  0xfc   :  { %3636 = vst [vmem:[#allocation3 + $0x210] sm:$0xff] %v9713_v1  ;;  %3637 = vst [vmem:[#allocation3 + $0x218] sm:$0xff] %v9713_v1 }
  0xfd   :  { %3638 = vst [vmem:[#allocation3 + $0x220] sm:$0x3] %v9713_v1  ;;  %3639 = vst [vmem:[#allocation3 + $0x228] sm:$0xff] %v9713_v1 }
  0xfe   :  { %3640 = vst [vmem:[#allocation3 + $0x230] sm:$0xff] %v9713_v1  ;;  %3641 = vst [vmem:[#allocation3 + $0x238] sm:$0x3] %v9713_v1 }
  0xff   :  { %3642 = vst [vmem:[#allocation3 + $0x240] sm:$0xff] %v9713_v1  ;;  %3643 = vst [vmem:[#allocation3 + $0x248] sm:$0xff] %v9713_v1 }
 0x100   :  { %3644 = vst [vmem:[#allocation3 + $0x250] sm:$0x3] %v9713_v1  ;;  %3645 = vst [vmem:[#allocation3 + $0x258] sm:$0xff] %v9713_v1 }
 0x101   :  { %3646 = vst [vmem:[#allocation3 + $0x260] sm:$0xff] %v9713_v1  ;;  %3647 = vst [vmem:[#allocation3 + $0x268] sm:$0x3] %v9713_v1 }
 0x102   :  { %3648 = vst [vmem:[#allocation3 + $0x270] sm:$0xff] %v9713_v1  ;;  %3649 = vst [vmem:[#allocation3 + $0x278] sm:$0xff] %v9713_v1 }
 0x103   :  { %3650 = vst [vmem:[#allocation3 + $0x280] sm:$0x3] %v9713_v1  ;;  %3651 = vst [vmem:[#allocation3 + $0x288] sm:$0xff] %v9713_v1 }
 0x104   :  { %3652 = vst [vmem:[#allocation3 + $0x290] sm:$0xff] %v9713_v1  ;;  %3653 = vst [vmem:[#allocation3 + $0x298] sm:$0x3] %v9713_v1 }
 0x105   :  { %3654 = vst [vmem:[#allocation3 + $0x2a0] sm:$0xff] %v9713_v1  ;;  %3655 = vst [vmem:[#allocation3 + $0x2a8] sm:$0xff] %v9713_v1 }
 0x106   :  { %3656 = vst [vmem:[#allocation3 + $0x2b0] sm:$0x3] %v9713_v1  ;;  %3657 = vst [vmem:[#allocation3 + $0x2b8] sm:$0xff] %v9713_v1 }
 0x107   :  { %3658 = vst [vmem:[#allocation3 + $0x2c0] sm:$0xff] %v9713_v1  ;;  %3659 = vst [vmem:[#allocation3 + $0x2c8] sm:$0x3] %v9713_v1 }
 0x108   :  { %3660 = vst [vmem:[#allocation3 + $0x2d0] sm:$0xff] %v9713_v1  ;;  %3661 = vst [vmem:[#allocation3 + $0x2d8] sm:$0xff] %v9713_v1 }
 0x109   :  { %3662 = vst [vmem:[#allocation3 + $0x2e0] sm:$0x3] %v9713_v1  ;;  %3663 = vst [vmem:[#allocation3 + $0x2e8] sm:$0xff] %v9713_v1 }
 0x10a   :  { %3664 = vst [vmem:[#allocation3 + $0x2f0] sm:$0xff] %v9713_v1  ;;  %3665 = vst [vmem:[#allocation3 + $0x2f8] sm:$0x3] %v9713_v1 }
 0x10b   :  { %3666 = vst [vmem:[#allocation3 + $0x300] sm:$0xff] %v9713_v1  ;;  %3667 = vst [vmem:[#allocation3 + $0x308] sm:$0xff] %v9713_v1 }
 0x10c   :  { %3668 = vst [vmem:[#allocation3 + $0x310] sm:$0x3] %v9713_v1  ;;  %3669 = vst [vmem:[#allocation3 + $0x318] sm:$0xff] %v9713_v1 }
 0x10d   :  { %3670 = vst [vmem:[#allocation3 + $0x320] sm:$0xff] %v9713_v1  ;;  %3671 = vst [vmem:[#allocation3 + $0x328] sm:$0x3] %v9713_v1 }
 0x10e   :  { %3672 = vst [vmem:[#allocation3 + $0x330] sm:$0xff] %v9713_v1  ;;  %3673 = vst [vmem:[#allocation3 + $0x338] sm:$0xff] %v9713_v1 }
 0x10f   :  { %3674 = vst [vmem:[#allocation3 + $0x340] sm:$0x3] %v9713_v1  ;;  %3675 = vst [vmem:[#allocation3 + $0x348] sm:$0xff] %v9713_v1 }
 0x110   :  { %3676 = vst [vmem:[#allocation3 + $0x350] sm:$0xff] %v9713_v1  ;;  %3677 = vst [vmem:[#allocation3 + $0x358] sm:$0x3] %v9713_v1 }
 0x111   :  { %318 = vst [vmem:[#allocation2 + $0x19] sm:$0xff] %v10120_v17  ;;  %319 = vst [vmem:[#allocation2 + $0x21] sm:$0xff] %v10122_v18  ;;  %v8239_v17 = vpack.c.bf16 %v998_v58, %v997_v57  ;;  %v10292_v57 = vld [vmem:[#allocation4 + $0x148] sm:$0xff] }
 0x112   :  { %320 = vst [vmem:[#allocation2 + $0x31] sm:$0xff] %v10124_v19  ;;  %321 = vst [vmem:[#allocation2 + $0x39] sm:$0xff] %v10129_v20 }
 0x113   :  { %322 = vst [vmem:[#allocation2 + $0x49] sm:$0xff] %v10132_v21  ;;  %323 = vst [vmem:[#allocation2 + $0x51] sm:$0xff] %v10134_v22  ;;  %8240 = vmatpush1.bf16.msra.mxu0 %v8239_v17  ;;  %v10300_v17 = vld [vmem:[#allocation4 + $0x150] sm:$0xff] }
 0x114   :  { %324 = vst [vmem:[#allocation2 + $0x61] sm:$0xff] %v10136_v23  ;;  %325 = vst [vmem:[#allocation2 + $0x69] sm:$0xff] %v10141_v27  ;;  %8241 = vmatprep.subr.bf16.mxu0 %v15229_v0 }
 0x115   :  { %326 = vst [vmem:[#allocation2 + $0x79] sm:$0xff] %v10145_v28  ;;  %327 = vst [vmem:[#allocation2 + $0x81] sm:$0xff] %v10147_v29 }
 0x116   :  { %328 = vst [vmem:[#allocation2 + $0x91] sm:$0xff] %v10149_v30  ;;  %329 = vst [vmem:[#allocation2 + $0x99] sm:$0xff] %v10154_v31 }
 0x117   :  { %330 = vst [vmem:[#allocation2 + $0xa9] sm:$0xff] %v10157_v32  ;;  %331 = vst [vmem:[#allocation2 + $0xb1] sm:$0xff] %v10159_v33 }
 0x118   :  { %332 = vst [vmem:[#allocation2 + $0xc1] sm:$0xff] %v10161_v34  ;;  %333 = vst [vmem:[#allocation2 + $0xc9] sm:$0xff] %v10166_v36  ;;  %v10233_v54 = vld [vmem:[#allocation2 + $0x18] sm:$0xff]  ;;  %v10241_v1 = vld [vmem:[#allocation2 + $0x20] sm:$0xff] }
 0x119   :  { %334 = vst [vmem:[#allocation2 + $0xd9] sm:$0xff] %v10170_v39  ;;  %335 = vst [vmem:[#allocation2 + $0xe1] sm:$0xff] %v10172_v40  ;;  %1178 = vmatmul.mubr.f32.gmra.mrb[4].mxu0 %v10233_v54  ;;  %v10249_v3 = vld [vmem:[#allocation2 + $0x30] sm:$0xff]  ;;  %v10257_v8 = vld [vmem:[#allocation2 + $0x38] sm:$0xff] }
 0x11a   :  { %336 = vst [vmem:[#allocation2 + $0xf1] sm:$0xff] %v10176_v42  ;;  %337 = vst [vmem:[#allocation2 + $0xf9] sm:$0xff] %v10180_v45  ;;  %1182 = vmatprep.mubr.f32.mxu0 %v10122_v18  ;;  %v8242_v18 = vpack.c.bf16 %v1000_v62, %v999_v61  ;;  %v10265_v13 = vld [vmem:[#allocation2 + $0x48] sm:$0xff]  ;;  %v10273_v25 = vld [vmem:[#allocation2 + $0x50] sm:$0xff] }
 0x11b   :  { %338 = vst [vmem:[#allocation2 + $0x109] sm:$0xff] %v10183_v47  ;;  %339 = vst [vmem:[#allocation2 + $0x111] sm:$0xff] %v10185_v48  ;;  %v10281_v38 = vld [vmem:[#allocation2 + $0x60] sm:$0xff]  ;;  %v10289_v49 = vld [vmem:[#allocation2 + $0x68] sm:$0xff] }
 0x11c   :  { %340 = vst [vmem:[#allocation2 + $0x121] sm:$0xff] %v10190_v51  ;;  %341 = vst [vmem:[#allocation2 + $0x129] sm:$0xff] %v10193_v52  ;;  %8243 = vmatpush1.bf16.msra.mxu0 %v8242_v18  ;;  %v10297_v58 = vld [vmem:[#allocation2 + $0x78] sm:$0xff]  ;;  %v10305_v61 = vld [vmem:[#allocation2 + $0x80] sm:$0xff] }
 0x11d   :  { %342 = vst [vmem:[#allocation2 + $0x139] sm:$0xff] %v10197_v56  ;;  %343 = vst [vmem:[#allocation2 + $0x141] sm:$0xff] %v10201_v60  ;;  %1183 = vmatmul.mubr.f32.gmra.mrb[6].mxu0 %v10241_v1  ;;  %8244 = vmatprep.subr.bf16.mxu0 %v15229_v0  ;;  %v10313_v62 = vld [vmem:[#allocation2 + $0x90] sm:$0xff]  ;;  %v10315_v18 = vld [vmem:[#allocation4 + $0x160] sm:$0xff] }
 0x11e   :  { %344 = vst [vmem:[#allocation2 + $0x151] sm:$0xff] %v10205_v2  ;;  %345 = vst [vmem:[#allocation2 + $0x159] sm:$0xff] %v10209_v6  ;;  %1187 = vmatprep.mubr.f32.mxu0 %v10124_v19  ;;  %v8245_v19 = vpack.c.bf16 %v1002_v5, %v1001_v4  ;;  %v1014_v4 = vld [vmem:[#allocation7 + $0x1b8] sm:$0xff] }
 0x11f   :  { %346 = vst [vmem:[#allocation2 + $0x169] sm:$0xff] %v10213_v10  ;;  %347 = vst [vmem:[#allocation2 + $0x171] sm:$0xff] %v10217_v14  ;;  %v10320_v5 = vld [vmem:[#allocation2 + $0x98] sm:$0xff] }
 0x120   :  { %350 = vst [vmem:[#allocation2 + $0x1c9] sm:$0xff] %v10223_v44  ;;  %351 = vst [vmem:[#allocation2 + $0x1d1] sm:$0xff] %v10228_v53  ;;  %8246 = vmatpush1.bf16.msra.mxu0 %v8245_v19 }
 0x121   :  { %352 = vst [vmem:[#allocation2 + $0x1e1] sm:$0xff] %v10236_v59  ;;  %353 = vst [vmem:[#allocation2 + $0x1e9] sm:$0xff] %v10244_v63  ;;  %1188 = vmatmul.mubr.f32.gmra.mrb[8].mxu0 %v10249_v3  ;;  %8247 = vmatprep.subr.bf16.mxu0 %v15229_v0 }
 0x122   :  { %354 = vst [vmem:[#allocation2 + $0x1f9] sm:$0xff] %v10252_v7  ;;  %1192 = vmatprep.mubr.f32.mxu0 %v10129_v20  ;;  %355 = vst [vmem:[#allocation2 + $0x201] sm:$0xff] %v10260_v12  ;;  %v8248_v20 = vpack.c.bf16 %v1004_v11, %v1003_v9  ;;  %v10322_v9 = vld [vmem:[#allocation4 + $0x168] sm:$0xff]  ;;  %v10330_v11 = vld [vmem:[#allocation4 + $0x170] sm:$0xff] }
 0x123   :  { %356 = vst [vmem:[#allocation2 + $0x211] sm:$0xff] %v10268_v24  ;;  %357 = vst [vmem:[#allocation2 + $0x219] sm:$0xff] %v10276_v37 }
 0x124   :  { %8249 = vmatpush1.bf16.msra.mxu0 %v8248_v20  ;;  %358 = vst [vmem:[#allocation2 + $0x229] sm:$0xff] %v10284_v46  ;;  %359 = vst [vmem:[#allocation2 + $0x231] sm:$0xff] %v10292_v57  ;;  %v10337_v20 = vld [vmem:[#allocation4 + $0x178] sm:$0xff] }
 0x125   :  { %1193 = vmatmul.mubr.f32.gmra.mrb[10].mxu0 %v10257_v8  ;;  %8250 = vmatprep.subr.bf16.mxu0 %v15229_v0  ;;  %360 = vst [vmem:[#allocation2 + $0x241] sm:$0xff] %v10300_v17  ;;  %362 = vst [vmem:[#allocation2 + $0x259] sm:$0xff] %v10315_v18 }
 0x126   :  { %1197 = vmatprep.mubr.f32.mxu0 %v10132_v21  ;;  %v8251_v21 = vpack.c.bf16 %v1006_v16, %v1005_v15  ;;  %363 = vst [vmem:[#allocation2 + $0x261] sm:$0xff] %v10322_v9  ;;  %364 = vst [vmem:[#allocation2 + $0x271] sm:$0xff] %v10330_v11  ;;  %v10344_v15 = vld [vmem:[#allocation4 + $0x180] sm:$0xff] }
 0x127   :  { %365 = vst [vmem:[#allocation2 + $0x279] sm:$0xff] %v10337_v20  ;;  %v1015_v16 = vld [vmem:[#allocation7 + $0x1c0] sm:$0xff]  ;;  %366 = vst [vmem:[#allocation2 + $0x289] sm:$0xff] %v10344_v15 }
 0x128   :  { %8252 = vmatpush1.bf16.msra.mxu0 %v8251_v21  ;;  %v1016_v21 = vld [vmem:[#allocation7 + $0x1c8] sm:$0xff] }
 0x129   :  { %1198 = vmatmul.mubr.f32.gmra.mrb[12].mxu0 %v10265_v13  ;;  %8253 = vmatprep.subr.bf16.mxu0 %v15229_v0 }
 0x12a   :  { %1202 = vmatprep.mubr.f32.mxu0 %v10134_v22  ;;  %v8254_v22 = vpack.c.bf16 %v1008_v35, %v1007_v26  ;;  %v8266_v26 = vpack.c.bf16 %v1016_v21, %v1015_v16  ;;  %v10351_v35 = vld [vmem:[#allocation4 + $0x188] sm:$0xff]  ;;  %v1019_v16 = vld [vmem:[#allocation7 + $0x1e0] sm:$0xff] }
 0x12b   :  { %367 = vst [vmem:[#allocation2 + $0x291] sm:$0xff] %v10351_v35  ;;  %v1020_v21 = vld [vmem:[#allocation7 + $0x1e8] sm:$0xff] }
 0x12c   :  { %8255 = vmatpush1.bf16.msra.mxu0 %v8254_v22  ;;  %v10359_v22 = vld [vmem:[#allocation4 + $0x190] sm:$0xff] }
 0x12d   :  { %1203 = vmatmul.mubr.f32.gmra.mrb[14].mxu0 %v10273_v25  ;;  %8256 = vmatprep.subr.bf16.mxu0 %v15229_v0  ;;  %368 = vst [vmem:[#allocation2 + $0x2a1] sm:$0xff] %v10359_v22 }
 0x12e   :  { %1207 = vmatprep.mubr.f32.mxu0 %v10136_v23  ;;  %v8257_v23 = vpack.c.bf16 %v1010_v43, %v1009_v41  ;;  %v10366_v41 = vld [vmem:[#allocation4 + $0x198] sm:$0xff]  ;;  %v10373_v43 = vld [vmem:[#allocation4 + $0x1a0] sm:$0xff] }
 0x12f   :  { %369 = vst [vmem:[#allocation2 + $0x2a9] sm:$0xff] %v10366_v41  ;;  %370 = vst [vmem:[#allocation2 + $0x2b9] sm:$0xff] %v10373_v43 }
 0x130   :  { %8258 = vmatpush1.bf16.msra.mxu0 %v8257_v23  ;;  %v1017_v23 = vld [vmem:[#allocation7 + $0x1d0] sm:$0xff] }
 0x131   :  { %1208 = vmatmul.mubr.f32.gmra.mrb[16].mxu0 %v10281_v38  ;;  %8259 = vmatprep.subr.bf16.mxu0 %v15229_v0 }
 0x132   :  { %1212 = vmatprep.mubr.f32.mxu0 %v10141_v27  ;;  %v8260_v27 = vpack.c.bf16 %v1012_v55, %v1011_v50  ;;  %v1018_v50 = vld [vmem:[#allocation7 + $0x1d8] sm:$0xff] }
 0x133   :  { %v8269_v55 = vpack.c.bf16 %v1018_v50, %v1017_v23  ;;  %v10409_v23 = vld [vmem:[#allocation4 + $0x1c8] sm:$0xff]  ;;  %v10417_v50 = vld [vmem:[#allocation4 + $0x1d0] sm:$0xff] }
 0x134   :  { %8261 = vmatpush1.bf16.msra.mxu0 %v8260_v27  ;;  %v10380_v27 = vld [vmem:[#allocation4 + $0x1a8] sm:$0xff]  ;;  %375 = vst [vmem:[#allocation2 + $0x2f1] sm:$0xff] %v10409_v23  ;;  %376 = vst [vmem:[#allocation2 + $0x301] sm:$0xff] %v10417_v50 }
 0x135   :  { %1213 = vmatmul.mubr.f32.gmra.mrb[18].mxu0 %v10289_v49  ;;  %8262 = vmatprep.subr.bf16.mxu0 %v15229_v0  ;;  %371 = vst [vmem:[#allocation2 + $0x2c1] sm:$0xff] %v10380_v27 }
 0x136   :  { %1217 = vmatprep.mubr.f32.mxu0 %v10145_v28  ;;  %v10308_v28 = vld [vmem:[#allocation4 + $0x158] sm:$0xff] }
 0x137   :  { %361 = vst [vmem:[#allocation2 + $0x249] sm:$0xff] %v10308_v28 }
 0x139   :  { %1218 = vmatmul.mubr.f32.gmra.mrb[20].mxu0 %v10297_v58 }
 0x13a   :  { %1222 = vmatprep.mubr.f32.mxu0 %v10147_v29  ;;  %v1013_v29 = vld [vmem:[#allocation7 + $0x1b0] sm:$0xff] }
 0x13b   :  { %v8263_v19 = vpack.c.bf16 %v1014_v4, %v1013_v29  ;;  %v10388_v29 = vld [vmem:[#allocation4 + $0x1b0] sm:$0xff]  ;;  %v10395_v4 = vld [vmem:[#allocation4 + $0x1b8] sm:$0xff] }
 0x13c   :  { %372 = vst [vmem:[#allocation2 + $0x2d1] sm:$0xff] %v10388_v29  ;;  %373 = vst [vmem:[#allocation2 + $0x2d9] sm:$0xff] %v10395_v4 }
 0x13d   :  { %1223 = vmatmul.mubr.f32.gmra.mrb[22].mxu0 %v10305_v61 }
 0x13e   :  { %1227 = vmatprep.mubr.f32.mxu0 %v10149_v30  ;;  %8264 = vmatpush1.bf16.msra.mxu0 %v8263_v19  ;;  %v10328_v30 = vld [vmem:[#allocation2 + $0xa8] sm:$0xff]  ;;  %v10402_v19 = vld [vmem:[#allocation4 + $0x1c0] sm:$0xff] }
 0x13f   :  { %8265 = vmatprep.subr.bf16.mxu0 %v15229_v0  ;;  %374 = vst [vmem:[#allocation2 + $0x2e9] sm:$0xff] %v10402_v19 }
 0x141   :  { %1228 = vmatmul.mubr.f32.gmra.mrb[24].mxu0 %v10313_v62 }
 0x142   :  { %1232 = vmatprep.mubr.f32.mxu0 %v10154_v31  ;;  %v10335_v31 = vld [vmem:[#allocation2 + $0xb0] sm:$0xff]  ;;  %8267 = vmatpush1.bf16.msra.mxu0 %v8266_v26  ;;  %v8272_v26 = vpack.c.bf16 %v1020_v21, %v1019_v16  ;;  %v10431_v16 = vld [vmem:[#allocation4 + $0x1e0] sm:$0xff] }
 0x143   :  { %8268 = vmatprep.subr.bf16.mxu0 %v15229_v0  ;;  %v1021_v21 = vld [vmem:[#allocation7 + $0x1f0] sm:$0xff]  ;;  %378 = vst [vmem:[#allocation2 + $0x319] sm:$0xff] %v10431_v16 }
 0x145   :  { %1233 = vmatmul.mubr.f32.gmra.mrb[26].mxu0 %v10320_v5 }
 0x146   :  { %1237 = vmatprep.mubr.f32.mxu0 %v10157_v32  ;;  %v10342_v32 = vld [vmem:[#allocation2 + $0xc0] sm:$0xff]  ;;  %8270 = vmatpush1.bf16.msra.mxu0 %v8269_v55  ;;  %v10424_v55 = vld [vmem:[#allocation4 + $0x1d8] sm:$0xff] }
 0x147   :  { %8271 = vmatprep.subr.bf16.mxu0 %v15229_v0  ;;  %377 = vst [vmem:[#allocation2 + $0x309] sm:$0xff] %v10424_v55 }
 0x149   :  { %1238 = vmatmul.mubr.f32.gmra.mrb[28].mxu0 %v10328_v30 }
 0x14a   :  { %1242 = vmatprep.mubr.f32.mxu0 %v10159_v33  ;;  %v10349_v33 = vld [vmem:[#allocation2 + $0xc8] sm:$0xff]  ;;  %8273 = vmatpush1.bf16.msra.mxu0 %v8272_v26  ;;  %v1022_v26 = vld [vmem:[#allocation7 + $0x1f8] sm:$0xff] }
 0x14b   :  { %8274 = vmatprep.subr.bf16.mxu0 %v15229_v0  ;;  %v8275_v0 = vpack.c.bf16 %v1022_v26, %v1021_v21  ;;  %v478_v21 = vld [vmem:[#allocation2 + $0x1b1] sm:$0xff]  ;;  %v9463_v26 = vld [vmem:[#allocation2] sm:$0xff] }
 0x14d   :  { %1243 = vmatmul.mubr.f32.gmra.mrb[30].mxu0 %v10335_v31 }
 0x14e   :  { %1247 = vmatprep.mubr.f32.mxu0 %v10161_v34  ;;  %v10357_v34 = vld [vmem:[#allocation2 + $0xd8] sm:$0xff]  ;;  %8276 = vmatpush1.bf16.msra.mxu0 %v8275_v0 }
 0x14f   :  { %v479_v0 = vld [vmem:[#allocation2 + $0x1b9] sm:$0xff] }
 0x151   :  { %1248 = vmatmul.mubr.f32.gmra.mrb[32].mxu0 %v10342_v32 }
 0x152   :  { %1252 = vmatprep.mubr.f32.mxu0 %v10166_v36  ;;  %v10364_v36 = vld [vmem:[#allocation2 + $0xe0] sm:$0xff] }
 0x155   :  { %1253 = vmatmul.mubr.f32.gmra.mrb[34].mxu0 %v10349_v33 }
 0x156   :  { %1257 = vmatprep.mubr.f32.mxu0 %v10170_v39  ;;  %v10371_v39 = vld [vmem:[#allocation2 + $0xf0] sm:$0xff] }
 0x159   :  { %1258 = vmatmul.mubr.f32.gmra.mrb[36].mxu0 %v10357_v34 }
 0x15a   :  { %1262 = vmatprep.mubr.f32.mxu0 %v10172_v40  ;;  %v10378_v40 = vld [vmem:[#allocation2 + $0xf8] sm:$0xff] }
 0x15d   :  { %1263 = vmatmul.mubr.f32.gmra.mrb[38].mxu0 %v10364_v36 }
 0x15e   :  { %1267 = vmatprep.mubr.f32.mxu0 %v10176_v42  ;;  %v10386_v42 = vld [vmem:[#allocation2 + $0x108] sm:$0xff] }
 0x161   :  { %1268 = vmatmul.mubr.f32.gmra.mrb[40].mxu0 %v10371_v39 }
 0x162   :  { %1272 = vmatprep.mubr.f32.mxu0 %v10180_v45  ;;  %v10393_v45 = vld [vmem:[#allocation2 + $0x110] sm:$0xff] }
 0x165   :  { %1273 = vmatmul.mubr.f32.gmra.mrb[42].mxu0 %v10378_v40 }
 0x166   :  { %1277 = vmatprep.mubr.f32.mxu0 %v10183_v47  ;;  %v10400_v47 = vld [vmem:[#allocation2 + $0x120] sm:$0xff] }
 0x169   :  { %1278 = vmatmul.mubr.f32.gmra.mrb[44].mxu0 %v10386_v42 }
 0x16a   :  { %1282 = vmatprep.mubr.f32.mxu0 %v10185_v48  ;;  %v10407_v48 = vld [vmem:[#allocation2 + $0x128] sm:$0xff] }
 0x16d   :  { %1283 = vmatmul.mubr.f32.gmra.mrb[46].mxu0 %v10393_v45 }
 0x16e   :  { %1287 = vmatprep.mubr.f32.mxu0 %v10190_v51  ;;  %v10415_v51 = vld [vmem:[#allocation2 + $0x138] sm:$0xff] }
 0x171   :  { %1288 = vmatmul.mubr.f32.gmra.mrb[48].mxu0 %v10400_v47 }
 0x172   :  { %1292 = vmatprep.mubr.f32.mxu0 %v10193_v52  ;;  %v10422_v52 = vld [vmem:[#allocation2 + $0x140] sm:$0xff] }
 0x173   :  { %15417 = vst [vmem:[#allocation26_spill] sm:$0xff] %v10422_v52 }
 0x175   :  { %1293 = vmatmul.mubr.f32.gmra.mrb[50].mxu0 %v10407_v48 }
 0x176   :  { %1297 = vmatprep.mubr.f32.mxu0 %v10197_v56  ;;  %v10429_v56 = vld [vmem:[#allocation2 + $0x150] sm:$0xff] }
 0x177   :  { %15418 = vst [vmem:[#allocation27_spill] sm:$0xff] %v10429_v56 }
 0x179   :  { %1298 = vmatmul.mubr.f32.gmra.mrb[52].mxu0 %v10415_v51 }
 0x17a   :  { %1302 = vmatprep.mubr.f32.mxu0 %v10201_v60  ;;  %v10436_v60 = vld [vmem:[#allocation2 + $0x158] sm:$0xff] }
 0x17d   :  { %1303 = vmatmul.mubr.f32.gmra.mrb[54].mxu0 %v10422_v52  ;;  %v10438_v52 = vld [vmem:[#allocation4 + $0x1e8] sm:$0xff] }
 0x17e   :  { %1307 = vmatprep.mubr.f32.mxu0 %v10205_v2  ;;  %379 = vst [vmem:[#allocation2 + $0x321] sm:$0xff] %v10438_v52  ;;  %v15419_v2 = vmov 0.0|0.0  }
 0x17f   :  { %8277 = vmatprep.subr.bf16.mxu0 %v15419_v2 }
 0x181   :  { %1308 = vmatmul.mubr.f32.gmra.mrb[56].mxu0 %v10429_v56  ;;  %v10444_v56 = vld [vmem:[#allocation2 + $0x168] sm:$0xff] }
 0x182   :  { %1312 = vmatprep.mubr.f32.mxu0 %v10209_v6  ;;  %v10448_v6 = vld [vmem:[#allocation2 + $0x170] sm:$0xff] }
 0x185   :  { %1313 = vmatmul.mubr.f32.gmra.mrb[58].mxu0 %v10436_v60 }
 0x186   :  { %1317 = vmatprep.mubr.f32.mxu0 %v10213_v10  ;;  %v10452_v10 = vld [vmem:[#allocation2 + $0x1c8] sm:$0xff] }
 0x189   :  { %1318 = vmatmul.mubr.f32.gmra.mrb[60].mxu0 %v10444_v56 }
 0x18a   :  { %1322 = vmatprep.mubr.f32.mxu0 %v10217_v14  ;;  %v10456_v14 = vld [vmem:[#allocation2 + $0x1d0] sm:$0xff] }
 0x18d   :  { %1323 = vmatmul.mubr.f32.gmra.mrb[62].mxu0 %v10448_v6 }
 0x18e   :  { %1327 = vmatprep.mubr.f32.mxu0 %v478_v21  ;;  %v10460_v21 = vld [vmem:[#allocation2 + $0x1e0] sm:$0xff] }
 0x191   :  { %1328 = vmatmul.mubr.f32.gmra.mrb[64].mxu0 %v9463_v26 }
 0x192   :  { %1332 = vmatprep.mubr.f32.mxu0 %v479_v0  ;;  %v10464_v0 = vld [vmem:[#allocation2 + $0x1e8] sm:$0xff] }
 0x195   :  { %1333 = vmatmul.mubr.f32.gmra.mrb[66].mxu0 %v9463_v26  ;;  %v10565_v26 = vld [vmem:[#allocation4 + $0xf8] sm:$0xff] }
 0x196   :  { %1337 = vmatprep.mubr.f32.mxu0 %v10223_v44  ;;  %v10468_v44 = vld [vmem:[#allocation2 + $0x1f8] sm:$0xff]  ;;  %15425 = vst [vmem:[#allocation33_spill] sm:$0xff] %v10565_v26  ;;  %349 = vst [vmem:[#allocation2 + $0x189] sm:$0xff] %v10565_v26 }
 0x199   :  { %1338 = vmatmul.mubr.f32.gmra.mrb[68].mxu0 %v10452_v10 }
 0x19a   :  { %1342 = vmatprep.mubr.f32.mxu0 %v10228_v53  ;;  %v10472_v53 = vld [vmem:[#allocation2 + $0x200] sm:$0xff] }
 0x19d   :  { %1343 = vmatmul.mubr.f32.gmra.mrb[70].mxu0 %v10456_v14 }
 0x19e   :  { %1347 = vmatprep.mubr.f32.mxu0 %v10236_v59  ;;  %v10476_v59 = vld [vmem:[#allocation2 + $0x210] sm:$0xff] }
 0x1a1   :  { %1348 = vmatmul.mubr.f32.gmra.mrb[72].mxu0 %v10460_v21 }
 0x1a2   :  { %1352 = vmatprep.mubr.f32.mxu0 %v10244_v63  ;;  %v10480_v63 = vld [vmem:[#allocation2 + $0x218] sm:$0xff] }
 0x1a5   :  { %1353 = vmatmul.mubr.f32.gmra.mrb[74].mxu0 %v10464_v0 }
 0x1a6   :  { %1357 = vmatprep.mubr.f32.mxu0 %v10252_v7  ;;  %v10484_v7 = vld [vmem:[#allocation2 + $0x228] sm:$0xff] }
 0x1a9   :  { %1358 = vmatmul.mubr.f32.gmra.mrb[76].mxu0 %v10468_v44 }
 0x1aa   :  { %1362 = vmatprep.mubr.f32.mxu0 %v10260_v12  ;;  %v10488_v12 = vld [vmem:[#allocation2 + $0x230] sm:$0xff] }
 0x1ad   :  { %1363 = vmatmul.mubr.f32.gmra.mrb[78].mxu0 %v10472_v53 }
 0x1ae   :  { %1367 = vmatprep.mubr.f32.mxu0 %v10268_v24  ;;  %v10492_v24 = vld [vmem:[#allocation2 + $0x240] sm:$0xff] }
 0x1b1   :  { %1368 = vmatmul.mubr.f32.gmra.mrb[80].mxu0 %v10476_v59 }
 0x1b2   :  { %1372 = vmatprep.mubr.f32.mxu0 %v10276_v37  ;;  %v10496_v37 = vld [vmem:[#allocation2 + $0x248] sm:$0xff] }
 0x1b5   :  { %1373 = vmatmul.mubr.f32.gmra.mrb[82].mxu0 %v10480_v63 }
 0x1b6   :  { %1377 = vmatprep.mubr.f32.mxu0 %v10284_v46  ;;  %v10500_v46 = vld [vmem:[#allocation2 + $0x258] sm:$0xff] }
 0x1b9   :  { %1378 = vmatmul.mubr.f32.gmra.mrb[84].mxu0 %v10484_v7 }
 0x1ba   :  { %1382 = vmatprep.mubr.f32.mxu0 %v10292_v57  ;;  %v10504_v57 = vld [vmem:[#allocation2 + $0x260] sm:$0xff] }
 0x1bd   :  { %1383 = vmatmul.mubr.f32.gmra.mrb[86].mxu0 %v10488_v12 }
 0x1be   :  { %1387 = vmatprep.mubr.f32.mxu0 %v10300_v17  ;;  %v10508_v17 = vld [vmem:[#allocation2 + $0x270] sm:$0xff] }
 0x1c1   :  { %1388 = vmatmul.mubr.f32.gmra.mrb[88].mxu0 %v10492_v24 }
 0x1c2   :  { %1392 = vmatprep.mubr.f32.mxu0 %v10308_v28  ;;  %v10512_v28 = vld [vmem:[#allocation2 + $0x278] sm:$0xff] }
 0x1c5   :  { %1393 = vmatmul.mubr.f32.gmra.mrb[90].mxu0 %v10496_v37 }
 0x1c6   :  { %1397 = vmatprep.mubr.f32.mxu0 %v10315_v18  ;;  %v10516_v18 = vld [vmem:[#allocation2 + $0x288] sm:$0xff] }
 0x1c9   :  { %1398 = vmatmul.mubr.f32.gmra.mrb[92].mxu0 %v10500_v46 }
 0x1ca   :  { %1402 = vmatprep.mubr.f32.mxu0 %v10322_v9  ;;  %v10520_v9 = vld [vmem:[#allocation2 + $0x290] sm:$0xff] }
 0x1cd   :  { %1403 = vmatmul.mubr.f32.gmra.mrb[94].mxu0 %v10504_v57 }
 0x1ce   :  { %1407 = vmatprep.mubr.f32.mxu0 %v10330_v11  ;;  %v10524_v11 = vld [vmem:[#allocation2 + $0x2a0] sm:$0xff] }
 0x1d1   :  { %1408 = vmatmul.mubr.f32.gmra.mrb[96].mxu0 %v10508_v17 }
 0x1d2   :  { %1412 = vmatprep.mubr.f32.mxu0 %v10337_v20  ;;  %v10528_v20 = vld [vmem:[#allocation2 + $0x2a8] sm:$0xff] }
 0x1d5   :  { %1413 = vmatmul.mubr.f32.gmra.mrb[98].mxu0 %v10512_v28 }
 0x1d6   :  { %1417 = vmatprep.mubr.f32.mxu0 %v10344_v15  ;;  %v10532_v15 = vld [vmem:[#allocation2 + $0x2b8] sm:$0xff] }
 0x1d9   :  { %1418 = vmatmul.mubr.f32.gmra.mrb[100].mxu0 %v10516_v18 }
 0x1da   :  { %1422 = vmatprep.mubr.f32.mxu0 %v10351_v35  ;;  %v10536_v35 = vld [vmem:[#allocation2 + $0x2c0] sm:$0xff] }
 0x1dd   :  { %1423 = vmatmul.mubr.f32.gmra.mrb[102].mxu0 %v10520_v9 }
 0x1de   :  { %1427 = vmatprep.mubr.f32.mxu0 %v10359_v22  ;;  %v10540_v22 = vld [vmem:[#allocation2 + $0x2d0] sm:$0xff] }
 0x1e1   :  { %1428 = vmatmul.mubr.f32.gmra.mrb[104].mxu0 %v10524_v11 }
 0x1e2   :  { %1432 = vmatprep.mubr.f32.mxu0 %v10366_v41  ;;  %v10544_v41 = vld [vmem:[#allocation2 + $0x2d8] sm:$0xff] }
 0x1e5   :  { %1433 = vmatmul.mubr.f32.gmra.mrb[106].mxu0 %v10528_v20 }
 0x1e6   :  { %1437 = vmatprep.mubr.f32.mxu0 %v10373_v43  ;;  %v10548_v43 = vld [vmem:[#allocation2 + $0x2e8] sm:$0xff] }
 0x1e7   :  { %15420 = vst [vmem:[#allocation28_spill] sm:$0xff] %v10548_v43 }
 0x1e9   :  { %1438 = vmatmul.mubr.f32.gmra.mrb[108].mxu0 %v10532_v15 }
 0x1ea   :  { %1442 = vmatprep.mubr.f32.mxu0 %v10380_v27  ;;  %v10552_v27 = vld [vmem:[#allocation2 + $0x2f0] sm:$0xff] }
 0x1eb   :  { %15421 = vst [vmem:[#allocation29_spill] sm:$0xff] %v10552_v27 }
 0x1ed   :  { %1443 = vmatmul.mubr.f32.gmra.mrb[110].mxu0 %v10536_v35 }
 0x1ee   :  { %1447 = vmatprep.mubr.f32.mxu0 %v10388_v29  ;;  %v10556_v29 = vld [vmem:[#allocation2 + $0x300] sm:$0xff] }
 0x1ef   :  { %15422 = vst [vmem:[#allocation30_spill] sm:$0xff] %v10556_v29 }
 0x1f1   :  { %1448 = vmatmul.mubr.f32.gmra.mrb[112].mxu0 %v10540_v22 }
 0x1f2   :  { %1452 = vmatprep.mubr.f32.mxu0 %v10395_v4  ;;  %v10558_v4 = vld [vmem:[#allocation4 + $0xf0] sm:$0xff] }
 0x1f3   :  { %15423 = vst [vmem:[#allocation31_spill] sm:$0xff] %v10558_v4  ;;  %348 = vst [vmem:[#allocation2 + $0x181] sm:$0xff] %v10558_v4  ;;  %v1023_v4 = vld [vmem:[#allocation7 + $0x200] sm:$0xff] }
 0x1f5   :  { %1453 = vmatmul.mubr.f32.gmra.mrb[114].mxu0 %v10544_v41 }
 0x1f6   :  { %1457 = vmatprep.mubr.f32.mxu0 %v10402_v19  ;;  %v10563_v19 = vld [vmem:[#allocation2 + $0x308] sm:$0xff] }
 0x1f7   :  { %15424 = vst [vmem:[#allocation32_spill] sm:$0xff] %v10563_v19 }
 0x1f9   :  { %1458 = vmatmul.mubr.f32.gmra.mrb[116].mxu0 %v10548_v43  ;;  %v1028_v43 = vld [vmem:[#allocation7 + $0x228] sm:$0xff] }
 0x1fa   :  { %1462 = vmatprep.mubr.f32.mxu0 %v10409_v23  ;;  %v10570_v23 = vld [vmem:[#allocation2 + $0x318] sm:$0xff] }
 0x1fb   :  { %15426 = vst [vmem:[#allocation34_spill] sm:$0xff] %v10570_v23 }
 0x1fd   :  { %1463 = vmatmul.mubr.f32.gmra.mrb[118].mxu0 %v10552_v27  ;;  %v1025_v27 = vld [vmem:[#allocation7 + $0x210] sm:$0xff] }
 0x1fe   :  { %1467 = vmatprep.mubr.f32.mxu0 %v10417_v50  ;;  %v10574_v50 = vld [vmem:[#allocation2 + $0x320] sm:$0xff] }
 0x1ff   :  { %15427 = vst [vmem:[#allocation35_spill] sm:$0xff] %v10574_v50 }
 0x201   :  { %1468 = vmatmul.mubr.f32.gmra.mrb[120].mxu0 %v10556_v29  ;;  %v510_v29 = vld [vmem:[#allocation2 + $0x2] sm:$0xff] }
 0x202   :  { %1472 = vmatprep.mubr.f32.mxu0 %v10424_v55  ;;  %v1024_v55 = vld [vmem:[#allocation7 + $0x208] sm:$0xff] }
 0x203   :  { %v8278_v26 = vpack.c.bf16 %v1024_v55, %v1023_v4  ;;  %v1029_v4 = vld [vmem:[#allocation7 + $0x230] sm:$0xff]  ;;  %v10596_v55 = vld [vmem:[#allocation2 + $0x3a] sm:$0xff] }
 0x205   :  { %1473 = vmatmul.mubr.f32.gmra.mrb[122].mxu0 %v10563_v19  ;;  %v1026_v19 = vld [vmem:[#allocation7 + $0x218] sm:$0xff] }
 0x206   :  { %1477 = vmatprep.mubr.f32.mxu0 %v10431_v16  ;;  %v511_v16 = vld [vmem:[#allocation2 + $0xa] sm:$0xff] }
 0x209   :  { %1478 = vmatmul.mubr.f32.gmra.mrb[124].mxu0 %v10570_v23  ;;  %v8281_v23 = vpack.c.bf16 %v1026_v19, %v1025_v27  ;;  %v1031_v19 = vld [vmem:[#allocation7 + $0x240] sm:$0xff] }
 0x20a   :  { %1482 = vmatprep.mubr.f32.mxu0 %v10438_v52  ;;  %v1027_v52 = vld [vmem:[#allocation7 + $0x220] sm:$0xff] }
 0x20d   :  { %1483 = vmatmul.mubr.f32.gmra.mrb[126].mxu0 %v10574_v50  ;;  %v10581_v50 = vld [vmem:[#allocation2 + $0x1a] sm:$0xff] }
 0x20e   :  { %1552 = vmatprep.mubr.f32.mxu0 %v10233_v54  ;;  %v8284_v54 = vpack.c.bf16 %v1028_v43, %v1027_v52  ;;  %v10591_v43 = vld [vmem:[#allocation2 + $0x32] sm:$0xff]  ;;  %v1035_v52 = vld [vmem:[#allocation7 + $0x260] sm:$0xff] }
 0x211   :  { %1553 = vmatmul.mubr.f32.vlgmr.msra.gmra.mrb[0].mxu0 %v510_v29  ;;  %v1030_v29 = vld [vmem:[#allocation7 + $0x238] sm:$0xff] }
 0x212   :  { %8279 = vmatpush1.bf16.msra.mxu0 %v8278_v26  ;;  %1557 = vmatprep.mubr.f32.mxu0 %v10241_v1  ;;  %v10586_v1 = vld [vmem:[#allocation2 + $0x22] sm:$0xff]  ;;  %v8287_v27 = vpack.c.bf16 %v1030_v29, %v1029_v4  ;;  %v1037_v29 = vld [vmem:[#allocation7 + $0x270] sm:$0xff] }
 0x213   :  { %8280 = vmatprep.subr.bf16.mxu0 %v15419_v2 }
 0x215   :  { %1558 = vmatmul.mubr.f32.gmra.mrb[2].mxu0 %v511_v16 }
 0x216   :  { %1562 = vmatprep.mubr.f32.mxu0 %v10249_v3  ;;  %8282 = vmatpush1.bf16.msra.mxu0 %v8281_v23  ;;  %v1032_v3 = vld [vmem:[#allocation7 + $0x248] sm:$0xff]  ;;  %v1033_v23 = vld [vmem:[#allocation7 + $0x250] sm:$0xff] }
 0x217   :  { %8283 = vmatprep.subr.bf16.mxu0 %v15419_v2  ;;  %v8290_v26 = vpack.c.bf16 %v1032_v3, %v1031_v19  ;;  %v1039_v3 = vld [vmem:[#allocation7 + $0x280] sm:$0xff] }
 0x219   :  { %1563 = vmatmul.mubr.f32.gmra.mrb[4].mxu0 %v10581_v50 }
 0x21a   :  { %1567 = vmatprep.mubr.f32.mxu0 %v10257_v8  ;;  %8285 = vmatpush1.bf16.msra.mxu0 %v8284_v54  ;;  %v1034_v8 = vld [vmem:[#allocation7 + $0x258] sm:$0xff]  ;;  %v10601_v54 = vld [vmem:[#allocation2 + $0x4a] sm:$0xff] }
 0x21b   :  { %8286 = vmatprep.subr.bf16.mxu0 %v15419_v2  ;;  %v8293_v16 = vpack.c.bf16 %v1034_v8, %v1033_v23  ;;  %v1041_v8 = vld [vmem:[#allocation7 + $0x290] sm:$0xff] }
 0x21d   :  { %1568 = vmatmul.mubr.f32.gmra.mrb[6].mxu0 %v10586_v1 }
 0x21e   :  { %1572 = vmatprep.mubr.f32.mxu0 %v10265_v13  ;;  %8288 = vmatpush1.bf16.msra.mxu0 %v8287_v27  ;;  %v1036_v13 = vld [vmem:[#allocation7 + $0x268] sm:$0xff]  ;;  %v10606_v27 = vld [vmem:[#allocation2 + $0x52] sm:$0xff] }
 0x21f   :  { %8289 = vmatprep.subr.bf16.mxu0 %v15419_v2  ;;  %v8296_v4 = vpack.c.bf16 %v1036_v13, %v1035_v52  ;;  %v1043_v13 = vld [vmem:[#allocation7 + $0x2a0] sm:$0xff] }
 0x221   :  { %1573 = vmatmul.mubr.f32.gmra.mrb[8].mxu0 %v10591_v43 }
 0x222   :  { %1577 = vmatprep.mubr.f32.mxu0 %v10273_v25  ;;  %8291 = vmatpush1.bf16.msra.mxu0 %v8290_v26  ;;  %v1038_v25 = vld [vmem:[#allocation7 + $0x278] sm:$0xff]  ;;  %v10611_v26 = vld [vmem:[#allocation2 + $0x62] sm:$0xff] }
 0x223   :  { %8292 = vmatprep.subr.bf16.mxu0 %v15419_v2  ;;  %v8299_v19 = vpack.c.bf16 %v1038_v25, %v1037_v29  ;;  %v1045_v25 = vld [vmem:[#allocation7 + $0x2b0] sm:$0xff] }
 0x225   :  { %1578 = vmatmul.mubr.f32.gmra.mrb[10].mxu0 %v10596_v55 }
 0x226   :  { %1582 = vmatprep.mubr.f32.mxu0 %v10281_v38  ;;  %8294 = vmatpush1.bf16.msra.mxu0 %v8293_v16  ;;  %v1040_v38 = vld [vmem:[#allocation7 + $0x288] sm:$0xff] }
 0x227   :  { %8295 = vmatprep.subr.bf16.mxu0 %v15419_v2  ;;  %v8302_v23 = vpack.c.bf16 %v1040_v38, %v1039_v3  ;;  %v10616_v16 = vld [vmem:[#allocation2 + $0x6a] sm:$0xff]  ;;  %v10635_v3 = vld [vmem:[#allocation2 + $0x9a] sm:$0xff] }
 0x228   :  { %v10640_v38 = vld [vmem:[#allocation2 + $0xaa] sm:$0xff] }
 0x229   :  { %1583 = vmatmul.mubr.f32.gmra.mrb[12].mxu0 %v10601_v54 }
 0x22a   :  { %1587 = vmatprep.mubr.f32.mxu0 %v10289_v49  ;;  %8297 = vmatpush1.bf16.msra.mxu0 %v8296_v4  ;;  %v1042_v49 = vld [vmem:[#allocation7 + $0x298] sm:$0xff] }
 0x22b   :  { %8298 = vmatprep.subr.bf16.mxu0 %v15419_v2  ;;  %v8305_v52 = vpack.c.bf16 %v1042_v49, %v1041_v8  ;;  %v10621_v4 = vld [vmem:[#allocation2 + $0x7a] sm:$0xff]  ;;  %v1048_v8 = vld [vmem:[#allocation7 + $0x2c8] sm:$0xff] }
 0x22d   :  { %1588 = vmatmul.mubr.f32.gmra.mrb[14].mxu0 %v10606_v27 }
 0x22e   :  { %1592 = vmatprep.mubr.f32.mxu0 %v10297_v58  ;;  %8300 = vmatpush1.bf16.msra.mxu0 %v8299_v19  ;;  %v1044_v58 = vld [vmem:[#allocation7 + $0x2a8] sm:$0xff]  ;;  %v1046_v19 = vld [vmem:[#allocation7 + $0x2b8] sm:$0xff] }
 0x22f   :  { %8301 = vmatprep.subr.bf16.mxu0 %v15419_v2  ;;  %v8308_v29 = vpack.c.bf16 %v1044_v58, %v1043_v13  ;;  %v1050_v13 = vld [vmem:[#allocation7 + $0x2d8] sm:$0xff] }
 0x231   :  { %1593 = vmatmul.mubr.f32.gmra.mrb[16].mxu0 %v10611_v26 }
 0x232   :  { %1597 = vmatprep.mubr.f32.mxu0 %v10305_v61  ;;  %8303 = vmatpush1.bf16.msra.mxu0 %v8302_v23  ;;  %v10626_v61 = vld [vmem:[#allocation2 + $0x82] sm:$0xff] }
 0x233   :  { %8304 = vmatprep.subr.bf16.mxu0 %v15419_v2  ;;  %v1047_v23 = vld [vmem:[#allocation7 + $0x2c0] sm:$0xff] }
 0x234   :  { %v8314_v49 = vpack.c.bf16 %v1048_v8, %v1047_v23  ;;  %v10691_v23 = vld [vmem:[#allocation2 + $0x13a] sm:$0xff]  ;;  %v10699_v8 = vld [vmem:[#allocation2 + $0x152] sm:$0xff] }
 0x235   :  { %1598 = vmatmul.mubr.f32.gmra.mrb[18].mxu0 %v10616_v16 }
 0x236   :  { %1602 = vmatprep.mubr.f32.mxu0 %v10313_v62  ;;  %8306 = vmatpush1.bf16.msra.mxu0 %v8305_v52  ;;  %v10631_v62 = vld [vmem:[#allocation2 + $0x92] sm:$0xff] }
 0x237   :  { %8307 = vmatprep.subr.bf16.mxu0 %v15419_v2  ;;  %v1049_v52 = vld [vmem:[#allocation7 + $0x2d0] sm:$0xff] }
 0x238   :  { %v8317_v58 = vpack.c.bf16 %v1050_v13, %v1049_v52  ;;  %v1053_v52 = vld [vmem:[#allocation7 + $0x2f0] sm:$0xff]  ;;  %v1054_v13 = vld [vmem:[#allocation7 + $0x2f8] sm:$0xff] }
 0x239   :  { %1603 = vmatmul.mubr.f32.gmra.mrb[20].mxu0 %v10621_v4 }
 0x23a   :  { %1607 = vmatprep.mubr.f32.mxu0 %v10320_v5  ;;  %8309 = vmatpush1.bf16.msra.mxu0 %v8308_v29  ;;  %v8311_v5 = vpack.c.bf16 %v1046_v19, %v1045_v25  ;;  %v1051_v29 = vld [vmem:[#allocation7 + $0x2e0] sm:$0xff]  ;;  %v1052_v25 = vld [vmem:[#allocation7 + $0x2e8] sm:$0xff] }
 0x23b   :  { %8310 = vmatprep.subr.bf16.mxu0 %v15419_v2  ;;  %v15428_v19 = vld [vmem:[#allocation26_spill] sm:$0xff] }
 0x23d   :  { %1608 = vmatmul.mubr.f32.gmra.mrb[22].mxu0 %v10626_v61 }
 0x23e   :  { %1612 = vmatprep.mubr.f32.mxu0 %v10328_v30  ;;  %8312 = vmatpush1.bf16.msra.mxu0 %v8311_v5  ;;  %v10644_v30 = vld [vmem:[#allocation2 + $0xb2] sm:$0xff]  ;;  %v8320_v5 = vpack.c.bf16 %v1052_v25, %v1051_v29  ;;  %v604_v29 = vld [vmem:[#allocation2 + $0x180] sm:$0xff] }
 0x23f   :  { %8313 = vmatprep.subr.bf16.mxu0 %v15419_v2  ;;  %v10708_v25 = vld [vmem:[#allocation4 + $0x1f8] sm:$0xff] }
 0x240   :  { %381 = vst [vmem:[#allocation2 + $0x339] sm:$0xff] %v10708_v25 }
 0x241   :  { %1613 = vmatmul.mubr.f32.gmra.mrb[24].mxu0 %v10631_v62 }
 0x242   :  { %1617 = vmatprep.mubr.f32.mxu0 %v10335_v31  ;;  %v10648_v31 = vld [vmem:[#allocation2 + $0xc2] sm:$0xff]  ;;  %8315 = vmatpush1.bf16.msra.mxu0 %v8314_v49  ;;  %v10701_v49 = vld [vmem:[#allocation4 + $0x1f0] sm:$0xff] }
 0x243   :  { %8316 = vmatprep.subr.bf16.mxu0 %v15419_v2  ;;  %15430 = vst [vmem:[#allocation26_spill] sm:$0xff] %v10701_v49  ;;  %380 = vst [vmem:[#allocation2 + $0x331] sm:$0xff] %v10701_v49  ;;  %v10833_v49 = vld [vmem:[#allocation2 + $0x31a] sm:$0xff] }
 0x244   :  { %15444 = vst [vmem:[#allocation36_spill] sm:$0xff] %v10833_v49 }
 0x245   :  { %1618 = vmatmul.mubr.f32.gmra.mrb[26].mxu0 %v10635_v3 }
 0x246   :  { %1622 = vmatprep.mubr.f32.mxu0 %v10342_v32  ;;  %v10652_v32 = vld [vmem:[#allocation2 + $0xca] sm:$0xff]  ;;  %8318 = vmatpush1.bf16.msra.mxu0 %v8317_v58  ;;  %v10706_v58 = vld [vmem:[#allocation2 + $0x15a] sm:$0xff] }
 0x247   :  { %8319 = vmatprep.subr.bf16.mxu0 %v15419_v2 }
 0x249   :  { %1623 = vmatmul.mubr.f32.gmra.mrb[28].mxu0 %v10640_v38 }
 0x24a   :  { %1627 = vmatprep.mubr.f32.mxu0 %v10349_v33  ;;  %v10657_v33 = vld [vmem:[#allocation2 + $0xda] sm:$0xff]  ;;  %8321 = vmatpush1.bf16.msra.mxu0 %v8320_v5  ;;  %v542_v5 = vld [vmem:[#allocation2 + $0x1b2] sm:$0xff] }
 0x24b   :  { %8322 = vmatprep.subr.bf16.mxu0 %v15419_v2 }
 0x24d   :  { %1628 = vmatmul.mubr.f32.gmra.mrb[30].mxu0 %v10644_v30 }
 0x24e   :  { %1632 = vmatprep.mubr.f32.mxu0 %v10357_v34  ;;  %v10661_v34 = vld [vmem:[#allocation2 + $0xe2] sm:$0xff] }
 0x251   :  { %1633 = vmatmul.mubr.f32.gmra.mrb[32].mxu0 %v10648_v31 }
 0x252   :  { %1637 = vmatprep.mubr.f32.mxu0 %v10364_v36  ;;  %v10665_v36 = vld [vmem:[#allocation2 + $0xf2] sm:$0xff] }
 0x255   :  { %1638 = vmatmul.mubr.f32.gmra.mrb[34].mxu0 %v10652_v32 }
 0x256   :  { %1642 = vmatprep.mubr.f32.mxu0 %v10371_v39  ;;  %v10669_v39 = vld [vmem:[#allocation2 + $0xfa] sm:$0xff] }
 0x259   :  { %1643 = vmatmul.mubr.f32.gmra.mrb[36].mxu0 %v10657_v33 }
 0x25a   :  { %1647 = vmatprep.mubr.f32.mxu0 %v10378_v40  ;;  %v10674_v40 = vld [vmem:[#allocation2 + $0x10a] sm:$0xff] }
 0x25d   :  { %1648 = vmatmul.mubr.f32.gmra.mrb[38].mxu0 %v10661_v34 }
 0x25e   :  { %1652 = vmatprep.mubr.f32.mxu0 %v10386_v42  ;;  %v10678_v42 = vld [vmem:[#allocation2 + $0x112] sm:$0xff] }
 0x261   :  { %1653 = vmatmul.mubr.f32.gmra.mrb[40].mxu0 %v10665_v36 }
 0x262   :  { %1657 = vmatprep.mubr.f32.mxu0 %v10393_v45  ;;  %v10682_v45 = vld [vmem:[#allocation2 + $0x122] sm:$0xff] }
 0x265   :  { %1658 = vmatmul.mubr.f32.gmra.mrb[42].mxu0 %v10669_v39 }
 0x266   :  { %1662 = vmatprep.mubr.f32.mxu0 %v10400_v47  ;;  %v10686_v47 = vld [vmem:[#allocation2 + $0x12a] sm:$0xff] }
 0x269   :  { %1663 = vmatmul.mubr.f32.gmra.mrb[44].mxu0 %v10674_v40 }
 0x26a   :  { %1667 = vmatprep.mubr.f32.mxu0 %v10407_v48  ;;  %v15429_v48 = vld [vmem:[#allocation27_spill] sm:$0xff] }
 0x26b   :  { %15431 = vst [vmem:[#allocation27_spill] sm:$0xff] %v10708_v25  ;;  %v10830_v25 = vld [vmem:[#allocation2 + $0x30a] sm:$0xff] }
 0x26d   :  { %1668 = vmatmul.mubr.f32.gmra.mrb[46].mxu0 %v10678_v42 }
 0x26e   :  { %1672 = vmatprep.mubr.f32.mxu0 %v10415_v51  ;;  %v10695_v51 = vld [vmem:[#allocation2 + $0x142] sm:$0xff] }
 0x271   :  { %1673 = vmatmul.mubr.f32.gmra.mrb[48].mxu0 %v10682_v45 }
 0x272   :  { %1677 = vmatprep.mubr.f32.mxu0 %v15428_v19  ;;  %v605_v19 = vld [vmem:[#allocation2 + $0x188] sm:$0xff] }
 0x275   :  { %1678 = vmatmul.mubr.f32.gmra.mrb[50].mxu0 %v10686_v47 }
 0x276   :  { %1682 = vmatprep.mubr.f32.mxu0 %v15429_v48  ;;  %v543_v48 = vld [vmem:[#allocation2 + $0x1ba] sm:$0xff] }
 0x279   :  { %1683 = vmatmul.mubr.f32.gmra.mrb[52].mxu0 %v10691_v23 }
 0x27a   :  { %1687 = vmatprep.mubr.f32.mxu0 %v10436_v60  ;;  %v8323_v60 = vpack.c.bf16 %v1054_v13, %v1053_v52  ;;  %v10722_v52 = vld [vmem:[#allocation2 + $0x1ca] sm:$0xff]  ;;  %v10726_v13 = vld [vmem:[#allocation2 + $0x1d2] sm:$0xff] }
 0x27c   :  { %8324 = vmatpush1.bf16.msra.mxu0 %v8323_v60  ;;  %v10810_v60 = vld [vmem:[#allocation2 + $0x2d2] sm:$0xff] }
 0x27d   :  { %1688 = vmatmul.mubr.f32.gmra.mrb[54].mxu0 %v10695_v51  ;;  %8325 = vmatprep.subr.bf16.mxu0 %v15419_v2 }
 0x27e   :  { %1692 = vmatprep.mubr.f32.mxu0 %v10444_v56  ;;  %v10713_v56 = vld [vmem:[#allocation2 + $0x16a] sm:$0xff] }
 0x281   :  { %1693 = vmatmul.mubr.f32.gmra.mrb[56].mxu0 %v10699_v8 }
 0x282   :  { %1697 = vmatprep.mubr.f32.mxu0 %v10448_v6  ;;  %v10716_v6 = vld [vmem:[#allocation2 + $0x172] sm:$0xff] }
 0x285   :  { %1698 = vmatmul.mubr.f32.gmra.mrb[58].mxu0 %v10706_v58 }
 0x286   :  { %1702 = vmatprep.mubr.f32.mxu0 %v604_v29  ;;  %v10814_v29 = vld [vmem:[#allocation2 + $0x2da] sm:$0xff] }
 0x289   :  { %1703 = vmatmul.mubr.f32.gmra.mrb[60].mxu0 %v10713_v56 }
 0x28a   :  { %1707 = vmatprep.mubr.f32.mxu0 %v605_v19  ;;  %v10818_v19 = vld [vmem:[#allocation2 + $0x2ea] sm:$0xff] }
 0x28d   :  { %1708 = vmatmul.mubr.f32.gmra.mrb[62].mxu0 %v10716_v6 }
 0x28e   :  { %1712 = vmatprep.mubr.f32.mxu0 %v10452_v10  ;;  %v10730_v10 = vld [vmem:[#allocation2 + $0x1e2] sm:$0xff] }
 0x291   :  { %1713 = vmatmul.mubr.f32.gmra.mrb[64].mxu0 %v542_v5  ;;  %v10822_v5 = vld [vmem:[#allocation2 + $0x2f2] sm:$0xff] }
 0x292   :  { %1717 = vmatprep.mubr.f32.mxu0 %v10456_v14  ;;  %v10734_v14 = vld [vmem:[#allocation2 + $0x1ea] sm:$0xff] }
 0x295   :  { %1718 = vmatmul.mubr.f32.gmra.mrb[66].mxu0 %v543_v48  ;;  %v15440_v48 = vld [vmem:[#allocation34_spill] sm:$0xff] }
 0x296   :  { %1722 = vmatprep.mubr.f32.mxu0 %v10460_v21  ;;  %v10738_v21 = vld [vmem:[#allocation2 + $0x1fa] sm:$0xff] }
 0x299   :  { %1723 = vmatmul.mubr.f32.gmra.mrb[68].mxu0 %v10722_v52 }
 0x29a   :  { %1727 = vmatprep.mubr.f32.mxu0 %v10464_v0  ;;  %v10742_v0 = vld [vmem:[#allocation2 + $0x202] sm:$0xff] }
 0x29d   :  { %1728 = vmatmul.mubr.f32.gmra.mrb[70].mxu0 %v10726_v13 }
 0x29e   :  { %1732 = vmatprep.mubr.f32.mxu0 %v10468_v44  ;;  %v10746_v44 = vld [vmem:[#allocation2 + $0x212] sm:$0xff] }
 0x2a1   :  { %1733 = vmatmul.mubr.f32.gmra.mrb[72].mxu0 %v10730_v10 }
 0x2a2   :  { %1737 = vmatprep.mubr.f32.mxu0 %v10472_v53  ;;  %v10750_v53 = vld [vmem:[#allocation2 + $0x21a] sm:$0xff] }
 0x2a5   :  { %1738 = vmatmul.mubr.f32.gmra.mrb[74].mxu0 %v10734_v14 }
 0x2a6   :  { %1742 = vmatprep.mubr.f32.mxu0 %v10476_v59  ;;  %v10754_v59 = vld [vmem:[#allocation2 + $0x22a] sm:$0xff] }
 0x2a9   :  { %1743 = vmatmul.mubr.f32.gmra.mrb[76].mxu0 %v10738_v21 }
 0x2aa   :  { %1747 = vmatprep.mubr.f32.mxu0 %v10480_v63  ;;  %v10758_v63 = vld [vmem:[#allocation2 + $0x232] sm:$0xff] }
 0x2ad   :  { %1748 = vmatmul.mubr.f32.gmra.mrb[78].mxu0 %v10742_v0 }
 0x2ae   :  { %1752 = vmatprep.mubr.f32.mxu0 %v10484_v7  ;;  %v10762_v7 = vld [vmem:[#allocation2 + $0x242] sm:$0xff] }
 0x2b1   :  { %1753 = vmatmul.mubr.f32.gmra.mrb[80].mxu0 %v10746_v44 }
 0x2b2   :  { %1757 = vmatprep.mubr.f32.mxu0 %v10488_v12  ;;  %v10766_v12 = vld [vmem:[#allocation2 + $0x24a] sm:$0xff] }
 0x2b5   :  { %1758 = vmatmul.mubr.f32.gmra.mrb[82].mxu0 %v10750_v53 }
 0x2b6   :  { %1762 = vmatprep.mubr.f32.mxu0 %v10492_v24  ;;  %v10770_v24 = vld [vmem:[#allocation2 + $0x25a] sm:$0xff] }
 0x2b9   :  { %1763 = vmatmul.mubr.f32.gmra.mrb[84].mxu0 %v10754_v59 }
 0x2ba   :  { %1767 = vmatprep.mubr.f32.mxu0 %v10496_v37  ;;  %v10774_v37 = vld [vmem:[#allocation2 + $0x262] sm:$0xff] }
 0x2bd   :  { %1768 = vmatmul.mubr.f32.gmra.mrb[86].mxu0 %v10758_v63 }
 0x2be   :  { %1772 = vmatprep.mubr.f32.mxu0 %v10500_v46  ;;  %v10778_v46 = vld [vmem:[#allocation2 + $0x272] sm:$0xff] }
 0x2c1   :  { %1773 = vmatmul.mubr.f32.gmra.mrb[88].mxu0 %v10762_v7 }
 0x2c2   :  { %1777 = vmatprep.mubr.f32.mxu0 %v10504_v57  ;;  %v10782_v57 = vld [vmem:[#allocation2 + $0x27a] sm:$0xff] }
 0x2c5   :  { %1778 = vmatmul.mubr.f32.gmra.mrb[90].mxu0 %v10766_v12 }
 0x2c6   :  { %1782 = vmatprep.mubr.f32.mxu0 %v10508_v17  ;;  %v10786_v17 = vld [vmem:[#allocation2 + $0x28a] sm:$0xff] }
 0x2c9   :  { %1783 = vmatmul.mubr.f32.gmra.mrb[92].mxu0 %v10770_v24 }
 0x2ca   :  { %1787 = vmatprep.mubr.f32.mxu0 %v10512_v28  ;;  %v10790_v28 = vld [vmem:[#allocation2 + $0x292] sm:$0xff] }
 0x2cd   :  { %1788 = vmatmul.mubr.f32.gmra.mrb[94].mxu0 %v10774_v37 }
 0x2ce   :  { %1792 = vmatprep.mubr.f32.mxu0 %v10516_v18  ;;  %v10794_v18 = vld [vmem:[#allocation2 + $0x2a2] sm:$0xff] }
 0x2d1   :  { %1793 = vmatmul.mubr.f32.gmra.mrb[96].mxu0 %v10778_v46 }
 0x2d2   :  { %1797 = vmatprep.mubr.f32.mxu0 %v10520_v9  ;;  %v10798_v9 = vld [vmem:[#allocation2 + $0x2aa] sm:$0xff] }
 0x2d5   :  { %1798 = vmatmul.mubr.f32.gmra.mrb[98].mxu0 %v10782_v57 }
 0x2d6   :  { %1802 = vmatprep.mubr.f32.mxu0 %v10524_v11  ;;  %v10802_v11 = vld [vmem:[#allocation2 + $0x2ba] sm:$0xff] }
 0x2d9   :  { %1803 = vmatmul.mubr.f32.gmra.mrb[100].mxu0 %v10786_v17 }
 0x2da   :  { %1807 = vmatprep.mubr.f32.mxu0 %v10528_v20  ;;  %v10806_v20 = vld [vmem:[#allocation2 + $0x2c2] sm:$0xff] }
 0x2dd   :  { %1808 = vmatmul.mubr.f32.gmra.mrb[102].mxu0 %v10790_v28 }
 0x2de   :  { %1812 = vmatprep.mubr.f32.mxu0 %v10532_v15  ;;  %v15432_v15 = vld [vmem:[#allocation28_spill] sm:$0xff] }
 0x2df   :  { %15433 = vst [vmem:[#allocation28_spill] sm:$0xff] %v10810_v60 }
 0x2e1   :  { %1813 = vmatmul.mubr.f32.gmra.mrb[104].mxu0 %v10794_v18 }
 0x2e2   :  { %1817 = vmatprep.mubr.f32.mxu0 %v10536_v35  ;;  %v15434_v35 = vld [vmem:[#allocation29_spill] sm:$0xff] }
 0x2e3   :  { %15435 = vst [vmem:[#allocation29_spill] sm:$0xff] %v10814_v29 }
 0x2e5   :  { %1818 = vmatmul.mubr.f32.gmra.mrb[106].mxu0 %v10798_v9 }
 0x2e6   :  { %1822 = vmatprep.mubr.f32.mxu0 %v10540_v22  ;;  %v15436_v22 = vld [vmem:[#allocation30_spill] sm:$0xff] }
 0x2e7   :  { %15437 = vst [vmem:[#allocation30_spill] sm:$0xff] %v10818_v19 }
 0x2e9   :  { %1823 = vmatmul.mubr.f32.gmra.mrb[108].mxu0 %v10802_v11 }
 0x2ea   :  { %1827 = vmatprep.mubr.f32.mxu0 %v10544_v41  ;;  %v15438_v41 = vld [vmem:[#allocation32_spill] sm:$0xff] }
 0x2eb   :  { %15439 = vst [vmem:[#allocation32_spill] sm:$0xff] %v10822_v5 }
 0x2ed   :  { %1828 = vmatmul.mubr.f32.gmra.mrb[110].mxu0 %v10806_v20 }
 0x2ee   :  { %1832 = vmatprep.mubr.f32.mxu0 %v15432_v15  ;;  %v10826_v15 = vld [vmem:[#allocation2 + $0x302] sm:$0xff] }
 0x2ef   :  { %15441 = vst [vmem:[#allocation34_spill] sm:$0xff] %v10826_v15 }
 0x2f1   :  { %1833 = vmatmul.mubr.f32.gmra.mrb[112].mxu0 %v10810_v60  ;;  %v1058_v60 = vld [vmem:[#allocation7 + $0x318] sm:$0xff] }
 0x2f2   :  { %1837 = vmatprep.mubr.f32.mxu0 %v15434_v35  ;;  %v15442_v35 = vld [vmem:[#allocation35_spill] sm:$0xff] }
 0x2f3   :  { %15443 = vst [vmem:[#allocation35_spill] sm:$0xff] %v10830_v25 }
 0x2f5   :  { %1838 = vmatmul.mubr.f32.gmra.mrb[114].mxu0 %v10814_v29  ;;  %v1057_v29 = vld [vmem:[#allocation7 + $0x310] sm:$0xff] }
 0x2f6   :  { %1842 = vmatprep.mubr.f32.mxu0 %v15436_v22  ;;  %v636_v22 = vld [vmem:[#allocation2 + $0x330] sm:$0xff] }
 0x2f9   :  { %1843 = vmatmul.mubr.f32.gmra.mrb[116].mxu0 %v10818_v19  ;;  %v1056_v19 = vld [vmem:[#allocation7 + $0x308] sm:$0xff] }
 0x2fa   :  { %1847 = vmatprep.mubr.f32.mxu0 %v15438_v41  ;;  %v637_v41 = vld [vmem:[#allocation2 + $0x338] sm:$0xff] }
 0x2fd   :  { %1848 = vmatmul.mubr.f32.gmra.mrb[118].mxu0 %v10822_v5  ;;  %v10836_v5 = vld [vmem:[#allocation2 + $0x322] sm:$0xff] }
 0x2fe   :  { %1852 = vmatprep.mubr.f32.mxu0 %v15440_v48  ;;  %15445 = vst [vmem:[#allocation37_spill] sm:$0xff] %v10836_v5  ;;  %v1055_v48 = vld [vmem:[#allocation7 + $0x300] sm:$0xff] }
 0x301   :  { %1853 = vmatmul.mubr.f32.gmra.mrb[120].mxu0 %v10826_v15  ;;  %v8326_v15 = vpack.c.bf16 %v1056_v19, %v1055_v48  ;;  %v1061_v19 = vld [vmem:[#allocation7 + $0x330] sm:$0xff]  ;;  %v1062_v48 = vld [vmem:[#allocation7 + $0x338] sm:$0xff] }
 0x302   :  { %1857 = vmatprep.mubr.f32.mxu0 %v15442_v35  ;;  %v638_v35 = vld [vmem:[#allocation2 + $0x19] sm:$0xff] }
 0x305   :  { %1858 = vmatmul.mubr.f32.gmra.mrb[122].mxu0 %v10830_v25  ;;  %v8329_v25 = vpack.c.bf16 %v1058_v60, %v1057_v29  ;;  %v8335_v60 = vpack.c.bf16 %v1062_v48, %v1061_v19  ;;  %v1063_v29 = vld [vmem:[#allocation7 + $0x340] sm:$0xff]  ;;  %v1069_v48 = vld [vmem:[#allocation7 + $0x370] sm:$0xff] }
 0x306   :  { %1862 = vmatprep.mubr.f32.mxu0 %v636_v22  ;;  %v639_v22 = vld [vmem:[#allocation2 + $0x21] sm:$0xff] }
 0x309   :  { %1863 = vmatmul.mubr.f32.gmra.mrb[124].mxu0 %v10833_v49  ;;  %v1060_v49 = vld [vmem:[#allocation7 + $0x328] sm:$0xff] }
 0x30a   :  { %1867 = vmatprep.mubr.f32.mxu0 %v637_v41  ;;  %v1059_v41 = vld [vmem:[#allocation7 + $0x320] sm:$0xff] }
 0x30d   :  { %1868 = vmatmul.mubr.f32.gmra.mrb[126].mxu0 %v10836_v5  ;;  %v10843_v5 = vld [vmem:[#allocation2 + $0x31] sm:$0xff] }
 0x30e   :  { %1937 = vmatprep.mubr.f32.mxu0 %v10581_v50  ;;  %v8332_v50 = vpack.c.bf16 %v1060_v49, %v1059_v41  ;;  %v10853_v49 = vld [vmem:[#allocation2 + $0x49] sm:$0xff]  ;;  %v1067_v41 = vld [vmem:[#allocation7 + $0x360] sm:$0xff] }
 0x311   :  { %1938 = vmatmul.mubr.f32.vlgmr.msra.gmra.mrb[0].mxu0 %v638_v35  ;;  %v10858_v35 = vld [vmem:[#allocation2 + $0x51] sm:$0xff] }
 0x312   :  { %8327 = vmatpush1.bf16.msra.mxu0 %v8326_v15  ;;  %1942 = vmatprep.mubr.f32.mxu0 %v10586_v1  ;;  %v10848_v1 = vld [vmem:[#allocation2 + $0x39] sm:$0xff]  ;;  %v1065_v15 = vld [vmem:[#allocation7 + $0x350] sm:$0xff] }
 0x313   :  { %8328 = vmatprep.subr.bf16.mxu0 %v15419_v2 }
 0x315   :  { %1943 = vmatmul.mubr.f32.gmra.mrb[2].mxu0 %v639_v22 }
 0x316   :  { %1947 = vmatprep.mubr.f32.mxu0 %v10591_v43  ;;  %8330 = vmatpush1.bf16.msra.mxu0 %v8329_v25  ;;  %v1064_v43 = vld [vmem:[#allocation7 + $0x348] sm:$0xff] }
 0x317   :  { %8331 = vmatprep.subr.bf16.mxu0 %v15419_v2  ;;  %v8338_v25 = vpack.c.bf16 %v1064_v43, %v1063_v29  ;;  %v1071_v43 = vld [vmem:[#allocation7 + $0x380] sm:$0xff] }
 0x319   :  { %1948 = vmatmul.mubr.f32.gmra.mrb[4].mxu0 %v10843_v5 }
 0x31a   :  { %1952 = vmatprep.mubr.f32.mxu0 %v10596_v55  ;;  %8333 = vmatpush1.bf16.msra.mxu0 %v8332_v50  ;;  %v1066_v55 = vld [vmem:[#allocation7 + $0x358] sm:$0xff]  ;;  %v10863_v50 = vld [vmem:[#allocation2 + $0x61] sm:$0xff] }
 0x31b   :  { %8334 = vmatprep.subr.bf16.mxu0 %v15419_v2  ;;  %v8341_v22 = vpack.c.bf16 %v1066_v55, %v1065_v15  ;;  %v1073_v55 = vld [vmem:[#allocation7 + $0x390] sm:$0xff] }
 0x31d   :  { %1953 = vmatmul.mubr.f32.gmra.mrb[6].mxu0 %v10848_v1 }
 0x31e   :  { %1957 = vmatprep.mubr.f32.mxu0 %v10601_v54  ;;  %8336 = vmatpush1.bf16.msra.mxu0 %v8335_v60  ;;  %v1068_v54 = vld [vmem:[#allocation7 + $0x368] sm:$0xff] }
 0x31f   :  { %8337 = vmatprep.subr.bf16.mxu0 %v15419_v2  ;;  %v8344_v19 = vpack.c.bf16 %v1068_v54, %v1067_v41  ;;  %v10868_v60 = vld [vmem:[#allocation2 + $0x69] sm:$0xff]  ;;  %v1075_v54 = vld [vmem:[#allocation7 + $0x3a0] sm:$0xff] }
 0x321   :  { %1958 = vmatmul.mubr.f32.gmra.mrb[8].mxu0 %v10853_v49 }
 0x322   :  { %1962 = vmatprep.mubr.f32.mxu0 %v10606_v27  ;;  %8339 = vmatpush1.bf16.msra.mxu0 %v8338_v25  ;;  %v1070_v27 = vld [vmem:[#allocation7 + $0x378] sm:$0xff] }
 0x323   :  { %8340 = vmatprep.subr.bf16.mxu0 %v15419_v2  ;;  %v8347_v29 = vpack.c.bf16 %v1070_v27, %v1069_v48  ;;  %v10873_v25 = vld [vmem:[#allocation2 + $0x79] sm:$0xff]  ;;  %v1077_v27 = vld [vmem:[#allocation7 + $0x3b0] sm:$0xff] }
 0x325   :  { %1963 = vmatmul.mubr.f32.gmra.mrb[10].mxu0 %v10858_v35 }
 0x326   :  { %1967 = vmatprep.mubr.f32.mxu0 %v10611_v26  ;;  %8342 = vmatpush1.bf16.msra.mxu0 %v8341_v22  ;;  %v1072_v26 = vld [vmem:[#allocation7 + $0x388] sm:$0xff] }
 0x327   :  { %8343 = vmatprep.subr.bf16.mxu0 %v15419_v2  ;;  %v8350_v15 = vpack.c.bf16 %v1072_v26, %v1071_v43  ;;  %v10878_v22 = vld [vmem:[#allocation2 + $0x81] sm:$0xff]  ;;  %v10897_v43 = vld [vmem:[#allocation2 + $0xb1] sm:$0xff] }
 0x328   :  { %v10902_v26 = vld [vmem:[#allocation2 + $0xc1] sm:$0xff] }
 0x329   :  { %1968 = vmatmul.mubr.f32.gmra.mrb[12].mxu0 %v10863_v50 }
 0x32a   :  { %1972 = vmatprep.mubr.f32.mxu0 %v10616_v16  ;;  %8345 = vmatpush1.bf16.msra.mxu0 %v8344_v19  ;;  %v1074_v16 = vld [vmem:[#allocation7 + $0x398] sm:$0xff] }
 0x32b   :  { %8346 = vmatprep.subr.bf16.mxu0 %v15419_v2  ;;  %v8353_v41 = vpack.c.bf16 %v1074_v16, %v1073_v55  ;;  %v10883_v19 = vld [vmem:[#allocation2 + $0x91] sm:$0xff]  ;;  %v1080_v55 = vld [vmem:[#allocation7 + $0x3c8] sm:$0xff] }
 0x32d   :  { %1973 = vmatmul.mubr.f32.gmra.mrb[14].mxu0 %v10868_v60 }
 0x32e   :  { %1977 = vmatprep.mubr.f32.mxu0 %v10621_v4  ;;  %8348 = vmatpush1.bf16.msra.mxu0 %v8347_v29  ;;  %v1076_v4 = vld [vmem:[#allocation7 + $0x3a8] sm:$0xff]  ;;  %v1078_v29 = vld [vmem:[#allocation7 + $0x3b8] sm:$0xff] }
 0x32f   :  { %8349 = vmatprep.subr.bf16.mxu0 %v15419_v2  ;;  %v8356_v48 = vpack.c.bf16 %v1076_v4, %v1075_v54  ;;  %v1082_v54 = vld [vmem:[#allocation7 + $0x3d8] sm:$0xff] }
 0x331   :  { %1978 = vmatmul.mubr.f32.gmra.mrb[16].mxu0 %v10873_v25 }
 0x332   :  { %1982 = vmatprep.mubr.f32.mxu0 %v10626_v61  ;;  %8351 = vmatpush1.bf16.msra.mxu0 %v8350_v15  ;;  %v10888_v61 = vld [vmem:[#allocation2 + $0x99] sm:$0xff] }
 0x333   :  { %8352 = vmatprep.subr.bf16.mxu0 %v15419_v2  ;;  %v1079_v15 = vld [vmem:[#allocation7 + $0x3c0] sm:$0xff] }
 0x334   :  { %v8362_v16 = vpack.c.bf16 %v1080_v55, %v1079_v15  ;;  %v1086_v15 = vld [vmem:[#allocation7 + $0x3f8] sm:$0xff] }
 0x335   :  { %1983 = vmatmul.mubr.f32.gmra.mrb[18].mxu0 %v10878_v22 }
 0x336   :  { %1987 = vmatprep.mubr.f32.mxu0 %v10631_v62  ;;  %8354 = vmatpush1.bf16.msra.mxu0 %v8353_v41  ;;  %v10893_v62 = vld [vmem:[#allocation2 + $0xa9] sm:$0xff] }
 0x337   :  { %8355 = vmatprep.subr.bf16.mxu0 %v15419_v2  ;;  %v1081_v41 = vld [vmem:[#allocation7 + $0x3d0] sm:$0xff] }
 0x338   :  { %v8365_v4 = vpack.c.bf16 %v1082_v54, %v1081_v41  ;;  %v15447_v41 = vld [vmem:[#allocation33_spill] sm:$0xff] }
 0x339   :  { %1988 = vmatmul.mubr.f32.gmra.mrb[20].mxu0 %v10883_v19  ;;  %v1087_v54 = vld [vmem:[#allocation7 + $0x400] sm:$0xff] }
 0x33a   :  { %1992 = vmatprep.mubr.f32.mxu0 %v10635_v3  ;;  %8357 = vmatpush1.bf16.msra.mxu0 %v8356_v48  ;;  %v8359_v3 = vpack.c.bf16 %v1078_v29, %v1077_v27  ;;  %v1083_v48 = vld [vmem:[#allocation7 + $0x3e0] sm:$0xff]  ;;  %v1084_v27 = vld [vmem:[#allocation7 + $0x3e8] sm:$0xff] }
 0x33b   :  { %8358 = vmatprep.subr.bf16.mxu0 %v15419_v2  ;;  %v8368_v29 = vpack.c.bf16 %v1084_v27, %v1083_v48  ;;  %v671_v48 = vld [vmem:[#allocation2 + $0x1d1] sm:$0xff] }
 0x33d   :  { %1993 = vmatmul.mubr.f32.gmra.mrb[22].mxu0 %v10888_v61 }
 0x33e   :  { %1997 = vmatprep.mubr.f32.mxu0 %v10640_v38  ;;  %8360 = vmatpush1.bf16.msra.mxu0 %v8359_v3  ;;  %v10906_v38 = vld [vmem:[#allocation2 + $0xc9] sm:$0xff] }
 0x33f   :  { %8361 = vmatprep.subr.bf16.mxu0 %v15419_v2  ;;  %v1085_v3 = vld [vmem:[#allocation7 + $0x3f0] sm:$0xff] }
 0x340   :  { %v8371_v55 = vpack.c.bf16 %v1086_v15, %v1085_v3  ;;  %v10996_v3 = vld [vmem:[#allocation2 + $0x201] sm:$0xff]  ;;  %v1090_v15 = vld [vmem:[#allocation7 + $0x418] sm:$0xff] }
 0x341   :  { %1998 = vmatmul.mubr.f32.gmra.mrb[24].mxu0 %v10893_v62 }
 0x342   :  { %2002 = vmatprep.mubr.f32.mxu0 %v10644_v30  ;;  %v10910_v30 = vld [vmem:[#allocation2 + $0xd9] sm:$0xff]  ;;  %8363 = vmatpush1.bf16.msra.mxu0 %v8362_v16  ;;  %v10967_v16 = vld [vmem:[#allocation2 + $0x182] sm:$0xff] }
 0x343   :  { %8364 = vmatprep.subr.bf16.mxu0 %v15419_v2 }
 0x345   :  { %2003 = vmatmul.mubr.f32.gmra.mrb[26].mxu0 %v10897_v43 }
 0x346   :  { %2007 = vmatprep.mubr.f32.mxu0 %v10648_v31  ;;  %v10914_v31 = vld [vmem:[#allocation2 + $0xe1] sm:$0xff]  ;;  %8366 = vmatpush1.bf16.msra.mxu0 %v8365_v4 }
 0x347   :  { %8367 = vmatprep.subr.bf16.mxu0 %v15419_v2  ;;  %v1088_v4 = vld [vmem:[#allocation7 + $0x408] sm:$0xff] }
 0x348   :  { %v10978_v27 = vpack.c.bf16 %v1088_v4, %v1087_v54  ;;  %v1094_v54 = vld [vmem:[#allocation7 + $0x438] sm:$0xff] }
 0x349   :  { %2008 = vmatmul.mubr.f32.gmra.mrb[28].mxu0 %v10902_v26 }
 0x34a   :  { %2012 = vmatprep.mubr.f32.mxu0 %v10652_v32  ;;  %v10919_v32 = vld [vmem:[#allocation2 + $0xf1] sm:$0xff]  ;;  %8369 = vmatpush1.bf16.msra.mxu0 %v8368_v29  ;;  %v10984_v29 = vld [vmem:[#allocation2 + $0x1e1] sm:$0xff] }
 0x34b   :  { %8370 = vmatprep.subr.bf16.mxu0 %v15419_v2  ;;  %8661 = vmatprep.subr.bf16.mxu1 %v10978_v27 }
 0x34c   :  { %8669 = vmatpush3.bf16.msra.mxu1 %v10978_v27 }
 0x34d   :  { %2013 = vmatmul.mubr.f32.gmra.mrb[30].mxu0 %v10906_v38 }
 0x34e   :  { %2017 = vmatprep.mubr.f32.mxu0 %v10657_v33  ;;  %v10923_v33 = vld [vmem:[#allocation2 + $0xf9] sm:$0xff]  ;;  %8372 = vmatpush1.bf16.msra.mxu0 %v8371_v55 }
 0x34f   :  { %8374 = vmatprep.subr.bf16.mxu0 %v10978_v27 }
 0x351   :  { %2018 = vmatmul.mubr.f32.gmra.mrb[32].mxu0 %v10910_v30 }
 0x352   :  { %2022 = vmatprep.mubr.f32.mxu0 %v10661_v34  ;;  %v10927_v34 = vld [vmem:[#allocation2 + $0x109] sm:$0xff] }
 0x355   :  { %2023 = vmatmul.mubr.f32.gmra.mrb[34].mxu0 %v10914_v31 }
 0x356   :  { %2027 = vmatprep.mubr.f32.mxu0 %v10665_v36  ;;  %v10931_v36 = vld [vmem:[#allocation2 + $0x111] sm:$0xff] }
 0x359   :  { %2028 = vmatmul.mubr.f32.gmra.mrb[36].mxu0 %v10919_v32 }
 0x35a   :  { %2032 = vmatprep.mubr.f32.mxu0 %v10669_v39  ;;  %v10936_v39 = vld [vmem:[#allocation2 + $0x121] sm:$0xff] }
 0x35d   :  { %2033 = vmatmul.mubr.f32.gmra.mrb[38].mxu0 %v10923_v33 }
 0x35e   :  { %2037 = vmatprep.mubr.f32.mxu0 %v10674_v40  ;;  %v10940_v40 = vld [vmem:[#allocation2 + $0x129] sm:$0xff] }
 0x361   :  { %2038 = vmatmul.mubr.f32.gmra.mrb[40].mxu0 %v10927_v34 }
 0x362   :  { %2042 = vmatprep.mubr.f32.mxu0 %v10678_v42  ;;  %v10944_v42 = vld [vmem:[#allocation2 + $0x139] sm:$0xff] }
 0x365   :  { %2043 = vmatmul.mubr.f32.gmra.mrb[42].mxu0 %v10931_v36 }
 0x366   :  { %2047 = vmatprep.mubr.f32.mxu0 %v10682_v45  ;;  %v10948_v45 = vld [vmem:[#allocation2 + $0x141] sm:$0xff] }
 0x369   :  { %2048 = vmatmul.mubr.f32.gmra.mrb[44].mxu0 %v10936_v39 }
 0x36a   :  { %2052 = vmatprep.mubr.f32.mxu0 %v10686_v47  ;;  %v10953_v47 = vld [vmem:[#allocation2 + $0x151] sm:$0xff] }
 0x36d   :  { %2053 = vmatmul.mubr.f32.gmra.mrb[46].mxu0 %v10940_v40 }
 0x36e   :  { %2057 = vmatprep.mubr.f32.mxu0 %v10691_v23  ;;  %v10957_v23 = vld [vmem:[#allocation2 + $0x159] sm:$0xff] }
 0x371   :  { %2058 = vmatmul.mubr.f32.gmra.mrb[48].mxu0 %v10944_v42 }
 0x372   :  { %2062 = vmatprep.mubr.f32.mxu0 %v10695_v51  ;;  %v10961_v51 = vld [vmem:[#allocation2 + $0x169] sm:$0xff] }
 0x375   :  { %2063 = vmatmul.mubr.f32.gmra.mrb[50].mxu0 %v10948_v45 }
 0x376   :  { %2067 = vmatprep.mubr.f32.mxu0 %v10699_v8  ;;  %v10965_v8 = vld [vmem:[#allocation2 + $0x171] sm:$0xff] }
 0x379   :  { %2068 = vmatmul.mubr.f32.gmra.mrb[52].mxu0 %v10953_v47 }
 0x37a   :  { %2072 = vmatprep.mubr.f32.mxu0 %v10706_v58  ;;  %v10971_v58 = vld [vmem:[#allocation2 + $0x18a] sm:$0xff] }
 0x37d   :  { %2073 = vmatmul.mubr.f32.gmra.mrb[54].mxu0 %v10957_v23 }
 0x37e   :  { %2077 = vmatprep.mubr.f32.mxu0 %v10713_v56  ;;  %v15446_v56 = vld [vmem:[#allocation31_spill] sm:$0xff] }
 0x381   :  { %2078 = vmatmul.mubr.f32.gmra.mrb[56].mxu0 %v10961_v51 }
 0x382   :  { %2082 = vmatprep.mubr.f32.mxu0 %v10716_v6  ;;  %v670_v6 = vld [vmem:[#allocation2 + $0x1c9] sm:$0xff] }
 0x385   :  { %2083 = vmatmul.mubr.f32.gmra.mrb[58].mxu0 %v10965_v8 }
 0x386   :  { %2087 = vmatprep.mubr.f32.mxu0 %v10967_v16 }
 0x389   :  { %2088 = vmatmul.mubr.f32.gmra.mrb[60].mxu0 %v15446_v56  ;;  %v11032_v56 = vld [vmem:[#allocation2 + $0x261] sm:$0xff] }
 0x38a   :  { %2092 = vmatprep.mubr.f32.mxu0 %v10971_v58 }
 0x38d   :  { %2093 = vmatmul.mubr.f32.gmra.mrb[62].mxu0 %v15447_v41  ;;  %v1092_v41 = vld [vmem:[#allocation7 + $0x428] sm:$0xff] }
 0x38e   :  { %2097 = vmatprep.mubr.f32.mxu0 %v10722_v52  ;;  %v10988_v52 = vld [vmem:[#allocation2 + $0x1e9] sm:$0xff] }
 0x391   :  { %2098 = vmatmul.mubr.f32.gmra.mrb[64].mxu0 %v670_v6 }
 0x392   :  { %2102 = vmatprep.mubr.f32.mxu0 %v10726_v13  ;;  %v10992_v13 = vld [vmem:[#allocation2 + $0x1f9] sm:$0xff] }
 0x395   :  { %2103 = vmatmul.mubr.f32.gmra.mrb[66].mxu0 %v671_v48  ;;  %v1095_v48 = vld [vmem:[#allocation7 + $0x440] sm:$0xff] }
 0x396   :  { %2107 = vmatprep.mubr.f32.mxu0 %v10730_v10  ;;  %v11000_v10 = vld [vmem:[#allocation2 + $0x211] sm:$0xff] }
 0x399   :  { %2108 = vmatmul.mubr.f32.gmra.mrb[68].mxu0 %v10984_v29 }
 0x39a   :  { %2112 = vmatprep.mubr.f32.mxu0 %v10734_v14  ;;  %v11004_v14 = vld [vmem:[#allocation2 + $0x219] sm:$0xff] }
 0x39d   :  { %2113 = vmatmul.mubr.f32.gmra.mrb[70].mxu0 %v10988_v52 }
 0x39e   :  { %2117 = vmatprep.mubr.f32.mxu0 %v10738_v21  ;;  %v11008_v21 = vld [vmem:[#allocation2 + $0x229] sm:$0xff] }
 0x3a1   :  { %2118 = vmatmul.mubr.f32.gmra.mrb[72].mxu0 %v10992_v13 }
 0x3a2   :  { %2122 = vmatprep.mubr.f32.mxu0 %v10742_v0  ;;  %v1089_v0 = vld [vmem:[#allocation7 + $0x410] sm:$0xff] }
 0x3a3   :  { %v11014_v55 = vpack.c.bf16 %v1090_v15, %v1089_v0  ;;  %v11068_v0 = vld [vmem:[#allocation2 + $0x2b9] sm:$0xff] }
 0x3a4   :  { %15450 = vst [vmem:[#allocation38_spill] sm:$0xff] %v11068_v0 }
 0x3a5   :  { %2123 = vmatmul.mubr.f32.gmra.mrb[74].mxu0 %v10996_v3  ;;  %8662 = vmatprep.subr.bf16.mxu1 %v11014_v55 }
 0x3a6   :  { %2127 = vmatprep.mubr.f32.mxu0 %v10746_v44  ;;  %v11012_v44 = vld [vmem:[#allocation2 + $0x231] sm:$0xff]  ;;  %8670 = vmatpush3.bf16.msra.mxu1 %v11014_v55 }
 0x3a9   :  { %2128 = vmatmul.mubr.f32.gmra.mrb[76].mxu0 %v11000_v10 }
 0x3aa   :  { %2132 = vmatprep.mubr.f32.mxu0 %v10750_v53  ;;  %v11020_v53 = vld [vmem:[#allocation2 + $0x241] sm:$0xff] }
 0x3ad   :  { %2133 = vmatmul.mubr.f32.gmra.mrb[78].mxu0 %v11004_v14 }
 0x3ae   :  { %2137 = vmatprep.mubr.f32.mxu0 %v10754_v59  ;;  %v11024_v59 = vld [vmem:[#allocation2 + $0x249] sm:$0xff] }
 0x3b1   :  { %2138 = vmatmul.mubr.f32.gmra.mrb[80].mxu0 %v11008_v21 }
 0x3b2   :  { %2142 = vmatprep.mubr.f32.mxu0 %v10758_v63  ;;  %v11028_v63 = vld [vmem:[#allocation2 + $0x259] sm:$0xff] }
 0x3b5   :  { %2143 = vmatmul.mubr.f32.gmra.mrb[82].mxu0 %v11012_v44 }
 0x3b6   :  { %2147 = vmatprep.mubr.f32.mxu0 %v10762_v7  ;;  %v11036_v7 = vld [vmem:[#allocation2 + $0x271] sm:$0xff] }
 0x3b9   :  { %2148 = vmatmul.mubr.f32.gmra.mrb[84].mxu0 %v11020_v53 }
 0x3ba   :  { %2152 = vmatprep.mubr.f32.mxu0 %v10766_v12  ;;  %v11040_v12 = vld [vmem:[#allocation2 + $0x279] sm:$0xff] }
 0x3bd   :  { %2153 = vmatmul.mubr.f32.gmra.mrb[86].mxu0 %v11024_v59 }
 0x3be   :  { %2157 = vmatprep.mubr.f32.mxu0 %v10770_v24  ;;  %v11044_v24 = vld [vmem:[#allocation2 + $0x289] sm:$0xff] }
 0x3c1   :  { %2158 = vmatmul.mubr.f32.gmra.mrb[88].mxu0 %v11028_v63 }
 0x3c2   :  { %2162 = vmatprep.mubr.f32.mxu0 %v10774_v37  ;;  %v1091_v37 = vld [vmem:[#allocation7 + $0x420] sm:$0xff] }
 0x3c3   :  { %v11050_v6 = vpack.c.bf16 %v1092_v41, %v1091_v37  ;;  %v1098_v37 = vld [vmem:[#allocation7 + $0x458] sm:$0xff]  ;;  %v11076_v41 = vld [vmem:[#allocation2 + $0x2c1] sm:$0xff] }
 0x3c4   :  { %15451 = vst [vmem:[#allocation39_spill] sm:$0xff] %v11076_v41 }
 0x3c5   :  { %2163 = vmatmul.mubr.f32.gmra.mrb[90].mxu0 %v11032_v56  ;;  %8663 = vmatprep.subr.bf16.mxu1 %v11050_v6 }
 0x3c6   :  { %2167 = vmatprep.mubr.f32.mxu0 %v10778_v46  ;;  %v11048_v46 = vld [vmem:[#allocation2 + $0x291] sm:$0xff]  ;;  %8671 = vmatpush3.bf16.msra.mxu1 %v11050_v6 }
 0x3c9   :  { %2168 = vmatmul.mubr.f32.gmra.mrb[92].mxu0 %v11036_v7 }
 0x3ca   :  { %2172 = vmatprep.mubr.f32.mxu0 %v10782_v57  ;;  %v11056_v57 = vld [vmem:[#allocation2 + $0x2a1] sm:$0xff] }
 0x3cb   :  { %15448 = vst [vmem:[#allocation31_spill] sm:$0xff] %v11056_v57 }
 0x3cd   :  { %2173 = vmatmul.mubr.f32.gmra.mrb[94].mxu0 %v11040_v12 }
 0x3ce   :  { %2177 = vmatprep.mubr.f32.mxu0 %v10786_v17  ;;  %v1093_v17 = vld [vmem:[#allocation7 + $0x430] sm:$0xff] }
 0x3cf   :  { %v11062_v4 = vpack.c.bf16 %v1094_v54, %v1093_v17  ;;  %v1100_v54 = vld [vmem:[#allocation7 + $0x468] sm:$0xff] }
 0x3d1   :  { %2178 = vmatmul.mubr.f32.gmra.mrb[96].mxu0 %v11044_v24  ;;  %8664 = vmatprep.subr.bf16.mxu1 %v11062_v4 }
 0x3d2   :  { %2182 = vmatprep.mubr.f32.mxu0 %v10790_v28  ;;  %v11060_v28 = vld [vmem:[#allocation2 + $0x2a9] sm:$0xff]  ;;  %8672 = vmatpush3.bf16.msra.mxu1 %v11062_v4 }
 0x3d3   :  { %15449 = vst [vmem:[#allocation33_spill] sm:$0xff] %v11060_v28 }
 0x3d5   :  { %2183 = vmatmul.mubr.f32.gmra.mrb[98].mxu0 %v11048_v46 }
 0x3d6   :  { %2187 = vmatprep.mubr.f32.mxu0 %v10794_v18  ;;  %v1096_v18 = vld [vmem:[#allocation7 + $0x448] sm:$0xff] }
 0x3d7   :  { %v11070_v15 = vpack.c.bf16 %v1096_v18, %v1095_v48  ;;  %v15452_v48 = vld [vmem:[#allocation28_spill] sm:$0xff]  ;;  %v11084_v18 = vld [vmem:[#allocation2 + $0x2d1] sm:$0xff] }
 0x3d8   :  { %15453 = vst [vmem:[#allocation28_spill] sm:$0xff] %v11084_v18 }
 0x3d9   :  { %2188 = vmatmul.mubr.f32.gmra.mrb[100].mxu0 %v11056_v57  ;;  %8665 = vmatprep.subr.bf16.mxu1 %v11070_v15  ;;  %v11109_v57 = vld [vmem:[#allocation2 + $0x301] sm:$0xff] }
 0x3da   :  { %2192 = vmatprep.mubr.f32.mxu0 %v10798_v9  ;;  %8673 = vmatpush3.bf16.msra.mxu1 %v11070_v15  ;;  %v1097_v9 = vld [vmem:[#allocation7 + $0x450] sm:$0xff] }
 0x3db   :  { %v11078_v17 = vpack.c.bf16 %v1098_v37, %v1097_v9  ;;  %v1102_v9 = vld [vmem:[#allocation7 + $0x478] sm:$0xff]  ;;  %v15454_v37 = vld [vmem:[#allocation29_spill] sm:$0xff] }
 0x3dd   :  { %2193 = vmatmul.mubr.f32.gmra.mrb[102].mxu0 %v11060_v28  ;;  %8666 = vmatprep.subr.bf16.mxu1 %v11078_v17 }
 0x3de   :  { %2197 = vmatprep.mubr.f32.mxu0 %v10802_v11  ;;  %8674 = vmatpush3.bf16.msra.mxu1 %v11078_v17  ;;  %v1099_v11 = vld [vmem:[#allocation7 + $0x460] sm:$0xff] }
 0x3e1   :  { %2198 = vmatmul.mubr.f32.gmra.mrb[104].mxu0 %v11068_v0  ;;  %v11086_v0 = vpack.c.bf16 %v1100_v54, %v1099_v11  ;;  %v919_v11 = vld [vmem:[#allocation2 + $0x152] sm:$0xff]  ;;  %v15456_v54 = vld [vmem:[#allocation30_spill] sm:$0xff] }
 0x3e2   :  { %2202 = vmatprep.mubr.f32.mxu0 %v10806_v20  ;;  %v1101_v20 = vld [vmem:[#allocation7 + $0x470] sm:$0xff]  ;;  %7865 = vmatprep.mubr.f32.mxu1 %v919_v11 }
 0x3e3   :  { %8667 = vmatprep.subr.bf16.mxu1 %v11086_v0  ;;  %v11094_v28 = vpack.c.bf16 %v1102_v9, %v1101_v20  ;;  %v15457_v20 = vld [vmem:[#allocation32_spill] sm:$0xff]  ;;  %v11105_v9 = vld [vmem:[#allocation2 + $0x2f1] sm:$0xff]  ;;  %v11114_v11 = vld [vmem:[#allocation2 + $0x309] sm:$0xff] }
 0x3e4   :  { %8675 = vmatpush3.bf16.msra.mxu1 %v11086_v0  ;;  %15460 = vst [vmem:[#allocation30_spill] sm:$0xff] %v11114_v11 }
 0x3e5   :  { %2203 = vmatmul.mubr.f32.gmra.mrb[106].mxu0 %v11076_v41  ;;  %v11092_v41 = vld [vmem:[#allocation2 + $0x2d9] sm:$0xff]  ;;  %8668 = vmatprep.subr.bf16.mxu1 %v11094_v28 }
 0x3e6   :  { %2207 = vmatprep.mubr.f32.mxu0 %v15452_v48  ;;  %15455 = vst [vmem:[#allocation29_spill] sm:$0xff] %v11092_v41  ;;  %v11100_v48 = vld [vmem:[#allocation2 + $0x2e9] sm:$0xff] }
 0x3e8   :  { %8676 = vmatpush3.bf16.msra.mxu1 %v11094_v28 }
 0x3e9   :  { %2208 = vmatmul.mubr.f32.gmra.mrb[108].mxu0 %v11084_v18  ;;  %v920_v18 = vld [vmem:[#allocation2 + $0x15a] sm:$0xff]  ;;  %8405 = vmatprep.subr.bf16.mxu1 %v15419_v2 }
 0x3ea   :  { %2212 = vmatprep.mubr.f32.mxu0 %v15454_v37  ;;  %v921_v37 = vld [vmem:[#allocation2 + $0x16a] sm:$0xff]  ;;  %v11129_v2 = vld [vmem:[#allocation2 + $0x33a] sm:$0xff] }
 0x3eb   :  { %7866 = vmatmul.mubr.f32.vlgmr.msra.gmra.mrb[0].mxu1 %v920_v18  ;;  %v15459_v18 = vld [vmem:[#allocation35_spill] sm:$0xff] }
 0x3ec   :  { %7868 = vmatprep.mubr.f32.mxu1 %v921_v37  ;;  %v15463_v37 = vld [vmem:[#allocation37_spill] sm:$0xff] }
 0x3ed   :  { %2213 = vmatmul.mubr.f32.gmra.mrb[110].mxu0 %v11092_v41  ;;  %v15458_v41 = vld [vmem:[#allocation34_spill] sm:$0xff] }
 0x3ee   :  { %2217 = vmatprep.mubr.f32.mxu0 %v15456_v54  ;;  %v922_v54 = vld [vmem:[#allocation2 + $0x172] sm:$0xff] }
 0x3ef   :  { %7869 = vmatmul.mubr.f32.gmra.mrb[2].mxu1 %v922_v54  ;;  %v11123_v54 = vld [vmem:[#allocation2 + $0x321] sm:$0xff] }
 0x3f0   :  { %7871 = vmatprep.mubr.f32.mxu1 %v10967_v16  ;;  %15464 = vst [vmem:[#allocation34_spill] sm:$0xff] %v11123_v54  ;;  %v11125_v16 = vld [vmem:[#allocation2 + $0x332] sm:$0xff] }
 0x3f1   :  { %2218 = vmatmul.mubr.f32.gmra.mrb[112].mxu0 %v11100_v48 }
 0x3f2   :  { %2222 = vmatprep.mubr.f32.mxu0 %v15457_v20  ;;  %v15461_v20 = vld [vmem:[#allocation36_spill] sm:$0xff] }
 0x3f3   :  { %7872 = vmatmul.mubr.f32.gmra.mrb[4].mxu1 %v10971_v58  ;;  %v926_v58 = vld [vmem:[#allocation2 + $0x1a2] sm:$0xff] }
 0x3f5   :  { %2223 = vmatmul.mubr.f32.gmra.mrb[114].mxu0 %v11105_v9 }
 0x3f6   :  { %2227 = vmatprep.mubr.f32.mxu0 %v15458_v41  ;;  %v11119_v41 = vld [vmem:[#allocation2 + $0x319] sm:$0xff] }
 0x3f7   :  { %15462 = vst [vmem:[#allocation32_spill] sm:$0xff] %v11119_v41 }
 0x3f9   :  { %2228 = vmatmul.mubr.f32.gmra.mrb[116].mxu0 %v11109_v57 }
 0x3fa   :  { %2232 = vmatprep.mubr.f32.mxu0 %v15459_v18  ;;  %v925_v18 = vld [vmem:[#allocation2 + $0x19a] sm:$0xff] }
 0x3fb   :  { %7874 = vmatprep.mubr.f32.mxu1 %v925_v18  ;;  %v768_v18 = vld [vmem:[#allocation2 + $0x38] sm:$0xff] }
 0x3fc   :  { %7875 = vmatmul.mubr.f32.gmra.mrb[6].mxu1 %v926_v58  ;;  %v929_v58 = vld [vmem:[#allocation2 + $0x1fa] sm:$0xff] }
 0x3fd   :  { %2233 = vmatmul.mubr.f32.gmra.mrb[118].mxu0 %v11114_v11  ;;  %v767_v11 = vld [vmem:[#allocation2 + $0x30] sm:$0xff] }
 0x3fe   :  { %2237 = vmatprep.mubr.f32.mxu0 %v15461_v20  ;;  %v15465_v20 = vld [vmem:[#allocation26_spill] sm:$0xff] }
 0x401   :  { %2238 = vmatmul.mubr.f32.gmra.mrb[120].mxu0 %v11119_v41  ;;  %v15466_v41 = vld [vmem:[#allocation27_spill] sm:$0xff] }
 0x402   :  { %2242 = vmatprep.mubr.f32.mxu0 %v15463_v37  ;;  %v927_v37 = vld [vmem:[#allocation2 + $0x1e2] sm:$0xff] }
 0x403   :  { %7877 = vmatprep.mubr.f32.mxu1 %v927_v37  ;;  %v941_v37 = vld [vmem:[#allocation2 + $0x28a] sm:$0xff] }
 0x405   :  { %2243 = vmatmul.mubr.f32.gmra.mrb[122].mxu0 %v11123_v54  ;;  %v928_v54 = vld [vmem:[#allocation2 + $0x1ea] sm:$0xff] }
 0x406   :  { %2247 = vmatprep.mubr.f32.mxu0 %v11125_v16  ;;  %7878 = vmatmul.mubr.f32.gmra.mrb[8].mxu1 %v928_v54  ;;  %v938_v54 = vld [vmem:[#allocation2 + $0x262] sm:$0xff] }
 0x407   :  { %7880 = vmatprep.mubr.f32.mxu1 %v929_v58  ;;  %v943_v58 = vld [vmem:[#allocation2 + $0x2a2] sm:$0xff] }
 0x409   :  { %2248 = vmatmul.mubr.f32.gmra.mrb[124].mxu0 %v15465_v20  ;;  %v939_v20 = vld [vmem:[#allocation2 + $0x272] sm:$0xff] }
 0x40a   :  { %2252 = vmatprep.mubr.f32.mxu0 %v11129_v2 }
 0x40d   :  { %2253 = vmatmul.mubr.f32.gmra.mrb[126].mxu0 %v15466_v41  ;;  %v769_v41 = vld [vmem:[#allocation2 + $0x48] sm:$0xff] }
 0x40e   :  { %2322 = vmatprep.mubr.f32.mxu0 %v10843_v5  ;;  %v930_v5 = vld [vmem:[#allocation2 + $0x202] sm:$0xff] }
 0x40f   :  { %7881 = vmatmul.mubr.f32.gmra.mrb[10].mxu1 %v930_v5  ;;  %v945_v5 = vld [vmem:[#allocation2 + $0x2ba] sm:$0xff] }
 0x411   :  { %2323 = vmatmul.mubr.f32.vlgmr.msra.gmra.mrb[0].mxu0 %v767_v11  ;;  %v936_v11 = vld [vmem:[#allocation2 + $0x24a] sm:$0xff] }
 0x412   :  { %8376 = vmatpush3.bf16.msra.mxu0 %v10978_v27  ;;  %2327 = vmatprep.mubr.f32.mxu0 %v10848_v1  ;;  %v770_v27 = vld [vmem:[#allocation2 + $0x50] sm:$0xff] }
 0x413   :  { %8378 = vmatprep.subr.bf16.mxu0 %v11014_v55  ;;  %v931_v1 = vld [vmem:[#allocation2 + $0x212] sm:$0xff] }
 0x414   :  { %7883 = vmatprep.mubr.f32.mxu1 %v931_v1  ;;  %v947_v1 = vld [vmem:[#allocation2 + $0x2d2] sm:$0xff] }
 0x415   :  { %2328 = vmatmul.mubr.f32.gmra.mrb[2].mxu0 %v768_v18  ;;  %v781_v18 = vld [vmem:[#allocation2 + $0xd8] sm:$0xff] }
 0x416   :  { %2332 = vmatprep.mubr.f32.mxu0 %v10853_v49  ;;  %8380 = vmatpush3.bf16.msra.mxu0 %v11014_v55  ;;  %v771_v49 = vld [vmem:[#allocation2 + $0x60] sm:$0xff] }
 0x417   :  { %8382 = vmatprep.subr.bf16.mxu0 %v11050_v6  ;;  %v932_v55 = vld [vmem:[#allocation2 + $0x21a] sm:$0xff] }
 0x418   :  { %7884 = vmatmul.mubr.f32.gmra.mrb[12].mxu1 %v932_v55  ;;  %v949_v55 = vld [vmem:[#allocation2 + $0x2ea] sm:$0xff] }
 0x419   :  { %2333 = vmatmul.mubr.f32.gmra.mrb[4].mxu0 %v769_v41  ;;  %v783_v41 = vld [vmem:[#allocation2 + $0xf0] sm:$0xff] }
 0x41a   :  { %2337 = vmatprep.mubr.f32.mxu0 %v10858_v35  ;;  %8384 = vmatpush3.bf16.msra.mxu0 %v11050_v6  ;;  %v772_v35 = vld [vmem:[#allocation2 + $0x68] sm:$0xff] }
 0x41b   :  { %8386 = vmatprep.subr.bf16.mxu0 %v11062_v4  ;;  %v933_v6 = vld [vmem:[#allocation2 + $0x22a] sm:$0xff] }
 0x41c   :  { %7886 = vmatprep.mubr.f32.mxu1 %v933_v6  ;;  %v951_v6 = vld [vmem:[#allocation2 + $0x302] sm:$0xff] }
 0x41d   :  { %2338 = vmatmul.mubr.f32.gmra.mrb[6].mxu0 %v770_v27  ;;  %v785_v27 = vld [vmem:[#allocation2 + $0x108] sm:$0xff] }
 0x41e   :  { %2342 = vmatprep.mubr.f32.mxu0 %v10863_v50  ;;  %8388 = vmatpush3.bf16.msra.mxu0 %v11062_v4  ;;  %v773_v50 = vld [vmem:[#allocation2 + $0x78] sm:$0xff] }
 0x41f   :  { %8390 = vmatprep.subr.bf16.mxu0 %v11070_v15  ;;  %v934_v4 = vld [vmem:[#allocation2 + $0x232] sm:$0xff] }
 0x420   :  { %7887 = vmatmul.mubr.f32.gmra.mrb[14].mxu1 %v934_v4  ;;  %v953_v4 = vld [vmem:[#allocation2 + $0x31a] sm:$0xff] }
 0x421   :  { %2343 = vmatmul.mubr.f32.gmra.mrb[8].mxu0 %v771_v49  ;;  %v787_v49 = vld [vmem:[#allocation2 + $0x120] sm:$0xff] }
 0x422   :  { %2347 = vmatprep.mubr.f32.mxu0 %v10868_v60  ;;  %8392 = vmatpush3.bf16.msra.mxu0 %v11070_v15  ;;  %v774_v60 = vld [vmem:[#allocation2 + $0x80] sm:$0xff] }
 0x423   :  { %8394 = vmatprep.subr.bf16.mxu0 %v11078_v17  ;;  %v935_v15 = vld [vmem:[#allocation2 + $0x242] sm:$0xff] }
 0x424   :  { %7889 = vmatprep.mubr.f32.mxu1 %v935_v15  ;;  %v859_v15 = vld [vmem:[#allocation2 + $0x181] sm:$0xff] }
 0x425   :  { %2348 = vmatmul.mubr.f32.gmra.mrb[10].mxu0 %v772_v35  ;;  %7890 = vmatmul.mubr.f32.gmra.mrb[16].mxu1 %v936_v11  ;;  %v789_v35 = vld [vmem:[#allocation2 + $0x138] sm:$0xff] }
 0x426   :  { %2352 = vmatprep.mubr.f32.mxu0 %v10873_v25  ;;  %8396 = vmatpush3.bf16.msra.mxu0 %v11078_v17  ;;  %v775_v25 = vld [vmem:[#allocation2 + $0x90] sm:$0xff]  ;;  %v776_v17 = vld [vmem:[#allocation2 + $0x98] sm:$0xff] }
 0x427   :  { %8398 = vmatprep.subr.bf16.mxu0 %v11086_v0  ;;  %v861_v11 = vld [vmem:[#allocation2 + $0x199] sm:$0xff] }
 0x429   :  { %2353 = vmatmul.mubr.f32.gmra.mrb[12].mxu0 %v773_v50  ;;  %v791_v50 = vld [vmem:[#allocation2 + $0x150] sm:$0xff] }
 0x42a   :  { %2357 = vmatprep.mubr.f32.mxu0 %v10878_v22  ;;  %8400 = vmatpush3.bf16.msra.mxu0 %v11086_v0  ;;  %v937_v22 = vld [vmem:[#allocation2 + $0x25a] sm:$0xff]  ;;  %v777_v0 = vld [vmem:[#allocation2 + $0xa8] sm:$0xff] }
 0x42b   :  { %8402 = vmatprep.subr.bf16.mxu0 %v11094_v28  ;;  %7892 = vmatprep.mubr.f32.mxu1 %v937_v22  ;;  %v862_v22 = vld [vmem:[#allocation2 + $0x1a1] sm:$0xff] }
 0x42c   :  { %7893 = vmatmul.mubr.f32.gmra.mrb[18].mxu1 %v938_v54  ;;  %v801_v54 = vld [vmem:[#allocation2 + $0x1f8] sm:$0xff] }
 0x42d   :  { %2358 = vmatmul.mubr.f32.gmra.mrb[14].mxu0 %v774_v60  ;;  %7895 = vmatprep.mubr.f32.mxu1 %v939_v20  ;;  %v793_v60 = vld [vmem:[#allocation2 + $0x168] sm:$0xff]  ;;  %v803_v20 = vld [vmem:[#allocation2 + $0x210] sm:$0xff] }
 0x42e   :  { %2362 = vmatprep.mubr.f32.mxu0 %v10883_v19  ;;  %8404 = vmatpush3.bf16.msra.mxu0 %v11094_v28  ;;  %v778_v19 = vld [vmem:[#allocation2 + $0xb0] sm:$0xff]  ;;  %v779_v28 = vld [vmem:[#allocation2 + $0xc0] sm:$0xff] }
 0x431   :  { %2363 = vmatmul.mubr.f32.gmra.mrb[16].mxu0 %v775_v25  ;;  %v860_v25 = vld [vmem:[#allocation2 + $0x189] sm:$0xff] }
 0x432   :  { %2367 = vmatprep.mubr.f32.mxu0 %v10888_v61  ;;  %v940_v61 = vld [vmem:[#allocation2 + $0x27a] sm:$0xff] }
 0x433   :  { %7896 = vmatmul.mubr.f32.gmra.mrb[20].mxu1 %v940_v61 }
 0x434   :  { %7898 = vmatprep.mubr.f32.mxu1 %v941_v37  ;;  %v15468_v37 = vld [vmem:[#allocation33_spill] sm:$0xff] }
 0x435   :  { %2368 = vmatmul.mubr.f32.gmra.mrb[18].mxu0 %v776_v17  ;;  %v957_v17 = vld [vmem:[#allocation2 + $0x34a] sm:$0xff] }
 0x436   :  { %2372 = vmatprep.mubr.f32.mxu0 %v10893_v62  ;;  %v780_v62 = vld [vmem:[#allocation2 + $0xc8] sm:$0xff] }
 0x439   :  { %2373 = vmatmul.mubr.f32.gmra.mrb[20].mxu0 %v777_v0  ;;  %v800_v0 = vld [vmem:[#allocation2 + $0x1e8] sm:$0xff] }
 0x43a   :  { %2377 = vmatprep.mubr.f32.mxu0 %v10897_v43  ;;  %v942_v43 = vld [vmem:[#allocation2 + $0x292] sm:$0xff] }
 0x43b   :  { %7899 = vmatmul.mubr.f32.gmra.mrb[22].mxu1 %v942_v43 }
 0x43c   :  { %7901 = vmatprep.mubr.f32.mxu1 %v943_v58  ;;  %v15470_v58 = vld [vmem:[#allocation39_spill] sm:$0xff] }
 0x43d   :  { %2378 = vmatmul.mubr.f32.gmra.mrb[22].mxu0 %v778_v19  ;;  %v802_v19 = vld [vmem:[#allocation2 + $0x200] sm:$0xff] }
 0x43e   :  { %2382 = vmatprep.mubr.f32.mxu0 %v10902_v26  ;;  %v782_v26 = vld [vmem:[#allocation2 + $0xe0] sm:$0xff] }
 0x441   :  { %2383 = vmatmul.mubr.f32.gmra.mrb[24].mxu0 %v779_v28 }
 0x442   :  { %2387 = vmatprep.mubr.f32.mxu0 %v10906_v38  ;;  %v944_v38 = vld [vmem:[#allocation2 + $0x2aa] sm:$0xff] }
 0x443   :  { %7902 = vmatmul.mubr.f32.gmra.mrb[24].mxu1 %v944_v38 }
 0x444   :  { %7904 = vmatprep.mubr.f32.mxu1 %v945_v5  ;;  %v15471_v5 = vld [vmem:[#allocation28_spill] sm:$0xff] }
 0x445   :  { %2388 = vmatmul.mubr.f32.gmra.mrb[26].mxu0 %v780_v62  ;;  %v15467_v62 = vld [vmem:[#allocation31_spill] sm:$0xff] }
 0x446   :  { %2392 = vmatprep.mubr.f32.mxu0 %v10910_v30  ;;  %v784_v30 = vld [vmem:[#allocation2 + $0xf8] sm:$0xff] }
 0x449   :  { %2393 = vmatmul.mubr.f32.gmra.mrb[28].mxu0 %v781_v18  ;;  %v816_v18 = vld [vmem:[#allocation2 + $0x2a8] sm:$0xff] }
 0x44a   :  { %2397 = vmatprep.mubr.f32.mxu0 %v10914_v31  ;;  %v946_v31 = vld [vmem:[#allocation2 + $0x2c2] sm:$0xff] }
 0x44b   :  { %7905 = vmatmul.mubr.f32.gmra.mrb[26].mxu1 %v946_v31  ;;  %v15472_v31 = vld [vmem:[#allocation29_spill] sm:$0xff] }
 0x44c   :  { %7907 = vmatprep.mubr.f32.mxu1 %v947_v1 }
 0x44d   :  { %2398 = vmatmul.mubr.f32.gmra.mrb[30].mxu0 %v782_v26  ;;  %v15469_v26 = vld [vmem:[#allocation38_spill] sm:$0xff] }
 0x44e   :  { %2402 = vmatprep.mubr.f32.mxu0 %v10919_v32  ;;  %v786_v32 = vld [vmem:[#allocation2 + $0x110] sm:$0xff] }
 0x451   :  { %2403 = vmatmul.mubr.f32.gmra.mrb[32].mxu0 %v783_v41  ;;  %v818_v41 = vld [vmem:[#allocation2 + $0x2c0] sm:$0xff] }
 0x452   :  { %2407 = vmatprep.mubr.f32.mxu0 %v10923_v33  ;;  %v948_v33 = vld [vmem:[#allocation2 + $0x2da] sm:$0xff] }
 0x453   :  { %7908 = vmatmul.mubr.f32.gmra.mrb[28].mxu1 %v948_v33 }
 0x454   :  { %7910 = vmatprep.mubr.f32.mxu1 %v949_v55  ;;  %v821_v55 = vld [vmem:[#allocation2 + $0x2e8] sm:$0xff] }
 0x455   :  { %2408 = vmatmul.mubr.f32.gmra.mrb[34].mxu0 %v784_v30 }
 0x456   :  { %2412 = vmatprep.mubr.f32.mxu0 %v10927_v34  ;;  %v788_v34 = vld [vmem:[#allocation2 + $0x128] sm:$0xff] }
 0x459   :  { %2413 = vmatmul.mubr.f32.gmra.mrb[36].mxu0 %v785_v27  ;;  %v819_v27 = vld [vmem:[#allocation2 + $0x2d0] sm:$0xff] }
 0x45a   :  { %2417 = vmatprep.mubr.f32.mxu0 %v10931_v36  ;;  %v950_v36 = vld [vmem:[#allocation2 + $0x2f2] sm:$0xff] }
 0x45b   :  { %7911 = vmatmul.mubr.f32.gmra.mrb[30].mxu1 %v950_v36 }
 0x45c   :  { %7913 = vmatprep.mubr.f32.mxu1 %v951_v6 }
 0x45d   :  { %2418 = vmatmul.mubr.f32.gmra.mrb[38].mxu0 %v786_v32  ;;  %v820_v32 = vld [vmem:[#allocation2 + $0x2d8] sm:$0xff] }
 0x45e   :  { %2422 = vmatprep.mubr.f32.mxu0 %v10936_v39  ;;  %v790_v39 = vld [vmem:[#allocation2 + $0x140] sm:$0xff] }
 0x461   :  { %2423 = vmatmul.mubr.f32.gmra.mrb[40].mxu0 %v787_v49 }
 0x462   :  { %2427 = vmatprep.mubr.f32.mxu0 %v10940_v40  ;;  %v952_v40 = vld [vmem:[#allocation2 + $0x30a] sm:$0xff] }
 0x463   :  { %7914 = vmatmul.mubr.f32.gmra.mrb[32].mxu1 %v952_v40 }
 0x464   :  { %7916 = vmatprep.mubr.f32.mxu1 %v953_v4  ;;  %v823_v4 = vld [vmem:[#allocation2 + $0x300] sm:$0xff] }
 0x465   :  { %2428 = vmatmul.mubr.f32.gmra.mrb[42].mxu0 %v788_v34 }
 0x466   :  { %2432 = vmatprep.mubr.f32.mxu0 %v10944_v42  ;;  %v792_v42 = vld [vmem:[#allocation2 + $0x158] sm:$0xff] }
 0x469   :  { %2433 = vmatmul.mubr.f32.gmra.mrb[44].mxu0 %v789_v35 }
 0x46a   :  { %2437 = vmatprep.mubr.f32.mxu0 %v10948_v45  ;;  %v954_v45 = vld [vmem:[#allocation2 + $0x322] sm:$0xff] }
 0x46b   :  { %7917 = vmatmul.mubr.f32.gmra.mrb[34].mxu1 %v954_v45  ;;  %v15473_v45 = vld [vmem:[#allocation30_spill] sm:$0xff] }
 0x46c   :  { %7919 = vmatprep.mubr.f32.mxu1 %v11125_v16  ;;  %v958_v16 = vld [vmem:[#allocation2 + $0x352] sm:$0xff] }
 0x46d   :  { %2438 = vmatmul.mubr.f32.gmra.mrb[46].mxu0 %v790_v39  ;;  %v822_v39 = vld [vmem:[#allocation2 + $0x2f0] sm:$0xff] }
 0x46e   :  { %2442 = vmatprep.mubr.f32.mxu0 %v10953_v47  ;;  %v794_v47 = vld [vmem:[#allocation2 + $0x170] sm:$0xff] }
 0x46f   :  { %7920 = vmatmul.mubr.f32.gmra.mrb[36].mxu1 %v11129_v2  ;;  %v799_v2 = vld [vmem:[#allocation2 + $0x1e0] sm:$0xff] }
 0x470   :  { %7922 = vmatprep.mubr.f32.mxu1 %v957_v17 }
 0x471   :  { %2443 = vmatmul.mubr.f32.gmra.mrb[48].mxu0 %v791_v50 }
 0x472   :  { %2447 = vmatprep.mubr.f32.mxu0 %v10957_v23  ;;  %v795_v23 = vld [vmem:[#allocation2 + $0x180] sm:$0xff] }
 0x473   :  { %7923 = vmatmul.mubr.f32.gmra.mrb[38].mxu1 %v958_v16  ;;  %v826_v16 = vld [vmem:[#allocation2 + $0x320] sm:$0xff] }
 0x475   :  { %2448 = vmatmul.mubr.f32.gmra.mrb[50].mxu0 %v792_v42 }
 0x476   :  { %2452 = vmatprep.mubr.f32.mxu0 %v10961_v51  ;;  %v796_v51 = vld [vmem:[#allocation2 + $0x188] sm:$0xff] }
 0x479   :  { %2453 = vmatmul.mubr.f32.gmra.mrb[52].mxu0 %v793_v60 }
 0x47a   :  { %2457 = vmatprep.mubr.f32.mxu0 %v10965_v8  ;;  %v11179_v8 = vld [vmem:[#allocation2] sm:$0xff] }
 0x47d   :  { %2458 = vmatmul.mubr.f32.gmra.mrb[54].mxu0 %v794_v47  ;;  %v824_v47 = vld [vmem:[#allocation2 + $0x308] sm:$0xff] }
 0x47e   :  { %2462 = vmatprep.mubr.f32.mxu0 %v859_v15 }
 0x481   :  { %2463 = vmatmul.mubr.f32.gmra.mrb[56].mxu0 %v795_v23 }
 0x482   :  { %2467 = vmatprep.mubr.f32.mxu0 %v860_v25 }
 0x485   :  { %2468 = vmatmul.mubr.f32.gmra.mrb[58].mxu0 %v796_v51  ;;  %v15474_v51 = vld [vmem:[#allocation32_spill] sm:$0xff] }
 0x486   :  { %2472 = vmatprep.mubr.f32.mxu0 %v861_v11  ;;  %v825_v11 = vld [vmem:[#allocation2 + $0x318] sm:$0xff] }
 0x489   :  { %2473 = vmatmul.mubr.f32.gmra.mrb[60].mxu0 %v11179_v8 }
 0x48a   :  { %2477 = vmatprep.mubr.f32.mxu0 %v862_v22  ;;  %v15475_v22 = vld [vmem:[#allocation34_spill] sm:$0xff] }
 0x48d   :  { %2478 = vmatmul.mubr.f32.gmra.mrb[62].mxu0 %v11179_v8 }
 0x48e   :  { %2482 = vmatprep.mubr.f32.mxu0 %v10984_v29  ;;  %v804_v29 = vld [vmem:[#allocation2 + $0x218] sm:$0xff] }
 0x491   :  { %2483 = vmatmul.mubr.f32.gmra.mrb[64].mxu0 %v799_v2  ;;  %v891_v2 = vld [vmem:[#allocation2 + $0x331] sm:$0xff] }
 0x492   :  { %2487 = vmatprep.mubr.f32.mxu0 %v10988_v52  ;;  %v805_v52 = vld [vmem:[#allocation2 + $0x228] sm:$0xff] }
 0x495   :  { %2488 = vmatmul.mubr.f32.gmra.mrb[66].mxu0 %v800_v0 }
 0x496   :  { %2492 = vmatprep.mubr.f32.mxu0 %v10992_v13  ;;  %v806_v13 = vld [vmem:[#allocation2 + $0x230] sm:$0xff] }
 0x499   :  { %2493 = vmatmul.mubr.f32.gmra.mrb[68].mxu0 %v801_v54 }
 0x49a   :  { %2497 = vmatprep.mubr.f32.mxu0 %v10996_v3  ;;  %v807_v3 = vld [vmem:[#allocation2 + $0x240] sm:$0xff] }
 0x49d   :  { %2498 = vmatmul.mubr.f32.gmra.mrb[70].mxu0 %v802_v19 }
 0x49e   :  { %2502 = vmatprep.mubr.f32.mxu0 %v11000_v10  ;;  %v808_v10 = vld [vmem:[#allocation2 + $0x248] sm:$0xff] }
 0x4a1   :  { %2503 = vmatmul.mubr.f32.gmra.mrb[72].mxu0 %v803_v20 }
 0x4a2   :  { %2507 = vmatprep.mubr.f32.mxu0 %v11004_v14  ;;  %v809_v14 = vld [vmem:[#allocation2 + $0x258] sm:$0xff] }
 0x4a5   :  { %2508 = vmatmul.mubr.f32.gmra.mrb[74].mxu0 %v804_v29  ;;  %v827_v29 = vld [vmem:[#allocation2 + $0x330] sm:$0xff] }
 0x4a6   :  { %2512 = vmatprep.mubr.f32.mxu0 %v11008_v21  ;;  %v810_v21 = vld [vmem:[#allocation2 + $0x260] sm:$0xff] }
 0x4a9   :  { %2513 = vmatmul.mubr.f32.gmra.mrb[76].mxu0 %v805_v52  ;;  %v892_v52 = vld [vmem:[#allocation2 + $0x339] sm:$0xff] }
 0x4aa   :  { %2517 = vmatprep.mubr.f32.mxu0 %v11012_v44  ;;  %v811_v44 = vld [vmem:[#allocation2 + $0x270] sm:$0xff] }
 0x4ad   :  { %2518 = vmatmul.mubr.f32.gmra.mrb[78].mxu0 %v806_v13 }
 0x4ae   :  { %2522 = vmatprep.mubr.f32.mxu0 %v11020_v53  ;;  %v812_v53 = vld [vmem:[#allocation2 + $0x278] sm:$0xff] }
 0x4b1   :  { %2523 = vmatmul.mubr.f32.gmra.mrb[80].mxu0 %v807_v3 }
 0x4b2   :  { %2527 = vmatprep.mubr.f32.mxu0 %v11024_v59 }
 0x4b5   :  { %2528 = vmatmul.mubr.f32.gmra.mrb[82].mxu0 %v808_v10  ;;  %v828_v10 = vld [vmem:[#allocation2 + $0x338] sm:$0xff] }
 0x4b6   :  { %2532 = vmatprep.mubr.f32.mxu0 %v11028_v63  ;;  %v813_v63 = vld [vmem:[#allocation2 + $0x288] sm:$0xff] }
 0x4b9   :  { %2533 = vmatmul.mubr.f32.gmra.mrb[84].mxu0 %v809_v14  ;;  %v893_v14 = vld [vmem:[#allocation2 + $0x349] sm:$0xff] }
 0x4ba   :  { %2537 = vmatprep.mubr.f32.mxu0 %v11032_v56  ;;  %v814_v56 = vld [vmem:[#allocation2 + $0x290] sm:$0xff] }
 0x4bd   :  { %2538 = vmatmul.mubr.f32.gmra.mrb[86].mxu0 %v810_v21 }
 0x4be   :  { %2542 = vmatprep.mubr.f32.mxu0 %v11036_v7  ;;  %v11197_v28 = vpop.f32.mrb[0].mxu1 }
 0x4bf   :  { %v11199_v59 = vpop.f32.mrb[1].mxu1 }
 0x4c1   :  { %2543 = vmatmul.mubr.f32.gmra.mrb[88].mxu0 %v811_v44 }
 0x4c2   :  { %2547 = vmatprep.mubr.f32.mxu0 %v11040_v12  ;;  %v11203_v61 = vpop.f32.mrb[2].mxu1  ;;  %v815_v12 = vld [vmem:[#allocation2 + $0x2a0] sm:$0xff] }
 0x4c3   :  { %v11205_v7 = vpop.f32.mrb[3].mxu1 }
 0x4c5   :  { %2548 = vmatmul.mubr.f32.gmra.mrb[90].mxu0 %v812_v53 }
 0x4c6   :  { %2552 = vmatprep.mubr.f32.mxu0 %v11044_v24  ;;  %v11209_v43 = vpop.f32.mrb[4].mxu1 }
 0x4c7   :  { %v11211_v24 = vpop.f32.mrb[5].mxu1 }
 0x4c9   :  { %2553 = vmatmul.mubr.f32.gmra.mrb[92].mxu0 %v813_v63 }
 0x4ca   :  { %2557 = vmatprep.mubr.f32.mxu0 %v11048_v46  ;;  %v817_v46 = vld [vmem:[#allocation2 + $0x2b8] sm:$0xff] }
 0x4cd   :  { %2558 = vmatmul.mubr.f32.gmra.mrb[94].mxu0 %v814_v56  ;;  %v894_v56 = vld [vmem:[#allocation2 + $0x351] sm:$0xff] }
 0x4ce   :  { %2562 = vmatprep.mubr.f32.mxu0 %v15467_v62 }
 0x4cf   :  { %v11215_v38 = vpop.f32.mrb[6].mxu1 }
 0x4d0   :  { %v11217_v30 = vpop.f32.mrb[7].mxu1 }
 0x4d1   :  { %2563 = vmatmul.mubr.f32.gmra.mrb[96].mxu0 %v815_v12 }
 0x4d2   :  { %2567 = vmatprep.mubr.f32.mxu0 %v15468_v37  ;;  %v895_v37 = vld [vmem:[#allocation2 + $0x32] sm:$0xff] }
 0x4d5   :  { %2568 = vmatmul.mubr.f32.gmra.mrb[98].mxu0 %v816_v18 }
 0x4d6   :  { %2572 = vmatprep.mubr.f32.mxu0 %v15469_v26 }
 0x4d9   :  { %2573 = vmatmul.mubr.f32.gmra.mrb[100].mxu0 %v817_v46  ;;  %v11221_v1 = vpop.f32.mrb[8].mxu1 }
 0x4da   :  { %2577 = vmatprep.mubr.f32.mxu0 %v15470_v58  ;;  %v11225_v33 = vpop.f32.mrb[9].mxu1 }
 0x4dd   :  { %2578 = vmatmul.mubr.f32.gmra.mrb[102].mxu0 %v818_v41  ;;  %v896_v41 = vld [vmem:[#allocation2 + $0x3a] sm:$0xff] }
 0x4de   :  { %2582 = vmatprep.mubr.f32.mxu0 %v15471_v5  ;;  %v897_v5 = vld [vmem:[#allocation2 + $0x4a] sm:$0xff] }
 0x4e1   :  { %2583 = vmatmul.mubr.f32.gmra.mrb[104].mxu0 %v819_v27 }
 0x4e2   :  { %2587 = vmatprep.mubr.f32.mxu0 %v15472_v31  ;;  %v11231_v6 = vpop.f32.mrb[10].mxu1 }
 0x4e3   :  { %v11235_v40 = vpop.f32.mrb[11].mxu1 }
 0x4e4   :  { %v11223_v49 = vpop.f32.mrb[0].mxu0 }
 0x4e5   :  { %v2326_v34 = vpop.f32.mrb[1].mxu0  ;;  %2588 = vmatmul.mubr.f32.gmra.mrb[106].mxu0 %v820_v32  ;;  %v898_v32 = vld [vmem:[#allocation2 + $0x52] sm:$0xff] }
 0x4e6   :  { %2592 = vmatprep.mubr.f32.mxu0 %v11100_v48  ;;  %v899_v34 = vld [vmem:[#allocation2 + $0x62] sm:$0xff] }
 0x4e8   :  { %v11228_v35 = vpop.f32.mrb[2].mxu0 }
 0x4e9   :  { %v2331_v36 = vpop.f32.mrb[3].mxu0  ;;  %2593 = vmatmul.mubr.f32.gmra.mrb[108].mxu0 %v821_v55 }
 0x4ea   :  { %2597 = vmatprep.mubr.f32.mxu0 %v11105_v9 }
 0x4eb   :  { %v11241_v9 = vpop.f32.mrb[12].mxu1 }
 0x4ec   :  { %v11233_v50 = vpop.f32.mrb[4].mxu0  ;;  %v11245_v23 = vpop.f32.mrb[13].mxu1 }
 0x4ed   :  { %v2336_v42 = vpop.f32.mrb[5].mxu0  ;;  %2598 = vmatmul.mubr.f32.gmra.mrb[110].mxu0 %v822_v39 }
 0x4ee   :  { %2602 = vmatprep.mubr.f32.mxu0 %v11109_v57 }
 0x4f0   :  { %v11238_v48 = vpop.f32.mrb[6].mxu0 }
 0x4f1   :  { %v2341_v60 = vpop.f32.mrb[7].mxu0  ;;  %2603 = vmatmul.mubr.f32.gmra.mrb[112].mxu0 %v823_v4  ;;  %v901_v4 = vld [vmem:[#allocation2 + $0x7a] sm:$0xff] }
 0x4f2   :  { %2607 = vmatprep.mubr.f32.mxu0 %v15473_v45 }
 0x4f3   :  { %v11251_v0 = vpop.f32.mrb[14].mxu1 }
 0x4f4   :  { %v11243_v15 = vpop.f32.mrb[8].mxu0  ;;  %v11255_v19 = vpop.f32.mrb[15].mxu1 }
 0x4f5   :  { %v2346_v25 = vpop.f32.mrb[9].mxu0  ;;  %2608 = vmatmul.mubr.f32.gmra.mrb[114].mxu0 %v824_v47  ;;  %v902_v47 = vld [vmem:[#allocation2 + $0x82] sm:$0xff] }
 0x4f6   :  { %2612 = vmatprep.mubr.f32.mxu0 %v15474_v51  ;;  %v903_v25 = vld [vmem:[#allocation2 + $0x92] sm:$0xff] }
 0x4f8   :  { %v11248_v57 = vpop.f32.mrb[10].mxu0  ;;  %v11259_v21 = vpop.f32.mrb[16].mxu1 }
 0x4f9   :  { %v2351_v17 = vpop.f32.mrb[11].mxu0  ;;  %2613 = vmatmul.mubr.f32.gmra.mrb[116].mxu0 %v825_v11  ;;  %v11263_v53 = vpop.f32.mrb[17].mxu1 }
 0x4fa   :  { %2617 = vmatprep.mubr.f32.mxu0 %v15475_v22 }
 0x4fc   :  { %v11253_v54 = vpop.f32.mrb[12].mxu0 }
 0x4fd   :  { %v2356_v20 = vpop.f32.mrb[13].mxu0  ;;  %2618 = vmatmul.mubr.f32.gmra.mrb[118].mxu0 %v826_v16  ;;  %v904_v16 = vld [vmem:[#allocation2 + $0x9a] sm:$0xff] }
 0x4fe   :  { %2622 = vmatprep.mubr.f32.mxu0 %v891_v2  ;;  %v905_v2 = vld [vmem:[#allocation2 + $0xaa] sm:$0xff] }
 0x4ff   :  { %v11268_v18 = vpop.f32.mrb[18].mxu1 }
 0x500   :  { %v11257_v13 = vpop.f32.mrb[14].mxu0  ;;  %v11272_v46 = vpop.f32.mrb[19].mxu1 }
 0x501   :  { %v2361_v3 = vpop.f32.mrb[15].mxu0  ;;  %2623 = vmatmul.mubr.f32.gmra.mrb[120].mxu0 %v827_v29 }
 0x502   :  { %2627 = vmatprep.mubr.f32.mxu0 %v892_v52  ;;  %v906_v52 = vld [vmem:[#allocation2 + $0xb2] sm:$0xff]  ;;  %v907_v3 = vld [vmem:[#allocation2 + $0xc2] sm:$0xff] }
 0x504   :  { %v11261_v44 = vpop.f32.mrb[16].mxu0 }
 0x505   :  { %v2366_v63 = vpop.f32.mrb[17].mxu0  ;;  %2628 = vmatmul.mubr.f32.gmra.mrb[122].mxu0 %v828_v10 }
 0x506   :  { %2632 = vmatprep.mubr.f32.mxu0 %v893_v14  ;;  %v11277_v55 = vpop.f32.mrb[20].mxu1 }
 0x507   :  { %v11281_v39 = vpop.f32.mrb[21].mxu1 }
 0x508   :  { %v11265_v62 = vpop.f32.mrb[18].mxu0 }
 0x509   :  { %v2371_v12 = vpop.f32.mrb[19].mxu0  ;;  %2633 = vmatmul.mubr.f32.gmra.mrb[124].mxu0 %v11179_v8 }
 0x50a   :  { %2637 = vmatprep.mubr.f32.mxu0 %v894_v56  ;;  %v908_v12 = vld [vmem:[#allocation2 + $0xca] sm:$0xff] }
 0x50c   :  { %v11270_v26 = vpop.f32.mrb[20].mxu0 }
 0x50d   :  { %v2376_v58 = vpop.f32.mrb[21].mxu0  ;;  %2638 = vmatmul.mubr.f32.gmra.mrb[126].mxu0 %v11179_v8  ;;  %v900_v8 = vld [vmem:[#allocation2 + $0x6a] sm:$0xff] }
 0x50e   :  { %7829 = vmatprep.mubr.f32.mxu0 %v895_v37  ;;  %v11285_v51 = vpop.f32.mrb[22].mxu1  ;;  %v909_v37 = vld [vmem:[#allocation2 + $0xda] sm:$0xff] }
 0x50f   :  { %v11289_v17 = vpop.f32.mrb[23].mxu1 }
 0x510   :  { %v11275_v27 = vpop.f32.mrb[22].mxu0 }
 0x511   :  { %v2381_v31 = vpop.f32.mrb[23].mxu0  ;;  %7830 = vmatmul.mubr.f32.vlgmr.msra.gmra.mrb[128].mxu0 %v896_v41 }
 0x512   :  { %7832 = vmatprep.mubr.f32.mxu0 %v897_v5  ;;  %v910_v5 = vld [vmem:[#allocation2 + $0xe2] sm:$0xff]  ;;  %v911_v31 = vld [vmem:[#allocation2 + $0xf2] sm:$0xff] }
 0x514   :  { %v11279_v36 = vpop.f32.mrb[24].mxu0 }
 0x515   :  { %v2386_v42 = vpop.f32.mrb[25].mxu0  ;;  %7833 = vmatmul.mubr.f32.gmra.mrb[130].mxu0 %v898_v32 }
 0x516   :  { %7835 = vmatprep.mubr.f32.mxu0 %v899_v34  ;;  %v11293_v10 = vpop.f32.mrb[24].mxu1 }
 0x517   :  { %v11297_v63 = vpop.f32.mrb[25].mxu1 }
 0x518   :  { %v11283_v60 = vpop.f32.mrb[26].mxu0 }
 0x519   :  { %v2391_v45 = vpop.f32.mrb[27].mxu0  ;;  %7836 = vmatmul.mubr.f32.gmra.mrb[132].mxu0 %v900_v8 }
 0x51a   :  { %7838 = vmatprep.mubr.f32.mxu0 %v901_v4  ;;  %v912_v4 = vld [vmem:[#allocation2 + $0xfa] sm:$0xff]  ;;  %v913_v45 = vld [vmem:[#allocation2 + $0x10a] sm:$0xff] }
 0x51c   :  { %v11287_v11 = vpop.f32.mrb[28].mxu0 }
 0x51d   :  { %v2396_v22 = vpop.f32.mrb[29].mxu0  ;;  %7839 = vmatmul.mubr.f32.gmra.mrb[134].mxu0 %v902_v47 }
 0x51e   :  { %7841 = vmatprep.mubr.f32.mxu0 %v903_v25  ;;  %v11301_v32 = vpop.f32.mrb[26].mxu1  ;;  %v914_v22 = vld [vmem:[#allocation2 + $0x112] sm:$0xff] }
 0x51f   :  { %v11305_v42 = vpop.f32.mrb[27].mxu1 }
 0x520   :  { %v11291_v20 = vpop.f32.mrb[30].mxu0 }
 0x521   :  { %v2401_v29 = vpop.f32.mrb[31].mxu0  ;;  %7842 = vmatmul.mubr.f32.gmra.mrb[136].mxu0 %v904_v16  ;;  %v915_v16 = vld [vmem:[#allocation2 + $0x122] sm:$0xff] }
 0x522   :  { %7844 = vmatprep.mubr.f32.mxu0 %v905_v2 }
 0x524   :  { %v11295_v14 = vpop.f32.mrb[32].mxu0 }
 0x525   :  { %15476 = vst [vmem:[#allocation35_spill] sm:$0xff] %v11295_v14  ;;  %v2406_v56 = vpop.f32.mrb[33].mxu0  ;;  %7845 = vmatmul.mubr.f32.gmra.mrb[138].mxu0 %v906_v52 }
 0x526   :  { %7847 = vmatprep.mubr.f32.mxu0 %v907_v3  ;;  %v11309_v2 = vpop.f32.mrb[28].mxu1  ;;  %v916_v56 = vld [vmem:[#allocation2 + $0x12a] sm:$0xff] }
 0x527   :  { %v11313_v52 = vpop.f32.mrb[29].mxu1 }
 0x528   :  { %v11299_v58 = vpop.f32.mrb[34].mxu0 }
 0x529   :  { %v2411_v41 = vpop.f32.mrb[35].mxu0  ;;  %7848 = vmatmul.mubr.f32.gmra.mrb[140].mxu0 %v908_v12  ;;  %v917_v12 = vld [vmem:[#allocation2 + $0x13a] sm:$0xff] }
 0x52a   :  { %7850 = vmatprep.mubr.f32.mxu0 %v909_v37 }
 0x52c   :  { %v11303_v34 = vpop.f32.mrb[36].mxu0 }
 0x52d   :  { %15477 = vst [vmem:[#allocation36_spill] sm:$0xff] %v11303_v34  ;;  %v2416_v8 = vpop.f32.mrb[37].mxu0  ;;  %7851 = vmatmul.mubr.f32.gmra.mrb[142].mxu0 %v910_v5  ;;  %v918_v5 = vld [vmem:[#allocation2 + $0x142] sm:$0xff] }
 0x52e   :  { %7853 = vmatprep.mubr.f32.mxu0 %v911_v31  ;;  %v11317_v31 = vpop.f32.mrb[30].mxu1 }
 0x530   :  { %v11307_v47 = vpop.f32.mrb[38].mxu0 }
 0x531   :  { %15478 = vst [vmem:[#allocation37_spill] sm:$0xff] %v11307_v47  ;;  %v2421_v25 = vpop.f32.mrb[39].mxu0  ;;  %7854 = vmatmul.mubr.f32.gmra.mrb[144].mxu0 %v912_v4  ;;  %v11321_v4 = vpop.f32.mrb[31].mxu1 }
 0x532   :  { %7856 = vmatprep.mubr.f32.mxu0 %v913_v45 }
 0x534   :  { %v11311_v29 = vpop.f32.mrb[40].mxu0 }
 0x535   :  { %15479 = vst [vmem:[#allocation26_spill] sm:$0xff] %v11311_v29  ;;  %v2426_v3 = vpop.f32.mrb[41].mxu0  ;;  %7857 = vmatmul.mubr.f32.gmra.mrb[146].mxu0 %v914_v22 }
 0x536   :  { %7859 = vmatprep.mubr.f32.mxu0 %v915_v16  ;;  %v11325_v16 = vpop.f32.mrb[32].mxu1 }
 0x537   :  { %v11327_v29 = vpop.f32.mrb[33].mxu1 }
 0x538   :  { %v11315_v37 = vpop.f32.mrb[42].mxu0 }
 0x539   :  { %15480 = vst [vmem:[#allocation27_spill] sm:$0xff] %v11315_v37  ;;  %v2431_v41 = vpop.f32.mrb[43].mxu0  ;;  %7860 = vmatmul.mubr.f32.gmra.mrb[148].mxu0 %v916_v56 }
 0x53a   :  { %7862 = vmatprep.mubr.f32.mxu0 %v917_v12 }
 0x53c   :  { %v11319_v8 = vpop.f32.mrb[44].mxu0 }
 0x53d   :  { %15481 = vst [vmem:[#allocation31_spill] sm:$0xff] %v11319_v8  ;;  %v2436_v45 = vpop.f32.mrb[45].mxu0  ;;  %7863 = vmatmul.mubr.f32.gmra.mrb[150].mxu0 %v918_v5 }
 0x53e   :  { %v11335_v34 = vpop.f32.mrb[34].mxu1 }
 0x53f   :  { %v11337_v45 = vpop.f32.mrb[35].mxu1 }
 0x540   :  { %v11323_v25 = vpop.f32.mrb[46].mxu0 }
 0x541   :  { %15482 = vst [vmem:[#allocation33_spill] sm:$0xff] %v11323_v25  ;;  %v2441_v22 = vpop.f32.mrb[47].mxu0 }
 0x544   :  { %v2444_v3 = vpop.f32.mrb[48].mxu0 }
 0x545   :  { %v11330_v56 = vadd.f32 %v11199_v59, %v2444_v3  ;;  %v2446_v12 = vpop.f32.mrb[49].mxu0  ;;  %v11345_v3 = vpop.f32.mrb[36].mxu1 }
 0x547   :  { %15483 = vst [vmem:[#allocation38_spill] sm:$0xff] %v11330_v56 }
 0x548   :  { %v2449_v41 = vpop.f32.mrb[50].mxu0 }
 0x549   :  { %v11333_v37 = vadd.f32 %v11197_v28, %v2449_v41  ;;  %v2451_v8 = vpop.f32.mrb[51].mxu0  ;;  %v11347_v28 = vpop.f32.mrb[37].mxu1 }
 0x54b   :  { %15484 = vst [vmem:[#allocation39_spill] sm:$0xff] %v11333_v37 }
 0x54c   :  { %v2454_v5 = vpop.f32.mrb[52].mxu0 }
 0x54d   :  { %v11340_v22 = vadd.f32 %v11205_v7, %v2454_v5  ;;  %v2456_v25 = vpop.f32.mrb[53].mxu0 }
 0x54e   :  { %v11355_v25 = vpop.f32.mrb[38].mxu1 }
 0x54f   :  { %15485 = vst [vmem:[#allocation28_spill] sm:$0xff] %v11340_v22 }
 0x550   :  { %v2459_v47 = vpop.f32.mrb[54].mxu0 }
 0x551   :  { %v11343_v14 = vadd.f32 %v11203_v61, %v2459_v47  ;;  %v2461_v59 = vpop.f32.mrb[55].mxu0  ;;  %v11357_v61 = vpop.f32.mrb[39].mxu1 }
 0x553   :  { %15486 = vst [vmem:[#allocation29_spill] sm:$0xff] %v11343_v14 }
 0x554   :  { %v2464_v12 = vpop.f32.mrb[56].mxu0 }
 0x555   :  { %v11350_v8 = vadd.f32 %v11211_v24, %v2464_v12  ;;  %v2466_v41 = vpop.f32.mrb[57].mxu0 }
 0x557   :  { %15487 = vst [vmem:[#allocation30_spill] sm:$0xff] %v11350_v8 }
 0x558   :  { %v2469_v37 = vpop.f32.mrb[58].mxu0 }
 0x559   :  { %v11353_v56 = vadd.f32 %v11209_v43, %v2469_v37  ;;  %v2471_v7 = vpop.f32.mrb[59].mxu0 }
 0x55b   :  { %15488 = vst [vmem:[#allocation32_spill] sm:$0xff] %v11353_v56 }
 0x55c   :  { %v2474_v5 = vpop.f32.mrb[60].mxu0 }
 0x55d   :  { %v11360_v47 = vadd.f32 %v11217_v30, %v2474_v5  ;;  %v2476_v59 = vpop.f32.mrb[61].mxu0 }
 0x560   :  { %v2479_v14 = vpop.f32.mrb[62].mxu0 }
 0x561   :  { %v11363_v22 = vadd.f32 %v11215_v38, %v2479_v14  ;;  %v2481_v24 = vpop.f32.mrb[63].mxu0 }
 0x564   :  { %v2484_v12 = vpop.f32.mrb[64].mxu0 }
 0x565   :  { %v11366_v41 = vadd.f32 %v11225_v33, %v2484_v12  ;;  %v2486_v43 = vpop.f32.mrb[65].mxu0 }
 0x568   :  { %v2489_v37 = vpop.f32.mrb[66].mxu0 }
 0x569   :  { %v11369_v7 = vadd.f32 %v11221_v1, %v2489_v37  ;;  %v2491_v56 = vpop.f32.mrb[67].mxu0 }
 0x56c   :  { %v2494_v8 = vpop.f32.mrb[68].mxu0 }
 0x56d   :  { %v11372_v30 = vadd.f32 %v11235_v40, %v2494_v8  ;;  %v2496_v5 = vpop.f32.mrb[69].mxu0 }
 0x56f   :  { %15489 = vst [vmem:[#allocation34_spill] sm:$0xff] %v11372_v30 }
 0x570   :  { %v2499_v59 = vpop.f32.mrb[70].mxu0 }
 0x571   :  { %v11375_v38 = vadd.f32 %v11231_v6, %v2499_v59  ;;  %v2501_v14 = vpop.f32.mrb[71].mxu0 }
 0x573   :  { %15490 = vst [vmem:[#allocation40_spill] sm:$0xff] %v11375_v38 }
 0x574   :  { %v2504_v24 = vpop.f32.mrb[72].mxu0 }
 0x575   :  { %v11378_v33 = vadd.f32 %v11245_v23, %v2504_v24  ;;  %v2506_v12 = vpop.f32.mrb[73].mxu0 }
 0x578   :  { %v2509_v43 = vpop.f32.mrb[74].mxu0 }
 0x579   :  { %v11381_v1 = vadd.f32 %v11241_v9, %v2509_v43  ;;  %v2511_v56 = vpop.f32.mrb[75].mxu0 }
 0x57c   :  { %v2514_v37 = vpop.f32.mrb[76].mxu0 }
 0x57d   :  { %v11384_v40 = vadd.f32 %v11255_v19, %v2514_v37  ;;  %v2516_v8 = vpop.f32.mrb[77].mxu0 }
 0x57f   :  { %15491 = vst [vmem:[#allocation41_spill] sm:$0xff] %v11384_v40 }
 0x580   :  { %v2519_v5 = vpop.f32.mrb[78].mxu0 }
 0x581   :  { %v11387_v6 = vadd.f32 %v11251_v0, %v2519_v5  ;;  %v2521_v59 = vpop.f32.mrb[79].mxu0 }
 0x583   :  { %15492 = vst [vmem:[#allocation42_spill] sm:$0xff] %v11387_v6 }
 0x584   :  { %v2524_v14 = vpop.f32.mrb[80].mxu0 }
 0x585   :  { %v11390_v23 = vadd.f32 %v11263_v53, %v2524_v14  ;;  %v2526_v24 = vpop.f32.mrb[81].mxu0 }
 0x587   :  { %15493 = vst [vmem:[#allocation43_spill] sm:$0xff] %v11390_v23 }
 0x588   :  { %v2529_v12 = vpop.f32.mrb[82].mxu0 }
 0x589   :  { %v11393_v9 = vadd.f32 %v11259_v21, %v2529_v12  ;;  %v2531_v43 = vpop.f32.mrb[83].mxu0 }
 0x58c   :  { %v2534_v56 = vpop.f32.mrb[84].mxu0 }
 0x58d   :  { %v11396_v19 = vadd.f32 %v11272_v46, %v2534_v56  ;;  %v2536_v37 = vpop.f32.mrb[85].mxu0 }
 0x590   :  { %v2539_v8 = vpop.f32.mrb[86].mxu0 }
 0x591   :  { %v11399_v0 = vadd.f32 %v11268_v18, %v2539_v8  ;;  %v2541_v5 = vpop.f32.mrb[87].mxu0 }
 0x594   :  { %v2544_v59 = vpop.f32.mrb[88].mxu0 }
 0x595   :  { %v11402_v53 = vadd.f32 %v11281_v39, %v2544_v59  ;;  %v2546_v14 = vpop.f32.mrb[89].mxu0 }
 0x598   :  { %v2549_v24 = vpop.f32.mrb[90].mxu0 }
 0x599   :  { %v11405_v21 = vadd.f32 %v11277_v55, %v2549_v24  ;;  %v2551_v12 = vpop.f32.mrb[91].mxu0 }
 0x59b   :  { %15494 = vst [vmem:[#allocation44_spill] sm:$0xff] %v11405_v21 }
 0x59c   :  { %v2554_v43 = vpop.f32.mrb[92].mxu0 }
 0x59d   :  { %v11408_v46 = vadd.f32 %v11289_v17, %v2554_v43  ;;  %v2556_v56 = vpop.f32.mrb[93].mxu0 }
 0x59f   :  { %15495 = vst [vmem:[#allocation45_spill] sm:$0xff] %v11408_v46 }
 0x5a0   :  { %v2559_v37 = vpop.f32.mrb[94].mxu0 }
 0x5a1   :  { %v11411_v18 = vadd.f32 %v11285_v51, %v2559_v37  ;;  %v2561_v8 = vpop.f32.mrb[95].mxu0 }
 0x5a3   :  { %15496 = vst [vmem:[#allocation46_spill] sm:$0xff] %v11411_v18 }
 0x5a4   :  { %v2564_v5 = vpop.f32.mrb[96].mxu0 }
 0x5a5   :  { %v11414_v39 = vadd.f32 %v11297_v63, %v2564_v5  ;;  %v2566_v59 = vpop.f32.mrb[97].mxu0 }
 0x5a8   :  { %v2569_v14 = vpop.f32.mrb[98].mxu0 }
 0x5a9   :  { %v11417_v55 = vadd.f32 %v11293_v10, %v2569_v14  ;;  %v2571_v24 = vpop.f32.mrb[99].mxu0 }
 0x5ac   :  { %v2574_v12 = vpop.f32.mrb[100].mxu0 }
 0x5ad   :  { %v11420_v17 = vadd.f32 %v11305_v42, %v2574_v12  ;;  %v2576_v43 = vpop.f32.mrb[101].mxu0 }
 0x5b0   :  { %v2579_v56 = vpop.f32.mrb[102].mxu0 }
 0x5b1   :  { %v11423_v51 = vadd.f32 %v11301_v32, %v2579_v56  ;;  %v2581_v37 = vpop.f32.mrb[103].mxu0 }
 0x5b3   :  { %15497 = vst [vmem:[#allocation47_spill] sm:$0xff] %v11423_v51 }
 0x5b4   :  { %v2584_v8 = vpop.f32.mrb[104].mxu0 }
 0x5b5   :  { %v11426_v63 = vadd.f32 %v11313_v52, %v2584_v8  ;;  %v2586_v5 = vpop.f32.mrb[105].mxu0 }
 0x5b8   :  { %v2589_v59 = vpop.f32.mrb[106].mxu0 }
 0x5b9   :  { %v11429_v10 = vadd.f32 %v11309_v2, %v2589_v59  ;;  %v2591_v14 = vpop.f32.mrb[107].mxu0 }
 0x5bc   :  { %v2594_v24 = vpop.f32.mrb[108].mxu0 }
 0x5bd   :  { %v11432_v42 = vadd.f32 %v11321_v4, %v2594_v24  ;;  %v2596_v12 = vpop.f32.mrb[109].mxu0 }
 0x5c0   :  { %v2599_v43 = vpop.f32.mrb[110].mxu0 }
 0x5c1   :  { %v11435_v32 = vadd.f32 %v11317_v31, %v2599_v43  ;;  %v2601_v56 = vpop.f32.mrb[111].mxu0 }
 0x5c4   :  { %v2604_v37 = vpop.f32.mrb[112].mxu0 }
 0x5c5   :  { %v11438_v52 = vadd.f32 %v11327_v29, %v2604_v37  ;;  %v2606_v8 = vpop.f32.mrb[113].mxu0 }
 0x5c8   :  { %v2609_v5 = vpop.f32.mrb[114].mxu0 }
 0x5c9   :  { %v11441_v2 = vadd.f32 %v11325_v16, %v2609_v5  ;;  %v2611_v59 = vpop.f32.mrb[115].mxu0 }
 0x5cc   :  { %v2614_v14 = vpop.f32.mrb[116].mxu0 }
 0x5cd   :  { %v11444_v4 = vadd.f32 %v11337_v45, %v2614_v14  ;;  %v2616_v24 = vpop.f32.mrb[117].mxu0 }
 0x5cf   :  { %15498 = vst [vmem:[#allocation48_spill] sm:$0xff] %v11444_v4 }
 0x5d0   :  { %v2619_v12 = vpop.f32.mrb[118].mxu0 }
 0x5d1   :  { %v11447_v31 = vadd.f32 %v11335_v34, %v2619_v12  ;;  %v2621_v43 = vpop.f32.mrb[119].mxu0 }
 0x5d3   :  { %15499 = vst [vmem:[#allocation49_spill] sm:$0xff] %v11447_v31 }
 0x5d4   :  { %v2624_v56 = vpop.f32.mrb[120].mxu0 }
 0x5d5   :  { %v11450_v29 = vadd.f32 %v11347_v28, %v2624_v56  ;;  %v2626_v37 = vpop.f32.mrb[121].mxu0 }
 0x5d8   :  { %v2629_v8 = vpop.f32.mrb[122].mxu0 }
 0x5d9   :  { %v11453_v16 = vadd.f32 %v11345_v3, %v2629_v8  ;;  %v2631_v5 = vpop.f32.mrb[123].mxu0 }
 0x5dc   :  { %v2634_v59 = vpop.f32.mrb[124].mxu0 }
 0x5dd   :  { %v11456_v45 = vadd.f32 %v11357_v61, %v2634_v59  ;;  %v2636_v14 = vpop.f32.mrb[125].mxu0 }
 0x5e0   :  { %v2639_v24 = vpop.f32.mrb[126].mxu0 }
 0x5e1   :  { %v11459_v34 = vadd.f32 %v11355_v25, %v2639_v24  ;;  %v2641_v12 = vpop.f32.mrb[127].mxu0 }
 0x5e4   :  { %v7831_v43 = vpop.f32.mrb[128].mxu0 }
 0x5e5   :  { %v11462_v28 = vadd.f32 %v7831_v43, %v11228_v35  ;;  %v2709_v56 = vpop.f32.mrb[129].mxu0 }
 0x5e6   :  { %v11465_v37 = vadd.f32 %v2709_v56, %v11223_v49 }
 0x5e7   :  { %15500 = vst [vmem:[#allocation50_spill] sm:$0xff] %v11462_v28  ;;  %v3101_v3 = vmul.f32 %v11462_v28, %v11462_v28 }
 0x5e8   :  { %v3100_v61 = vmul.f32 %v11465_v37, %v11465_v37  ;;  %v7834_v8 = vpop.f32.mrb[130].mxu0  ;;  %v3030_v59 = vadd.f32 %v11462_v28, %v11465_v37 }
 0x5e9   :  { %v11472_v5 = vadd.f32 %v7834_v8, %v11238_v48  ;;  %v2719_v25 = vpop.f32.mrb[131].mxu0 }
 0x5ea   :  { %v11477_v35 = vadd.f32 %v2719_v25, %v11233_v50  ;;  %v3164_v14 = vadd.f32 %v3101_v3, %v3100_v61 }
 0x5eb   :  { %v3103_v48 = vmul.f32 %v11472_v5, %v11472_v5 }
 0x5ec   :  { %15501 = vst [vmem:[#allocation51_spill] sm:$0xff] %v11477_v35  ;;  %v3031_v49 = vadd.f32 %v3030_v59, %v11477_v35  ;;  %v3102_v24 = vmul.f32 %v11477_v35, %v11477_v35  ;;  %v7837_v12 = vpop.f32.mrb[132].mxu0 }
 0x5ed   :  { %v11483_v43 = vadd.f32 %v7837_v12, %v11248_v57  ;;  %v2729_v56 = vpop.f32.mrb[133].mxu0 }
 0x5ee   :  { %v3165_v8 = vadd.f32 %v3164_v14, %v3102_v24  ;;  %v11488_v28 = vadd.f32 %v2729_v56, %v11243_v15  ;;  %v3032_v50 = vadd.f32 %v3031_v49, %v11472_v5 }
 0x5ef   :  { %v3105_v35 = vmul.f32 %v11483_v43, %v11483_v43 }
 0x5f0   :  { %v3033_v3 = vadd.f32 %v3032_v50, %v11488_v28  ;;  %v3104_v61 = vmul.f32 %v11488_v28, %v11488_v28  ;;  %v3166_v25 = vadd.f32 %v3165_v8, %v3103_v48  ;;  %v7840_v59 = vpop.f32.mrb[134].mxu0 }
 0x5f1   :  { %v11495_v57 = vadd.f32 %v7840_v59, %v11257_v13  ;;  %v2739_v12 = vpop.f32.mrb[135].mxu0 }
 0x5f2   :  { %v3167_v14 = vadd.f32 %v3166_v25, %v3104_v61  ;;  %v11500_v15 = vadd.f32 %v2739_v12, %v11253_v54  ;;  %v3034_v49 = vadd.f32 %v3033_v3, %v11483_v43 }
 0x5f3   :  { %v3107_v59 = vmul.f32 %v11495_v57, %v11495_v57 }
 0x5f4   :  { %v3035_v24 = vadd.f32 %v3034_v49, %v11500_v15  ;;  %v3106_v56 = vmul.f32 %v11500_v15, %v11500_v15  ;;  %v3168_v48 = vadd.f32 %v3167_v14, %v3105_v35  ;;  %v7843_v8 = vpop.f32.mrb[136].mxu0 }
 0x5f5   :  { %v11507_v13 = vadd.f32 %v7843_v8, %v11265_v62  ;;  %v2749_v50 = vpop.f32.mrb[137].mxu0 }
 0x5f6   :  { %v3169_v61 = vadd.f32 %v3168_v48, %v3106_v56  ;;  %v11512_v54 = vadd.f32 %v2749_v50, %v11261_v44  ;;  %v3036_v3 = vadd.f32 %v3035_v24, %v11495_v57 }
 0x5f7   :  { %v3109_v8 = vmul.f32 %v11507_v13, %v11507_v13 }
 0x5f8   :  { %v3037_v25 = vadd.f32 %v3036_v3, %v11512_v54  ;;  %v3108_v12 = vmul.f32 %v11512_v54, %v11512_v54  ;;  %v3170_v35 = vadd.f32 %v3169_v61, %v3107_v59  ;;  %v7846_v14 = vpop.f32.mrb[138].mxu0 }
 0x5f9   :  { %v11519_v62 = vadd.f32 %v7846_v14, %v11275_v27  ;;  %v2759_v49 = vpop.f32.mrb[139].mxu0 }
 0x5fa   :  { %v3171_v56 = vadd.f32 %v3170_v35, %v3108_v12  ;;  %v11524_v44 = vadd.f32 %v2759_v49, %v11270_v26  ;;  %v3038_v24 = vadd.f32 %v3037_v25, %v11507_v13 }
 0x5fb   :  { %15502 = vst [vmem:[#allocation52_spill] sm:$0xff] %v11519_v62  ;;  %v3111_v14 = vmul.f32 %v11519_v62, %v11519_v62 }
 0x5fc   :  { %v3039_v48 = vadd.f32 %v3038_v24, %v11524_v44  ;;  %v3110_v50 = vmul.f32 %v11524_v44, %v11524_v44  ;;  %v3172_v59 = vadd.f32 %v3171_v56, %v3109_v8  ;;  %v7849_v61 = vpop.f32.mrb[140].mxu0 }
 0x5fd   :  { %v11531_v27 = vadd.f32 %v7849_v61, %v11283_v60  ;;  %v2769_v3 = vpop.f32.mrb[141].mxu0 }
 0x5fe   :  { %v3173_v12 = vadd.f32 %v3172_v59, %v3110_v50  ;;  %v11536_v26 = vadd.f32 %v2769_v3, %v11279_v36  ;;  %v3040_v25 = vadd.f32 %v3039_v48, %v11519_v62  ;;  %v4320_v59 = vld [vmem:[#allocation12] sm:$0xff]  ;;  %v4321_v3 = vld [vmem:[#allocation12 + $0x8] sm:$0xff] }
 0x5ff   :  { %15503 = vst [vmem:[#allocation53_spill] sm:$0xff] %v11531_v27  ;;  %v3113_v61 = vmul.f32 %v11531_v27, %v11531_v27 }
 0x600   :  { %15504 = vst [vmem:[#allocation54_spill] sm:$0xff] %v11536_v26  ;;  %v3041_v35 = vadd.f32 %v3040_v25, %v11536_v26  ;;  %v3112_v49 = vmul.f32 %v11536_v26, %v11536_v26  ;;  %v3174_v8 = vadd.f32 %v3173_v12, %v3111_v14  ;;  %v7852_v56 = vpop.f32.mrb[142].mxu0  ;;  %v8406_v25 = vpack.c.bf16 %v4321_v3, %v4320_v59  ;;  %v4322_v59 = vld [vmem:[#allocation12 + $0x10] sm:$0xff]  ;;  %v4323_v3 = vld [vmem:[#allocation12 + $0x18] sm:$0xff] }
 0x601   :  { %v11543_v60 = vadd.f32 %v7852_v56, %v11291_v20  ;;  %v2779_v24 = vpop.f32.mrb[143].mxu0 }
 0x602   :  { %v3175_v50 = vadd.f32 %v3174_v8, %v3112_v49  ;;  %v11548_v36 = vadd.f32 %v2779_v24, %v11287_v11  ;;  %v3042_v48 = vadd.f32 %v3041_v35, %v11531_v27  ;;  %8407 = vmatpush1.bf16.msra.mxu1 %v8406_v25  ;;  %v15508_v35 = vld [vmem:[#allocation35_spill] sm:$0xff] }
 0x603   :  { %15505 = vst [vmem:[#allocation55_spill] sm:$0xff] %v11543_v60  ;;  %v3115_v11 = vmul.f32 %v11543_v60, %v11543_v60 }
 0x604   :  { %15506 = vst [vmem:[#allocation56_spill] sm:$0xff] %v11548_v36  ;;  %v3043_v26 = vadd.f32 %v3042_v48, %v11548_v36  ;;  %v3114_v14 = vmul.f32 %v11548_v36, %v11548_v36  ;;  %v3176_v20 = vadd.f32 %v3175_v50, %v3113_v61  ;;  %v7855_v12 = vpop.f32.mrb[144].mxu0  ;;  %v15510_v48 = vmov 0.0|0.0   ;;  %v15511_v36 = vld [vmem:[#allocation37_spill] sm:$0xff] }
 0x605   :  { %v11555_v56 = vadd.f32 %v7855_v12, %v11299_v58  ;;  %v2789_v62 = vpop.f32.mrb[145].mxu0  ;;  %8408 = vmatprep.subr.bf16.mxu1 %v15510_v48  ;;  %v8409_v61 = vpack.c.bf16 %v4323_v3, %v4322_v59  ;;  %v4325_v3 = vld [vmem:[#allocation12 + $0x28] sm:$0xff] }
 0x606   :  { %v3177_v49 = vadd.f32 %v3176_v20, %v3114_v14  ;;  %v11560_v8 = vadd.f32 %v2789_v62, %v15508_v35  ;;  %v3044_v24 = vadd.f32 %v3043_v26, %v11543_v60  ;;  %v15513_v20 = vld [vmem:[#allocation36_spill] sm:$0xff] }
 0x607   :  { %15507 = vst [vmem:[#allocation57_spill] sm:$0xff] %v11555_v56  ;;  %8410 = vmatpush1.bf16.msra.mxu1 %v8409_v61  ;;  %v3117_v62 = vmul.f32 %v11555_v56, %v11555_v56 }
 0x608   :  { %15509 = vst [vmem:[#allocation35_spill] sm:$0xff] %v11560_v8  ;;  %v3045_v50 = vadd.f32 %v3044_v24, %v11560_v8  ;;  %v3116_v58 = vmul.f32 %v11560_v8, %v11560_v8  ;;  %v3178_v25 = vadd.f32 %v3177_v49, %v3115_v11  ;;  %v7858_v12 = vpop.f32.mrb[146].mxu0  ;;  %8411 = vmatprep.subr.bf16.mxu1 %v15510_v48  ;;  %v4324_v24 = vld [vmem:[#allocation12 + $0x20] sm:$0xff]  ;;  %v15515_v8 = vld [vmem:[#allocation27_spill] sm:$0xff] }
 0x609   :  { %v11568_v27 = vadd.f32 %v7858_v12, %v15511_v36  ;;  %v2799_v14 = vpop.f32.mrb[147].mxu0  ;;  %v8412_v11 = vpack.c.bf16 %v4325_v3, %v4324_v24  ;;  %v4327_v3 = vld [vmem:[#allocation12 + $0x38] sm:$0xff] }
 0x60a   :  { %v3179_v26 = vadd.f32 %v3178_v25, %v3116_v58  ;;  %v11573_v35 = vadd.f32 %v2799_v14, %v15513_v20  ;;  %v3046_v59 = vadd.f32 %v3045_v50, %v11555_v56  ;;  %v15517_v14 = vld [vmem:[#allocation26_spill] sm:$0xff] }
 0x60b   :  { %15512 = vst [vmem:[#allocation37_spill] sm:$0xff] %v11568_v27  ;;  %8413 = vmatpush1.bf16.msra.mxu1 %v8412_v11  ;;  %v3119_v50 = vmul.f32 %v11568_v27, %v11568_v27 }
 0x60c   :  { %15514 = vst [vmem:[#allocation36_spill] sm:$0xff] %v11573_v35  ;;  %v3047_v49 = vadd.f32 %v3046_v59, %v11573_v35  ;;  %v3118_v36 = vmul.f32 %v11573_v35, %v11573_v35  ;;  %v3180_v61 = vadd.f32 %v3179_v26, %v3117_v62  ;;  %v7861_v12 = vpop.f32.mrb[148].mxu0  ;;  %8414 = vmatprep.subr.bf16.mxu1 %v15510_v48  ;;  %v4326_v59 = vld [vmem:[#allocation12 + $0x30] sm:$0xff]  ;;  %v15519_v35 = vld [vmem:[#allocation33_spill] sm:$0xff] }
 0x60d   :  { %v11581_v60 = vadd.f32 %v7861_v12, %v15515_v8  ;;  %v2809_v58 = vpop.f32.mrb[149].mxu0  ;;  %v8415_v62 = vpack.c.bf16 %v4327_v3, %v4326_v59  ;;  %v4329_v3 = vld [vmem:[#allocation12 + $0x48] sm:$0xff] }
 0x60e   :  { %v3181_v25 = vadd.f32 %v3180_v61, %v3118_v36  ;;  %v11586_v20 = vadd.f32 %v2809_v58, %v15517_v14  ;;  %v3048_v24 = vadd.f32 %v3047_v49, %v11568_v27  ;;  %v15521_v58 = vld [vmem:[#allocation31_spill] sm:$0xff] }
 0x60f   :  { %15516 = vst [vmem:[#allocation27_spill] sm:$0xff] %v11581_v60  ;;  %8416 = vmatpush1.bf16.msra.mxu1 %v8415_v62  ;;  %v3121_v49 = vmul.f32 %v11581_v60, %v11581_v60 }
 0x610   :  { %15518 = vst [vmem:[#allocation26_spill] sm:$0xff] %v11586_v20  ;;  %v3049_v26 = vadd.f32 %v3048_v24, %v11586_v20  ;;  %v3120_v8 = vmul.f32 %v11586_v20, %v11586_v20  ;;  %v3182_v11 = vadd.f32 %v3181_v25, %v3119_v50  ;;  %v7864_v12 = vpop.f32.mrb[150].mxu0  ;;  %8417 = vmatprep.subr.bf16.mxu1 %v15510_v48  ;;  %v4328_v24 = vld [vmem:[#allocation12 + $0x40] sm:$0xff] }
 0x611   :  { %v11594_v56 = vadd.f32 %v7864_v12, %v15519_v35  ;;  %v2819_v36 = vpop.f32.mrb[151].mxu0  ;;  %v8418_v50 = vpack.c.bf16 %v4329_v3, %v4328_v24 }
 0x612   :  { %v3183_v61 = vadd.f32 %v3182_v11, %v3120_v8  ;;  %v11599_v14 = vadd.f32 %v2819_v36, %v15521_v58  ;;  %v3050_v59 = vadd.f32 %v3049_v26, %v11581_v60  ;;  %v4330_v26 = vld [vmem:[#allocation12 + $0x50] sm:$0xff]  ;;  %v4331_v36 = vld [vmem:[#allocation12 + $0x58] sm:$0xff]  ;;  %v15522_v60 = vld [vmem:[#allocation38_spill] sm:$0xff] }
 0x613   :  { %15520 = vst [vmem:[#allocation33_spill] sm:$0xff] %v11594_v56  ;;  %8419 = vmatpush1.bf16.msra.mxu1 %v8418_v50  ;;  %v3123_v8 = vmul.f32 %v11594_v56, %v11594_v56  ;;  %v8421_v58 = vpack.c.bf16 %v4331_v36, %v4330_v26  ;;  %v3124_v24 = vmul.f32 %v15522_v60, %v15522_v60 }
 0x614   :  { %v3051_v25 = vadd.f32 %v3050_v59, %v11599_v14  ;;  %v3122_v35 = vmul.f32 %v11599_v14, %v11599_v14  ;;  %v3184_v62 = vadd.f32 %v3183_v61, %v3121_v49  ;;  %8420 = vmatprep.subr.bf16.mxu1 %v15510_v48  ;;  %v15523_v49 = vld [vmem:[#allocation39_spill] sm:$0xff] }
 0x615   :  { %v3125_v61 = vmul.f32 %v15523_v49, %v15523_v49 }
 0x616   :  { %v3052_v11 = vadd.f32 %v3051_v25, %v11594_v56  ;;  %v3185_v12 = vadd.f32 %v3184_v62, %v3122_v35  ;;  %v4332_v25 = vld [vmem:[#allocation12 + $0x60] sm:$0xff]  ;;  %v4333_v35 = vld [vmem:[#allocation12 + $0x68] sm:$0xff]  ;;  %v15524_v56 = vld [vmem:[#allocation28_spill] sm:$0xff] }
 0x617   :  { %8422 = vmatpush1.bf16.msra.mxu1 %v8421_v58  ;;  %v8424_v62 = vpack.c.bf16 %v4333_v35, %v4332_v25  ;;  %v3126_v26 = vmul.f32 %v15524_v56, %v15524_v56 }
 0x618   :  { %v3053_v59 = vadd.f32 %v3052_v11, %v15522_v60  ;;  %v3186_v3 = vadd.f32 %v3185_v12, %v3123_v8  ;;  %8423 = vmatprep.subr.bf16.mxu1 %v15510_v48  ;;  %v15525_v8 = vld [vmem:[#allocation29_spill] sm:$0xff] }
 0x619   :  { %v3127_v11 = vmul.f32 %v15525_v8, %v15525_v8 }
 0x61a   :  { %v3054_v50 = vadd.f32 %v3053_v59, %v15523_v49  ;;  %v3187_v20 = vadd.f32 %v3186_v3, %v3124_v24  ;;  %v4334_v24 = vld [vmem:[#allocation12 + $0x70] sm:$0xff]  ;;  %v4335_v59 = vld [vmem:[#allocation12 + $0x78] sm:$0xff]  ;;  %v15526_v49 = vld [vmem:[#allocation30_spill] sm:$0xff] }
 0x61b   :  { %8425 = vmatpush1.bf16.msra.mxu1 %v8424_v62  ;;  %v8427_v3 = vpack.c.bf16 %v4335_v59, %v4334_v24  ;;  %v3128_v25 = vmul.f32 %v15526_v49, %v15526_v49  ;;  %v3130_v24 = vmul.f32 %v11360_v47, %v11360_v47 }
 0x61c   :  { %v3055_v36 = vadd.f32 %v3054_v50, %v15524_v56  ;;  %v3188_v27 = vadd.f32 %v3187_v20, %v3125_v61  ;;  %8426 = vmatprep.subr.bf16.mxu1 %v15510_v48  ;;  %v15527_v20 = vld [vmem:[#allocation32_spill] sm:$0xff] }
 0x61d   :  { %v3129_v61 = vmul.f32 %v15527_v20, %v15527_v20 }
 0x61e   :  { %v3056_v12 = vadd.f32 %v3055_v36, %v15525_v8  ;;  %v3189_v58 = vadd.f32 %v3188_v27, %v3126_v26  ;;  %v4336_v27 = vld [vmem:[#allocation12 + $0x80] sm:$0xff]  ;;  %v4337_v26 = vld [vmem:[#allocation12 + $0x88] sm:$0xff] }
 0x61f   :  { %8428 = vmatpush1.bf16.msra.mxu1 %v8427_v3  ;;  %v8430_v36 = vpack.c.bf16 %v4337_v26, %v4336_v27  ;;  %v4339_v3 = vld [vmem:[#allocation12 + $0x98] sm:$0xff] }
 0x620   :  { %v3057_v35 = vadd.f32 %v3056_v12, %v15526_v49  ;;  %v3190_v60 = vadd.f32 %v3189_v58, %v3127_v11  ;;  %8429 = vmatprep.subr.bf16.mxu1 %v15510_v48  ;;  %v3131_v11 = vmul.f32 %v11363_v22, %v11363_v22  ;;  %v11897_v49 = vld [vmem:[#allocation10] ss:$0 sm:$0xff] }
 0x621   :  { %15553 = vst [vmem:[#allocation31_spill] sm:$0xff] %v11897_v49 }
 0x622   :  { %v3058_v50 = vadd.f32 %v3057_v35, %v15527_v20  ;;  %v3191_v62 = vadd.f32 %v3190_v60, %v3128_v25  ;;  %v4338_v60 = vld [vmem:[#allocation12 + $0x90] sm:$0xff]  ;;  %v3132_v35 = vmul.f32 %v11366_v41, %v11366_v41 }
 0x623   :  { %8431 = vmatpush1.bf16.msra.mxu1 %v8430_v36  ;;  %v8433_v25 = vpack.c.bf16 %v4339_v3, %v4338_v60  ;;  %v4341_v36 = vld [vmem:[#allocation12 + $0xa8] sm:$0xff] }
 0x624   :  { %v3059_v59 = vadd.f32 %v3058_v50, %v11360_v47  ;;  %v3192_v8 = vadd.f32 %v3191_v62, %v3129_v61  ;;  %8432 = vmatprep.subr.bf16.mxu1 %v15510_v48  ;;  %v3133_v61 = vmul.f32 %v11369_v7, %v11369_v7 }
 0x626   :  { %v3060_v12 = vadd.f32 %v3059_v59, %v11363_v22  ;;  %v3193_v58 = vadd.f32 %v3192_v8, %v3130_v24  ;;  %v4340_v8 = vld [vmem:[#allocation12 + $0xa0] sm:$0xff]  ;;  %v3134_v59 = vmul.f32 %v11372_v30, %v11372_v30 }
 0x627   :  { %8434 = vmatpush1.bf16.msra.mxu1 %v8433_v25  ;;  %v8436_v24 = vpack.c.bf16 %v4341_v36, %v4340_v8  ;;  %v4342_v25 = vld [vmem:[#allocation12 + $0xb0] sm:$0xff]  ;;  %v4449_v8 = vld [vmem:[#allocation12 + $0x408] sm:$0xff]  ;;  %v3136_v36 = vmul.f32 %v11378_v33, %v11378_v33 }
 0x628   :  { %v3061_v27 = vadd.f32 %v3060_v12, %v11366_v41  ;;  %v3194_v26 = vadd.f32 %v3193_v58, %v3131_v11  ;;  %8435 = vmatprep.subr.bf16.mxu1 %v15510_v48  ;;  %v3135_v11 = vmul.f32 %v11375_v38, %v11375_v38 }
 0x62a   :  { %v3062_v50 = vadd.f32 %v3061_v27, %v11369_v7  ;;  %v3195_v62 = vadd.f32 %v3194_v26, %v3132_v35  ;;  %v4343_v35 = vld [vmem:[#allocation12 + $0xb8] sm:$0xff]  ;;  %v4448_v26 = vld [vmem:[#allocation12 + $0x400] sm:$0xff] }
 0x62b   :  { %8437 = vmatpush1.bf16.msra.mxu1 %v8436_v24  ;;  %v8439_v27 = vpack.c.bf16 %v4343_v35, %v4342_v25  ;;  %v3137_v24 = vmul.f32 %v11381_v1, %v11381_v1  ;;  %v4345_v25 = vld [vmem:[#allocation12 + $0xc8] sm:$0xff]  ;;  %v4450_v35 = vld [vmem:[#allocation12 + $0x410] sm:$0xff] }
 0x62c   :  { %v3063_v60 = vadd.f32 %v3062_v50, %v11372_v30  ;;  %v3196_v3 = vadd.f32 %v3195_v62, %v3133_v61  ;;  %8438 = vmatprep.subr.bf16.mxu1 %v15510_v48  ;;  %v8597_v62 = vpack.c.bf16 %v4449_v8, %v4448_v26  ;;  %v3139_v26 = vmul.f32 %v11387_v6, %v11387_v6 }
 0x62e   :  { %v3064_v12 = vadd.f32 %v3063_v60, %v11375_v38  ;;  %v3197_v58 = vadd.f32 %v3196_v3, %v3134_v59  ;;  %8598 = vmatprep.subr.bf16.mxu0 %v8597_v62  ;;  %v4344_v3 = vld [vmem:[#allocation12 + $0xc0] sm:$0xff]  ;;  %v4451_v38 = vld [vmem:[#allocation12 + $0x418] sm:$0xff] }
 0x62f   :  { %8440 = vmatpush1.bf16.msra.mxu1 %v8439_v27  ;;  %8600 = vmatpush3.bf16.msra.mxu0 %v8597_v62  ;;  %v8442_v30 = vpack.c.bf16 %v4345_v25, %v4344_v3  ;;  %v8601_v27 = vpack.c.bf16 %v4451_v38, %v4450_v35  ;;  %v4452_v62 = vld [vmem:[#allocation12 + $0x420] sm:$0xff]  ;;  %v4453_v3 = vld [vmem:[#allocation12 + $0x428] sm:$0xff] }
 0x630   :  { %v3065_v50 = vadd.f32 %v3064_v12, %v11378_v33  ;;  %v3198_v61 = vadd.f32 %v3197_v58, %v3135_v11  ;;  %8441 = vmatprep.subr.bf16.mxu1 %v15510_v48  ;;  %v3138_v11 = vmul.f32 %v11384_v40, %v11384_v40 }
 0x631   :  { %8602 = vmatprep.subr.bf16.mxu0 %v8601_v27 }
 0x632   :  { %v3066_v59 = vadd.f32 %v3065_v50, %v11381_v1  ;;  %v3199_v60 = vadd.f32 %v3198_v61, %v3136_v36  ;;  %v4346_v50 = vld [vmem:[#allocation12 + $0xd0] sm:$0xff]  ;;  %v4347_v61 = vld [vmem:[#allocation12 + $0xd8] sm:$0xff] }
 0x633   :  { %8443 = vmatpush1.bf16.msra.mxu1 %v8442_v30  ;;  %8604 = vmatpush3.bf16.msra.mxu0 %v8601_v27  ;;  %v8445_v25 = vpack.c.bf16 %v4347_v61, %v4346_v50  ;;  %v4454_v27 = vld [vmem:[#allocation12 + $0x430] sm:$0xff]  ;;  %v4455_v50 = vld [vmem:[#allocation12 + $0x438] sm:$0xff] }
 0x634   :  { %v3067_v12 = vadd.f32 %v3066_v59, %v11384_v40  ;;  %v3200_v58 = vadd.f32 %v3199_v60, %v3137_v24  ;;  %8444 = vmatprep.subr.bf16.mxu1 %v15510_v48  ;;  %v3140_v24 = vmul.f32 %v11390_v23, %v11390_v23  ;;  %v8605_v59 = vpack.c.bf16 %v4453_v3, %v4452_v62  ;;  %v11869_v40 = vld [vmem:[#allocation9] ss:$0 sm:$0xff] }
 0x635   :  { %v3141_v60 = vmul.f32 %v11393_v9, %v11393_v9  ;;  %v8609_v62 = vpack.c.bf16 %v4455_v50, %v4454_v27  ;;  %v3143_v3 = vmul.f32 %v11399_v0, %v11399_v0  ;;  %v3145_v50 = vmul.f32 %v11405_v21, %v11405_v21 }
 0x636   :  { %v3068_v8 = vadd.f32 %v3067_v12, %v11387_v6  ;;  %v3201_v36 = vadd.f32 %v3200_v58, %v3138_v11  ;;  %8606 = vmatprep.subr.bf16.mxu0 %v8605_v59  ;;  %v4348_v12 = vld [vmem:[#allocation12 + $0xe0] sm:$0xff]  ;;  %v4349_v58 = vld [vmem:[#allocation12 + $0xe8] sm:$0xff] }
 0x637   :  { %8446 = vmatpush1.bf16.msra.mxu1 %v8445_v25  ;;  %8608 = vmatpush3.bf16.msra.mxu0 %v8605_v59  ;;  %v8448_v61 = vpack.c.bf16 %v4349_v58, %v4348_v12  ;;  %v4456_v59 = vld [vmem:[#allocation12 + $0x440] sm:$0xff]  ;;  %v4457_v12 = vld [vmem:[#allocation12 + $0x448] sm:$0xff] }
 0x638   :  { %v3069_v30 = vadd.f32 %v3068_v8, %v11390_v23  ;;  %v3202_v38 = vadd.f32 %v3201_v36, %v3139_v26  ;;  %8447 = vmatprep.subr.bf16.mxu1 %v15510_v48  ;;  %v3142_v26 = vmul.f32 %v11396_v19, %v11396_v19  ;;  %8610 = vmatprep.subr.bf16.mxu0 %v8609_v62 }
 0x639   :  { %v8613_v27 = vpack.c.bf16 %v4457_v12, %v4456_v59  ;;  %v3147_v59 = vmul.f32 %v11411_v18, %v11411_v18 }
 0x63a   :  { %v3070_v35 = vadd.f32 %v3069_v30, %v11393_v9  ;;  %v3203_v11 = vadd.f32 %v3202_v38, %v3140_v24  ;;  %v4350_v30 = vld [vmem:[#allocation12 + $0xf0] sm:$0xff]  ;;  %v4351_v38 = vld [vmem:[#allocation12 + $0xf8] sm:$0xff] }
 0x63b   :  { %8449 = vmatpush1.bf16.msra.mxu1 %v8448_v61  ;;  %8612 = vmatpush3.bf16.msra.mxu0 %v8609_v62  ;;  %v8451_v58 = vpack.c.bf16 %v4351_v38, %v4350_v30  ;;  %v4459_v62 = vld [vmem:[#allocation12 + $0x458] sm:$0xff] }
 0x63c   :  { %v3071_v8 = vadd.f32 %v3070_v35, %v11396_v19  ;;  %v3204_v36 = vadd.f32 %v3203_v11, %v3141_v60  ;;  %8450 = vmatprep.subr.bf16.mxu1 %v15510_v48  ;;  %v3144_v60 = vmul.f32 %v11402_v53, %v11402_v53  ;;  %8614 = vmatprep.subr.bf16.mxu0 %v8613_v27  ;;  %v9465_v38 = vld [vmem:[#allocation2] sm:$0xff] }
 0x63e   :  { %v3072_v25 = vadd.f32 %v3071_v8, %v11399_v0  ;;  %v3205_v24 = vadd.f32 %v3204_v36, %v3142_v26  ;;  %v3807_v8 = vld [vmem:[#allocation3 + $0x1] sm:$0xff]  ;;  %v4458_v36 = vld [vmem:[#allocation12 + $0x450] sm:$0xff] }
 0x63f   :  { %8452 = vmatpush1.bf16.msra.mxu1 %v8451_v58  ;;  %8616 = vmatpush3.bf16.msra.mxu0 %v8613_v27  ;;  %v8617_v30 = vpack.c.bf16 %v4459_v62, %v4458_v36  ;;  %v3148_v27 = vmul.f32 %v11414_v39, %v11414_v39  ;;  %v4353_v36 = vld [vmem:[#allocation12 + $0x108] sm:$0xff]  ;;  %v4462_v62 = vld [vmem:[#allocation12 + $0x470] sm:$0xff] }
 0x640   :  { %v3073_v35 = vadd.f32 %v3072_v25, %v11402_v53  ;;  %v3206_v11 = vadd.f32 %v3205_v24, %v3143_v3  ;;  %8453 = vmatprep.subr.bf16.mxu1 %v15510_v48  ;;  %4528 = vmatprep.mubr.f32.mxu1 %v3807_v8  ;;  %v3146_v25 = vmul.f32 %v11408_v46, %v11408_v46  ;;  %v4352_v8 = vld [vmem:[#allocation12 + $0x100] sm:$0xff] }
 0x641   :  { %8618 = vmatprep.subr.bf16.mxu0 %v8617_v30 }
 0x642   :  { %v3074_v61 = vadd.f32 %v3073_v35, %v11405_v21  ;;  %v3207_v26 = vadd.f32 %v3206_v11, %v3144_v60  ;;  %4529 = vmatmul.mubr.f32.vlgmr.msra.gmra.mrb[40].mxu1 %v9465_v38  ;;  %v3808_v60 = vld [vmem:[#allocation3 + $0x9] sm:$0xff]  ;;  %v4355_v21 = vld [vmem:[#allocation12 + $0x118] sm:$0xff] }
 0x643   :  { %8620 = vmatpush3.bf16.msra.mxu0 %v8617_v30  ;;  %v4460_v35 = vld [vmem:[#allocation12 + $0x460] sm:$0xff]  ;;  %v4461_v11 = vld [vmem:[#allocation12 + $0x468] sm:$0xff]  ;;  %4533 = vmatprep.mubr.f32.mxu1 %v3808_v60  ;;  %v8454_v30 = vpack.c.bf16 %v4353_v36, %v4352_v8  ;;  %v4463_v60 = vld [vmem:[#allocation12 + $0x478] sm:$0xff]  ;;  %v3154_v36 = vmul.f32 %v11432_v42, %v11432_v42 }
 0x644   :  { %v3075_v3 = vadd.f32 %v3074_v61, %v11408_v46  ;;  %v3208_v24 = vadd.f32 %v3207_v26, %v3145_v50  ;;  %v8621_v26 = vpack.c.bf16 %v4461_v11, %v4460_v35  ;;  %v4354_v46 = vld [vmem:[#allocation12 + $0x110] sm:$0xff]  ;;  %v3151_v35 = vmul.f32 %v11423_v51, %v11423_v51 }
 0x645   :  { %8455 = vmatpush1.bf16.msra.mxu1 %v8454_v30  ;;  %v3156_v30 = vmul.f32 %v11438_v52, %v11438_v52 }
 0x646   :  { %v3076_v12 = vadd.f32 %v3075_v3, %v11411_v18  ;;  %v3209_v58 = vadd.f32 %v3208_v24, %v3146_v25  ;;  %4534 = vmatmul.mubr.f32.gmra.mrb[42].mxu1 %v9465_v38  ;;  %v3149_v25 = vmul.f32 %v11417_v55, %v11417_v55  ;;  %8622 = vmatprep.subr.bf16.mxu0 %v8621_v26 }
 0x647   :  { %8624 = vmatpush3.bf16.msra.mxu0 %v8621_v26  ;;  %v8625_v18 = vpack.c.bf16 %v4463_v60, %v4462_v62  ;;  %8456 = vmatprep.subr.bf16.mxu1 %v15510_v48 }
 0x648   :  { %v3077_v50 = vadd.f32 %v3076_v12, %v11414_v39  ;;  %v3210_v61 = vadd.f32 %v3209_v58, %v3147_v59  ;;  %v3150_v59 = vmul.f32 %v11420_v17, %v11420_v17  ;;  %v8457_v58 = vpack.c.bf16 %v4355_v21, %v4354_v46 }
 0x649   :  { %8626 = vmatprep.subr.bf16.mxu0 %v8625_v18  ;;  %v3153_v21 = vmul.f32 %v11429_v10, %v11429_v10 }
 0x64a   :  { %v3078_v3 = vadd.f32 %v3077_v50, %v11417_v55  ;;  %v3211_v24 = vadd.f32 %v3210_v61, %v3148_v27  ;;  %v3152_v50 = vmul.f32 %v11426_v63, %v11426_v63  ;;  %8458 = vmatpush1.bf16.msra.mxu1 %v8457_v58 }
 0x64b   :  { %8628 = vmatpush3.bf16.msra.mxu0 %v8625_v18  ;;  %8459 = vmatprep.subr.bf16.mxu1 %v15510_v48 }
 0x64c   :  { %v3079_v38 = vadd.f32 %v3078_v3, %v11420_v17  ;;  %v3212_v12 = vadd.f32 %v3211_v24, %v3149_v25  ;;  %v3155_v25 = vmul.f32 %v11435_v32, %v11435_v32 }
 0x64e   :  { %v3080_v11 = vadd.f32 %v3079_v38, %v11423_v51  ;;  %v3213_v27 = vadd.f32 %v3212_v12, %v3150_v59  ;;  %v3157_v38 = vmul.f32 %v11441_v2, %v11441_v2 }
 0x650   :  { %v3081_v61 = vadd.f32 %v3080_v11, %v11426_v63  ;;  %v3214_v26 = vadd.f32 %v3213_v27, %v3151_v35  ;;  %v4356_v35 = vld [vmem:[#allocation12 + $0x120] sm:$0xff]  ;;  %v4357_v11 = vld [vmem:[#allocation12 + $0x128] sm:$0xff]  ;;  %v3158_v27 = vmul.f32 %v11444_v4, %v11444_v4 }
 0x652   :  { %v3082_v46 = vadd.f32 %v3081_v61, %v11429_v10  ;;  %v3215_v8 = vadd.f32 %v3214_v26, %v3152_v50  ;;  %v8460_v26 = vpack.c.bf16 %v4357_v11, %v4356_v35 }
 0x654   :  { %v3083_v18 = vadd.f32 %v3082_v46, %v11432_v42  ;;  %v3216_v62 = vadd.f32 %v3215_v8, %v3153_v21  ;;  %v3159_v21 = vmul.f32 %v11447_v31, %v11447_v31  ;;  %8461 = vmatpush1.bf16.msra.mxu1 %v8460_v26  ;;  %v4359_v26 = vld [vmem:[#allocation12 + $0x138] sm:$0xff] }
 0x655   :  { %8462 = vmatprep.subr.bf16.mxu1 %v15510_v48 }
 0x656   :  { %v3084_v3 = vadd.f32 %v3083_v18, %v11435_v32  ;;  %v3217_v24 = vadd.f32 %v3216_v62, %v3154_v36  ;;  %v3160_v36 = vmul.f32 %v11450_v29, %v11450_v29 }
 0x658   :  { %v3085_v60 = vadd.f32 %v3084_v3, %v11438_v52  ;;  %v3218_v59 = vadd.f32 %v3217_v24, %v3155_v25  ;;  %v3161_v25 = vmul.f32 %v11453_v16, %v11453_v16 }
 0x65a   :  { %v3086_v12 = vadd.f32 %v3085_v60, %v11441_v2  ;;  %v3219_v58 = vadd.f32 %v3218_v59, %v3156_v30  ;;  %v3162_v30 = vmul.f32 %v11456_v45, %v11456_v45 }
 0x65c   :  { %v3087_v50 = vadd.f32 %v3086_v12, %v11444_v4  ;;  %v3220_v61 = vadd.f32 %v3219_v58, %v3157_v38  ;;  %v3163_v38 = vmul.f32 %v11459_v34, %v11459_v34 }
 0x65e   :  { %v3088_v46 = vadd.f32 %v3087_v50, %v11447_v31  ;;  %v3221_v8 = vadd.f32 %v3220_v61, %v3158_v27  ;;  %v4358_v61 = vld [vmem:[#allocation12 + $0x130] sm:$0xff] }
 0x660   :  { %v3089_v18 = vadd.f32 %v3088_v46, %v11450_v29  ;;  %v3222_v62 = vadd.f32 %v3221_v8, %v3159_v21  ;;  %v8463_v8 = vpack.c.bf16 %v4359_v26, %v4358_v61  ;;  %v15540_v26 = vld [vmem:[#allocation27_spill] sm:$0xff]  ;;  %v15541_v61 = vld [vmem:[#allocation33_spill] sm:$0xff] }
 0x662   :  { %v3090_v3 = vadd.f32 %v3089_v18, %v11453_v16  ;;  %v3223_v24 = vadd.f32 %v3222_v62, %v3160_v36  ;;  %8464 = vmatpush1.bf16.msra.mxu1 %v8463_v8  ;;  %v15532_v8 = vld [vmem:[#allocation53_spill] sm:$0xff] }
 0x663   :  { %8465 = vmatprep.subr.bf16.mxu1 %v15510_v48 }
 0x664   :  { %v3091_v60 = vadd.f32 %v3090_v3, %v11456_v45  ;;  %v3224_v59 = vadd.f32 %v3223_v24, %v3161_v25 }
 0x666   :  { %v3092_v12 = vadd.f32 %v3091_v60, %v11459_v34  ;;  %v3225_v58 = vadd.f32 %v3224_v59, %v3162_v30 }
 0x668   :  { %v3093_v35 = vrot.slane %v3092_v12, 4  ;;  %v3226_v11 = vadd.f32 %v3225_v58, %v3163_v38 }
 0x66a   :  { %v3094_v27 = vadd.f32 %v3093_v35, %v3092_v12  ;;  %v3227_v50 = vrot.slane %v3226_v11, 4  ;;  %v15528_v35 = vld [vmem:[#allocation50_spill] sm:$0xff]  ;;  %v15546_v12 = vld [vmem:[#allocation40_spill] sm:$0xff] }
 0x66c   :  { %v3095_v21 = vrot.slane %v3094_v27, 2  ;;  %v3228_v46 = vadd.f32 %v3227_v50, %v3226_v11  ;;  %v15542_v50 = vld [vmem:[#allocation38_spill] sm:$0xff]  ;;  %v15543_v11 = vld [vmem:[#allocation39_spill] sm:$0xff] }
 0x66e   :  { %v3096_v36 = vadd.f32 %v3095_v21, %v3094_v27  ;;  %v3229_v18 = vrot.slane %v3228_v46, 2  ;;  %v15529_v27 = vld [vmem:[#allocation51_spill] sm:$0xff] }
 0x670   :  { %v3097_v62 = vrot.slane %v3096_v36, 1  ;;  %v3230_v25 = vadd.f32 %v3229_v18, %v3228_v46  ;;  %v15539_v46 = vld [vmem:[#allocation26_spill] sm:$0xff] }
 0x672   :  { %v3098_v3 = vadd.f32 %v3097_v62, %v3096_v36  ;;  %v3231_v24 = vrot.slane %v3230_v25, 1  ;;  %v15533_v36 = vld [vmem:[#allocation56_spill] sm:$0xff] }
 0x673   :  { %v15547_v62 = vld [vmem:[#allocation44_spill] sm:$0xff] }
 0x674   :  { %v11745_v60 = vmul.f32 0.001953125, %v3098_v3  ;;  %v3232_v30 = vadd.f32 %v3231_v24, %v3230_v25  ;;  %v15530_v3 = vld [vmem:[#allocation52_spill] sm:$0xff]  ;;  %v15545_v24 = vld [vmem:[#allocation34_spill] sm:$0xff]  ;;  %v15548_v25 = vld [vmem:[#allocation45_spill] sm:$0xff] }
 0x676   :  { %v3233_v59 = vmul.f32 0.001953125, %v3232_v30  ;;  %v3234_v38 = vmul.f32 %v11745_v60, %v11745_v60  ;;  %v15550_v48 = vsub.f32 %v11599_v14, %v11745_v60  ;;  %v15551_v6 = vsub.f32 %v11465_v37, %v11745_v60 }
 0x677   :  { %v15552_v58 = vsub.f32 %v15528_v35, %v11745_v60  ;;  %v15555_v37 = vsub.f32 %v11472_v5, %v11745_v60  ;;  %v15556_v35 = vsub.f32 %v11488_v28, %v11745_v60  ;;  %v15557_v4 = vsub.f32 %v11483_v43, %v11745_v60 }
 0x678   :  { %v3235_v21 = vsub.f32 %v3233_v59, %v3234_v38  ;;  %v15531_v59 = vld [vmem:[#allocation54_spill] sm:$0xff]  ;;  %v15538_v38 = vld [vmem:[#allocation37_spill] sm:$0xff]  ;;  %v15558_v5 = vsub.f32 %v11500_v15, %v11745_v60  ;;  %v15559_v28 = vsub.f32 %v11495_v57, %v11745_v60  ;;  %v15560_v43 = vsub.f32 %v11512_v54, %v11745_v60 }
 0x67a   :  { %v3300_v30 = vadd.f32 1e-05, %v3235_v21  ;;  %v15537_v21 = vld [vmem:[#allocation36_spill] sm:$0xff] }
 0x67c   :  { %9459 = vrsqrt.f32 %v3300_v30  ;;  %v15549_v30 = vld [vmem:[#allocation46_spill] sm:$0xff] }
 0x686   :  { %v11867_v51 = vpop.eup %9459 }
 0x687   :  { %v3324_v18 = vmul.f32 %v11867_v51, %v15550_v48  ;;  %v11889_v31 = vmul.f32 %v11867_v51, %v15551_v6  ;;  %v11895_v23 = vmul.f32 %v11867_v51, %v15552_v58  ;;  %v15554_v48 = vsub.f32 %v15529_v27, %v11745_v60 }
 0x688   :  { %v11909_v6 = vmul.f32 %v11867_v51, %v15555_v37  ;;  %v11915_v58 = vmul.f32 %v11867_v51, %v15556_v35  ;;  %v11921_v27 = vmul.f32 %v11867_v51, %v15557_v4  ;;  %v11928_v37 = vmul.f32 %v11867_v51, %v15558_v5 }
 0x689   :  { %v11903_v14 = vmul.f32 %v11867_v51, %v15554_v48  ;;  %v3394_v48 = vmul.f32 %v11869_v40, %v3324_v18  ;;  %v11934_v35 = vmul.f32 %v11867_v51, %v15559_v28  ;;  %v11940_v4 = vmul.f32 %v11867_v51, %v15560_v43 }
 0x68a   :  { %v15561_v18 = vsub.f32 %v11507_v13, %v11745_v60  ;;  %v15562_v5 = vsub.f32 %v11524_v44, %v11745_v60  ;;  %v15563_v28 = vsub.f32 %v15530_v3, %v11745_v60  ;;  %v15565_v43 = vsub.f32 %v15531_v59, %v11745_v60 }
 0x68b   :  { %v15567_v44 = vsub.f32 %v15532_v8, %v11745_v60  ;;  %v15568_v3 = vsub.f32 %v15533_v36, %v11745_v60 }
 0x68c   :  { %v11946_v15 = vmul.f32 %v11867_v51, %v15561_v18  ;;  %v11952_v57 = vmul.f32 %v11867_v51, %v15562_v5  ;;  %v11958_v54 = vmul.f32 %v11867_v51, %v15563_v28  ;;  %v11964_v13 = vmul.f32 %v11867_v51, %v15565_v43 }
 0x68d   :  { %v3464_v18 = vadd.f32 %v11897_v49, %v3394_v48  ;;  %v11971_v5 = vmul.f32 %v11867_v51, %v15567_v44  ;;  %v11977_v28 = vmul.f32 %v11867_v51, %v15568_v3  ;;  %v15574_v44 = vld [vmem:[#allocation57_spill] sm:$0xff]  ;;  %v15576_v3 = vsub.f32 %v15537_v21, %v11745_v60 }
 0x68e   :  { %15564 = vst [vmem:[#allocation28_spill] sm:$0xff] %v11958_v54  ;;  %15566 = vst [vmem:[#allocation32_spill] sm:$0xff] %v11964_v13  ;;  %v15569_v54 = vld [vmem:[#allocation55_spill] sm:$0xff]  ;;  %v15575_v49 = vsub.f32 %v15574_v44, %v11745_v60 }
 0x68f   :  { %v15570_v59 = vsub.f32 %v15569_v54, %v11745_v60  ;;  %v15571_v13 = vld [vmem:[#allocation35_spill] sm:$0xff]  ;;  %v12001_v54 = vmul.f32 %v11867_v51, %v15576_v3  ;;  %v15580_v3 = vsub.f32 %v15541_v61, %v11745_v60 }
 0x690   :  { %v15572_v48 = vsub.f32 %v15571_v13, %v11745_v60  ;;  %v11995_v36 = vmul.f32 %v11867_v51, %v15575_v49  ;;  %v15579_v49 = vsub.f32 %v15540_v26, %v11745_v60 }
 0x691   :  { %v11983_v43 = vmul.f32 %v11867_v51, %v15570_v59  ;;  %v15577_v59 = vsub.f32 %v15538_v38, %v11745_v60  ;;  %v12025_v38 = vmul.f32 %v11867_v51, %v15580_v3 }
 0x692   :  { %v11989_v8 = vmul.f32 %v11867_v51, %v15572_v48  ;;  %v3528_v48 = vmax.f32 %v3464_v18, 0.0  ;;  %v12019_v21 = vmul.f32 %v11867_v51, %v15579_v49  ;;  %v15581_v18 = vsub.f32 %v15542_v50, %v11745_v60  ;;  %v15585_v49 = vld [vmem:[#allocation29_spill] sm:$0xff] }
 0x693   :  { %v12007_v13 = vmul.f32 %v11867_v51, %v15577_v59  ;;  %v15584_v59 = vsub.f32 %v15524_v56, %v11745_v60  ;;  %v15586_v3 = vsub.f32 %v15585_v49, %v11745_v60 }
 0x694   :  { %15573 = vst [vmem:[#allocation50_spill] sm:$0xff] %v11989_v8  ;;  %v15578_v8 = vsub.f32 %v15539_v46, %v11745_v60  ;;  %v12031_v46 = vmul.f32 %v11867_v51, %v15581_v18  ;;  %3701 = vst [vmem:[#allocation3 + $0x121] sm:$0xff] %v3528_v48  ;;  %v15587_v18 = vld [vmem:[#allocation30_spill] sm:$0xff]  ;;  %v15591_v48 = vsub.f32 %v11363_v22, %v11745_v60 }
 0x695   :  { %v12043_v61 = vmul.f32 %v11867_v51, %v15584_v59  ;;  %v12049_v50 = vmul.f32 %v11867_v51, %v15586_v3  ;;  %v15590_v59 = vsub.f32 %v11360_v47, %v11745_v60 }
 0x696   :  { %v12013_v44 = vmul.f32 %v11867_v51, %v15578_v8  ;;  %15582 = vst [vmem:[#allocation51_spill] sm:$0xff] %v12031_v46  ;;  %v15583_v8 = vsub.f32 %v15543_v11, %v11745_v60  ;;  %v15588_v46 = vsub.f32 %v15587_v18, %v11745_v60  ;;  %v12073_v3 = vmul.f32 %v11867_v51, %v15591_v48 }
 0x697   :  { %v12067_v49 = vmul.f32 %v11867_v51, %v15590_v59  ;;  %v15593_v18 = vsub.f32 %v11369_v7, %v11745_v60  ;;  %v15595_v59 = vsub.f32 %v15546_v12, %v11745_v60  ;;  %v15597_v48 = vsub.f32 %v11378_v33, %v11745_v60 }
 0x698   :  { %v12037_v26 = vmul.f32 %v11867_v51, %v15583_v8  ;;  %v12055_v11 = vmul.f32 %v11867_v51, %v15588_v46  ;;  %v15589_v8 = vsub.f32 %v15527_v20, %v11745_v60  ;;  %v15592_v46 = vsub.f32 %v11366_v41, %v11745_v60 }
 0x699   :  { %v12085_v47 = vmul.f32 %v11867_v51, %v15593_v18  ;;  %v12097_v41 = vmul.f32 %v11867_v51, %v15595_v59  ;;  %v12103_v7 = vmul.f32 %v11867_v51, %v15597_v48  ;;  %v15600_v18 = vld [vmem:[#allocation41_spill] sm:$0xff]  ;;  %v15602_v59 = vld [vmem:[#allocation42_spill] sm:$0xff]  ;;  %v15604_v48 = vld [vmem:[#allocation43_spill] sm:$0xff] }
 0x69a   :  { %v12061_v56 = vmul.f32 %v11867_v51, %v15589_v8  ;;  %v12079_v20 = vmul.f32 %v11867_v51, %v15592_v46  ;;  %v15594_v8 = vsub.f32 %v15545_v24, %v11745_v60  ;;  %v15599_v46 = vsub.f32 %v11381_v1, %v11745_v60 }
 0x69b   :  { %15596 = vst [vmem:[#allocation52_spill] sm:$0xff] %v12097_v41  ;;  %15598 = vst [vmem:[#allocation54_spill] sm:$0xff] %v12103_v7  ;;  %v15603_v41 = vsub.f32 %v15602_v59, %v11745_v60  ;;  %v15605_v7 = vsub.f32 %v15604_v48, %v11745_v60 }
 0x69c   :  { %v12091_v22 = vmul.f32 %v11867_v51, %v15594_v8  ;;  %v12109_v24 = vmul.f32 %v11867_v51, %v15599_v46  ;;  %v15601_v8 = vsub.f32 %v15600_v18, %v11745_v60  ;;  %v15606_v46 = vsub.f32 %v11393_v9, %v11745_v60 }
 0x69d   :  { %v12121_v33 = vmul.f32 %v11867_v51, %v15603_v41  ;;  %v12127_v1 = vmul.f32 %v11867_v51, %v15605_v7  ;;  %v15608_v41 = vsub.f32 %v11399_v0, %v11745_v60  ;;  %v15609_v7 = vsub.f32 %v11402_v53, %v11745_v60 }
 0x69e   :  { %v12115_v12 = vmul.f32 %v11867_v51, %v15601_v8  ;;  %v12133_v18 = vmul.f32 %v11867_v51, %v15606_v46  ;;  %v15607_v8 = vsub.f32 %v11396_v19, %v11745_v60  ;;  %v15610_v46 = vsub.f32 %v15547_v62, %v11745_v60 }
 0x69f   :  { %v12145_v48 = vmul.f32 %v11867_v51, %v15608_v41  ;;  %v12151_v9 = vmul.f32 %v11867_v51, %v15609_v7  ;;  %v15612_v41 = vsub.f32 %v15549_v30, %v11745_v60  ;;  %v15614_v7 = vsub.f32 %v11414_v39, %v11745_v60 }
 0x6a0   :  { %v12139_v59 = vmul.f32 %v11867_v51, %v15607_v8  ;;  %v12157_v19 = vmul.f32 %v11867_v51, %v15610_v46  ;;  %v15611_v8 = vsub.f32 %v15548_v25, %v11745_v60  ;;  %v15615_v46 = vsub.f32 %v11417_v55, %v11745_v60 }
 0x6a1   :  { %v12169_v53 = vmul.f32 %v11867_v51, %v15612_v41  ;;  %v12175_v62 = vmul.f32 %v11867_v51, %v15614_v7  ;;  %v15617_v41 = vld [vmem:[#allocation47_spill] sm:$0xff]  ;;  %v15619_v7 = vsub.f32 %v11426_v63, %v11745_v60 }
 0x6a2   :  { %v12163_v0 = vmul.f32 %v11867_v51, %v15611_v8  ;;  %v12181_v25 = vmul.f32 %v11867_v51, %v15615_v46  ;;  %v15616_v8 = vsub.f32 %v11420_v17, %v11745_v60  ;;  %v15620_v46 = vsub.f32 %v11429_v10, %v11745_v60 }
 0x6a3   :  { %15613 = vst [vmem:[#allocation53_spill] sm:$0xff] %v12169_v53  ;;  %v15618_v53 = vsub.f32 %v15617_v41, %v11745_v60  ;;  %v12199_v55 = vmul.f32 %v11867_v51, %v15619_v7  ;;  %v15625_v7 = vsub.f32 %v11438_v52, %v11745_v60 }
 0x6a4   :  { %v12187_v30 = vmul.f32 %v11867_v51, %v15616_v8  ;;  %v12205_v17 = vmul.f32 %v11867_v51, %v15620_v46  ;;  %v15621_v8 = vsub.f32 %v11432_v42, %v11745_v60  ;;  %v15626_v46 = vsub.f32 %v11441_v2, %v11745_v60 }
 0x6a5   :  { %v12193_v39 = vmul.f32 %v11867_v51, %v15618_v53  ;;  %v15623_v53 = vsub.f32 %v11435_v32, %v11745_v60  ;;  %v12223_v10 = vmul.f32 %v11867_v51, %v15625_v7  ;;  %v15631_v7 = vsub.f32 %v11450_v29, %v11745_v60 }
 0x6a6   :  { %v12211_v41 = vmul.f32 %v11867_v51, %v15621_v8  ;;  %v12229_v42 = vmul.f32 %v11867_v51, %v15626_v46  ;;  %v15627_v8 = vld [vmem:[#allocation48_spill] sm:$0xff]  ;;  %v15632_v46 = vsub.f32 %v11453_v16, %v11745_v60  ;;  %v12273_v16 = vmul.f32 %v11869_v40, %v11895_v23 }
 0x6a7   :  { %v12217_v63 = vmul.f32 %v11867_v51, %v15623_v53  ;;  %v15629_v53 = vld [vmem:[#allocation49_spill] sm:$0xff]  ;;  %v12247_v2 = vmul.f32 %v11867_v51, %v15631_v7  ;;  %v12269_v7 = vmul.f32 %v11869_v40, %v11889_v31  ;;  %v12289_v31 = vmul.f32 %v11869_v40, %v11921_v27 }
 0x6a8   :  { %15622 = vst [vmem:[#allocation56_spill] sm:$0xff] %v12211_v41  ;;  %v15628_v41 = vsub.f32 %v15627_v8, %v11745_v60  ;;  %v12253_v8 = vmul.f32 %v11867_v51, %v15632_v46  ;;  %v12281_v46 = vmul.f32 %v11869_v40, %v11909_v6  ;;  %v12293_v23 = vmul.f32 %v11869_v40, %v11928_v37  ;;  %v15636_v37 = vld [vmem:[#allocation32_spill] sm:$0xff] }
 0x6a9   :  { %15624 = vst [vmem:[#allocation36_spill] sm:$0xff] %v12217_v63  ;;  %v15630_v63 = vsub.f32 %v15629_v53, %v11745_v60  ;;  %v12309_v6 = vmul.f32 %v11869_v40, %v11952_v57  ;;  %v12329_v57 = vmul.f32 %v11869_v40, %v11983_v43  ;;  %v12349_v43 = vmul.f32 %v11869_v40, %v12013_v44 }
 0x6aa   :  { %v12235_v32 = vmul.f32 %v11867_v51, %v15628_v41  ;;  %v15633_v41 = vsub.f32 %v11456_v45, %v11745_v60  ;;  %v12277_v45 = vmul.f32 %v11869_v40, %v11903_v14  ;;  %v12305_v14 = vmul.f32 %v11869_v40, %v11946_v15 }
 0x6ab   :  { %v12241_v52 = vmul.f32 %v11867_v51, %v15630_v63  ;;  %v15634_v63 = vsub.f32 %v11459_v34, %v11745_v60  ;;  %v12297_v34 = vmul.f32 %v11869_v40, %v11934_v35  ;;  %v12301_v60 = vmul.f32 %v11869_v40, %v11940_v4 }
 0x6ac   :  { %v12259_v53 = vmul.f32 %v11867_v51, %v15633_v41  ;;  %v12317_v35 = vmul.f32 %v11869_v40, %v15636_v37  ;;  %v12321_v4 = vmul.f32 %v11869_v40, %v11971_v5  ;;  %v12325_v15 = vmul.f32 %v11869_v40, %v11977_v28  ;;  %v15637_v41 = vld [vmem:[#allocation50_spill] sm:$0xff] }
 0x6ad   :  { %v12265_v29 = vmul.f32 %v11867_v51, %v15634_v63  ;;  %v12285_v51 = vmul.f32 %v11869_v40, %v11915_v58  ;;  %v15635_v58 = vld [vmem:[#allocation28_spill] sm:$0xff]  ;;  %v12333_v63 = vmul.f32 %v11869_v40, %v15637_v41  ;;  %v12341_v5 = vmul.f32 %v11869_v40, %v12001_v54  ;;  %v15638_v41 = vld [vmem:[#allocation51_spill] sm:$0xff] }
 0x6ae   :  { %v12313_v27 = vmul.f32 %v11869_v40, %v15635_v58  ;;  %v12337_v58 = vmul.f32 %v11869_v40, %v11995_v36  ;;  %v12345_v28 = vmul.f32 %v11869_v40, %v12007_v13  ;;  %v12353_v37 = vmul.f32 %v11869_v40, %v12019_v21 }
 0x6af   :  { %v12357_v36 = vmul.f32 %v11869_v40, %v12025_v38  ;;  %v12361_v54 = vmul.f32 %v11869_v40, %v15638_v41  ;;  %v12365_v13 = vmul.f32 %v11869_v40, %v12037_v26  ;;  %v12369_v44 = vmul.f32 %v11869_v40, %v12043_v61 }
 0x6b0   :  { %v12373_v21 = vmul.f32 %v11869_v40, %v12049_v50  ;;  %v12377_v38 = vmul.f32 %v11869_v40, %v12055_v11  ;;  %v12381_v41 = vmul.f32 %v11869_v40, %v12061_v56  ;;  %v12385_v26 = vmul.f32 %v11869_v40, %v12067_v49 }
 0x6b1   :  { %v12389_v61 = vmul.f32 %v11869_v40, %v12073_v3  ;;  %v12393_v50 = vmul.f32 %v11869_v40, %v12079_v20  ;;  %v12397_v11 = vmul.f32 %v11869_v40, %v12085_v47  ;;  %v12401_v56 = vmul.f32 %v11869_v40, %v12091_v22 }
 0x6b2   :  { %15639 = vst [vmem:[#allocation37_spill] sm:$0xff] %v12381_v41  ;;  %15640 = vst [vmem:[#allocation26_spill] sm:$0xff] %v12385_v26  ;;  %v15641_v41 = vld [vmem:[#allocation52_spill] sm:$0xff]  ;;  %v15642_v26 = vld [vmem:[#allocation54_spill] sm:$0xff]  ;;  %v12413_v20 = vmul.f32 %v11869_v40, %v12109_v24  ;;  %v12417_v47 = vmul.f32 %v11869_v40, %v12115_v12  ;;  %v12421_v22 = vmul.f32 %v11869_v40, %v12121_v33 }
 0x6b3   :  { %v12405_v49 = vmul.f32 %v11869_v40, %v15641_v41  ;;  %v12409_v3 = vmul.f32 %v11869_v40, %v15642_v26  ;;  %v12425_v41 = vmul.f32 %v11869_v40, %v12127_v1  ;;  %v12429_v26 = vmul.f32 %v11869_v40, %v12133_v18 }
 0x6b4   :  { %v12433_v24 = vmul.f32 %v11869_v40, %v12139_v59  ;;  %v12437_v12 = vmul.f32 %v11869_v40, %v12145_v48  ;;  %v12441_v33 = vmul.f32 %v11869_v40, %v12151_v9  ;;  %v12445_v1 = vmul.f32 %v11869_v40, %v12157_v19 }
 0x6b5   :  { %15643 = vst [vmem:[#allocation27_spill] sm:$0xff] %v12429_v26  ;;  %v12449_v18 = vmul.f32 %v11869_v40, %v12163_v0  ;;  %v15644_v26 = vld [vmem:[#allocation53_spill] sm:$0xff]  ;;  %v12457_v48 = vmul.f32 %v11869_v40, %v12175_v62  ;;  %v12461_v9 = vmul.f32 %v11869_v40, %v12181_v25  ;;  %v12465_v19 = vmul.f32 %v11869_v40, %v12187_v30 }
 0x6b6   :  { %v12453_v59 = vmul.f32 %v11869_v40, %v15644_v26  ;;  %v12469_v0 = vmul.f32 %v11869_v40, %v12193_v39  ;;  %v12473_v26 = vmul.f32 %v11869_v40, %v12199_v55  ;;  %v12477_v62 = vmul.f32 %v11869_v40, %v12205_v17 }
 0x6b7   :  { %15645 = vst [vmem:[#allocation33_spill] sm:$0xff] %v12457_v48  ;;  %15646 = vst [vmem:[#allocation38_spill] sm:$0xff] %v12461_v9  ;;  %v15647_v48 = vld [vmem:[#allocation56_spill] sm:$0xff]  ;;  %v12489_v39 = vmul.f32 %v11869_v40, %v12223_v10  ;;  %v12493_v55 = vmul.f32 %v11869_v40, %v12229_v42  ;;  %v12497_v17 = vmul.f32 %v11869_v40, %v12235_v32 }
 0x6b8   :  { %v12481_v25 = vmul.f32 %v11869_v40, %v15647_v48  ;;  %v15648_v9 = vld [vmem:[#allocation36_spill] sm:$0xff]  ;;  %v12501_v48 = vmul.f32 %v11869_v40, %v12241_v52  ;;  %v12509_v10 = vmul.f32 %v11869_v40, %v12253_v8  ;;  %v12513_v42 = vmul.f32 %v11869_v40, %v12259_v53 }
 0x6b9   :  { %v12485_v30 = vmul.f32 %v11869_v40, %v15648_v9  ;;  %15649 = vst [vmem:[#allocation39_spill] sm:$0xff] %v12497_v17  ;;  %v12505_v9 = vmul.f32 %v11869_v40, %v12247_v2  ;;  %v12517_v32 = vmul.f32 %v11869_v40, %v12265_v29  ;;  %v15650_v17 = vld [vmem:[#allocation31_spill] sm:$0xff] }
 0x6ba   :  { %v12521_v52 = vadd.f32 %v15650_v17, %v12269_v7  ;;  %v12525_v2 = vadd.f32 %v15650_v17, %v12273_v16  ;;  %v12529_v8 = vadd.f32 %v15650_v17, %v12277_v45  ;;  %v12533_v53 = vadd.f32 %v15650_v17, %v12281_v46 }
 0x6bb   :  { %v12537_v40 = vadd.f32 %v15650_v17, %v12285_v51  ;;  %v12541_v29 = vadd.f32 %v15650_v17, %v12289_v31  ;;  %v12545_v7 = vadd.f32 %v15650_v17, %v12293_v23  ;;  %v12549_v16 = vadd.f32 %v15650_v17, %v12297_v34 }
 0x6bc   :  { %v12553_v45 = vadd.f32 %v15650_v17, %v12301_v60  ;;  %v12557_v46 = vadd.f32 %v15650_v17, %v12305_v14  ;;  %v12561_v51 = vadd.f32 %v15650_v17, %v12309_v6  ;;  %v12565_v31 = vadd.f32 %v15650_v17, %v12313_v27 }
 0x6bd   :  { %v12569_v23 = vadd.f32 %v15650_v17, %v12317_v35  ;;  %v12573_v34 = vadd.f32 %v15650_v17, %v12321_v4  ;;  %v12577_v60 = vadd.f32 %v15650_v17, %v12325_v15  ;;  %v12581_v14 = vadd.f32 %v15650_v17, %v12329_v57 }
 0x6be   :  { %v12585_v6 = vadd.f32 %v15650_v17, %v12333_v63  ;;  %v12589_v27 = vadd.f32 %v15650_v17, %v12337_v58  ;;  %v12593_v35 = vadd.f32 %v15650_v17, %v12341_v5  ;;  %v12597_v4 = vadd.f32 %v15650_v17, %v12345_v28 }
 0x6bf   :  { %v12601_v15 = vadd.f32 %v15650_v17, %v12349_v43  ;;  %v12605_v57 = vadd.f32 %v15650_v17, %v12353_v37  ;;  %v12609_v63 = vadd.f32 %v15650_v17, %v12357_v36  ;;  %v12613_v58 = vadd.f32 %v15650_v17, %v12361_v54  ;;  %v15652_v36 = vld [vmem:[#allocation37_spill] sm:$0xff] }
 0x6c0   :  { %v12617_v5 = vadd.f32 %v15650_v17, %v12365_v13  ;;  %v12621_v28 = vadd.f32 %v15650_v17, %v12369_v44  ;;  %v12625_v43 = vadd.f32 %v15650_v17, %v12373_v21  ;;  %v12629_v37 = vadd.f32 %v15650_v17, %v12377_v38 }
 0x6c1   :  { %15651 = vst [vmem:[#allocation34_spill] sm:$0xff] %v12613_v58  ;;  %v12633_v54 = vadd.f32 %v15650_v17, %v15652_v36  ;;  %v15653_v58 = vld [vmem:[#allocation26_spill] sm:$0xff]  ;;  %v12641_v44 = vadd.f32 %v15650_v17, %v12389_v61  ;;  %v12645_v21 = vadd.f32 %v15650_v17, %v12393_v50  ;;  %v12649_v38 = vadd.f32 %v15650_v17, %v12397_v11 }
 0x6c2   :  { %v12637_v13 = vadd.f32 %v15650_v17, %v15653_v58  ;;  %v12653_v36 = vadd.f32 %v15650_v17, %v12401_v56  ;;  %v12657_v58 = vadd.f32 %v15650_v17, %v12405_v49  ;;  %v12661_v61 = vadd.f32 %v15650_v17, %v12409_v3 }
 0x6c3   :  { %v12665_v50 = vadd.f32 %v15650_v17, %v12413_v20  ;;  %v12669_v11 = vadd.f32 %v15650_v17, %v12417_v47  ;;  %v12673_v56 = vadd.f32 %v15650_v17, %v12421_v22  ;;  %v12677_v49 = vadd.f32 %v15650_v17, %v12425_v41 }
 0x6c4   :  { %15654 = vst [vmem:[#allocation40_spill] sm:$0xff] %v12657_v58  ;;  %v15655_v58 = vld [vmem:[#allocation27_spill] sm:$0xff]  ;;  %v12685_v20 = vadd.f32 %v15650_v17, %v12433_v24  ;;  %v12689_v47 = vadd.f32 %v15650_v17, %v12437_v12  ;;  %v12693_v22 = vadd.f32 %v15650_v17, %v12441_v33  ;;  %v12697_v41 = vadd.f32 %v15650_v17, %v12445_v1 }
 0x6c5   :  { %v12681_v3 = vadd.f32 %v15650_v17, %v15655_v58  ;;  %v12701_v58 = vadd.f32 %v15650_v17, %v12449_v18  ;;  %v12705_v24 = vadd.f32 %v15650_v17, %v12453_v59  ;;  %v12717_v1 = vadd.f32 %v15650_v17, %v12465_v19 }
 0x6c6   :  { %15656 = vst [vmem:[#allocation44_spill] sm:$0xff] %v12685_v20  ;;  %15657 = vst [vmem:[#allocation45_spill] sm:$0xff] %v12689_v47  ;;  %v15660_v20 = vld [vmem:[#allocation33_spill] sm:$0xff]  ;;  %v15661_v47 = vld [vmem:[#allocation38_spill] sm:$0xff]  ;;  %v12721_v18 = vadd.f32 %v15650_v17, %v12469_v0  ;;  %v12725_v59 = vadd.f32 %v15650_v17, %v12473_v26  ;;  %v12737_v19 = vadd.f32 %v15650_v17, %v12485_v30 }
 0x6c7   :  { %15658 = vst [vmem:[#allocation46_spill] sm:$0xff] %v12693_v22  ;;  %15659 = vst [vmem:[#allocation55_spill] sm:$0xff] %v12697_v41  ;;  %v12709_v12 = vadd.f32 %v15650_v17, %v15660_v20  ;;  %v12713_v33 = vadd.f32 %v15650_v17, %v15661_v47  ;;  %v12729_v20 = vadd.f32 %v15650_v17, %v12477_v62 }
 0x6c8   :  { %15662 = vst [vmem:[#allocation35_spill] sm:$0xff] %v12725_v59  ;;  %v12733_v47 = vadd.f32 %v15650_v17, %v12481_v25  ;;  %v12741_v0 = vadd.f32 %v15650_v17, %v12489_v39  ;;  %v12745_v26 = vadd.f32 %v15650_v17, %v12493_v55  ;;  %v15663_v59 = vld [vmem:[#allocation39_spill] sm:$0xff]  ;;  %v12753_v25 = vadd.f32 %v15650_v17, %v12501_v48 }
 0x6c9   :  { %v12749_v62 = vadd.f32 %v15650_v17, %v15663_v59  ;;  %v12757_v30 = vadd.f32 %v15650_v17, %v12505_v9  ;;  %v12761_v39 = vadd.f32 %v15650_v17, %v12509_v10  ;;  %v12765_v55 = vadd.f32 %v15650_v17, %v12513_v42 }
 0x6ca   :  { %15665 = vst [vmem:[#allocation29_spill] sm:$0xff] %v12753_v25  ;;  %v12769_v59 = vadd.f32 %v15650_v17, %v12517_v32  ;;  %v15322_v48 = vmax.f32 %v12525_v2, 0.0  ;;  %v15324_v25 = vmax.f32 %v12529_v8, 0.0  ;;  %v15323_v9 = vmax.f32 %v12533_v53, 0.0 }
 0x6cb   :  { %15664 = vst [vmem:[#allocation57_spill] sm:$0xff] %v12749_v62  ;;  %15666 = vst [vmem:[#allocation30_spill] sm:$0xff] %v12757_v30  ;;  %v3506_v62 = vmax.f32 %v12521_v52, 0.0  ;;  %v15326_v42 = vmax.f32 %v12549_v16, 0.0  ;;  %v15328_v32 = vmax.f32 %v12561_v51, 0.0  ;;  %v15669_v17 = vmax.f32 %v12537_v40, 0.0 }
 0x6cc   :  { %15667 = vst [vmem:[#allocation41_spill] sm:$0xff] %v12761_v39  ;;  %15668 = vst [vmem:[#allocation42_spill] sm:$0xff] %v12765_v55  ;;  %v15325_v39 = vmax.f32 %v12545_v7, 0.0  ;;  %v15327_v55 = vmax.f32 %v12553_v45, 0.0  ;;  %v15330_v52 = vmax.f32 %v12581_v14, 0.0  ;;  %v15331_v30 = vmax.f32 %v12585_v6, 0.0 }
 0x6cd   :  { %3679 = vst [vmem:[#allocation3 + $0x19] sm:$0xff] %v3506_v62  ;;  %3680 = vst [vmem:[#allocation3 + $0x21] sm:$0xff] %v15322_v48  ;;  %4538 = vmatprep.mubr.f32.mxu1 %v3506_v62  ;;  %v15670_v48 = vmax.f32 %v12541_v29, 0.0  ;;  %v15329_v62 = vmax.f32 %v12577_v60, 0.0  ;;  %v3536_v10 = vmax.f32 %v12637_v13, 0.0  ;;  %v15697_v13 = vmax.f32 %v12525_v2, 0.0 }
 0x6ce   :  { %3681 = vst [vmem:[#allocation3 + $0x31] sm:$0xff] %v15324_v25  ;;  %3682 = vst [vmem:[#allocation3 + $0x39] sm:$0xff] %v15323_v9  ;;  %v15677_v25 = vmax.f32 %v12593_v35, 0.0 }
 0x6cf   :  { %3683 = vst [vmem:[#allocation3 + $0x49] sm:$0xff] %v15669_v17  ;;  %3684 = vst [vmem:[#allocation3 + $0x51] sm:$0xff] %v15670_v48  ;;  %v15671_v17 = vmax.f32 %v12557_v46, 0.0  ;;  %v15675_v48 = vld [vmem:[#allocation34_spill] sm:$0xff] }
 0x6d0   :  { %3685 = vst [vmem:[#allocation3 + $0x61] sm:$0xff] %v15325_v39  ;;  %3686 = vst [vmem:[#allocation3 + $0x69] sm:$0xff] %v15326_v42  ;;  %v15672_v39 = vmax.f32 %v12565_v31, 0.0  ;;  %v15673_v42 = vmax.f32 %v12569_v23, 0.0  ;;  %v15333_v9 = vmax.f32 %v15675_v48, 0.0 }
 0x6d1   :  { %3687 = vst [vmem:[#allocation3 + $0x79] sm:$0xff] %v15327_v55  ;;  %3688 = vst [vmem:[#allocation3 + $0x81] sm:$0xff] %v15671_v17  ;;  %v15674_v55 = vmax.f32 %v12573_v34, 0.0  ;;  %v15332_v17 = vmax.f32 %v12609_v63, 0.0 }
 0x6d2   :  { %3689 = vst [vmem:[#allocation3 + $0x91] sm:$0xff] %v15328_v32  ;;  %3690 = vst [vmem:[#allocation3 + $0x99] sm:$0xff] %v15672_v39  ;;  %v15676_v39 = vmax.f32 %v12589_v27, 0.0  ;;  %v3556_v32 = vmax.f32 %v12717_v1, 0.0  ;;  %v15703_v1 = vld [vmem:[#allocation35_spill] sm:$0xff] }
 0x6d3   :  { %3691 = vst [vmem:[#allocation3 + $0xa9] sm:$0xff] %v15673_v42  ;;  %3692 = vst [vmem:[#allocation3 + $0xb1] sm:$0xff] %v15674_v55  ;;  %v15334_v55 = vmax.f32 %v12625_v43, 0.0  ;;  %v15335_v42 = vmax.f32 %v12645_v21, 0.0 }
 0x6d4   :  { %3693 = vst [vmem:[#allocation3 + $0xc1] sm:$0xff] %v15329_v62  ;;  %3694 = vst [vmem:[#allocation3 + $0xc9] sm:$0xff] %v15330_v52  ;;  %v15678_v62 = vmax.f32 %v12597_v4, 0.0  ;;  %v15679_v52 = vmax.f32 %v12601_v15, 0.0 }
 0x6d5   :  { %3695 = vst [vmem:[#allocation3 + $0xd9] sm:$0xff] %v15331_v30  ;;  %3696 = vst [vmem:[#allocation3 + $0xe1] sm:$0xff] %v15676_v39  ;;  %v15680_v30 = vmax.f32 %v12605_v57, 0.0  ;;  %v3537_v39 = vmax.f32 %v12641_v44, 0.0  ;;  %v15687_v44 = vld [vmem:[#allocation44_spill] sm:$0xff] }
 0x6d6   :  { %3697 = vst [vmem:[#allocation3 + $0xf1] sm:$0xff] %v15677_v25  ;;  %3698 = vst [vmem:[#allocation3 + $0xf9] sm:$0xff] %v15678_v62  ;;  %v15681_v25 = vmax.f32 %v12617_v5, 0.0  ;;  %v15692_v62 = vld [vmem:[#allocation45_spill] sm:$0xff]  ;;  %v15701_v2 = vmax.f32 %v15687_v44, 0.0  ;;  %v15711_v44 = vld [vmem:[#allocation42_spill] sm:$0xff] }
 0x6d7   :  { %3699 = vst [vmem:[#allocation3 + $0x109] sm:$0xff] %v15679_v52  ;;  %3700 = vst [vmem:[#allocation3 + $0x111] sm:$0xff] %v15680_v30  ;;  %v15682_v52 = vmax.f32 %v12621_v28, 0.0  ;;  %v15683_v30 = vld [vmem:[#allocation40_spill] sm:$0xff] }
 0x6d8   :  { %3702 = vst [vmem:[#allocation3 + $0x129] sm:$0xff] %v15332_v17  ;;  %3703 = vst [vmem:[#allocation3 + $0x139] sm:$0xff] %v15333_v9  ;;  %v15684_v17 = vmax.f32 %v12629_v37, 0.0  ;;  %v15685_v9 = vmax.f32 %v12633_v54, 0.0 }
 0x6d9   :  { %3704 = vst [vmem:[#allocation3 + $0x141] sm:$0xff] %v15681_v25  ;;  %3705 = vst [vmem:[#allocation3 + $0x151] sm:$0xff] %v15682_v52  ;;  %v12865_v25 = vld [vmem:[#allocation3 + $0x18] sm:$0xff]  ;;  %v15693_v52 = vmax.f32 %v15683_v30, 0.0 }
 0x6da   :  { %3706 = vst [vmem:[#allocation3 + $0x159] sm:$0xff] %v15334_v55  ;;  %3707 = vst [vmem:[#allocation3 + $0x169] sm:$0xff] %v15684_v17  ;;  %v15688_v17 = vmax.f32 %v12649_v38, 0.0  ;;  %4539 = vmatmul.mubr.f32.gmra.mrb[44].mxu1 %v12865_v25  ;;  %v12880_v55 = vld [vmem:[#allocation3 + $0x3a] sm:$0xff] }
 0x6db   :  { %3708 = vst [vmem:[#allocation3 + $0x171] sm:$0xff] %v15685_v9  ;;  %3709 = vst [vmem:[#allocation3 + $0x181] sm:$0xff] %v3536_v10  ;;  %v15689_v9 = vmax.f32 %v12653_v36, 0.0  ;;  %v12877_v10 = vld [vmem:[#allocation3 + $0x32] sm:$0xff]  ;;  %4543 = vmatprep.mubr.f32.mxu1 %v15697_v13  ;;  %v3558_v13 = vmax.f32 %v15703_v1, 0.0  ;;  %v3561_v1 = vmax.f32 %v12737_v19, 0.0 }
 0x6dc   :  { %15686 = vst [vmem:[#allocation43_spill] sm:$0xff] %v12865_v25  ;;  %3710 = vst [vmem:[#allocation3 + $0x189] sm:$0xff] %v3537_v39  ;;  %v15696_v25 = vmax.f32 %v12669_v11, 0.0  ;;  %7957 = vmatprep.mubr.f32.mxu0 %v12877_v10  ;;  %v3553_v39 = vmax.f32 %v12705_v24, 0.0  ;;  %v12910_v24 = vld [vmem:[#allocation3 + $0x4a] sm:$0xff]  ;;  %v3568_v19 = vmax.f32 %v15711_v44, 0.0 }
 0x6dd   :  { %3711 = vst [vmem:[#allocation3 + $0x1c9] sm:$0xff] %v15335_v42  ;;  %3712 = vst [vmem:[#allocation3 + $0x1d1] sm:$0xff] %v15688_v17  ;;  %v3552_v42 = vmax.f32 %v12701_v58, 0.0  ;;  %v15694_v17 = vmax.f32 %v12661_v61, 0.0  ;;  %v3554_v58 = vmax.f32 %v12709_v12, 0.0  ;;  %7958 = vmatmul.mubr.f32.vlgmr.msra.gmra.mrb[152].mxu0 %v12880_v55  ;;  %v4360_v12 = vld [vmem:[#allocation12 + $0x140] sm:$0xff] }
 0x6de   :  { %3713 = vst [vmem:[#allocation3 + $0x1e1] sm:$0xff] %v15689_v9  ;;  %15690 = vst [vmem:[#allocation47_spill] sm:$0xff] %v12877_v10  ;;  %v15695_v9 = vmax.f32 %v12665_v50, 0.0  ;;  %v3560_v10 = vmax.f32 %v12733_v47, 0.0  ;;  %7960 = vmatprep.mubr.f32.mxu0 %v12910_v24  ;;  %v3563_v47 = vmax.f32 %v12745_v26, 0.0  ;;  %v15712_v26 = vmax.f32 %v12529_v8, 0.0 }
 0x6df   :  { %15691 = vst [vmem:[#allocation48_spill] sm:$0xff] %v12880_v55  ;;  %3714 = vst [vmem:[#allocation3 + $0x1e9] sm:$0xff] %v15693_v52  ;;  %v3555_v52 = vmax.f32 %v12713_v33, 0.0  ;;  %v3557_v33 = vmax.f32 %v12721_v18, 0.0  ;;  %v12923_v55 = vld [vmem:[#allocation3 + $0x20] sm:$0xff]  ;;  %v4361_v18 = vld [vmem:[#allocation12 + $0x148] sm:$0xff] }
 0x6e0   :  { %3715 = vst [vmem:[#allocation3 + $0x1f9] sm:$0xff] %v15694_v17  ;;  %3716 = vst [vmem:[#allocation3 + $0x201] sm:$0xff] %v15695_v9  ;;  %v15698_v17 = vmax.f32 %v12673_v56, 0.0  ;;  %v15699_v9 = vmax.f32 %v12677_v49, 0.0  ;;  %4544 = vmatmul.mubr.f32.gmra.mrb[46].mxu1 %v12923_v55  ;;  %v8466_v44 = vpack.c.bf16 %v4361_v18, %v4360_v12  ;;  %v12943_v8 = vld [vmem:[#allocation3 + $0x30] sm:$0xff]  ;;  %v15714_v12 = vmov 0.0|0.0  }
 0x6e1   :  { %3717 = vst [vmem:[#allocation3 + $0x211] sm:$0xff] %v15696_v25  ;;  %v15700_v25 = vmax.f32 %v12681_v3, 0.0  ;;  %3721 = vst [vmem:[#allocation3 + $0x241] sm:$0xff] %v15701_v2  ;;  %v15706_v2 = vmax.f32 %v12697_v41, 0.0  ;;  %v15710_v41 = vld [vmem:[#allocation41_spill] sm:$0xff]  ;;  %4548 = vmatprep.mubr.f32.mxu1 %v15712_v26  ;;  %v4264_v18 = vld [vmem:[#allocation3 + $0x92] sm:$0xff] }
 0x6e2   :  { %3718 = vst [vmem:[#allocation3 + $0x219] sm:$0xff] %v15698_v17  ;;  %3719 = vst [vmem:[#allocation3 + $0x229] sm:$0xff] %v15699_v9  ;;  %v3559_v17 = vmax.f32 %v12729_v20, 0.0  ;;  %v15704_v9 = vmax.f32 %v15692_v62, 0.0  ;;  %v3562_v20 = vmax.f32 %v12741_v0, 0.0  ;;  %v15707_v62 = vld [vmem:[#allocation57_spill] sm:$0xff]  ;;  %8467 = vmatpush1.bf16.msra.mxu1 %v8466_v44 }
 0x6e3   :  { %3720 = vst [vmem:[#allocation3 + $0x231] sm:$0xff] %v15700_v25  ;;  %15702 = vst [vmem:[#allocation49_spill] sm:$0xff] %v12910_v24  ;;  %v15705_v25 = vmax.f32 %v12693_v22, 0.0  ;;  %v3567_v22 = vmax.f32 %v15710_v41, 0.0  ;;  %v12934_v0 = vld [vmem:[#allocation3 + $0x52] sm:$0xff]  ;;  %v12940_v41 = vld [vmem:[#allocation3 + $0x62] sm:$0xff]  ;;  %8468 = vmatprep.subr.bf16.mxu1 %v15714_v12 }
 0x6e4   :  { %3722 = vst [vmem:[#allocation3 + $0x249] sm:$0xff] %v15704_v9  ;;  %3724 = vst [vmem:[#allocation3 + $0x261] sm:$0xff] %v15706_v2  ;;  %v3564_v9 = vmax.f32 %v15707_v62, 0.0  ;;  %v15709_v2 = vld [vmem:[#allocation30_spill] sm:$0xff]  ;;  %7961 = vmatmul.mubr.f32.gmra.mrb[154].mxu0 %v12934_v0  ;;  %v4362_v62 = vld [vmem:[#allocation12 + $0x150] sm:$0xff]  ;;  %4549 = vmatmul.mubr.f32.gmra.mrb[48].mxu1 %v12943_v8  ;;  %v15717_v44 = vmax.f32 %v12545_v7, 0.0 }
 0x6e5   :  { %3723 = vst [vmem:[#allocation3 + $0x259] sm:$0xff] %v15705_v25  ;;  %3725 = vst [vmem:[#allocation3 + $0x271] sm:$0xff] %v3552_v42  ;;  %v15708_v42 = vld [vmem:[#allocation29_spill] sm:$0xff]  ;;  %v3566_v24 = vmax.f32 %v15709_v2, 0.0  ;;  %7963 = vmatprep.mubr.f32.mxu0 %v12940_v41  ;;  %v12964_v26 = vld [vmem:[#allocation3 + $0x50] sm:$0xff] }
 0x6e6   :  { %3726 = vst [vmem:[#allocation3 + $0x279] sm:$0xff] %v3553_v39  ;;  %3727 = vst [vmem:[#allocation3 + $0x289] sm:$0xff] %v3554_v58  ;;  %v3565_v25 = vmax.f32 %v15708_v42, 0.0  ;;  %v4363_v39 = vld [vmem:[#allocation12 + $0x158] sm:$0xff]  ;;  %v15716_v42 = vmax.f32 %v12541_v29, 0.0  ;;  %v4368_v2 = vld [vmem:[#allocation12 + $0x180] sm:$0xff] }
 0x6e7   :  { %3728 = vst [vmem:[#allocation3 + $0x291] sm:$0xff] %v3555_v52  ;;  %3729 = vst [vmem:[#allocation3 + $0x2a1] sm:$0xff] %v3556_v32  ;;  %v3569_v32 = vmax.f32 %v12769_v59, 0.0  ;;  %v4261_v59 = vld [vmem:[#allocation3 + $0x6a] sm:$0xff]  ;;  %v8469_v58 = vpack.c.bf16 %v4363_v39, %v4362_v62  ;;  %v12948_v52 = vld [vmem:[#allocation3 + $0x7a] sm:$0xff] }
 0x6e8   :  { %3730 = vst [vmem:[#allocation3 + $0x2a9] sm:$0xff] %v3557_v33  ;;  %3731 = vst [vmem:[#allocation3 + $0x2b9] sm:$0xff] %v3558_v13  ;;  %7964 = vmatmul.mubr.f32.gmra.mrb[156].mxu0 %v4261_v59  ;;  %v12952_v33 = vld [vmem:[#allocation3 + $0x38] sm:$0xff]  ;;  %v4263_v13 = vld [vmem:[#allocation3 + $0x82] sm:$0xff] }
 0x6e9   :  { %3732 = vst [vmem:[#allocation3 + $0x2c1] sm:$0xff] %v3559_v17  ;;  %3733 = vst [vmem:[#allocation3 + $0x2d1] sm:$0xff] %v3560_v10  ;;  %v15713_v10 = vmax.f32 %v12533_v53, 0.0  ;;  %7966 = vmatprep.mubr.f32.mxu0 %v12948_v52  ;;  %v15715_v17 = vmax.f32 %v12537_v40, 0.0  ;;  %8470 = vmatpush1.bf16.msra.mxu1 %v8469_v58  ;;  %v4268_v62 = vld [vmem:[#allocation3 + $0xc2] sm:$0xff]  ;;  %v4269_v59 = vld [vmem:[#allocation3 + $0xca] sm:$0xff] }
 0x6ea   :  { %3734 = vst [vmem:[#allocation3 + $0x2d9] sm:$0xff] %v3561_v1  ;;  %3735 = vst [vmem:[#allocation3 + $0x2e9] sm:$0xff] %v3562_v20  ;;  %8471 = vmatprep.subr.bf16.mxu1 %v15714_v12  ;;  %v4366_v1 = vld [vmem:[#allocation12 + $0x170] sm:$0xff]  ;;  %v4367_v20 = vld [vmem:[#allocation12 + $0x178] sm:$0xff] }
 0x6eb   :  { %3736 = vst [vmem:[#allocation3 + $0x2f1] sm:$0xff] %v3563_v47  ;;  %3737 = vst [vmem:[#allocation3 + $0x301] sm:$0xff] %v3564_v9  ;;  %4553 = vmatprep.mubr.f32.mxu1 %v15713_v10  ;;  %v12958_v47 = vld [vmem:[#allocation3 + $0x48] sm:$0xff]  ;;  %v4265_v9 = vld [vmem:[#allocation3 + $0x9a] sm:$0xff]  ;;  %v8475_v40 = vpack.c.bf16 %v4367_v20, %v4366_v1  ;;  %v15718_v10 = vmax.f32 %v12549_v16, 0.0  ;;  %v15720_v1 = vmax.f32 %v12557_v46, 0.0 }
 0x6ec   :  { %3738 = vst [vmem:[#allocation3 + $0x309] sm:$0xff] %v3565_v25  ;;  %3739 = vst [vmem:[#allocation3 + $0x319] sm:$0xff] %v3566_v24  ;;  %v4365_v24 = vld [vmem:[#allocation12 + $0x168] sm:$0xff]  ;;  %4554 = vmatmul.mubr.f32.gmra.mrb[50].mxu1 %v12952_v33  ;;  %7967 = vmatmul.mubr.f32.gmra.mrb[158].mxu0 %v4263_v13  ;;  %v12970_v39 = vld [vmem:[#allocation3 + $0x60] sm:$0xff] }
 0x6ed   :  { %3740 = vst [vmem:[#allocation3 + $0x321] sm:$0xff] %v3567_v22  ;;  %3741 = vst [vmem:[#allocation3 + $0x331] sm:$0xff] %v3568_v19  ;;  %v4364_v22 = vld [vmem:[#allocation12 + $0x160] sm:$0xff]  ;;  %4558 = vmatprep.mubr.f32.mxu1 %v15715_v17  ;;  %7969 = vmatprep.mubr.f32.mxu0 %v4264_v18  ;;  %v4369_v19 = vld [vmem:[#allocation12 + $0x188] sm:$0xff] }
 0x6ee   :  { %3742 = vst [vmem:[#allocation3 + $0x339] sm:$0xff] %v3569_v32  ;;  %v8472_v53 = vpack.c.bf16 %v4365_v24, %v4364_v22  ;;  %v4266_v25 = vld [vmem:[#allocation3 + $0xaa] sm:$0xff]  ;;  %v4267_v32 = vld [vmem:[#allocation3 + $0xb2] sm:$0xff]  ;;  %v8478_v29 = vpack.c.bf16 %v4369_v19, %v4368_v2  ;;  %v4270_v58 = vld [vmem:[#allocation3 + $0xda] sm:$0xff]  ;;  %v15719_v24 = vmax.f32 %v12553_v45, 0.0  ;;  %v15721_v19 = vmax.f32 %v12561_v51, 0.0 }
 0x6ef   :  { %v12976_v7 = vld [vmem:[#allocation3 + $0x68] sm:$0xff]  ;;  %v4272_v13 = vld [vmem:[#allocation3 + $0xf2] sm:$0xff]  ;;  %v4273_v18 = vld [vmem:[#allocation3 + $0xfa] sm:$0xff] }
 0x6f0   :  { %4559 = vmatmul.mubr.f32.gmra.mrb[52].mxu1 %v12958_v47  ;;  %7970 = vmatmul.mubr.f32.gmra.mrb[160].mxu0 %v4265_v9  ;;  %v4271_v22 = vld [vmem:[#allocation3 + $0xe2] sm:$0xff]  ;;  %v12981_v17 = vld [vmem:[#allocation3 + $0x78] sm:$0xff]  ;;  %v4274_v9 = vld [vmem:[#allocation3 + $0x10a] sm:$0xff] }
 0x6f1   :  { %4563 = vmatprep.mubr.f32.mxu1 %v15716_v42  ;;  %8473 = vmatpush1.bf16.msra.mxu1 %v8472_v53  ;;  %v4370_v16 = vld [vmem:[#allocation12 + $0x190] sm:$0xff]  ;;  %v4371_v53 = vld [vmem:[#allocation12 + $0x198] sm:$0xff]  ;;  %v4372_v42 = vld [vmem:[#allocation12 + $0x1a0] sm:$0xff] }
 0x6f2   :  { %8474 = vmatprep.subr.bf16.mxu1 %v15714_v12  ;;  %7972 = vmatprep.mubr.f32.mxu0 %v4266_v25  ;;  %v8481_v20 = vpack.c.bf16 %v4371_v53, %v4370_v16  ;;  %v12986_v45 = vld [vmem:[#allocation3 + $0x80] sm:$0xff]  ;;  %v4275_v2 = vld [vmem:[#allocation3 + $0x112] sm:$0xff]  ;;  %v15724_v53 = vmax.f32 %v12573_v34, 0.0 }
 0x6f3   :  { %v4276_v46 = vld [vmem:[#allocation3 + $0x122] sm:$0xff]  ;;  %v4281_v16 = vld [vmem:[#allocation3 + $0x15a] sm:$0xff] }
 0x6f4   :  { %4564 = vmatmul.mubr.f32.gmra.mrb[54].mxu1 %v12964_v26  ;;  %7973 = vmatmul.mubr.f32.gmra.mrb[162].mxu0 %v4267_v32  ;;  %v12992_v32 = vld [vmem:[#allocation3 + $0x90] sm:$0xff]  ;;  %v4286_v34 = vld [vmem:[#allocation3 + $0x19a] sm:$0xff] }
 0x6f5   :  { %4568 = vmatprep.mubr.f32.mxu1 %v15717_v44  ;;  %8476 = vmatpush1.bf16.msra.mxu1 %v8475_v40  ;;  %v4373_v40 = vld [vmem:[#allocation12 + $0x1a8] sm:$0xff] }
 0x6f6   :  { %8477 = vmatprep.subr.bf16.mxu1 %v15714_v12  ;;  %7975 = vmatprep.mubr.f32.mxu0 %v4268_v62  ;;  %v8484_v25 = vpack.c.bf16 %v4373_v40, %v4372_v42  ;;  %v4277_v44 = vld [vmem:[#allocation3 + $0x12a] sm:$0xff]  ;;  %v4374_v62 = vld [vmem:[#allocation12 + $0x1b0] sm:$0xff]  ;;  %v13014_v42 = vld [vmem:[#allocation3 + $0xc0] sm:$0xff] }
 0x6f7   :  { %v4285_v40 = vld [vmem:[#allocation3 + $0x18a] sm:$0xff] }
 0x6f8   :  { %4569 = vmatmul.mubr.f32.gmra.mrb[56].mxu1 %v12970_v39  ;;  %7976 = vmatmul.mubr.f32.gmra.mrb[164].mxu0 %v4269_v59  ;;  %v4375_v59 = vld [vmem:[#allocation12 + $0x1b8] sm:$0xff] }
 0x6f9   :  { %4573 = vmatprep.mubr.f32.mxu1 %v15718_v10  ;;  %8479 = vmatpush1.bf16.msra.mxu1 %v8478_v29  ;;  %v15722_v29 = vmax.f32 %v12565_v31, 0.0  ;;  %v4278_v10 = vld [vmem:[#allocation3 + $0x13a] sm:$0xff]  ;;  %v8487_v51 = vpack.c.bf16 %v4375_v59, %v4374_v62  ;;  %v13004_v31 = vld [vmem:[#allocation3 + $0xa8] sm:$0xff] }
 0x6fa   :  { %8480 = vmatprep.subr.bf16.mxu1 %v15714_v12  ;;  %7978 = vmatprep.mubr.f32.mxu0 %v4270_v58  ;;  %v12998_v58 = vld [vmem:[#allocation3 + $0x98] sm:$0xff]  ;;  %v4288_v62 = vld [vmem:[#allocation3 + $0x1e2] sm:$0xff]  ;;  %v4289_v59 = vld [vmem:[#allocation3 + $0x1ea] sm:$0xff] }
 0x6fc   :  { %4574 = vmatmul.mubr.f32.gmra.mrb[58].mxu1 %v12976_v7  ;;  %7979 = vmatmul.mubr.f32.gmra.mrb[166].mxu0 %v4271_v22  ;;  %v4279_v22 = vld [vmem:[#allocation3 + $0x142] sm:$0xff] }
 0x6fd   :  { %4578 = vmatprep.mubr.f32.mxu1 %v15719_v24  ;;  %7981 = vmatprep.mubr.f32.mxu0 %v4272_v13  ;;  %v15723_v24 = vmax.f32 %v12569_v23, 0.0  ;;  %v4280_v13 = vld [vmem:[#allocation3 + $0x152] sm:$0xff] }
 0x6fe   :  { %8482 = vmatpush1.bf16.msra.mxu1 %v8481_v20  ;;  %v4283_v23 = vld [vmem:[#allocation3 + $0x172] sm:$0xff]  ;;  %v15725_v20 = vmax.f32 %v12577_v60, 0.0  ;;  %v4287_v60 = vld [vmem:[#allocation3 + $0x1a2] sm:$0xff] }
 0x6ff   :  { %8483 = vmatprep.subr.bf16.mxu1 %v15714_v12 }
 0x700   :  { %4579 = vmatmul.mubr.f32.gmra.mrb[60].mxu1 %v12981_v17  ;;  %7982 = vmatmul.mubr.f32.gmra.mrb[168].mxu0 %v4273_v18  ;;  %v4282_v18 = vld [vmem:[#allocation3 + $0x16a] sm:$0xff] }
 0x701   :  { %4583 = vmatprep.mubr.f32.mxu1 %v15720_v1  ;;  %7984 = vmatprep.mubr.f32.mxu0 %v4274_v9  ;;  %v13009_v1 = vld [vmem:[#allocation3 + $0xb0] sm:$0xff]  ;;  %v4284_v9 = vld [vmem:[#allocation3 + $0x182] sm:$0xff] }
 0x702   :  { %8485 = vmatpush1.bf16.msra.mxu1 %v8484_v25  ;;  %v15726_v25 = vmax.f32 %v12581_v14, 0.0  ;;  %v13025_v14 = vld [vmem:[#allocation3 + $0xd8] sm:$0xff] }
 0x703   :  { %8486 = vmatprep.subr.bf16.mxu1 %v15714_v12 }
 0x704   :  { %4584 = vmatmul.mubr.f32.gmra.mrb[62].mxu1 %v12986_v45  ;;  %7985 = vmatmul.mubr.f32.gmra.mrb[170].mxu0 %v4275_v2  ;;  %v4376_v2 = vld [vmem:[#allocation12 + $0x1c0] sm:$0xff] }
 0x705   :  { %4588 = vmatprep.mubr.f32.mxu1 %v15721_v19  ;;  %7987 = vmatprep.mubr.f32.mxu0 %v4276_v46  ;;  %v4377_v19 = vld [vmem:[#allocation12 + $0x1c8] sm:$0xff] }
 0x706   :  { %8488 = vmatpush1.bf16.msra.mxu1 %v8487_v51  ;;  %v8490_v46 = vpack.c.bf16 %v4377_v19, %v4376_v2  ;;  %v4290_v51 = vld [vmem:[#allocation3 + $0x1fa] sm:$0xff]  ;;  %v4297_v2 = vld [vmem:[#allocation3 + $0x24a] sm:$0xff]  ;;  %v15732_v19 = vmax.f32 %v12605_v57, 0.0  ;;  %v15733_v57 = vmax.f32 %v12609_v63, 0.0 }
 0x707   :  { %8489 = vmatprep.subr.bf16.mxu1 %v15714_v12  ;;  %v13065_v63 = vld [vmem:[#allocation3 + $0x138] sm:$0xff] }
 0x708   :  { %4589 = vmatmul.mubr.f32.gmra.mrb[64].mxu1 %v12992_v32  ;;  %7988 = vmatmul.mubr.f32.gmra.mrb[172].mxu0 %v4277_v44  ;;  %v13019_v44 = vld [vmem:[#allocation3 + $0xc8] sm:$0xff] }
 0x709   :  { %4593 = vmatprep.mubr.f32.mxu1 %v15722_v29  ;;  %7990 = vmatprep.mubr.f32.mxu0 %v4278_v10  ;;  %v15727_v29 = vmax.f32 %v12585_v6, 0.0  ;;  %v15728_v10 = vmax.f32 %v12589_v27, 0.0  ;;  %v4291_v6 = vld [vmem:[#allocation3 + $0x202] sm:$0xff]  ;;  %v4293_v27 = vld [vmem:[#allocation3 + $0x21a] sm:$0xff] }
 0x70a   :  { %8491 = vmatpush1.bf16.msra.mxu1 %v8490_v46  ;;  %v4298_v46 = vld [vmem:[#allocation3 + $0x25a] sm:$0xff] }
 0x70b   :  { %8492 = vmatprep.subr.bf16.mxu1 %v15714_v12 }
 0x70c   :  { %4594 = vmatmul.mubr.f32.gmra.mrb[66].mxu1 %v12998_v58  ;;  %7991 = vmatmul.mubr.f32.gmra.mrb[174].mxu0 %v4279_v22  ;;  %v13030_v22 = vld [vmem:[#allocation3 + $0xe0] sm:$0xff] }
 0x70d   :  { %4598 = vmatprep.mubr.f32.mxu1 %v15723_v24  ;;  %7993 = vmatprep.mubr.f32.mxu0 %v4280_v13  ;;  %v15729_v24 = vmax.f32 %v12593_v35, 0.0  ;;  %v4292_v13 = vld [vmem:[#allocation3 + $0x212] sm:$0xff] }
 0x70e   :  { %v4295_v35 = vld [vmem:[#allocation3 + $0x232] sm:$0xff] }
 0x710   :  { %4599 = vmatmul.mubr.f32.gmra.mrb[68].mxu1 %v13004_v31  ;;  %7994 = vmatmul.mubr.f32.gmra.mrb[176].mxu0 %v4281_v16  ;;  %v13035_v16 = vld [vmem:[#allocation3 + $0xf0] sm:$0xff] }
 0x711   :  { %4603 = vmatprep.mubr.f32.mxu1 %v15724_v53  ;;  %7996 = vmatprep.mubr.f32.mxu0 %v4282_v18  ;;  %v15730_v53 = vmax.f32 %v12597_v4, 0.0  ;;  %v4378_v18 = vld [vmem:[#allocation12 + $0x1d0] sm:$0xff]  ;;  %v13046_v4 = vld [vmem:[#allocation3 + $0x108] sm:$0xff] }
 0x714   :  { %4604 = vmatmul.mubr.f32.gmra.mrb[70].mxu1 %v13009_v1  ;;  %7997 = vmatmul.mubr.f32.gmra.mrb[178].mxu0 %v4283_v23  ;;  %v4379_v23 = vld [vmem:[#allocation12 + $0x1d8] sm:$0xff] }
 0x715   :  { %4608 = vmatprep.mubr.f32.mxu1 %v15725_v20  ;;  %7999 = vmatprep.mubr.f32.mxu0 %v4284_v9  ;;  %v4294_v20 = vld [vmem:[#allocation3 + $0x22a] sm:$0xff]  ;;  %v8493_v9 = vpack.c.bf16 %v4379_v23, %v4378_v18  ;;  %v15734_v18 = vmax.f32 %v15675_v48, 0.0  ;;  %v4304_v23 = vld [vmem:[#allocation3 + $0x2a2] sm:$0xff] }
 0x716   :  { %v4307_v48 = vld [vmem:[#allocation3 + $0x2c2] sm:$0xff] }
 0x717   :  { %8494 = vmatpush1.bf16.msra.mxu1 %v8493_v9  ;;  %v15735_v9 = vmax.f32 %v12617_v5, 0.0  ;;  %v4309_v5 = vld [vmem:[#allocation3 + $0x2da] sm:$0xff] }
 0x718   :  { %4609 = vmatmul.mubr.f32.gmra.mrb[72].mxu1 %v13014_v42  ;;  %8000 = vmatmul.mubr.f32.gmra.mrb[180].mxu0 %v4285_v40  ;;  %v15731_v40 = vmax.f32 %v12601_v15, 0.0  ;;  %v3831_v15 = vld [vmem:[#allocation3 + $0x121] sm:$0xff] }
 0x719   :  { %4613 = vmatprep.mubr.f32.mxu1 %v15726_v25  ;;  %8002 = vmatprep.mubr.f32.mxu0 %v4286_v34  ;;  %v13040_v34 = vld [vmem:[#allocation3 + $0xf8] sm:$0xff]  ;;  %v4296_v25 = vld [vmem:[#allocation3 + $0x242] sm:$0xff] }
 0x71a   :  { %8495 = vmatprep.subr.bf16.mxu1 %v15714_v12 }
 0x71c   :  { %4614 = vmatmul.mubr.f32.gmra.mrb[74].mxu1 %v13019_v44  ;;  %8003 = vmatmul.mubr.f32.gmra.mrb[182].mxu0 %v4287_v60  ;;  %v13051_v60 = vld [vmem:[#allocation3 + $0x110] sm:$0xff] }
 0x71d   :  { %4618 = vmatprep.mubr.f32.mxu1 %v15727_v29  ;;  %8005 = vmatprep.mubr.f32.mxu0 %v4288_v62  ;;  %v4299_v29 = vld [vmem:[#allocation3 + $0x262] sm:$0xff]  ;;  %v4300_v62 = vld [vmem:[#allocation3 + $0x272] sm:$0xff] }
 0x720   :  { %4619 = vmatmul.mubr.f32.gmra.mrb[76].mxu1 %v13025_v14  ;;  %8006 = vmatmul.mubr.f32.gmra.mrb[184].mxu0 %v4289_v59  ;;  %v13054_v59 = vld [vmem:[#allocation3 + $0x120] sm:$0xff] }
 0x721   :  { %4623 = vmatprep.mubr.f32.mxu1 %v15728_v10  ;;  %8008 = vmatprep.mubr.f32.mxu0 %v4290_v51  ;;  %v4301_v10 = vld [vmem:[#allocation3 + $0x27a] sm:$0xff]  ;;  %v4302_v51 = vld [vmem:[#allocation3 + $0x28a] sm:$0xff] }
 0x724   :  { %4624 = vmatmul.mubr.f32.gmra.mrb[78].mxu1 %v13030_v22  ;;  %8009 = vmatmul.mubr.f32.gmra.mrb[186].mxu0 %v4291_v6  ;;  %v4380_v6 = vld [vmem:[#allocation12 + $0x1e0] sm:$0xff] }
 0x725   :  { %4628 = vmatprep.mubr.f32.mxu1 %v15729_v24  ;;  %8011 = vmatprep.mubr.f32.mxu0 %v4292_v13  ;;  %v4381_v24 = vld [vmem:[#allocation12 + $0x1e8] sm:$0xff] }
 0x726   :  { %v13059_v13 = vld [vmem:[#allocation3 + $0x128] sm:$0xff] }
 0x728   :  { %4629 = vmatmul.mubr.f32.gmra.mrb[80].mxu1 %v13035_v16  ;;  %8012 = vmatmul.mubr.f32.gmra.mrb[188].mxu0 %v4293_v27  ;;  %v8496_v27 = vpack.c.bf16 %v4381_v24, %v4380_v6  ;;  %v4312_v6 = vld [vmem:[#allocation3 + $0x302] sm:$0xff]  ;;  %v4313_v24 = vld [vmem:[#allocation3 + $0x30a] sm:$0xff] }
 0x729   :  { %4633 = vmatprep.mubr.f32.mxu1 %v15730_v53  ;;  %8014 = vmatprep.mubr.f32.mxu0 %v4294_v20  ;;  %v4303_v53 = vld [vmem:[#allocation3 + $0x292] sm:$0xff]  ;;  %v4305_v20 = vld [vmem:[#allocation3 + $0x2aa] sm:$0xff] }
 0x72a   :  { %8497 = vmatpush1.bf16.msra.mxu1 %v8496_v27  ;;  %v15739_v27 = vmax.f32 %v12633_v54, 0.0  ;;  %v15740_v54 = vmax.f32 %v12645_v21, 0.0  ;;  %v15743_v21 = vmax.f32 %v15683_v30, 0.0  ;;  %v15746_v30 = vmax.f32 %v12669_v11, 0.0 }
 0x72b   :  { %8498 = vmatprep.subr.bf16.mxu1 %v15714_v12  ;;  %v15749_v11 = vmax.f32 %v12681_v3, 0.0  ;;  %v15754_v3 = vld [vmem:[#allocation46_spill] sm:$0xff] }
 0x72c   :  { %4634 = vmatmul.mubr.f32.gmra.mrb[82].mxu1 %v13040_v34  ;;  %8015 = vmatmul.mubr.f32.gmra.mrb[190].mxu0 %v4295_v35  ;;  %v4306_v35 = vld [vmem:[#allocation3 + $0x2ba] sm:$0xff] }
 0x72d   :  { %4638 = vmatprep.mubr.f32.mxu1 %v15731_v40  ;;  %8017 = vmatprep.mubr.f32.mxu0 %v4296_v25  ;;  %v13070_v40 = vld [vmem:[#allocation3 + $0x140] sm:$0xff]  ;;  %v15736_v25 = vmax.f32 %v12621_v28, 0.0 }
 0x730   :  { %4639 = vmatmul.mubr.f32.gmra.mrb[84].mxu1 %v13046_v4  ;;  %8018 = vmatmul.mubr.f32.gmra.mrb[192].mxu0 %v4297_v2  ;;  %v4308_v2 = vld [vmem:[#allocation3 + $0x2d2] sm:$0xff] }
 0x731   :  { %4643 = vmatprep.mubr.f32.mxu1 %v15732_v19  ;;  %8020 = vmatprep.mubr.f32.mxu0 %v4298_v46  ;;  %v13075_v19 = vld [vmem:[#allocation3 + $0x150] sm:$0xff]  ;;  %v15737_v46 = vmax.f32 %v12625_v43, 0.0  ;;  %v13086_v43 = vld [vmem:[#allocation3 + $0x168] sm:$0xff] }
 0x734   :  { %4644 = vmatmul.mubr.f32.gmra.mrb[86].mxu1 %v13051_v60  ;;  %8021 = vmatmul.mubr.f32.gmra.mrb[194].mxu0 %v4299_v29  ;;  %v4382_v29 = vld [vmem:[#allocation12 + $0x1f0] sm:$0xff] }
 0x735   :  { %4648 = vmatprep.mubr.f32.mxu1 %v3831_v15  ;;  %8023 = vmatprep.mubr.f32.mxu0 %v4300_v62  ;;  %v4310_v15 = vld [vmem:[#allocation3 + $0x2ea] sm:$0xff]  ;;  %v4383_v62 = vld [vmem:[#allocation12 + $0x1f8] sm:$0xff] }
 0x736   :  { %v8499_v28 = vpack.c.bf16 %v4383_v62, %v4382_v29  ;;  %v13111_v29 = vld [vmem:[#allocation3 + $0x1e8] sm:$0xff]  ;;  %v13116_v62 = vld [vmem:[#allocation3 + $0x1f8] sm:$0xff] }
 0x738   :  { %4649 = vmatmul.mubr.f32.gmra.mrb[88].mxu1 %v13054_v59  ;;  %8024 = vmatmul.mubr.f32.gmra.mrb[196].mxu0 %v4301_v10  ;;  %v13080_v10 = vld [vmem:[#allocation3 + $0x158] sm:$0xff] }
 0x739   :  { %4653 = vmatprep.mubr.f32.mxu1 %v15733_v57  ;;  %8026 = vmatprep.mubr.f32.mxu0 %v4302_v51  ;;  %v4311_v57 = vld [vmem:[#allocation3 + $0x2f2] sm:$0xff]  ;;  %v15738_v51 = vmax.f32 %v12629_v37, 0.0 }
 0x73a   :  { %8500 = vmatpush1.bf16.msra.mxu1 %v8499_v28  ;;  %v13091_v37 = vld [vmem:[#allocation3 + $0x170] sm:$0xff]  ;;  %v13121_v28 = vld [vmem:[#allocation3 + $0x200] sm:$0xff] }
 0x73b   :  { %8501 = vmatprep.subr.bf16.mxu1 %v15714_v12 }
 0x73c   :  { %4654 = vmatmul.mubr.f32.gmra.mrb[90].mxu1 %v13059_v13  ;;  %8027 = vmatmul.mubr.f32.gmra.mrb[198].mxu0 %v4303_v53  ;;  %v4314_v53 = vld [vmem:[#allocation3 + $0x31a] sm:$0xff] }
 0x73d   :  { %4658 = vmatprep.mubr.f32.mxu1 %v15734_v18  ;;  %8029 = vmatprep.mubr.f32.mxu0 %v4304_v23  ;;  %v3839_v18 = vld [vmem:[#allocation3 + $0x1b1] sm:$0xff]  ;;  %v4315_v23 = vld [vmem:[#allocation3 + $0x322] sm:$0xff] }
 0x740   :  { %4659 = vmatmul.mubr.f32.gmra.mrb[92].mxu1 %v13065_v63  ;;  %8030 = vmatmul.mubr.f32.gmra.mrb[200].mxu0 %v4305_v20  ;;  %v4316_v20 = vld [vmem:[#allocation3 + $0x332] sm:$0xff] }
 0x741   :  { %4663 = vmatprep.mubr.f32.mxu1 %v15735_v9  ;;  %8032 = vmatprep.mubr.f32.mxu0 %v4306_v35  ;;  %v3840_v9 = vld [vmem:[#allocation3 + $0x1b9] sm:$0xff] }
 0x742   :  { %v9466_v35 = vld [vmem:[#allocation2] sm:$0xff] }
 0x744   :  { %4664 = vmatmul.mubr.f32.gmra.mrb[94].mxu1 %v13070_v40  ;;  %8033 = vmatmul.mubr.f32.gmra.mrb[202].mxu0 %v4307_v48  ;;  %v4317_v48 = vld [vmem:[#allocation3 + $0x33a] sm:$0xff] }
 0x745   :  { %4668 = vmatprep.mubr.f32.mxu1 %v15736_v25  ;;  %8035 = vmatprep.mubr.f32.mxu0 %v4308_v2  ;;  %v13096_v25 = vld [vmem:[#allocation3 + $0x1c8] sm:$0xff]  ;;  %v15741_v2 = vmax.f32 %v12649_v38, 0.0  ;;  %v15744_v38 = vmax.f32 %v12661_v61, 0.0  ;;  %v15747_v61 = vmax.f32 %v12673_v56, 0.0  ;;  %v15750_v56 = vld [vmem:[#allocation44_spill] sm:$0xff] }
 0x748   :  { %4669 = vmatmul.mubr.f32.gmra.mrb[96].mxu1 %v13075_v19  ;;  %8036 = vmatmul.mubr.f32.gmra.mrb[204].mxu0 %v4309_v5  ;;  %v13101_v5 = vld [vmem:[#allocation3 + $0x1d0] sm:$0xff] }
 0x749   :  { %4673 = vmatprep.mubr.f32.mxu1 %v15737_v46  ;;  %8038 = vmatprep.mubr.f32.mxu0 %v4310_v15  ;;  %v15742_v46 = vmax.f32 %v12653_v36, 0.0  ;;  %v13106_v15 = vld [vmem:[#allocation3 + $0x1e0] sm:$0xff]  ;;  %v15745_v36 = vmax.f32 %v12665_v50, 0.0  ;;  %v15748_v50 = vmax.f32 %v12677_v49, 0.0 }
 0x74a   :  { %v15752_v49 = vld [vmem:[#allocation45_spill] sm:$0xff] }
 0x74c   :  { %4674 = vmatmul.mubr.f32.gmra.mrb[98].mxu1 %v13080_v10  ;;  %8039 = vmatmul.mubr.f32.gmra.mrb[206].mxu0 %v4311_v57  ;;  %v13126_v57 = vld [vmem:[#allocation3 + $0x210] sm:$0xff] }
 0x74d   :  { %4678 = vmatprep.mubr.f32.mxu1 %v15738_v51  ;;  %8041 = vmatprep.mubr.f32.mxu0 %v4312_v6  ;;  %v13131_v51 = vld [vmem:[#allocation3 + $0x218] sm:$0xff]  ;;  %v13136_v6 = vld [vmem:[#allocation3 + $0x228] sm:$0xff] }
 0x750   :  { %4679 = vmatmul.mubr.f32.gmra.mrb[100].mxu1 %v13086_v43  ;;  %8042 = vmatmul.mubr.f32.gmra.mrb[208].mxu0 %v4313_v24  ;;  %v13141_v24 = vld [vmem:[#allocation3 + $0x230] sm:$0xff] }
 0x751   :  { %4683 = vmatprep.mubr.f32.mxu1 %v15739_v27  ;;  %8044 = vmatprep.mubr.f32.mxu0 %v4314_v53  ;;  %v15751_v27 = vmax.f32 %v15750_v56, 0.0  ;;  %v13146_v53 = vld [vmem:[#allocation3 + $0x240] sm:$0xff] }
 0x752   :  { %v13176_v56 = vld [vmem:[#allocation3 + $0x2a0] sm:$0xff] }
 0x753   :  { %15759 = vst [vmem:[#allocation32_spill] sm:$0xff] %v13176_v56 }
 0x754   :  { %4684 = vmatmul.mubr.f32.gmra.mrb[102].mxu1 %v13091_v37  ;;  %8045 = vmatmul.mubr.f32.gmra.mrb[210].mxu0 %v4315_v23  ;;  %v13151_v23 = vld [vmem:[#allocation3 + $0x248] sm:$0xff] }
 0x755   :  { %4688 = vmatprep.mubr.f32.mxu1 %v3839_v18  ;;  %8047 = vmatprep.mubr.f32.mxu0 %v4316_v20  ;;  %v15753_v18 = vmax.f32 %v15752_v49, 0.0  ;;  %v15755_v20 = vmax.f32 %v15754_v3, 0.0  ;;  %v13179_v49 = vld [vmem:[#allocation3 + $0x2a8] sm:$0xff]  ;;  %v13182_v3 = vld [vmem:[#allocation3 + $0x2b8] sm:$0xff] }
 0x756   :  { %15760 = vst [vmem:[#allocation50_spill] sm:$0xff] %v13179_v49  ;;  %15761 = vst [vmem:[#allocation51_spill] sm:$0xff] %v13182_v3 }
 0x758   :  { %4689 = vmatmul.mubr.f32.gmra.mrb[104].mxu1 %v9466_v35  ;;  %8048 = vmatmul.mubr.f32.gmra.mrb[212].mxu0 %v4317_v48 }
 0x759   :  { %4693 = vmatprep.mubr.f32.mxu1 %v3840_v9  ;;  %v13156_v9 = vld [vmem:[#allocation3 + $0x258] sm:$0xff] }
 0x75c   :  { %4694 = vmatmul.mubr.f32.gmra.mrb[106].mxu1 %v9466_v35  ;;  %v15756_v35 = vld [vmem:[#allocation55_spill] sm:$0xff] }
 0x75d   :  { %4698 = vmatprep.mubr.f32.mxu1 %v15740_v54  ;;  %v15757_v48 = vmax.f32 %v15756_v35, 0.0  ;;  %v13161_v54 = vld [vmem:[#allocation3 + $0x260] sm:$0xff] }
 0x75e   :  { %v13185_v35 = vld [vmem:[#allocation3 + $0x2c0] sm:$0xff] }
 0x75f   :  { %15762 = vst [vmem:[#allocation52_spill] sm:$0xff] %v13185_v35 }
 0x760   :  { %4699 = vmatmul.mubr.f32.gmra.mrb[108].mxu1 %v13096_v25 }
 0x761   :  { %4703 = vmatprep.mubr.f32.mxu1 %v15741_v2  ;;  %v3855_v2 = vld [vmem:[#allocation3 + $0x271] sm:$0xff] }
 0x764   :  { %4704 = vmatmul.mubr.f32.gmra.mrb[110].mxu1 %v13101_v5 }
 0x765   :  { %4708 = vmatprep.mubr.f32.mxu1 %v15742_v46  ;;  %v13164_v46 = vld [vmem:[#allocation3 + $0x270] sm:$0xff] }
 0x768   :  { %4709 = vmatmul.mubr.f32.gmra.mrb[112].mxu1 %v13106_v15 }
 0x769   :  { %4713 = vmatprep.mubr.f32.mxu1 %v15743_v21  ;;  %v3856_v21 = vld [vmem:[#allocation3 + $0x279] sm:$0xff] }
 0x76c   :  { %4714 = vmatmul.mubr.f32.gmra.mrb[114].mxu1 %v13111_v29 }
 0x76d   :  { %4718 = vmatprep.mubr.f32.mxu1 %v15744_v38  ;;  %v13167_v38 = vld [vmem:[#allocation3 + $0x278] sm:$0xff] }
 0x770   :  { %4719 = vmatmul.mubr.f32.gmra.mrb[116].mxu1 %v13116_v62 }
 0x771   :  { %4723 = vmatprep.mubr.f32.mxu1 %v15745_v36  ;;  %v3857_v36 = vld [vmem:[#allocation3 + $0x289] sm:$0xff] }
 0x774   :  { %4724 = vmatmul.mubr.f32.gmra.mrb[118].mxu1 %v13121_v28 }
 0x775   :  { %4728 = vmatprep.mubr.f32.mxu1 %v15746_v30  ;;  %v13170_v30 = vld [vmem:[#allocation3 + $0x288] sm:$0xff] }
 0x778   :  { %4729 = vmatmul.mubr.f32.gmra.mrb[120].mxu1 %v13126_v57 }
 0x779   :  { %4733 = vmatprep.mubr.f32.mxu1 %v15747_v61  ;;  %v3858_v61 = vld [vmem:[#allocation3 + $0x291] sm:$0xff] }
 0x77c   :  { %4734 = vmatmul.mubr.f32.gmra.mrb[122].mxu1 %v13131_v51 }
 0x77d   :  { %4738 = vmatprep.mubr.f32.mxu1 %v15748_v50  ;;  %v13173_v50 = vld [vmem:[#allocation3 + $0x290] sm:$0xff] }
 0x77e   :  { %15758 = vst [vmem:[#allocation28_spill] sm:$0xff] %v13173_v50 }
 0x780   :  { %4739 = vmatmul.mubr.f32.gmra.mrb[124].mxu1 %v13136_v6 }
 0x781   :  { %4743 = vmatprep.mubr.f32.mxu1 %v15749_v11  ;;  %v3859_v11 = vld [vmem:[#allocation3 + $0x2a1] sm:$0xff] }
 0x784   :  { %4744 = vmatmul.mubr.f32.gmra.mrb[126].mxu1 %v13141_v24 }
 0x785   :  { %4748 = vmatprep.mubr.f32.mxu1 %v15751_v27  ;;  %v3860_v27 = vld [vmem:[#allocation3 + $0x2a9] sm:$0xff] }
 0x788   :  { %4749 = vmatmul.mubr.f32.gmra.mrb[128].mxu1 %v13146_v53 }
 0x789   :  { %4753 = vmatprep.mubr.f32.mxu1 %v15753_v18  ;;  %v3861_v18 = vld [vmem:[#allocation3 + $0x2b9] sm:$0xff] }
 0x78c   :  { %4754 = vmatmul.mubr.f32.gmra.mrb[130].mxu1 %v13151_v23 }
 0x78d   :  { %4758 = vmatprep.mubr.f32.mxu1 %v15755_v20  ;;  %v3862_v20 = vld [vmem:[#allocation3 + $0x2c1] sm:$0xff] }
 0x790   :  { %4759 = vmatmul.mubr.f32.gmra.mrb[132].mxu1 %v13156_v9 }
 0x791   :  { %4763 = vmatprep.mubr.f32.mxu1 %v15757_v48  ;;  %v3863_v48 = vld [vmem:[#allocation3 + $0x2d1] sm:$0xff] }
 0x794   :  { %4764 = vmatmul.mubr.f32.gmra.mrb[134].mxu1 %v13161_v54 }
 0x795   :  { %4768 = vmatprep.mubr.f32.mxu1 %v3855_v2 }
 0x798   :  { %4769 = vmatmul.mubr.f32.gmra.mrb[136].mxu1 %v13164_v46 }
 0x799   :  { %4773 = vmatprep.mubr.f32.mxu1 %v3856_v21 }
 0x79c   :  { %4774 = vmatmul.mubr.f32.gmra.mrb[138].mxu1 %v13167_v38 }
 0x79d   :  { %4778 = vmatprep.mubr.f32.mxu1 %v3857_v36  ;;  %v13192_v36 = vld [vmem:[#allocation3 + $0x2d0] sm:$0xff] }
 0x79e   :  { %15765 = vst [vmem:[#allocation56_spill] sm:$0xff] %v13192_v36 }
 0x7a0   :  { %4779 = vmatmul.mubr.f32.gmra.mrb[140].mxu1 %v13170_v30 }
 0x7a1   :  { %4783 = vmatprep.mubr.f32.mxu1 %v3858_v61  ;;  %v3864_v61 = vld [vmem:[#allocation3 + $0x2d9] sm:$0xff] }
 0x7a4   :  { %4784 = vmatmul.mubr.f32.gmra.mrb[142].mxu1 %v13173_v50 }
 0x7a5   :  { %4788 = vmatprep.mubr.f32.mxu1 %v3859_v11 }
 0x7a8   :  { %4789 = vmatmul.mubr.f32.gmra.mrb[144].mxu1 %v13176_v56  ;;  %v4387_v56 = vld [vmem:[#allocation12 + $0x218] sm:$0xff] }
 0x7a9   :  { %4793 = vmatprep.mubr.f32.mxu1 %v3860_v27 }
 0x7ac   :  { %4794 = vmatmul.mubr.f32.gmra.mrb[146].mxu1 %v13179_v49 }
 0x7ad   :  { %4798 = vmatprep.mubr.f32.mxu1 %v3861_v18  ;;  %v13199_v18 = vld [vmem:[#allocation3 + $0x2d8] sm:$0xff] }
 0x7ae   :  { %15768 = vst [vmem:[#allocation37_spill] sm:$0xff] %v13199_v18 }
 0x7b0   :  { %4799 = vmatmul.mubr.f32.gmra.mrb[148].mxu1 %v13182_v3  ;;  %v13188_v2 = vpop.f32.mrb[152].mxu0  ;;  %v13241_v3 = vld [vmem:[#allocation3 + $0x320] sm:$0xff] }
 0x7b1   :  { %4803 = vmatprep.mubr.f32.mxu1 %v3862_v20  ;;  %15763 = vst [vmem:[#allocation54_spill] sm:$0xff] %v13188_v2  ;;  %v13190_v21 = vpop.f32.mrb[153].mxu0  ;;  %v3865_v20 = vld [vmem:[#allocation3 + $0x2e9] sm:$0xff] }
 0x7b2   :  { %15764 = vst [vmem:[#allocation53_spill] sm:$0xff] %v13190_v21  ;;  %v13206_v2 = vld [vmem:[#allocation3 + $0x2e8] sm:$0xff]  ;;  %v3866_v21 = vld [vmem:[#allocation3 + $0x2f1] sm:$0xff] }
 0x7b3   :  { %15771 = vst [vmem:[#allocation33_spill] sm:$0xff] %v13206_v2 }
 0x7b4   :  { %4804 = vmatmul.mubr.f32.gmra.mrb[150].mxu1 %v13185_v35 }
 0x7b5   :  { %4808 = vmatprep.mubr.f32.mxu1 %v3863_v48 }
 0x7b7   :  { %v13195_v11 = vpop.f32.mrb[154].mxu0 }
 0x7b8   :  { %4809 = vmatmul.mubr.f32.gmra.mrb[152].mxu1 %v13192_v36  ;;  %15766 = vst [vmem:[#allocation36_spill] sm:$0xff] %v13195_v11  ;;  %v13197_v27 = vpop.f32.mrb[155].mxu0  ;;  %v13213_v11 = vld [vmem:[#allocation3 + $0x2f0] sm:$0xff] }
 0x7b9   :  { %4813 = vmatprep.mubr.f32.mxu1 %v3864_v61  ;;  %15767 = vst [vmem:[#allocation31_spill] sm:$0xff] %v13197_v27  ;;  %15774 = vst [vmem:[#allocation34_spill] sm:$0xff] %v13213_v11  ;;  %v3867_v27 = vld [vmem:[#allocation3 + $0x301] sm:$0xff] }
 0x7bb   :  { %v13202_v35 = vpop.f32.mrb[156].mxu0 }
 0x7bc   :  { %4814 = vmatmul.mubr.f32.gmra.mrb[154].mxu1 %v13199_v18  ;;  %15769 = vst [vmem:[#allocation26_spill] sm:$0xff] %v13202_v35  ;;  %v13204_v48 = vpop.f32.mrb[157].mxu0  ;;  %v13220_v35 = vld [vmem:[#allocation3 + $0x300] sm:$0xff] }
 0x7bd   :  { %4818 = vmatprep.mubr.f32.mxu1 %v3865_v20  ;;  %15770 = vst [vmem:[#allocation27_spill] sm:$0xff] %v13204_v48  ;;  %15777 = vst [vmem:[#allocation57_spill] sm:$0xff] %v13220_v35  ;;  %v3868_v48 = vld [vmem:[#allocation3 + $0x309] sm:$0xff] }
 0x7bf   :  { %v13209_v36 = vpop.f32.mrb[158].mxu0 }
 0x7c0   :  { %4819 = vmatmul.mubr.f32.gmra.mrb[156].mxu1 %v13206_v2  ;;  %15772 = vst [vmem:[#allocation38_spill] sm:$0xff] %v13209_v36  ;;  %v13211_v61 = vpop.f32.mrb[159].mxu0  ;;  %v13227_v36 = vld [vmem:[#allocation3 + $0x308] sm:$0xff] }
 0x7c1   :  { %4823 = vmatprep.mubr.f32.mxu1 %v3866_v21  ;;  %15773 = vst [vmem:[#allocation39_spill] sm:$0xff] %v13211_v61  ;;  %15780 = vst [vmem:[#allocation41_spill] sm:$0xff] %v13227_v36  ;;  %v3869_v61 = vld [vmem:[#allocation3 + $0x319] sm:$0xff] }
 0x7c3   :  { %v13216_v18 = vpop.f32.mrb[160].mxu0 }
 0x7c4   :  { %4824 = vmatmul.mubr.f32.gmra.mrb[158].mxu1 %v13213_v11  ;;  %15775 = vst [vmem:[#allocation40_spill] sm:$0xff] %v13216_v18  ;;  %v13218_v20 = vpop.f32.mrb[161].mxu0  ;;  %v13234_v18 = vld [vmem:[#allocation3 + $0x318] sm:$0xff] }
 0x7c5   :  { %4828 = vmatprep.mubr.f32.mxu1 %v3867_v27  ;;  %15776 = vst [vmem:[#allocation35_spill] sm:$0xff] %v13218_v20  ;;  %15783 = vst [vmem:[#allocation45_spill] sm:$0xff] %v13234_v18  ;;  %v3870_v20 = vld [vmem:[#allocation3 + $0x321] sm:$0xff] }
 0x7c7   :  { %v13223_v2 = vpop.f32.mrb[162].mxu0 }
 0x7c8   :  { %4829 = vmatmul.mubr.f32.gmra.mrb[160].mxu1 %v13220_v35  ;;  %15778 = vst [vmem:[#allocation29_spill] sm:$0xff] %v13223_v2  ;;  %v13225_v21 = vpop.f32.mrb[163].mxu0  ;;  %v4384_v2 = vld [vmem:[#allocation12 + $0x200] sm:$0xff] }
 0x7c9   :  { %4833 = vmatprep.mubr.f32.mxu1 %v3868_v48  ;;  %15779 = vst [vmem:[#allocation30_spill] sm:$0xff] %v13225_v21  ;;  %v4385_v21 = vld [vmem:[#allocation12 + $0x208] sm:$0xff] }
 0x7cb   :  { %v13230_v11 = vpop.f32.mrb[164].mxu0 }
 0x7cc   :  { %4834 = vmatmul.mubr.f32.gmra.mrb[162].mxu1 %v13227_v36  ;;  %15781 = vst [vmem:[#allocation42_spill] sm:$0xff] %v13230_v11  ;;  %v13232_v27 = vpop.f32.mrb[165].mxu0  ;;  %v8502_v36 = vpack.c.bf16 %v4385_v21, %v4384_v2 }
 0x7cd   :  { %4838 = vmatprep.mubr.f32.mxu1 %v3869_v61  ;;  %15782 = vst [vmem:[#allocation44_spill] sm:$0xff] %v13232_v27  ;;  %v15787_v61 = vld [vmem:[#allocation43_spill] sm:$0xff]  ;;  %v3871_v27 = vld [vmem:[#allocation3 + $0x2] sm:$0xff] }
 0x7cf   :  { %v13237_v35 = vpop.f32.mrb[166].mxu0 }
 0x7d0   :  { %4839 = vmatmul.mubr.f32.gmra.mrb[164].mxu1 %v13234_v18  ;;  %15784 = vst [vmem:[#allocation46_spill] sm:$0xff] %v13237_v35  ;;  %v13239_v48 = vpop.f32.mrb[167].mxu0  ;;  %v4386_v18 = vld [vmem:[#allocation12 + $0x210] sm:$0xff]  ;;  %v3872_v35 = vld [vmem:[#allocation3 + $0xa] sm:$0xff] }
 0x7d1   :  { %4843 = vmatprep.mubr.f32.mxu1 %v3870_v20  ;;  %15785 = vst [vmem:[#allocation55_spill] sm:$0xff] %v13239_v48  ;;  %v8505_v48 = vpack.c.bf16 %v4387_v56, %v4386_v18  ;;  %v13261_v56 = vld [vmem:[#allocation3 + $0x1a] sm:$0xff] }
 0x7d3   :  { %v13244_v11 = vpop.f32.mrb[168].mxu0 }
 0x7d4   :  { %4844 = vmatmul.mubr.f32.gmra.mrb[166].mxu1 %v13241_v3  ;;  %15786 = vst [vmem:[#allocation58_spill] sm:$0xff] %v13244_v11  ;;  %v13247_v49 = vpop.f32.mrb[169].mxu0  ;;  %v4388_v11 = vld [vmem:[#allocation12 + $0x220] sm:$0xff] }
 0x7d5   :  { %4913 = vmatprep.mubr.f32.mxu1 %v15787_v61  ;;  %15788 = vst [vmem:[#allocation43_spill] sm:$0xff] %v13247_v49  ;;  %v4389_v61 = vld [vmem:[#allocation12 + $0x228] sm:$0xff] }
 0x7d6   :  { %v8508_v21 = vpack.c.bf16 %v4389_v61, %v4388_v11  ;;  %v4393_v11 = vld [vmem:[#allocation12 + $0x248] sm:$0xff] }
 0x7d7   :  { %v13249_v20 = vpop.f32.mrb[170].mxu0  ;;  %v4421_v49 = vld [vmem:[#allocation12 + $0x328] sm:$0xff] }
 0x7d8   :  { %4914 = vmatmul.mubr.f32.vlgmr.msra.gmra.mrb[40].mxu1 %v3871_v27  ;;  %15789 = vst [vmem:[#allocation59_spill] sm:$0xff] %v13249_v20  ;;  %v13252_v50 = vpop.f32.mrb[171].mxu0 }
 0x7d9   :  { %4918 = vmatprep.mubr.f32.mxu1 %v12923_v55  ;;  %8503 = vmatpush1.bf16.msra.mxu1 %v8502_v36  ;;  %15790 = vst [vmem:[#allocation60_spill] sm:$0xff] %v13252_v50  ;;  %v4390_v55 = vld [vmem:[#allocation12 + $0x230] sm:$0xff]  ;;  %v4391_v36 = vld [vmem:[#allocation12 + $0x238] sm:$0xff] }
 0x7da   :  { %8504 = vmatprep.subr.bf16.mxu1 %v15714_v12  ;;  %v3999_v50 = vld [vmem:[#allocation3 + $0x19] sm:$0xff] }
 0x7db   :  { %v13255_v2 = vpop.f32.mrb[172].mxu0 }
 0x7dc   :  { %4919 = vmatmul.mubr.f32.gmra.mrb[42].mxu1 %v3872_v35  ;;  %15791 = vst [vmem:[#allocation61_spill] sm:$0xff] %v13255_v2  ;;  %v13258_v27 = vpop.f32.mrb[173].mxu0  ;;  %v8511_v35 = vpack.c.bf16 %v4391_v36, %v4390_v55  ;;  %v15797_v55 = vld [vmem:[#allocation47_spill] sm:$0xff] }
 0x7dd   :  { %4923 = vmatprep.mubr.f32.mxu1 %v12943_v8  ;;  %8506 = vmatpush1.bf16.msra.mxu1 %v8505_v48  ;;  %15792 = vst [vmem:[#allocation62_spill] sm:$0xff] %v13258_v27  ;;  %v4392_v8 = vld [vmem:[#allocation12 + $0x240] sm:$0xff] }
 0x7de   :  { %8507 = vmatprep.subr.bf16.mxu1 %v15714_v12  ;;  %v13270_v48 = vld [vmem:[#allocation3 + $0x22] sm:$0xff] }
 0x7df   :  { %v13264_v18 = vpop.f32.mrb[174].mxu0 }
 0x7e0   :  { %4924 = vmatmul.mubr.f32.gmra.mrb[44].mxu1 %v13261_v56  ;;  %15793 = vst [vmem:[#allocation63_spill] sm:$0xff] %v13264_v18  ;;  %v13267_v2 = vpop.f32.mrb[175].mxu0  ;;  %v8514_v18 = vpack.c.bf16 %v4393_v11, %v4392_v8  ;;  %v15800_v8 = vld [vmem:[#allocation48_spill] sm:$0xff] }
 0x7e1   :  { %4928 = vmatprep.mubr.f32.mxu1 %v12952_v33  ;;  %8509 = vmatpush1.bf16.msra.mxu1 %v8508_v21  ;;  %15794 = vst [vmem:[#allocation64_spill] sm:$0xff] %v13267_v2  ;;  %v4394_v33 = vld [vmem:[#allocation12 + $0x250] sm:$0xff]  ;;  %v4395_v21 = vld [vmem:[#allocation12 + $0x258] sm:$0xff] }
 0x7e2   :  { %8510 = vmatprep.subr.bf16.mxu1 %v15714_v12  ;;  %v8517_v2 = vpack.c.bf16 %v4395_v21, %v4394_v33  ;;  %v15803_v33 = vld [vmem:[#allocation49_spill] sm:$0xff] }
 0x7e3   :  { %v13273_v61 = vpop.f32.mrb[176].mxu0 }
 0x7e4   :  { %4929 = vmatmul.mubr.f32.gmra.mrb[46].mxu1 %v13270_v48  ;;  %15795 = vst [vmem:[#allocation65_spill] sm:$0xff] %v13273_v61  ;;  %v13276_v27 = vpop.f32.mrb[177].mxu0 }
 0x7e5   :  { %4933 = vmatprep.mubr.f32.mxu1 %v12958_v47  ;;  %8512 = vmatpush1.bf16.msra.mxu1 %v8511_v35  ;;  %15796 = vst [vmem:[#allocation66_spill] sm:$0xff] %v13276_v27  ;;  %v4396_v47 = vld [vmem:[#allocation12 + $0x260] sm:$0xff]  ;;  %v4397_v35 = vld [vmem:[#allocation12 + $0x268] sm:$0xff]  ;;  %v4419_v27 = vld [vmem:[#allocation12 + $0x318] sm:$0xff] }
 0x7e6   :  { %8513 = vmatprep.subr.bf16.mxu1 %v15714_v12 }
 0x7e7   :  { %v13280_v36 = vpop.f32.mrb[178].mxu0 }
 0x7e8   :  { %4934 = vmatmul.mubr.f32.gmra.mrb[48].mxu1 %v15797_v55  ;;  %15798 = vst [vmem:[#allocation47_spill] sm:$0xff] %v13280_v36  ;;  %v13283_v20 = vpop.f32.mrb[179].mxu0  ;;  %v8520_v55 = vpack.c.bf16 %v4397_v35, %v4396_v47 }
 0x7e9   :  { %4938 = vmatprep.mubr.f32.mxu1 %v12964_v26  ;;  %8515 = vmatpush1.bf16.msra.mxu1 %v8514_v18  ;;  %15799 = vst [vmem:[#allocation67_spill] sm:$0xff] %v13283_v20  ;;  %v4398_v26 = vld [vmem:[#allocation12 + $0x270] sm:$0xff]  ;;  %v4399_v18 = vld [vmem:[#allocation12 + $0x278] sm:$0xff] }
 0x7ea   :  { %8516 = vmatprep.subr.bf16.mxu1 %v15714_v12  ;;  %v4418_v20 = vld [vmem:[#allocation12 + $0x310] sm:$0xff] }
 0x7eb   :  { %v13287_v11 = vpop.f32.mrb[180].mxu0 }
 0x7ec   :  { %4939 = vmatmul.mubr.f32.gmra.mrb[50].mxu1 %v15800_v8  ;;  %15801 = vst [vmem:[#allocation48_spill] sm:$0xff] %v13287_v11  ;;  %v13290_v61 = vpop.f32.mrb[181].mxu0  ;;  %v8523_v8 = vpack.c.bf16 %v4399_v18, %v4398_v26  ;;  %v4416_v11 = vld [vmem:[#allocation12 + $0x300] sm:$0xff] }
 0x7ed   :  { %4943 = vmatprep.mubr.f32.mxu1 %v12970_v39  ;;  %8518 = vmatpush1.bf16.msra.mxu1 %v8517_v2  ;;  %15802 = vst [vmem:[#allocation68_spill] sm:$0xff] %v13290_v61  ;;  %v4400_v39 = vld [vmem:[#allocation12 + $0x280] sm:$0xff]  ;;  %v4401_v2 = vld [vmem:[#allocation12 + $0x288] sm:$0xff] }
 0x7ee   :  { %8519 = vmatprep.subr.bf16.mxu1 %v15714_v12  ;;  %v8526_v35 = vpack.c.bf16 %v4401_v2, %v4400_v39  ;;  %v13314_v39 = vld [vmem:[#allocation3 + $0x6a] sm:$0xff]  ;;  %v13577_v61 = vld [vmem:[#allocation3 + $0x322] sm:$0xff] }
 0x7ef   :  { %v13295_v21 = vpop.f32.mrb[182].mxu0 }
 0x7f0   :  { %4944 = vmatmul.mubr.f32.gmra.mrb[52].mxu1 %v15803_v33  ;;  %15804 = vst [vmem:[#allocation49_spill] sm:$0xff] %v13295_v21  ;;  %v13297_v36 = vpop.f32.mrb[183].mxu0  ;;  %v13567_v21 = vld [vmem:[#allocation3 + $0x302] sm:$0xff] }
 0x7f1   :  { %4948 = vmatprep.mubr.f32.mxu1 %v12976_v7  ;;  %8521 = vmatpush1.bf16.msra.mxu1 %v8520_v55  ;;  %15805 = vst [vmem:[#allocation69_spill] sm:$0xff] %v13297_v36  ;;  %v4402_v7 = vld [vmem:[#allocation12 + $0x290] sm:$0xff]  ;;  %v4403_v55 = vld [vmem:[#allocation12 + $0x298] sm:$0xff] }
 0x7f2   :  { %8522 = vmatprep.subr.bf16.mxu1 %v15714_v12  ;;  %v13574_v36 = vld [vmem:[#allocation3 + $0x31a] sm:$0xff] }
 0x7f3   :  { %v13301_v47 = vpop.f32.mrb[184].mxu0 }
 0x7f4   :  { %4949 = vmatmul.mubr.f32.gmra.mrb[54].mxu1 %v12934_v0  ;;  %15806 = vst [vmem:[#allocation70_spill] sm:$0xff] %v13301_v47  ;;  %v13304_v33 = vpop.f32.mrb[185].mxu0  ;;  %v8529_v0 = vpack.c.bf16 %v4403_v55, %v4402_v7  ;;  %v13330_v7 = vld [vmem:[#allocation3 + $0x82] sm:$0xff]  ;;  %v13559_v47 = vld [vmem:[#allocation3 + $0x2ea] sm:$0xff] }
 0x7f5   :  { %4953 = vmatprep.mubr.f32.mxu1 %v12981_v17  ;;  %8524 = vmatpush1.bf16.msra.mxu1 %v8523_v8  ;;  %15807 = vst [vmem:[#allocation71_spill] sm:$0xff] %v13304_v33  ;;  %v4404_v17 = vld [vmem:[#allocation12 + $0x2a0] sm:$0xff]  ;;  %v4405_v8 = vld [vmem:[#allocation12 + $0x2a8] sm:$0xff] }
 0x7f6   :  { %8525 = vmatprep.subr.bf16.mxu1 %v15714_v12  ;;  %v13563_v33 = vld [vmem:[#allocation3 + $0x2f2] sm:$0xff] }
 0x7f7   :  { %v13308_v26 = vpop.f32.mrb[186].mxu0 }
 0x7f8   :  { %4954 = vmatmul.mubr.f32.gmra.mrb[56].mxu1 %v12940_v41  ;;  %15808 = vst [vmem:[#allocation72_spill] sm:$0xff] %v13308_v26  ;;  %v13311_v18 = vpop.f32.mrb[187].mxu0  ;;  %v8532_v41 = vpack.c.bf16 %v4405_v8, %v4404_v17  ;;  %v4407_v17 = vld [vmem:[#allocation12 + $0x2b8] sm:$0xff] }
 0x7f9   :  { %4958 = vmatprep.mubr.f32.mxu1 %v12986_v45  ;;  %8527 = vmatpush1.bf16.msra.mxu1 %v8526_v35  ;;  %15809 = vst [vmem:[#allocation73_spill] sm:$0xff] %v13311_v18  ;;  %v13555_v18 = vld [vmem:[#allocation3 + $0x2da] sm:$0xff] }
 0x7fa   :  { %8528 = vmatprep.subr.bf16.mxu1 %v15714_v12 }
 0x7fb   :  { %v13317_v2 = vpop.f32.mrb[188].mxu0 }
 0x7fc   :  { %4959 = vmatmul.mubr.f32.gmra.mrb[58].mxu1 %v13314_v39  ;;  %15810 = vst [vmem:[#allocation74_spill] sm:$0xff] %v13317_v2  ;;  %v13320_v26 = vpop.f32.mrb[189].mxu0  ;;  %v13547_v2 = vld [vmem:[#allocation3 + $0x2c2] sm:$0xff] }
 0x7fd   :  { %4963 = vmatprep.mubr.f32.mxu1 %v12992_v32  ;;  %8530 = vmatpush1.bf16.msra.mxu1 %v8529_v0  ;;  %15811 = vst [vmem:[#allocation75_spill] sm:$0xff] %v13320_v26  ;;  %v4406_v0 = vld [vmem:[#allocation12 + $0x2b0] sm:$0xff] }
 0x7fe   :  { %8531 = vmatprep.subr.bf16.mxu1 %v15714_v12  ;;  %v13551_v26 = vld [vmem:[#allocation3 + $0x2d2] sm:$0xff] }
 0x7ff   :  { %v13324_v45 = vpop.f32.mrb[190].mxu0 }
 0x800   :  { %4964 = vmatmul.mubr.f32.gmra.mrb[60].mxu1 %v12948_v52  ;;  %15812 = vst [vmem:[#allocation76_spill] sm:$0xff] %v13324_v45  ;;  %v13327_v35 = vpop.f32.mrb[191].mxu0  ;;  %v13338_v52 = vld [vmem:[#allocation3 + $0x92] sm:$0xff]  ;;  %v13346_v45 = vld [vmem:[#allocation3 + $0x9a] sm:$0xff] }
 0x801   :  { %4968 = vmatprep.mubr.f32.mxu1 %v12998_v58  ;;  %8533 = vmatpush1.bf16.msra.mxu1 %v8532_v41  ;;  %15813 = vst [vmem:[#allocation77_spill] sm:$0xff] %v13327_v35  ;;  %v8535_v41 = vpack.c.bf16 %v4407_v17, %v4406_v0  ;;  %v13363_v17 = vld [vmem:[#allocation3 + $0xb2] sm:$0xff]  ;;  %v13543_v35 = vld [vmem:[#allocation3 + $0x2ba] sm:$0xff] }
 0x802   :  { %8534 = vmatprep.subr.bf16.mxu1 %v15714_v12 }
 0x803   :  { %v13333_v32 = vpop.f32.mrb[192].mxu0 }
 0x804   :  { %4969 = vmatmul.mubr.f32.gmra.mrb[62].mxu1 %v13330_v7  ;;  %15814 = vst [vmem:[#allocation78_spill] sm:$0xff] %v13333_v32  ;;  %v13336_v55 = vpop.f32.mrb[193].mxu0 }
 0x805   :  { %4973 = vmatprep.mubr.f32.mxu1 %v13004_v31  ;;  %15815 = vst [vmem:[#allocation79_spill] sm:$0xff] %v13336_v55  ;;  %8536 = vmatpush1.bf16.msra.mxu1 %v8535_v41  ;;  %v13379_v55 = vld [vmem:[#allocation3 + $0xca] sm:$0xff] }
 0x806   :  { %8537 = vmatprep.subr.bf16.mxu1 %v15714_v12 }
 0x807   :  { %v13341_v58 = vpop.f32.mrb[194].mxu0 }
 0x808   :  { %4974 = vmatmul.mubr.f32.gmra.mrb[64].mxu1 %v13338_v52  ;;  %15816 = vst [vmem:[#allocation80_spill] sm:$0xff] %v13341_v58  ;;  %v13344_v8 = vpop.f32.mrb[195].mxu0  ;;  %v13355_v58 = vld [vmem:[#allocation3 + $0xaa] sm:$0xff] }
 0x809   :  { %4978 = vmatprep.mubr.f32.mxu1 %v13009_v1  ;;  %15817 = vst [vmem:[#allocation81_spill] sm:$0xff] %v13344_v8 }
 0x80b   :  { %v13349_v31 = vpop.f32.mrb[196].mxu0 }
 0x80c   :  { %4979 = vmatmul.mubr.f32.gmra.mrb[66].mxu1 %v13346_v45  ;;  %15818 = vst [vmem:[#allocation82_spill] sm:$0xff] %v13349_v31  ;;  %v13352_v32 = vpop.f32.mrb[197].mxu0  ;;  %v13371_v31 = vld [vmem:[#allocation3 + $0xc2] sm:$0xff] }
 0x80d   :  { %4983 = vmatprep.mubr.f32.mxu1 %v13014_v42  ;;  %15819 = vst [vmem:[#allocation83_spill] sm:$0xff] %v13352_v32 }
 0x80f   :  { %v13358_v1 = vpop.f32.mrb[198].mxu0 }
 0x810   :  { %4984 = vmatmul.mubr.f32.gmra.mrb[68].mxu1 %v13355_v58  ;;  %15820 = vst [vmem:[#allocation84_spill] sm:$0xff] %v13358_v1  ;;  %v13361_v0 = vpop.f32.mrb[199].mxu0  ;;  %v4409_v1 = vld [vmem:[#allocation12 + $0x2c8] sm:$0xff] }
 0x811   :  { %4988 = vmatprep.mubr.f32.mxu1 %v13019_v44  ;;  %15821 = vst [vmem:[#allocation85_spill] sm:$0xff] %v13361_v0  ;;  %v4408_v44 = vld [vmem:[#allocation12 + $0x2c0] sm:$0xff] }
 0x812   :  { %v8538_v8 = vpack.c.bf16 %v4409_v1, %v4408_v44  ;;  %v13396_v44 = vld [vmem:[#allocation3 + $0xe2] sm:$0xff] }
 0x813   :  { %v13366_v42 = vpop.f32.mrb[200].mxu0 }
 0x814   :  { %4989 = vmatmul.mubr.f32.gmra.mrb[70].mxu1 %v13363_v17  ;;  %15822 = vst [vmem:[#allocation86_spill] sm:$0xff] %v13366_v42  ;;  %v13369_v41 = vpop.f32.mrb[201].mxu0 }
 0x815   :  { %4993 = vmatprep.mubr.f32.mxu1 %v13025_v14  ;;  %15823 = vst [vmem:[#allocation87_spill] sm:$0xff] %v13369_v41  ;;  %8539 = vmatpush1.bf16.msra.mxu1 %v8538_v8  ;;  %v13412_v41 = vld [vmem:[#allocation3 + $0xfa] sm:$0xff] }
 0x816   :  { %8540 = vmatprep.subr.bf16.mxu1 %v15714_v12 }
 0x817   :  { %v13374_v32 = vpop.f32.mrb[202].mxu0 }
 0x818   :  { %4994 = vmatmul.mubr.f32.gmra.mrb[72].mxu1 %v13371_v31  ;;  %15824 = vst [vmem:[#allocation88_spill] sm:$0xff] %v13374_v32  ;;  %v13377_v0 = vpop.f32.mrb[203].mxu0  ;;  %v13388_v32 = vld [vmem:[#allocation3 + $0xda] sm:$0xff] }
 0x819   :  { %4998 = vmatprep.mubr.f32.mxu1 %v13030_v22  ;;  %15825 = vst [vmem:[#allocation89_spill] sm:$0xff] %v13377_v0 }
 0x81b   :  { %v13382_v14 = vpop.f32.mrb[204].mxu0 }
 0x81c   :  { %4999 = vmatmul.mubr.f32.gmra.mrb[74].mxu1 %v13379_v55  ;;  %15826 = vst [vmem:[#allocation90_spill] sm:$0xff] %v13382_v14  ;;  %v13385_v42 = vpop.f32.mrb[205].mxu0  ;;  %v13404_v14 = vld [vmem:[#allocation3 + $0xf2] sm:$0xff] }
 0x81d   :  { %5003 = vmatprep.mubr.f32.mxu1 %v13035_v16  ;;  %15827 = vst [vmem:[#allocation91_spill] sm:$0xff] %v13385_v42 }
 0x81f   :  { %v13391_v22 = vpop.f32.mrb[206].mxu0 }
 0x820   :  { %5004 = vmatmul.mubr.f32.gmra.mrb[76].mxu1 %v13388_v32  ;;  %15828 = vst [vmem:[#allocation92_spill] sm:$0xff] %v13391_v22  ;;  %v13394_v1 = vpop.f32.mrb[207].mxu0  ;;  %v4411_v22 = vld [vmem:[#allocation12 + $0x2d8] sm:$0xff] }
 0x821   :  { %5008 = vmatprep.mubr.f32.mxu1 %v13040_v34  ;;  %15829 = vst [vmem:[#allocation93_spill] sm:$0xff] %v13394_v1  ;;  %v4410_v34 = vld [vmem:[#allocation12 + $0x2d0] sm:$0xff] }
 0x822   :  { %v8541_v0 = vpack.c.bf16 %v4411_v22, %v4410_v34  ;;  %v13429_v22 = vld [vmem:[#allocation3 + $0x122] sm:$0xff] }
 0x823   :  { %v13399_v16 = vpop.f32.mrb[208].mxu0 }
 0x824   :  { %5009 = vmatmul.mubr.f32.gmra.mrb[78].mxu1 %v13396_v44  ;;  %15830 = vst [vmem:[#allocation94_spill] sm:$0xff] %v13399_v16  ;;  %v13402_v8 = vpop.f32.mrb[209].mxu0 }
 0x825   :  { %5013 = vmatprep.mubr.f32.mxu1 %v13046_v4  ;;  %15831 = vst [vmem:[#allocation95_spill] sm:$0xff] %v13402_v8  ;;  %8542 = vmatpush1.bf16.msra.mxu1 %v8541_v0  ;;  %v4413_v0 = vld [vmem:[#allocation12 + $0x2e8] sm:$0xff] }
 0x826   :  { %8543 = vmatprep.subr.bf16.mxu1 %v15714_v12  ;;  %v13539_v8 = vld [vmem:[#allocation3 + $0x2aa] sm:$0xff] }
 0x827   :  { %v13407_v42 = vpop.f32.mrb[210].mxu0 }
 0x828   :  { %5014 = vmatmul.mubr.f32.gmra.mrb[80].mxu1 %v13404_v14  ;;  %15832 = vst [vmem:[#allocation96_spill] sm:$0xff] %v13407_v42  ;;  %v13410_v1 = vpop.f32.mrb[211].mxu0  ;;  %v13421_v42 = vld [vmem:[#allocation3 + $0x10a] sm:$0xff] }
 0x829   :  { %5018 = vmatprep.mubr.f32.mxu1 %v13051_v60  ;;  %15833 = vst [vmem:[#allocation97_spill] sm:$0xff] %v13410_v1  ;;  %v13425_v60 = vld [vmem:[#allocation3 + $0x112] sm:$0xff] }
 0x82a   :  { %v13457_v1 = vld [vmem:[#allocation3 + $0x172] sm:$0xff] }
 0x82b   :  { %v13415_v4 = vpop.f32.mrb[212].mxu0 }
 0x82c   :  { %5019 = vmatmul.mubr.f32.gmra.mrb[82].mxu1 %v13412_v41  ;;  %15834 = vst [vmem:[#allocation98_spill] sm:$0xff] %v13415_v4  ;;  %v13418_v16 = vpop.f32.mrb[213].mxu0  ;;  %v13433_v4 = vld [vmem:[#allocation3 + $0x12a] sm:$0xff] }
 0x82d   :  { %5023 = vmatprep.mubr.f32.mxu1 %v13054_v59  ;;  %15835 = vst [vmem:[#allocation99_spill] sm:$0xff] %v13418_v16  ;;  %v4412_v59 = vld [vmem:[#allocation12 + $0x2e0] sm:$0xff] }
 0x82e   :  { %v8544_v34 = vpack.c.bf16 %v4413_v0, %v4412_v59  ;;  %v4415_v59 = vld [vmem:[#allocation12 + $0x2f8] sm:$0xff]  ;;  %v13454_v16 = vld [vmem:[#allocation3 + $0x16a] sm:$0xff] }
 0x830   :  { %5024 = vmatmul.mubr.f32.gmra.mrb[84].mxu1 %v13421_v42 }
 0x831   :  { %5028 = vmatprep.mubr.f32.mxu1 %v13059_v13  ;;  %8545 = vmatpush1.bf16.msra.mxu1 %v8544_v34  ;;  %v13438_v13 = vld [vmem:[#allocation3 + $0x13a] sm:$0xff] }
 0x832   :  { %8546 = vmatprep.subr.bf16.mxu1 %v15714_v12  ;;  %v13450_v34 = vld [vmem:[#allocation3 + $0x15a] sm:$0xff] }
 0x834   :  { %5029 = vmatmul.mubr.f32.gmra.mrb[86].mxu1 %v13425_v60 }
 0x835   :  { %5033 = vmatprep.mubr.f32.mxu1 %v13065_v63  ;;  %v13442_v63 = vld [vmem:[#allocation3 + $0x142] sm:$0xff] }
 0x838   :  { %5034 = vmatmul.mubr.f32.gmra.mrb[88].mxu1 %v13429_v22 }
 0x839   :  { %5038 = vmatprep.mubr.f32.mxu1 %v13070_v40  ;;  %v13446_v40 = vld [vmem:[#allocation3 + $0x152] sm:$0xff] }
 0x83c   :  { %5039 = vmatmul.mubr.f32.gmra.mrb[90].mxu1 %v13433_v4 }
 0x83d   :  { %5043 = vmatprep.mubr.f32.mxu1 %v13075_v19  ;;  %v4414_v19 = vld [vmem:[#allocation12 + $0x2f0] sm:$0xff] }
 0x83e   :  { %v8547_v0 = vpack.c.bf16 %v4415_v59, %v4414_v19  ;;  %v3904_v19 = vld [vmem:[#allocation3 + $0x1ba] sm:$0xff]  ;;  %v13463_v59 = vld [vmem:[#allocation3 + $0x1ca] sm:$0xff] }
 0x840   :  { %5044 = vmatmul.mubr.f32.gmra.mrb[92].mxu1 %v13438_v13 }
 0x841   :  { %5048 = vmatprep.mubr.f32.mxu1 %v13080_v10  ;;  %v3965_v10 = vld [vmem:[#allocation3 + $0x180] sm:$0xff]  ;;  %8548 = vmatpush1.bf16.msra.mxu1 %v8547_v0  ;;  %v13467_v0 = vld [vmem:[#allocation3 + $0x1d2] sm:$0xff] }
 0x842   :  { %8549 = vmatprep.subr.bf16.mxu1 %v15714_v12 }
 0x844   :  { %5049 = vmatmul.mubr.f32.gmra.mrb[94].mxu1 %v13442_v63 }
 0x845   :  { %5053 = vmatprep.mubr.f32.mxu1 %v13086_v43  ;;  %v3966_v43 = vld [vmem:[#allocation3 + $0x188] sm:$0xff] }
 0x848   :  { %5054 = vmatmul.mubr.f32.gmra.mrb[96].mxu1 %v13446_v40 }
 0x849   :  { %5058 = vmatprep.mubr.f32.mxu1 %v13091_v37  ;;  %v3903_v37 = vld [vmem:[#allocation3 + $0x1b2] sm:$0xff] }
 0x84c   :  { %5059 = vmatmul.mubr.f32.gmra.mrb[98].mxu1 %v13450_v34 }
 0x84d   :  { %5063 = vmatprep.mubr.f32.mxu1 %v3965_v10  ;;  %v13523_v10 = vld [vmem:[#allocation3 + $0x27a] sm:$0xff] }
 0x850   :  { %5064 = vmatmul.mubr.f32.gmra.mrb[100].mxu1 %v13454_v16 }
 0x851   :  { %5068 = vmatprep.mubr.f32.mxu1 %v3966_v43  ;;  %v13527_v43 = vld [vmem:[#allocation3 + $0x28a] sm:$0xff] }
 0x854   :  { %5069 = vmatmul.mubr.f32.gmra.mrb[102].mxu1 %v13457_v1 }
 0x855   :  { %5073 = vmatprep.mubr.f32.mxu1 %v13096_v25  ;;  %v13471_v25 = vld [vmem:[#allocation3 + $0x1e2] sm:$0xff] }
 0x858   :  { %5074 = vmatmul.mubr.f32.gmra.mrb[104].mxu1 %v3903_v37  ;;  %v13531_v37 = vld [vmem:[#allocation3 + $0x292] sm:$0xff] }
 0x859   :  { %5078 = vmatprep.mubr.f32.mxu1 %v13101_v5  ;;  %v13475_v5 = vld [vmem:[#allocation3 + $0x1ea] sm:$0xff] }
 0x85c   :  { %5079 = vmatmul.mubr.f32.gmra.mrb[106].mxu1 %v3904_v19  ;;  %v13535_v19 = vld [vmem:[#allocation3 + $0x2a2] sm:$0xff] }
 0x85d   :  { %5083 = vmatprep.mubr.f32.mxu1 %v13106_v15  ;;  %v13479_v15 = vld [vmem:[#allocation3 + $0x1fa] sm:$0xff] }
 0x860   :  { %5084 = vmatmul.mubr.f32.gmra.mrb[108].mxu1 %v13463_v59 }
 0x861   :  { %5088 = vmatprep.mubr.f32.mxu1 %v13111_v29  ;;  %v13483_v29 = vld [vmem:[#allocation3 + $0x202] sm:$0xff] }
 0x864   :  { %5089 = vmatmul.mubr.f32.gmra.mrb[110].mxu1 %v13467_v0 }
 0x865   :  { %5093 = vmatprep.mubr.f32.mxu1 %v13116_v62  ;;  %v13487_v62 = vld [vmem:[#allocation3 + $0x212] sm:$0xff] }
 0x868   :  { %5094 = vmatmul.mubr.f32.gmra.mrb[112].mxu1 %v13471_v25 }
 0x869   :  { %5098 = vmatprep.mubr.f32.mxu1 %v13121_v28  ;;  %v13491_v28 = vld [vmem:[#allocation3 + $0x21a] sm:$0xff] }
 0x86c   :  { %5099 = vmatmul.mubr.f32.gmra.mrb[114].mxu1 %v13475_v5 }
 0x86d   :  { %5103 = vmatprep.mubr.f32.mxu1 %v13126_v57  ;;  %v13495_v57 = vld [vmem:[#allocation3 + $0x22a] sm:$0xff] }
 0x870   :  { %5104 = vmatmul.mubr.f32.gmra.mrb[116].mxu1 %v13479_v15 }
 0x871   :  { %5108 = vmatprep.mubr.f32.mxu1 %v13131_v51  ;;  %v13499_v51 = vld [vmem:[#allocation3 + $0x232] sm:$0xff] }
 0x874   :  { %5109 = vmatmul.mubr.f32.gmra.mrb[118].mxu1 %v13483_v29 }
 0x875   :  { %5113 = vmatprep.mubr.f32.mxu1 %v13136_v6  ;;  %v13503_v6 = vld [vmem:[#allocation3 + $0x242] sm:$0xff] }
 0x878   :  { %5114 = vmatmul.mubr.f32.gmra.mrb[120].mxu1 %v13487_v62 }
 0x879   :  { %5118 = vmatprep.mubr.f32.mxu1 %v13141_v24  ;;  %v13507_v24 = vld [vmem:[#allocation3 + $0x24a] sm:$0xff] }
 0x87c   :  { %5119 = vmatmul.mubr.f32.gmra.mrb[122].mxu1 %v13491_v28 }
 0x87d   :  { %5123 = vmatprep.mubr.f32.mxu1 %v13146_v53  ;;  %v13511_v53 = vld [vmem:[#allocation3 + $0x25a] sm:$0xff] }
 0x880   :  { %5124 = vmatmul.mubr.f32.gmra.mrb[124].mxu1 %v13495_v57 }
 0x881   :  { %5128 = vmatprep.mubr.f32.mxu1 %v13151_v23  ;;  %v13515_v23 = vld [vmem:[#allocation3 + $0x262] sm:$0xff] }
 0x884   :  { %5129 = vmatmul.mubr.f32.gmra.mrb[126].mxu1 %v13499_v51 }
 0x885   :  { %5133 = vmatprep.mubr.f32.mxu1 %v13156_v9  ;;  %v13519_v9 = vld [vmem:[#allocation3 + $0x272] sm:$0xff] }
 0x888   :  { %5134 = vmatmul.mubr.f32.gmra.mrb[128].mxu1 %v13503_v6 }
 0x889   :  { %5138 = vmatprep.mubr.f32.mxu1 %v13161_v54  ;;  %v15836_v54 = vld [vmem:[#allocation28_spill] sm:$0xff] }
 0x88c   :  { %5139 = vmatmul.mubr.f32.gmra.mrb[130].mxu1 %v13507_v24 }
 0x88d   :  { %5143 = vmatprep.mubr.f32.mxu1 %v13164_v46  ;;  %v15837_v46 = vld [vmem:[#allocation32_spill] sm:$0xff] }
 0x88e   :  { %15849 = vst [vmem:[#allocation32_spill] sm:$0xff] %v13574_v36 }
 0x890   :  { %5144 = vmatmul.mubr.f32.gmra.mrb[132].mxu1 %v13511_v53 }
 0x891   :  { %5148 = vmatprep.mubr.f32.mxu1 %v13167_v38  ;;  %v15838_v38 = vld [vmem:[#allocation50_spill] sm:$0xff] }
 0x892   :  { %15850 = vst [vmem:[#allocation50_spill] sm:$0xff] %v13577_v61 }
 0x894   :  { %5149 = vmatmul.mubr.f32.gmra.mrb[134].mxu1 %v13515_v23 }
 0x895   :  { %5153 = vmatprep.mubr.f32.mxu1 %v13170_v30  ;;  %v15839_v30 = vld [vmem:[#allocation51_spill] sm:$0xff] }
 0x898   :  { %5154 = vmatmul.mubr.f32.gmra.mrb[136].mxu1 %v13519_v9 }
 0x899   :  { %5158 = vmatprep.mubr.f32.mxu1 %v15836_v54  ;;  %v15840_v54 = vld [vmem:[#allocation52_spill] sm:$0xff] }
 0x89c   :  { %5159 = vmatmul.mubr.f32.gmra.mrb[138].mxu1 %v13523_v10 }
 0x89d   :  { %5163 = vmatprep.mubr.f32.mxu1 %v15837_v46  ;;  %v15841_v46 = vld [vmem:[#allocation56_spill] sm:$0xff] }
 0x8a0   :  { %5164 = vmatmul.mubr.f32.gmra.mrb[140].mxu1 %v13527_v43 }
 0x8a1   :  { %5168 = vmatprep.mubr.f32.mxu1 %v15838_v38  ;;  %v15842_v38 = vld [vmem:[#allocation37_spill] sm:$0xff] }
 0x8a4   :  { %5169 = vmatmul.mubr.f32.gmra.mrb[142].mxu1 %v13531_v37 }
 0x8a5   :  { %5173 = vmatprep.mubr.f32.mxu1 %v15839_v30  ;;  %v15843_v30 = vld [vmem:[#allocation33_spill] sm:$0xff] }
 0x8a8   :  { %5174 = vmatmul.mubr.f32.gmra.mrb[144].mxu1 %v13535_v19 }
 0x8a9   :  { %5178 = vmatprep.mubr.f32.mxu1 %v15840_v54  ;;  %v15844_v54 = vld [vmem:[#allocation34_spill] sm:$0xff] }
 0x8ac   :  { %5179 = vmatmul.mubr.f32.gmra.mrb[146].mxu1 %v13539_v8 }
 0x8ad   :  { %5183 = vmatprep.mubr.f32.mxu1 %v15841_v46  ;;  %v15845_v46 = vld [vmem:[#allocation57_spill] sm:$0xff] }
 0x8b0   :  { %5184 = vmatmul.mubr.f32.gmra.mrb[148].mxu1 %v13543_v35 }
 0x8b1   :  { %5188 = vmatprep.mubr.f32.mxu1 %v15842_v38  ;;  %v15846_v38 = vld [vmem:[#allocation41_spill] sm:$0xff] }
 0x8b4   :  { %5189 = vmatmul.mubr.f32.gmra.mrb[150].mxu1 %v13547_v2 }
 0x8b5   :  { %5193 = vmatprep.mubr.f32.mxu1 %v15843_v30  ;;  %v15847_v30 = vld [vmem:[#allocation45_spill] sm:$0xff] }
 0x8b8   :  { %5194 = vmatmul.mubr.f32.gmra.mrb[152].mxu1 %v13551_v26 }
 0x8b9   :  { %5198 = vmatprep.mubr.f32.mxu1 %v15844_v54  ;;  %v13571_v54 = vld [vmem:[#allocation3 + $0x30a] sm:$0xff] }
 0x8ba   :  { %15848 = vst [vmem:[#allocation28_spill] sm:$0xff] %v13571_v54 }
 0x8bc   :  { %5199 = vmatmul.mubr.f32.gmra.mrb[154].mxu1 %v13555_v18 }
 0x8bd   :  { %5203 = vmatprep.mubr.f32.mxu1 %v15845_v46  ;;  %v3997_v46 = vld [vmem:[#allocation3 + $0x330] sm:$0xff] }
 0x8c0   :  { %5204 = vmatmul.mubr.f32.gmra.mrb[156].mxu1 %v13559_v47 }
 0x8c1   :  { %5208 = vmatprep.mubr.f32.mxu1 %v15846_v38  ;;  %v3998_v38 = vld [vmem:[#allocation3 + $0x338] sm:$0xff] }
 0x8c4   :  { %5209 = vmatmul.mubr.f32.gmra.mrb[158].mxu1 %v13563_v33 }
 0x8c5   :  { %5213 = vmatprep.mubr.f32.mxu1 %v15847_v30  ;;  %v4417_v30 = vld [vmem:[#allocation12 + $0x308] sm:$0xff] }
 0x8c8   :  { %5214 = vmatmul.mubr.f32.gmra.mrb[160].mxu1 %v13567_v21 }
 0x8c9   :  { %5218 = vmatprep.mubr.f32.mxu1 %v13241_v3  ;;  %v8550_v3 = vpack.c.bf16 %v4417_v30, %v4416_v11  ;;  %v4423_v11 = vld [vmem:[#allocation12 + $0x338] sm:$0xff]  ;;  %v13584_v30 = vld [vmem:[#allocation3 + $0x31] sm:$0xff] }
 0x8cc   :  { %5219 = vmatmul.mubr.f32.gmra.mrb[162].mxu1 %v13571_v54  ;;  %v4065_v54 = vld [vmem:[#allocation3 + $0x32] sm:$0xff] }
 0x8cd   :  { %5223 = vmatprep.mubr.f32.mxu1 %v3997_v46  ;;  %v8553_v46 = vpack.c.bf16 %v4419_v27, %v4418_v20  ;;  %v4424_v27 = vld [vmem:[#allocation12 + $0x340] sm:$0xff] }
 0x8d0   :  { %5224 = vmatmul.mubr.f32.gmra.mrb[164].mxu1 %v13574_v36  ;;  %v4000_v36 = vld [vmem:[#allocation3 + $0x21] sm:$0xff] }
 0x8d1   :  { %5228 = vmatprep.mubr.f32.mxu1 %v3998_v38  ;;  %v4420_v38 = vld [vmem:[#allocation12 + $0x320] sm:$0xff] }
 0x8d4   :  { %5229 = vmatmul.mubr.f32.gmra.mrb[166].mxu1 %v13577_v61  ;;  %v8556_v61 = vpack.c.bf16 %v4421_v49, %v4420_v38  ;;  %v4067_v49 = vld [vmem:[#allocation3 + $0x4a] sm:$0xff] }
 0x8d5   :  { %5298 = vmatprep.mubr.f32.mxu1 %v13261_v56  ;;  %v4422_v56 = vld [vmem:[#allocation12 + $0x330] sm:$0xff]  ;;  %v13592_v38 = vld [vmem:[#allocation3 + $0x49] sm:$0xff] }
 0x8d6   :  { %v8559_v20 = vpack.c.bf16 %v4423_v11, %v4422_v56  ;;  %15852 = vst [vmem:[#allocation52_spill] sm:$0xff] %v13592_v38  ;;  %v4428_v11 = vld [vmem:[#allocation12 + $0x360] sm:$0xff] }
 0x8d8   :  { %5299 = vmatmul.mubr.f32.vlgmr.msra.gmra.mrb[40].mxu1 %v3999_v50  ;;  %v4066_v50 = vld [vmem:[#allocation3 + $0x3a] sm:$0xff] }
 0x8d9   :  { %5303 = vmatprep.mubr.f32.mxu1 %v13270_v48  ;;  %8551 = vmatpush1.bf16.msra.mxu1 %v8550_v3  ;;  %v4425_v48 = vld [vmem:[#allocation12 + $0x348] sm:$0xff]  ;;  %v4426_v3 = vld [vmem:[#allocation12 + $0x350] sm:$0xff] }
 0x8da   :  { %8552 = vmatprep.subr.bf16.mxu1 %v15714_v12 }
 0x8dc   :  { %5304 = vmatmul.mubr.f32.gmra.mrb[42].mxu1 %v4000_v36  ;;  %v13588_v36 = vld [vmem:[#allocation3 + $0x39] sm:$0xff] }
 0x8dd   :  { %5308 = vmatprep.mubr.f32.mxu1 %v4065_v54  ;;  %8554 = vmatpush1.bf16.msra.mxu1 %v8553_v46  ;;  %15851 = vst [vmem:[#allocation51_spill] sm:$0xff] %v13588_v36  ;;  %v8562_v54 = vpack.c.bf16 %v4425_v48, %v4424_v27  ;;  %v4427_v46 = vld [vmem:[#allocation12 + $0x358] sm:$0xff]  ;;  %v4430_v48 = vld [vmem:[#allocation12 + $0x370] sm:$0xff] }
 0x8de   :  { %8555 = vmatprep.subr.bf16.mxu1 %v15714_v12  ;;  %v8565_v56 = vpack.c.bf16 %v4427_v46, %v4426_v3  ;;  %v4432_v3 = vld [vmem:[#allocation12 + $0x380] sm:$0xff]  ;;  %v4433_v46 = vld [vmem:[#allocation12 + $0x388] sm:$0xff] }
 0x8e0   :  { %5309 = vmatmul.mubr.f32.gmra.mrb[44].mxu1 %v13584_v30 }
 0x8e1   :  { %5313 = vmatprep.mubr.f32.mxu1 %v4066_v50  ;;  %8557 = vmatpush1.bf16.msra.mxu1 %v8556_v61  ;;  %v4068_v61 = vld [vmem:[#allocation3 + $0x52] sm:$0xff] }
 0x8e2   :  { %8558 = vmatprep.subr.bf16.mxu1 %v15714_v12  ;;  %v4429_v50 = vld [vmem:[#allocation12 + $0x368] sm:$0xff] }
 0x8e3   :  { %v8568_v27 = vpack.c.bf16 %v4429_v50, %v4428_v11  ;;  %v8574_v11 = vpack.c.bf16 %v4433_v46, %v4432_v3  ;;  %v4434_v50 = vld [vmem:[#allocation12 + $0x390] sm:$0xff] }
 0x8e4   :  { %5314 = vmatmul.mubr.f32.gmra.mrb[46].mxu1 %v13588_v36  ;;  %v13596_v36 = vld [vmem:[#allocation3 + $0x51] sm:$0xff] }
 0x8e5   :  { %5318 = vmatprep.mubr.f32.mxu1 %v4067_v49  ;;  %8560 = vmatpush1.bf16.msra.mxu1 %v8559_v20  ;;  %v4069_v20 = vld [vmem:[#allocation3 + $0x62] sm:$0xff]  ;;  %v13619_v3 = vld [vmem:[#allocation3 + $0x91] sm:$0xff] }
 0x8e6   :  { %8561 = vmatprep.subr.bf16.mxu1 %v15714_v12  ;;  %v4431_v49 = vld [vmem:[#allocation12 + $0x378] sm:$0xff]  ;;  %v4438_v46 = vld [vmem:[#allocation12 + $0x3b0] sm:$0xff] }
 0x8e8   :  { %5319 = vmatmul.mubr.f32.gmra.mrb[48].mxu1 %v13592_v38  ;;  %v13600_v38 = vld [vmem:[#allocation3 + $0x61] sm:$0xff] }
 0x8e9   :  { %5323 = vmatprep.mubr.f32.mxu1 %v4068_v61  ;;  %8563 = vmatpush1.bf16.msra.mxu1 %v8562_v54  ;;  %15853 = vst [vmem:[#allocation56_spill] sm:$0xff] %v13600_v38  ;;  %v8571_v54 = vpack.c.bf16 %v4431_v49, %v4430_v48  ;;  %v13605_v61 = vld [vmem:[#allocation3 + $0x69] sm:$0xff]  ;;  %v13614_v49 = vld [vmem:[#allocation3 + $0x81] sm:$0xff] }
 0x8ea   :  { %8564 = vmatprep.subr.bf16.mxu1 %v15714_v12  ;;  %v4437_v48 = vld [vmem:[#allocation12 + $0x3a8] sm:$0xff] }
 0x8ec   :  { %5324 = vmatmul.mubr.f32.gmra.mrb[50].mxu1 %v13596_v36 }
 0x8ed   :  { %5328 = vmatprep.mubr.f32.mxu1 %v4069_v20  ;;  %8566 = vmatpush1.bf16.msra.mxu1 %v8565_v56  ;;  %v4071_v56 = vld [vmem:[#allocation3 + $0x7a] sm:$0xff] }
 0x8ee   :  { %8567 = vmatprep.subr.bf16.mxu1 %v15714_v12  ;;  %v4435_v20 = vld [vmem:[#allocation12 + $0x398] sm:$0xff] }
 0x8f0   :  { %5329 = vmatmul.mubr.f32.gmra.mrb[52].mxu1 %v13600_v38  ;;  %v13609_v38 = vld [vmem:[#allocation3 + $0x79] sm:$0xff] }
 0x8f1   :  { %5333 = vmatprep.mubr.f32.mxu1 %v13314_v39  ;;  %8569 = vmatpush1.bf16.msra.mxu1 %v8568_v27  ;;  %v8577_v39 = vpack.c.bf16 %v4435_v20, %v4434_v50  ;;  %v4436_v27 = vld [vmem:[#allocation12 + $0x3a0] sm:$0xff]  ;;  %v13632_v50 = vld [vmem:[#allocation3 + $0xb1] sm:$0xff] }
 0x8f2   :  { %8570 = vmatprep.subr.bf16.mxu1 %v15714_v12  ;;  %v4441_v20 = vld [vmem:[#allocation12 + $0x3c8] sm:$0xff] }
 0x8f4   :  { %5334 = vmatmul.mubr.f32.gmra.mrb[54].mxu1 %v13605_v61 }
 0x8f5   :  { %5338 = vmatprep.mubr.f32.mxu1 %v4071_v56  ;;  %8572 = vmatpush1.bf16.msra.mxu1 %v8571_v54  ;;  %v8580_v54 = vpack.c.bf16 %v4437_v48, %v4436_v27  ;;  %v4439_v56 = vld [vmem:[#allocation12 + $0x3b8] sm:$0xff] }
 0x8f6   :  { %8573 = vmatprep.subr.bf16.mxu1 %v15714_v12  ;;  %v13649_v27 = vld [vmem:[#allocation3 + $0xe1] sm:$0xff] }
 0x8f7   :  { %v4443_v48 = vld [vmem:[#allocation12 + $0x3d8] sm:$0xff] }
 0x8f8   :  { %5339 = vmatmul.mubr.f32.gmra.mrb[56].mxu1 %v13609_v38 }
 0x8f9   :  { %5343 = vmatprep.mubr.f32.mxu1 %v13330_v7  ;;  %8575 = vmatpush1.bf16.msra.mxu1 %v8574_v11  ;;  %v13624_v7 = vld [vmem:[#allocation3 + $0x99] sm:$0xff]  ;;  %v8583_v11 = vpack.c.bf16 %v4439_v56, %v4438_v46  ;;  %v13666_v46 = vld [vmem:[#allocation3 + $0x111] sm:$0xff] }
 0x8fa   :  { %8576 = vmatprep.subr.bf16.mxu1 %v15714_v12  ;;  %v4445_v56 = vld [vmem:[#allocation12 + $0x3e8] sm:$0xff] }
 0x8fc   :  { %5344 = vmatmul.mubr.f32.gmra.mrb[58].mxu1 %v13614_v49 }
 0x8fd   :  { %5348 = vmatprep.mubr.f32.mxu1 %v13338_v52  ;;  %8578 = vmatpush1.bf16.msra.mxu1 %v8577_v39  ;;  %v13628_v52 = vld [vmem:[#allocation3 + $0xa9] sm:$0xff] }
 0x8fe   :  { %8579 = vmatprep.subr.bf16.mxu1 %v15714_v12 }
 0x900   :  { %5349 = vmatmul.mubr.f32.gmra.mrb[60].mxu1 %v13619_v3 }
 0x901   :  { %5353 = vmatprep.mubr.f32.mxu1 %v13346_v45  ;;  %8581 = vmatpush1.bf16.msra.mxu1 %v8580_v54  ;;  %v13637_v45 = vld [vmem:[#allocation3 + $0xc1] sm:$0xff] }
 0x902   :  { %8582 = vmatprep.subr.bf16.mxu1 %v15714_v12 }
 0x904   :  { %5354 = vmatmul.mubr.f32.gmra.mrb[62].mxu1 %v13624_v7 }
 0x905   :  { %5358 = vmatprep.mubr.f32.mxu1 %v13355_v58  ;;  %8584 = vmatpush1.bf16.msra.mxu1 %v8583_v11  ;;  %v13641_v58 = vld [vmem:[#allocation3 + $0xc9] sm:$0xff] }
 0x906   :  { %8585 = vmatprep.subr.bf16.mxu1 %v15714_v12 }
 0x908   :  { %5359 = vmatmul.mubr.f32.gmra.mrb[64].mxu1 %v13628_v52 }
 0x909   :  { %5363 = vmatprep.mubr.f32.mxu1 %v13363_v17  ;;  %v13645_v17 = vld [vmem:[#allocation3 + $0xd9] sm:$0xff] }
 0x90c   :  { %5364 = vmatmul.mubr.f32.gmra.mrb[66].mxu1 %v13632_v50 }
 0x90d   :  { %5368 = vmatprep.mubr.f32.mxu1 %v13371_v31  ;;  %v4440_v31 = vld [vmem:[#allocation12 + $0x3c0] sm:$0xff] }
 0x90e   :  { %v8586_v39 = vpack.c.bf16 %v4441_v20, %v4440_v31  ;;  %v13683_v31 = vld [vmem:[#allocation3 + $0x141] sm:$0xff] }
 0x910   :  { %5369 = vmatmul.mubr.f32.gmra.mrb[68].mxu1 %v13637_v45 }
 0x911   :  { %5373 = vmatprep.mubr.f32.mxu1 %v13379_v55  ;;  %8587 = vmatpush1.bf16.msra.mxu1 %v8586_v39  ;;  %v13654_v55 = vld [vmem:[#allocation3 + $0xf1] sm:$0xff] }
 0x912   :  { %8588 = vmatprep.subr.bf16.mxu1 %v15714_v12  ;;  %v13700_v39 = vld [vmem:[#allocation3 + $0x171] sm:$0xff] }
 0x914   :  { %5374 = vmatmul.mubr.f32.gmra.mrb[70].mxu1 %v13641_v58 }
 0x915   :  { %5378 = vmatprep.mubr.f32.mxu1 %v13388_v32  ;;  %v13658_v32 = vld [vmem:[#allocation3 + $0xf9] sm:$0xff] }
 0x918   :  { %5379 = vmatmul.mubr.f32.gmra.mrb[72].mxu1 %v13645_v17 }
 0x919   :  { %5383 = vmatprep.mubr.f32.mxu1 %v13396_v44  ;;  %v13662_v44 = vld [vmem:[#allocation3 + $0x109] sm:$0xff] }
 0x91c   :  { %5384 = vmatmul.mubr.f32.gmra.mrb[74].mxu1 %v13649_v27 }
 0x91d   :  { %5388 = vmatprep.mubr.f32.mxu1 %v13404_v14  ;;  %v4442_v14 = vld [vmem:[#allocation12 + $0x3d0] sm:$0xff] }
 0x91e   :  { %v8589_v54 = vpack.c.bf16 %v4443_v48, %v4442_v14  ;;  %v13703_v14 = vld [vmem:[#allocation3 + $0x181] sm:$0xff]  ;;  %v13706_v48 = vld [vmem:[#allocation3 + $0x189] sm:$0xff] }
 0x920   :  { %5389 = vmatmul.mubr.f32.gmra.mrb[76].mxu1 %v13654_v55 }
 0x921   :  { %5393 = vmatprep.mubr.f32.mxu1 %v13412_v41  ;;  %8590 = vmatpush1.bf16.msra.mxu1 %v8589_v54  ;;  %v13671_v41 = vld [vmem:[#allocation3 + $0x121] sm:$0xff] }
 0x922   :  { %8591 = vmatprep.subr.bf16.mxu1 %v15714_v12  ;;  %v6931_v54 = vld [vmem:[#allocation16] sm:$0xff] }
 0x924   :  { %5394 = vmatmul.mubr.f32.gmra.mrb[78].mxu1 %v13658_v32 }
 0x925   :  { %5398 = vmatprep.mubr.f32.mxu1 %v13421_v42  ;;  %v13675_v42 = vld [vmem:[#allocation3 + $0x129] sm:$0xff] }
 0x928   :  { %5399 = vmatmul.mubr.f32.gmra.mrb[80].mxu1 %v13662_v44 }
 0x929   :  { %5403 = vmatprep.mubr.f32.mxu1 %v13425_v60  ;;  %v13679_v60 = vld [vmem:[#allocation3 + $0x139] sm:$0xff] }
 0x92c   :  { %5404 = vmatmul.mubr.f32.gmra.mrb[82].mxu1 %v13666_v46 }
 0x92d   :  { %5408 = vmatprep.mubr.f32.mxu1 %v13429_v22  ;;  %v4444_v22 = vld [vmem:[#allocation12 + $0x3e0] sm:$0xff] }
 0x92e   :  { %v8592_v11 = vpack.c.bf16 %v4445_v56, %v4444_v22  ;;  %v6932_v22 = vld [vmem:[#allocation16 + $0x8] sm:$0xff] }
 0x92f   :  { %v13711_v56 = vpack.c.bf16 %v6932_v22, %v6931_v54  ;;  %v4126_v54 = vld [vmem:[#allocation3 + $0x33a] sm:$0xff] }
 0x930   :  { %5409 = vmatmul.mubr.f32.gmra.mrb[84].mxu1 %v13671_v41  ;;  %v13829_v22 = vld [vmem:[#allocation3 + $0x339] sm:$0xff] }
 0x931   :  { %5413 = vmatprep.mubr.f32.mxu1 %v13433_v4  ;;  %8593 = vmatpush1.bf16.msra.mxu1 %v8592_v11  ;;  %v13688_v4 = vld [vmem:[#allocation3 + $0x151] sm:$0xff] }
 0x932   :  { %8594 = vmatprep.subr.bf16.mxu1 %v15714_v12  ;;  %v4447_v12 = vld [vmem:[#allocation12 + $0x3f8] sm:$0xff]  ;;  %v4032_v11 = vld [vmem:[#allocation3 + $0x1d1] sm:$0xff] }
 0x934   :  { %5414 = vmatmul.mubr.f32.gmra.mrb[86].mxu1 %v13675_v42 }
 0x935   :  { %5418 = vmatprep.mubr.f32.mxu1 %v13438_v13  ;;  %v13692_v13 = vld [vmem:[#allocation3 + $0x159] sm:$0xff] }
 0x938   :  { %5419 = vmatmul.mubr.f32.gmra.mrb[88].mxu1 %v13679_v60 }
 0x939   :  { %5423 = vmatprep.mubr.f32.mxu1 %v13442_v63  ;;  %v13696_v63 = vld [vmem:[#allocation3 + $0x169] sm:$0xff] }
 0x93c   :  { %5424 = vmatmul.mubr.f32.gmra.mrb[90].mxu1 %v13683_v31 }
 0x93d   :  { %5428 = vmatprep.mubr.f32.mxu1 %v13446_v40  ;;  %v4446_v40 = vld [vmem:[#allocation12 + $0x3f0] sm:$0xff] }
 0x93e   :  { %v8595_v20 = vpack.c.bf16 %v4447_v12, %v4446_v40  ;;  %v13715_v40 = vld [vmem:[#allocation3 + $0x1e1] sm:$0xff] }
 0x93f   :  { %v13727_v12 = vld [vmem:[#allocation3 + $0x201] sm:$0xff] }
 0x940   :  { %5429 = vmatmul.mubr.f32.gmra.mrb[92].mxu1 %v13688_v4 }
 0x941   :  { %5433 = vmatprep.mubr.f32.mxu1 %v13450_v34  ;;  %v4093_v34 = vld [vmem:[#allocation3 + $0x182] sm:$0xff]  ;;  %8596 = vmatpush1.bf16.msra.mxu1 %v8595_v20 }
 0x942   :  { %8630 = vmatprep.subr.bf16.mxu1 %v13711_v56  ;;  %v13815_v20 = vld [vmem:[#allocation3 + $0x309] sm:$0xff] }
 0x943   :  { %15857 = vst [vmem:[#allocation34_spill] sm:$0xff] %v13815_v20 }
 0x944   :  { %5434 = vmatmul.mubr.f32.gmra.mrb[94].mxu1 %v13692_v13 }
 0x945   :  { %5438 = vmatprep.mubr.f32.mxu1 %v13454_v16  ;;  %v4094_v16 = vld [vmem:[#allocation3 + $0x18a] sm:$0xff] }
 0x948   :  { %5439 = vmatmul.mubr.f32.gmra.mrb[96].mxu1 %v13696_v63 }
 0x949   :  { %5443 = vmatprep.mubr.f32.mxu1 %v13457_v1  ;;  %v4031_v1 = vld [vmem:[#allocation3 + $0x1c9] sm:$0xff] }
 0x94c   :  { %5444 = vmatmul.mubr.f32.gmra.mrb[98].mxu1 %v13700_v39 }
 0x94d   :  { %5448 = vmatprep.mubr.f32.mxu1 %v4093_v34  ;;  %v13819_v34 = vld [vmem:[#allocation3 + $0x319] sm:$0xff] }
 0x94e   :  { %15859 = vst [vmem:[#allocation57_spill] sm:$0xff] %v13819_v34 }
 0x950   :  { %5449 = vmatmul.mubr.f32.gmra.mrb[100].mxu1 %v13703_v14 }
 0x951   :  { %5453 = vmatprep.mubr.f32.mxu1 %v4094_v16  ;;  %v13823_v16 = vld [vmem:[#allocation3 + $0x321] sm:$0xff] }
 0x952   :  { %15861 = vst [vmem:[#allocation41_spill] sm:$0xff] %v13823_v16 }
 0x954   :  { %5454 = vmatmul.mubr.f32.gmra.mrb[102].mxu1 %v13706_v48 }
 0x955   :  { %5458 = vmatprep.mubr.f32.mxu1 %v13463_v59  ;;  %v13719_v59 = vld [vmem:[#allocation3 + $0x1e9] sm:$0xff] }
 0x958   :  { %5459 = vmatmul.mubr.f32.gmra.mrb[104].mxu1 %v4031_v1  ;;  %v13826_v1 = vld [vmem:[#allocation3 + $0x331] sm:$0xff] }
 0x959   :  { %5463 = vmatprep.mubr.f32.mxu1 %v13467_v0  ;;  %v13723_v0 = vld [vmem:[#allocation3 + $0x1f9] sm:$0xff]  ;;  %15862 = vst [vmem:[#allocation45_spill] sm:$0xff] %v13826_v1 }
 0x95c   :  { %5464 = vmatmul.mubr.f32.gmra.mrb[106].mxu1 %v4032_v11  ;;  %v6933_v11 = vld [vmem:[#allocation16 + $0x10] sm:$0xff] }
 0x95d   :  { %5468 = vmatprep.mubr.f32.mxu1 %v13471_v25  ;;  %v13731_v25 = vld [vmem:[#allocation3 + $0x211] sm:$0xff] }
 0x960   :  { %5469 = vmatmul.mubr.f32.gmra.mrb[108].mxu1 %v13715_v40 }
 0x961   :  { %5473 = vmatprep.mubr.f32.mxu1 %v13475_v5  ;;  %v13735_v5 = vld [vmem:[#allocation3 + $0x219] sm:$0xff] }
 0x964   :  { %5474 = vmatmul.mubr.f32.gmra.mrb[110].mxu1 %v13719_v59 }
 0x965   :  { %5478 = vmatprep.mubr.f32.mxu1 %v13479_v15  ;;  %v13739_v15 = vld [vmem:[#allocation3 + $0x229] sm:$0xff] }
 0x968   :  { %5479 = vmatmul.mubr.f32.gmra.mrb[112].mxu1 %v13723_v0 }
 0x969   :  { %5483 = vmatprep.mubr.f32.mxu1 %v13483_v29  ;;  %v13743_v29 = vld [vmem:[#allocation3 + $0x231] sm:$0xff] }
 0x96c   :  { %5484 = vmatmul.mubr.f32.gmra.mrb[114].mxu1 %v13727_v12 }
 0x96d   :  { %5488 = vmatprep.mubr.f32.mxu1 %v13487_v62  ;;  %v13747_v62 = vld [vmem:[#allocation3 + $0x241] sm:$0xff] }
 0x970   :  { %5489 = vmatmul.mubr.f32.gmra.mrb[116].mxu1 %v13731_v25 }
 0x971   :  { %5493 = vmatprep.mubr.f32.mxu1 %v13491_v28  ;;  %v13751_v28 = vld [vmem:[#allocation3 + $0x249] sm:$0xff] }
 0x974   :  { %5494 = vmatmul.mubr.f32.gmra.mrb[118].mxu1 %v13735_v5 }
 0x975   :  { %5498 = vmatprep.mubr.f32.mxu1 %v13495_v57  ;;  %v13755_v57 = vld [vmem:[#allocation3 + $0x259] sm:$0xff] }
 0x978   :  { %5499 = vmatmul.mubr.f32.gmra.mrb[120].mxu1 %v13739_v15 }
 0x979   :  { %5503 = vmatprep.mubr.f32.mxu1 %v13499_v51  ;;  %v13759_v51 = vld [vmem:[#allocation3 + $0x261] sm:$0xff] }
 0x97c   :  { %5504 = vmatmul.mubr.f32.gmra.mrb[122].mxu1 %v13743_v29 }
 0x97d   :  { %5508 = vmatprep.mubr.f32.mxu1 %v13503_v6  ;;  %v13763_v6 = vld [vmem:[#allocation3 + $0x271] sm:$0xff] }
 0x980   :  { %5509 = vmatmul.mubr.f32.gmra.mrb[124].mxu1 %v13747_v62 }
 0x981   :  { %5513 = vmatprep.mubr.f32.mxu1 %v13507_v24  ;;  %v13767_v24 = vld [vmem:[#allocation3 + $0x279] sm:$0xff] }
 0x984   :  { %5514 = vmatmul.mubr.f32.gmra.mrb[126].mxu1 %v13751_v28 }
 0x985   :  { %5518 = vmatprep.mubr.f32.mxu1 %v13511_v53  ;;  %v13771_v53 = vld [vmem:[#allocation3 + $0x289] sm:$0xff] }
 0x988   :  { %5519 = vmatmul.mubr.f32.gmra.mrb[128].mxu1 %v13755_v57 }
 0x989   :  { %5523 = vmatprep.mubr.f32.mxu1 %v13515_v23  ;;  %v13775_v23 = vld [vmem:[#allocation3 + $0x291] sm:$0xff] }
 0x98c   :  { %5524 = vmatmul.mubr.f32.gmra.mrb[130].mxu1 %v13759_v51 }
 0x98d   :  { %5528 = vmatprep.mubr.f32.mxu1 %v13519_v9  ;;  %v13779_v9 = vld [vmem:[#allocation3 + $0x2a1] sm:$0xff] }
 0x990   :  { %5529 = vmatmul.mubr.f32.gmra.mrb[132].mxu1 %v13763_v6 }
 0x991   :  { %5533 = vmatprep.mubr.f32.mxu1 %v13523_v10  ;;  %v13783_v10 = vld [vmem:[#allocation3 + $0x2a9] sm:$0xff] }
 0x994   :  { %5534 = vmatmul.mubr.f32.gmra.mrb[134].mxu1 %v13767_v24 }
 0x995   :  { %5538 = vmatprep.mubr.f32.mxu1 %v13527_v43  ;;  %v13787_v43 = vld [vmem:[#allocation3 + $0x2b9] sm:$0xff] }
 0x998   :  { %5539 = vmatmul.mubr.f32.gmra.mrb[136].mxu1 %v13771_v53 }
 0x999   :  { %5543 = vmatprep.mubr.f32.mxu1 %v13531_v37  ;;  %v13791_v37 = vld [vmem:[#allocation3 + $0x2c1] sm:$0xff] }
 0x99c   :  { %5544 = vmatmul.mubr.f32.gmra.mrb[138].mxu1 %v13775_v23 }
 0x99d   :  { %5548 = vmatprep.mubr.f32.mxu1 %v13535_v19  ;;  %v13795_v19 = vld [vmem:[#allocation3 + $0x2d1] sm:$0xff] }
 0x9a0   :  { %5549 = vmatmul.mubr.f32.gmra.mrb[140].mxu1 %v13779_v9 }
 0x9a1   :  { %5553 = vmatprep.mubr.f32.mxu1 %v13539_v8  ;;  %v13799_v8 = vld [vmem:[#allocation3 + $0x2d9] sm:$0xff] }
 0x9a4   :  { %5554 = vmatmul.mubr.f32.gmra.mrb[142].mxu1 %v13783_v10 }
 0x9a5   :  { %5558 = vmatprep.mubr.f32.mxu1 %v13543_v35  ;;  %v13803_v35 = vld [vmem:[#allocation3 + $0x2e9] sm:$0xff] }
 0x9a8   :  { %5559 = vmatmul.mubr.f32.gmra.mrb[144].mxu1 %v13787_v43 }
 0x9a9   :  { %5563 = vmatprep.mubr.f32.mxu1 %v13547_v2  ;;  %v13807_v2 = vld [vmem:[#allocation3 + $0x2f1] sm:$0xff] }
 0x9aa   :  { %15854 = vst [vmem:[#allocation37_spill] sm:$0xff] %v13807_v2 }
 0x9ac   :  { %5564 = vmatmul.mubr.f32.gmra.mrb[146].mxu1 %v13791_v37 }
 0x9ad   :  { %5568 = vmatprep.mubr.f32.mxu1 %v13551_v26  ;;  %v13811_v26 = vld [vmem:[#allocation3 + $0x301] sm:$0xff] }
 0x9ae   :  { %15855 = vst [vmem:[#allocation33_spill] sm:$0xff] %v13811_v26 }
 0x9b0   :  { %5569 = vmatmul.mubr.f32.gmra.mrb[148].mxu1 %v13795_v19 }
 0x9b1   :  { %5573 = vmatprep.mubr.f32.mxu1 %v13555_v18  ;;  %v15856_v18 = vld [vmem:[#allocation28_spill] sm:$0xff] }
 0x9b2   :  { %15863 = vst [vmem:[#allocation28_spill] sm:$0xff] %v13829_v22 }
 0x9b4   :  { %5574 = vmatmul.mubr.f32.gmra.mrb[150].mxu1 %v13799_v8 }
 0x9b5   :  { %5578 = vmatprep.mubr.f32.mxu1 %v13559_v47  ;;  %v15858_v47 = vld [vmem:[#allocation32_spill] sm:$0xff] }
 0x9b8   :  { %5579 = vmatmul.mubr.f32.gmra.mrb[152].mxu1 %v13803_v35 }
 0x9b9   :  { %5583 = vmatprep.mubr.f32.mxu1 %v13563_v33  ;;  %v15860_v33 = vld [vmem:[#allocation50_spill] sm:$0xff] }
 0x9bc   :  { %5584 = vmatmul.mubr.f32.gmra.mrb[154].mxu1 %v13807_v2  ;;  %v15865_v2 = vld [vmem:[#allocation52_spill] sm:$0xff] }
 0x9bd   :  { %5588 = vmatprep.mubr.f32.mxu1 %v13567_v21  ;;  %v4125_v21 = vld [vmem:[#allocation3 + $0x332] sm:$0xff] }
 0x9c0   :  { %5589 = vmatmul.mubr.f32.gmra.mrb[156].mxu1 %v13811_v26  ;;  %v6938_v26 = vld [vmem:[#allocation16 + $0x38] sm:$0xff] }
 0x9c1   :  { %5593 = vmatprep.mubr.f32.mxu1 %v15856_v18  ;;  %v6934_v18 = vld [vmem:[#allocation16 + $0x18] sm:$0xff] }
 0x9c4   :  { %5594 = vmatmul.mubr.f32.gmra.mrb[158].mxu1 %v13815_v20  ;;  %v6937_v20 = vld [vmem:[#allocation16 + $0x30] sm:$0xff] }
 0x9c5   :  { %5598 = vmatprep.mubr.f32.mxu1 %v15858_v47  ;;  %v8633_v47 = vpack.c.bf16 %v6934_v18, %v6933_v11  ;;  %v4130_v11 = vld [vmem:[#allocation3 + $0x48] sm:$0xff] }
 0x9c6   :  { %v6939_v18 = vld [vmem:[#allocation16 + $0x40] sm:$0xff] }
 0x9c8   :  { %5599 = vmatmul.mubr.f32.gmra.mrb[160].mxu1 %v13819_v34  ;;  %v6935_v34 = vld [vmem:[#allocation16 + $0x20] sm:$0xff] }
 0x9c9   :  { %5603 = vmatprep.mubr.f32.mxu1 %v15860_v33  ;;  %v4128_v33 = vld [vmem:[#allocation3 + $0x30] sm:$0xff] }
 0x9cc   :  { %5604 = vmatmul.mubr.f32.gmra.mrb[162].mxu1 %v13823_v16  ;;  %v6936_v16 = vld [vmem:[#allocation16 + $0x28] sm:$0xff] }
 0x9cd   :  { %5608 = vmatprep.mubr.f32.mxu1 %v4125_v21  ;;  %v15864_v21 = vld [vmem:[#allocation51_spill] sm:$0xff] }
 0x9d0   :  { %5609 = vmatmul.mubr.f32.gmra.mrb[164].mxu1 %v13826_v1  ;;  %v8637_v1 = vpack.c.bf16 %v6936_v16, %v6935_v34  ;;  %v15866_v34 = vld [vmem:[#allocation56_spill] sm:$0xff] }
 0x9d1   :  { %5613 = vmatprep.mubr.f32.mxu1 %v4126_v54  ;;  %v4129_v54 = vld [vmem:[#allocation3 + $0x38] sm:$0xff]  ;;  %v4132_v16 = vld [vmem:[#allocation3 + $0x60] sm:$0xff] }
 0x9d4   :  { %5614 = vmatmul.mubr.f32.gmra.mrb[166].mxu1 %v13829_v22  ;;  %v6940_v22 = vld [vmem:[#allocation16 + $0x48] sm:$0xff] }
 0x9d5   :  { %5683 = vmatprep.mubr.f32.mxu1 %v13584_v30  ;;  %v8641_v30 = vpack.c.bf16 %v6938_v26, %v6937_v20  ;;  %v4134_v26 = vld [vmem:[#allocation3 + $0x78] sm:$0xff]  ;;  %v4136_v20 = vld [vmem:[#allocation3 + $0x90] sm:$0xff] }
 0x9d8   :  { %5684 = vmatmul.mubr.f32.vlgmr.msra.gmra.mrb[40].mxu1 %v4128_v33  ;;  %v4131_v33 = vld [vmem:[#allocation3 + $0x50] sm:$0xff] }
 0x9d9   :  { %5688 = vmatprep.mubr.f32.mxu1 %v15864_v21  ;;  %8632 = vmatpush3.bf16.msra.mxu1 %v13711_v56  ;;  %v8645_v56 = vpack.c.bf16 %v6940_v22, %v6939_v18  ;;  %v6942_v22 = vld [vmem:[#allocation16 + $0x58] sm:$0xff]  ;;  %v4142_v21 = vld [vmem:[#allocation3 + $0xd8] sm:$0xff] }
 0x9da   :  { %8634 = vmatprep.subr.bf16.mxu1 %v8633_v47  ;;  %v6945_v18 = vld [vmem:[#allocation16 + $0x70] sm:$0xff] }
 0x9dc   :  { %5689 = vmatmul.mubr.f32.gmra.mrb[42].mxu1 %v4129_v54  ;;  %v6943_v54 = vld [vmem:[#allocation16 + $0x60] sm:$0xff] }
 0x9dd   :  { %5693 = vmatprep.mubr.f32.mxu1 %v15865_v2  ;;  %8636 = vmatpush3.bf16.msra.mxu1 %v8633_v47  ;;  %v4133_v2 = vld [vmem:[#allocation3 + $0x68] sm:$0xff]  ;;  %v4137_v47 = vld [vmem:[#allocation3 + $0x98] sm:$0xff] }
 0x9de   :  { %8638 = vmatprep.subr.bf16.mxu1 %v8637_v1 }
 0x9e0   :  { %5694 = vmatmul.mubr.f32.gmra.mrb[44].mxu1 %v4130_v11  ;;  %v4150_v11 = vld [vmem:[#allocation3 + $0x138] sm:$0xff] }
 0x9e1   :  { %5698 = vmatprep.mubr.f32.mxu1 %v13596_v36  ;;  %8640 = vmatpush3.bf16.msra.mxu1 %v8637_v1  ;;  %v4135_v36 = vld [vmem:[#allocation3 + $0x80] sm:$0xff]  ;;  %v6941_v1 = vld [vmem:[#allocation16 + $0x50] sm:$0xff] }
 0x9e2   :  { %8642 = vmatprep.subr.bf16.mxu1 %v8641_v30 }
 0x9e4   :  { %5699 = vmatmul.mubr.f32.gmra.mrb[46].mxu1 %v4131_v33  ;;  %v4157_v33 = vld [vmem:[#allocation3 + $0x188] sm:$0xff] }
 0x9e5   :  { %5703 = vmatprep.mubr.f32.mxu1 %v15866_v34  ;;  %8644 = vmatpush3.bf16.msra.mxu1 %v8641_v30  ;;  %v13863_v34 = vld [vmem:[#allocation2] sm:$0xff] }
 0x9e6   :  { %8646 = vmatprep.subr.bf16.mxu1 %v8645_v56 }
 0x9e8   :  { %5704 = vmatmul.mubr.f32.gmra.mrb[48].mxu1 %v4132_v16  ;;  %v4318_v16 = vld [vmem:[#allocation3 + $0x34a] sm:$0xff] }
 0x9e9   :  { %5708 = vmatprep.mubr.f32.mxu1 %v13605_v61  ;;  %8648 = vmatpush3.bf16.msra.mxu1 %v8645_v56  ;;  %v8649_v61 = vpack.c.bf16 %v6942_v22, %v6941_v1  ;;  %v15867_v1 = vld [vmem:[#allocation53_spill] sm:$0xff] }
 0x9ea   :  { %8050 = vmatprep.mubr.f32.mxu0 %v4318_v16  ;;  %v15879_v16 = vld [vmem:[#allocation45_spill] sm:$0xff] }
 0x9eb   :  { %8650 = vmatprep.subr.bf16.mxu1 %v8649_v61 }
 0x9ec   :  { %5709 = vmatmul.mubr.f32.gmra.mrb[50].mxu1 %v4133_v2  ;;  %v4162_v2 = vld [vmem:[#allocation3 + $0x1f8] sm:$0xff] }
 0x9ed   :  { %5713 = vmatprep.mubr.f32.mxu1 %v13609_v38  ;;  %8652 = vmatpush3.bf16.msra.mxu1 %v8649_v61  ;;  %v4138_v38 = vld [vmem:[#allocation3 + $0xa8] sm:$0xff] }
 0x9ee   :  { %v4182_v61 = vld [vmem:[#allocation3 + $0x2e8] sm:$0xff] }
 0x9f0   :  { %5714 = vmatmul.mubr.f32.gmra.mrb[52].mxu1 %v4134_v26  ;;  %v4163_v26 = vld [vmem:[#allocation3 + $0x200] sm:$0xff] }
 0x9f1   :  { %5718 = vmatprep.mubr.f32.mxu1 %v13614_v49  ;;  %v4139_v49 = vld [vmem:[#allocation3 + $0xb0] sm:$0xff] }
 0x9f4   :  { %5719 = vmatmul.mubr.f32.gmra.mrb[54].mxu1 %v4135_v36  ;;  %v4164_v36 = vld [vmem:[#allocation3 + $0x210] sm:$0xff] }
 0x9f5   :  { %5723 = vmatprep.mubr.f32.mxu1 %v13619_v3  ;;  %v4140_v3 = vld [vmem:[#allocation3 + $0xc0] sm:$0xff] }
 0x9f8   :  { %5724 = vmatmul.mubr.f32.gmra.mrb[56].mxu1 %v4136_v20  ;;  %v4181_v20 = vld [vmem:[#allocation3 + $0x2d8] sm:$0xff] }
 0x9f9   :  { %5728 = vmatprep.mubr.f32.mxu1 %v13624_v7  ;;  %v4141_v7 = vld [vmem:[#allocation3 + $0xc8] sm:$0xff] }
 0x9fc   :  { %5729 = vmatmul.mubr.f32.gmra.mrb[58].mxu1 %v4137_v47 }
 0x9fd   :  { %5733 = vmatprep.mubr.f32.mxu1 %v13628_v52  ;;  %v4143_v52 = vld [vmem:[#allocation3 + $0xe0] sm:$0xff] }
 0xa00   :  { %5734 = vmatmul.mubr.f32.gmra.mrb[60].mxu1 %v4138_v38 }
 0xa01   :  { %5738 = vmatprep.mubr.f32.mxu1 %v13632_v50  ;;  %v4144_v50 = vld [vmem:[#allocation3 + $0xf0] sm:$0xff] }
 0xa04   :  { %5739 = vmatmul.mubr.f32.gmra.mrb[62].mxu1 %v4139_v49 }
 0xa05   :  { %5743 = vmatprep.mubr.f32.mxu1 %v13637_v45  ;;  %v6944_v45 = vld [vmem:[#allocation16 + $0x68] sm:$0xff] }
 0xa06   :  { %v8653_v30 = vpack.c.bf16 %v6944_v45, %v6943_v54  ;;  %v15872_v54 = vld [vmem:[#allocation36_spill] sm:$0xff] }
 0xa08   :  { %5744 = vmatmul.mubr.f32.gmra.mrb[64].mxu1 %v4140_v3  ;;  %8654 = vmatprep.subr.bf16.mxu1 %v8653_v30  ;;  %v15870_v3 = vld [vmem:[#allocation31_spill] sm:$0xff] }
 0xa09   :  { %5748 = vmatprep.mubr.f32.mxu1 %v13641_v58  ;;  %v4145_v58 = vld [vmem:[#allocation3 + $0xf8] sm:$0xff]  ;;  %8656 = vmatpush3.bf16.msra.mxu1 %v8653_v30 }
 0xa0c   :  { %5749 = vmatmul.mubr.f32.gmra.mrb[66].mxu1 %v4141_v7 }
 0xa0d   :  { %5753 = vmatprep.mubr.f32.mxu1 %v13645_v17  ;;  %v4146_v17 = vld [vmem:[#allocation3 + $0x108] sm:$0xff] }
 0xa10   :  { %5754 = vmatmul.mubr.f32.gmra.mrb[68].mxu1 %v4142_v21 }
 0xa11   :  { %5758 = vmatprep.mubr.f32.mxu1 %v13649_v27  ;;  %v4147_v27 = vld [vmem:[#allocation3 + $0x110] sm:$0xff] }
 0xa14   :  { %5759 = vmatmul.mubr.f32.gmra.mrb[70].mxu1 %v4143_v52  ;;  %v15871_v52 = vld [vmem:[#allocation33_spill] sm:$0xff] }
 0xa15   :  { %5763 = vmatprep.mubr.f32.mxu1 %v13654_v55  ;;  %v4148_v55 = vld [vmem:[#allocation3 + $0x120] sm:$0xff] }
 0xa18   :  { %5764 = vmatmul.mubr.f32.gmra.mrb[72].mxu1 %v4144_v50 }
 0xa19   :  { %5768 = vmatprep.mubr.f32.mxu1 %v13658_v32  ;;  %v4149_v32 = vld [vmem:[#allocation3 + $0x128] sm:$0xff] }
 0xa1c   :  { %5769 = vmatmul.mubr.f32.gmra.mrb[74].mxu1 %v4145_v58  ;;  %v15873_v58 = vld [vmem:[#allocation34_spill] sm:$0xff] }
 0xa1d   :  { %5773 = vmatprep.mubr.f32.mxu1 %v13662_v44  ;;  %v4151_v44 = vld [vmem:[#allocation3 + $0x140] sm:$0xff] }
 0xa20   :  { %5774 = vmatmul.mubr.f32.gmra.mrb[76].mxu1 %v4146_v17 }
 0xa21   :  { %5778 = vmatprep.mubr.f32.mxu1 %v13666_v46  ;;  %v4152_v46 = vld [vmem:[#allocation3 + $0x150] sm:$0xff] }
 0xa24   :  { %5779 = vmatmul.mubr.f32.gmra.mrb[78].mxu1 %v4147_v27  ;;  %v4185_v27 = vld [vmem:[#allocation3 + $0x308] sm:$0xff] }
 0xa25   :  { %5783 = vmatprep.mubr.f32.mxu1 %v13671_v41  ;;  %v4153_v41 = vld [vmem:[#allocation3 + $0x158] sm:$0xff] }
 0xa28   :  { %5784 = vmatmul.mubr.f32.gmra.mrb[80].mxu1 %v4148_v55  ;;  %v15874_v55 = vld [vmem:[#allocation27_spill] sm:$0xff] }
 0xa29   :  { %5788 = vmatprep.mubr.f32.mxu1 %v13675_v42  ;;  %v6946_v42 = vld [vmem:[#allocation16 + $0x78] sm:$0xff] }
 0xa2a   :  { %v8657_v56 = vpack.c.bf16 %v6946_v42, %v6945_v18  ;;  %v15876_v18 = vld [vmem:[#allocation26_spill] sm:$0xff] }
 0xa2c   :  { %5789 = vmatmul.mubr.f32.gmra.mrb[82].mxu1 %v4149_v32  ;;  %8658 = vmatprep.subr.bf16.mxu1 %v8657_v56 }
 0xa2d   :  { %5793 = vmatprep.mubr.f32.mxu1 %v13679_v60  ;;  %v4154_v60 = vld [vmem:[#allocation3 + $0x168] sm:$0xff]  ;;  %8660 = vmatpush3.bf16.msra.mxu1 %v8657_v56 }
 0xa30   :  { %5794 = vmatmul.mubr.f32.gmra.mrb[84].mxu1 %v4150_v11 }
 0xa31   :  { %5798 = vmatprep.mubr.f32.mxu1 %v13683_v31  ;;  %v4155_v31 = vld [vmem:[#allocation3 + $0x170] sm:$0xff] }
 0xa34   :  { %5799 = vmatmul.mubr.f32.gmra.mrb[86].mxu1 %v4151_v44  ;;  %v15875_v44 = vld [vmem:[#allocation57_spill] sm:$0xff] }
 0xa35   :  { %5803 = vmatprep.mubr.f32.mxu1 %v13688_v4  ;;  %v4156_v4 = vld [vmem:[#allocation3 + $0x180] sm:$0xff] }
 0xa38   :  { %5804 = vmatmul.mubr.f32.gmra.mrb[88].mxu1 %v4152_v46 }
 0xa39   :  { %5808 = vmatprep.mubr.f32.mxu1 %v13692_v13  ;;  %v4222_v13 = vld [vmem:[#allocation3 + $0x199] sm:$0xff] }
 0xa3c   :  { %5809 = vmatmul.mubr.f32.gmra.mrb[90].mxu1 %v4153_v41  ;;  %v4186_v41 = vld [vmem:[#allocation3 + $0x318] sm:$0xff] }
 0xa3d   :  { %5813 = vmatprep.mubr.f32.mxu1 %v13696_v63  ;;  %v4223_v63 = vld [vmem:[#allocation3 + $0x1a1] sm:$0xff] }
 0xa40   :  { %5814 = vmatmul.mubr.f32.gmra.mrb[92].mxu1 %v4154_v60  ;;  %v15877_v60 = vld [vmem:[#allocation41_spill] sm:$0xff] }
 0xa41   :  { %5818 = vmatprep.mubr.f32.mxu1 %v13700_v39  ;;  %v4319_v39 = vld [vmem:[#allocation3 + $0x352] sm:$0xff] }
 0xa42   :  { %8051 = vmatmul.mubr.f32.gmra.mrb[214].mxu0 %v4319_v39 }
 0xa44   :  { %5819 = vmatmul.mubr.f32.gmra.mrb[94].mxu1 %v4155_v31 }
 0xa45   :  { %5823 = vmatprep.mubr.f32.mxu1 %v13703_v14  ;;  %v4160_v14 = vld [vmem:[#allocation3 + $0x1e0] sm:$0xff] }
 0xa48   :  { %5824 = vmatmul.mubr.f32.gmra.mrb[96].mxu1 %v4156_v4  ;;  %v4187_v4 = vld [vmem:[#allocation3 + $0x320] sm:$0xff] }
 0xa49   :  { %5828 = vmatprep.mubr.f32.mxu1 %v13706_v48  ;;  %v4161_v48 = vld [vmem:[#allocation3 + $0x1e8] sm:$0xff] }
 0xa4c   :  { %5829 = vmatmul.mubr.f32.gmra.mrb[98].mxu1 %v4157_v33 }
 0xa4d   :  { %5833 = vmatprep.mubr.f32.mxu1 %v4222_v13  ;;  %v15878_v13 = vld [vmem:[#allocation39_spill] sm:$0xff] }
 0xa50   :  { %5834 = vmatmul.mubr.f32.gmra.mrb[100].mxu1 %v13863_v34 }
 0xa51   :  { %5838 = vmatprep.mubr.f32.mxu1 %v4223_v63 }
 0xa54   :  { %5839 = vmatmul.mubr.f32.gmra.mrb[102].mxu1 %v13863_v34 }
 0xa55   :  { %5843 = vmatprep.mubr.f32.mxu1 %v13715_v40  ;;  %v4165_v40 = vld [vmem:[#allocation3 + $0x218] sm:$0xff] }
 0xa58   :  { %5844 = vmatmul.mubr.f32.gmra.mrb[104].mxu1 %v4160_v14  ;;  %v4188_v14 = vld [vmem:[#allocation3 + $0x330] sm:$0xff] }
 0xa59   :  { %5848 = vmatprep.mubr.f32.mxu1 %v13719_v59  ;;  %v4166_v59 = vld [vmem:[#allocation3 + $0x228] sm:$0xff] }
 0xa5c   :  { %5849 = vmatmul.mubr.f32.gmra.mrb[106].mxu1 %v4161_v48  ;;  %v15880_v48 = vld [vmem:[#allocation38_spill] sm:$0xff] }
 0xa5d   :  { %5853 = vmatprep.mubr.f32.mxu1 %v13723_v0  ;;  %v4167_v0 = vld [vmem:[#allocation3 + $0x230] sm:$0xff] }
 0xa60   :  { %5854 = vmatmul.mubr.f32.gmra.mrb[108].mxu1 %v4162_v2 }
 0xa61   :  { %5858 = vmatprep.mubr.f32.mxu1 %v13727_v12  ;;  %v4168_v12 = vld [vmem:[#allocation3 + $0x240] sm:$0xff] }
 0xa64   :  { %5859 = vmatmul.mubr.f32.gmra.mrb[110].mxu1 %v4163_v26 }
 0xa65   :  { %5863 = vmatprep.mubr.f32.mxu1 %v13731_v25  ;;  %v4169_v25 = vld [vmem:[#allocation3 + $0x248] sm:$0xff] }
 0xa68   :  { %5864 = vmatmul.mubr.f32.gmra.mrb[112].mxu1 %v4164_v36  ;;  %v15881_v36 = vld [vmem:[#allocation28_spill] sm:$0xff] }
 0xa69   :  { %5868 = vmatprep.mubr.f32.mxu1 %v13735_v5  ;;  %v4170_v5 = vld [vmem:[#allocation3 + $0x258] sm:$0xff] }
 0xa6c   :  { %5869 = vmatmul.mubr.f32.gmra.mrb[114].mxu1 %v4165_v40  ;;  %v4254_v40 = vld [vmem:[#allocation3 + $0x349] sm:$0xff] }
 0xa6d   :  { %5873 = vmatprep.mubr.f32.mxu1 %v13739_v15  ;;  %v4171_v15 = vld [vmem:[#allocation3 + $0x260] sm:$0xff] }
 0xa70   :  { %5874 = vmatmul.mubr.f32.gmra.mrb[116].mxu1 %v4166_v59 }
 0xa71   :  { %5878 = vmatprep.mubr.f32.mxu1 %v13743_v29  ;;  %v4172_v29 = vld [vmem:[#allocation3 + $0x270] sm:$0xff] }
 0xa74   :  { %5879 = vmatmul.mubr.f32.gmra.mrb[118].mxu1 %v4167_v0  ;;  %v4189_v0 = vld [vmem:[#allocation3 + $0x338] sm:$0xff] }
 0xa75   :  { %5883 = vmatprep.mubr.f32.mxu1 %v13747_v62  ;;  %v4173_v62 = vld [vmem:[#allocation3 + $0x278] sm:$0xff] }
 0xa78   :  { %5884 = vmatmul.mubr.f32.gmra.mrb[120].mxu1 %v4168_v12  ;;  %v15882_v12 = vld [vmem:[#allocation35_spill] sm:$0xff] }
 0xa79   :  { %5888 = vmatprep.mubr.f32.mxu1 %v13751_v28  ;;  %v4174_v28 = vld [vmem:[#allocation3 + $0x288] sm:$0xff] }
 0xa7c   :  { %5889 = vmatmul.mubr.f32.gmra.mrb[122].mxu1 %v4169_v25 }
 0xa7d   :  { %5893 = vmatprep.mubr.f32.mxu1 %v13755_v57  ;;  %v4175_v57 = vld [vmem:[#allocation3 + $0x290] sm:$0xff] }
 0xa80   :  { %5894 = vmatmul.mubr.f32.gmra.mrb[124].mxu1 %v4170_v5 }
 0xa81   :  { %5898 = vmatprep.mubr.f32.mxu1 %v13759_v51  ;;  %v4176_v51 = vld [vmem:[#allocation3 + $0x2a0] sm:$0xff] }
 0xa84   :  { %5899 = vmatmul.mubr.f32.gmra.mrb[126].mxu1 %v4171_v15  ;;  %v4255_v15 = vld [vmem:[#allocation3 + $0x351] sm:$0xff] }
 0xa85   :  { %5903 = vmatprep.mubr.f32.mxu1 %v13763_v6  ;;  %v4177_v6 = vld [vmem:[#allocation3 + $0x2a8] sm:$0xff] }
 0xa88   :  { %5904 = vmatmul.mubr.f32.gmra.mrb[128].mxu1 %v4172_v29 }
 0xa89   :  { %5908 = vmatprep.mubr.f32.mxu1 %v13767_v24  ;;  %v4178_v24 = vld [vmem:[#allocation3 + $0x2b8] sm:$0xff] }
 0xa8c   :  { %5909 = vmatmul.mubr.f32.gmra.mrb[130].mxu1 %v4173_v62  ;;  %v15883_v62 = vld [vmem:[#allocation40_spill] sm:$0xff] }
 0xa8d   :  { %5913 = vmatprep.mubr.f32.mxu1 %v13771_v53  ;;  %v4179_v53 = vld [vmem:[#allocation3 + $0x2c0] sm:$0xff] }
 0xa90   :  { %5914 = vmatmul.mubr.f32.gmra.mrb[132].mxu1 %v4174_v28 }
 0xa91   :  { %5918 = vmatprep.mubr.f32.mxu1 %v13775_v23  ;;  %v4180_v23 = vld [vmem:[#allocation3 + $0x2d0] sm:$0xff] }
 0xa94   :  { %5919 = vmatmul.mubr.f32.gmra.mrb[134].mxu1 %v4175_v57 }
 0xa95   :  { %5923 = vmatprep.mubr.f32.mxu1 %v13779_v9 }
 0xa98   :  { %5924 = vmatmul.mubr.f32.gmra.mrb[136].mxu1 %v4176_v51  ;;  %v6867_v51 = vld [vmem:[#allocation4] sm:$0xff] }
 0xa99   :  { %5928 = vmatprep.mubr.f32.mxu1 %v13783_v10 }
 0xa9c   :  { %5929 = vmatmul.mubr.f32.gmra.mrb[138].mxu1 %v4177_v6 }
 0xa9d   :  { %5933 = vmatprep.mubr.f32.mxu1 %v13787_v43 }
 0xaa0   :  { %5934 = vmatmul.mubr.f32.gmra.mrb[140].mxu1 %v4178_v24  ;;  %v15884_v24 = vld [vmem:[#allocation30_spill] sm:$0xff] }
 0xaa1   :  { %5938 = vmatprep.mubr.f32.mxu1 %v13791_v37  ;;  %v15868_v37 = vld [vmem:[#allocation54_spill] sm:$0xff] }
 0xaa4   :  { %5939 = vmatmul.mubr.f32.gmra.mrb[142].mxu1 %v4179_v53 }
 0xaa5   :  { %5943 = vmatprep.mubr.f32.mxu1 %v13795_v19  ;;  %v15869_v19 = vld [vmem:[#allocation37_spill] sm:$0xff] }
 0xaa8   :  { %5944 = vmatmul.mubr.f32.gmra.mrb[144].mxu1 %v4180_v23 }
 0xaa9   :  { %5948 = vmatprep.mubr.f32.mxu1 %v13799_v8  ;;  %v4183_v8 = vld [vmem:[#allocation3 + $0x2f0] sm:$0xff] }
 0xaab   :  { %v5685_v9 = vpop.f32.mrb[40].mxu1 }
 0xaac   :  { %v13890_v10 = vadd.f32 %v15867_v1, %v5685_v9  ;;  %v5687_v22 = vpop.f32.mrb[41].mxu1  ;;  %5949 = vmatmul.mubr.f32.gmra.mrb[146].mxu1 %v4181_v20  ;;  %v6868_v9 = vld [vmem:[#allocation4 + $0x8] sm:$0xff]  ;;  %v6869_v20 = vld [vmem:[#allocation4 + $0x10] sm:$0xff] }
 0xaad   :  { %5953 = vmatprep.mubr.f32.mxu1 %v13803_v35  ;;  %v4184_v35 = vld [vmem:[#allocation3 + $0x300] sm:$0xff] }
 0xaae   :  { %v15885_v22 = vld [vmem:[#allocation29_spill] sm:$0xff] }
 0xaaf   :  { %v5690_v43 = vpop.f32.mrb[42].mxu1 }
 0xab0   :  { %v13894_v47 = vadd.f32 %v15868_v37, %v5690_v43  ;;  %v5692_v38 = vpop.f32.mrb[43].mxu1  ;;  %5954 = vmatmul.mubr.f32.gmra.mrb[148].mxu1 %v4182_v61  ;;  %v6870_v37 = vld [vmem:[#allocation4 + $0x18] sm:$0xff] }
 0xab1   :  { %5958 = vmatprep.mubr.f32.mxu1 %v15869_v19  ;;  %v6871_v38 = vld [vmem:[#allocation4 + $0x20] sm:$0xff] }
 0xab3   :  { %v5695_v49 = vpop.f32.mrb[44].mxu1 }
 0xab4   :  { %v13898_v7 = vadd.f32 %v15870_v3, %v5695_v49  ;;  %v5697_v21 = vpop.f32.mrb[45].mxu1  ;;  %5959 = vmatmul.mubr.f32.gmra.mrb[150].mxu1 %v4183_v8  ;;  %v15886_v49 = vld [vmem:[#allocation44_spill] sm:$0xff] }
 0xab5   :  { %5963 = vmatprep.mubr.f32.mxu1 %v15871_v52  ;;  %v6873_v21 = vld [vmem:[#allocation4 + $0x30] sm:$0xff] }
 0xab7   :  { %v5700_v50 = vpop.f32.mrb[46].mxu1 }
 0xab8   :  { %v13902_v45 = vadd.f32 %v15872_v54, %v5700_v50  ;;  %v5702_v30 = vpop.f32.mrb[47].mxu1  ;;  %5964 = vmatmul.mubr.f32.gmra.mrb[152].mxu1 %v4184_v35  ;;  %v15887_v50 = vld [vmem:[#allocation42_spill] sm:$0xff] }
 0xab9   :  { %5968 = vmatprep.mubr.f32.mxu1 %v15873_v58  ;;  %v6874_v30 = vld [vmem:[#allocation4 + $0x38] sm:$0xff]  ;;  %v6875_v58 = vld [vmem:[#allocation4 + $0x40] sm:$0xff] }
 0xabb   :  { %v5705_v17 = vpop.f32.mrb[48].mxu1 }
 0xabc   :  { %v13906_v32 = vadd.f32 %v15874_v55, %v5705_v17  ;;  %v5707_v11 = vpop.f32.mrb[49].mxu1  ;;  %5969 = vmatmul.mubr.f32.gmra.mrb[154].mxu1 %v4185_v27  ;;  %v15888_v27 = vld [vmem:[#allocation55_spill] sm:$0xff] }
 0xabd   :  { %5973 = vmatprep.mubr.f32.mxu1 %v15875_v44  ;;  %v6876_v44 = vld [vmem:[#allocation4 + $0x48] sm:$0xff] }
 0xabf   :  { %v5710_v46 = vpop.f32.mrb[50].mxu1 }
 0xac0   :  { %v13910_v42 = vadd.f32 %v15876_v18, %v5710_v46  ;;  %v5712_v56 = vpop.f32.mrb[51].mxu1  ;;  %5974 = vmatmul.mubr.f32.gmra.mrb[156].mxu1 %v4186_v41  ;;  %v6877_v46 = vld [vmem:[#allocation4 + $0x50] sm:$0xff] }
 0xac1   :  { %5978 = vmatprep.mubr.f32.mxu1 %v15877_v60  ;;  %v15889_v18 = vld [vmem:[#allocation46_spill] sm:$0xff] }
 0xac3   :  { %v5715_v31 = vpop.f32.mrb[52].mxu1 }
 0xac4   :  { %v13914_v33 = vadd.f32 %v15878_v13, %v5715_v31  ;;  %v5717_v63 = vpop.f32.mrb[53].mxu1  ;;  %5979 = vmatmul.mubr.f32.gmra.mrb[158].mxu1 %v4187_v4  ;;  %v6878_v31 = vld [vmem:[#allocation4 + $0x58] sm:$0xff]  ;;  %v6879_v4 = vld [vmem:[#allocation4 + $0x60] sm:$0xff] }
 0xac5   :  { %5983 = vmatprep.mubr.f32.mxu1 %v15879_v16  ;;  %v15890_v63 = vld [vmem:[#allocation43_spill] sm:$0xff] }
 0xac7   :  { %v5720_v39 = vpop.f32.mrb[54].mxu1 }
 0xac8   :  { %v13918_v2 = vadd.f32 %v15880_v48, %v5720_v39  ;;  %v5722_v26 = vpop.f32.mrb[55].mxu1  ;;  %5984 = vmatmul.mubr.f32.gmra.mrb[160].mxu1 %v4188_v14  ;;  %v6880_v14 = vld [vmem:[#allocation4 + $0x68] sm:$0xff]  ;;  %v6881_v48 = vld [vmem:[#allocation4 + $0x70] sm:$0xff] }
 0xac9   :  { %5988 = vmatprep.mubr.f32.mxu1 %v15881_v36  ;;  %v15891_v36 = vld [vmem:[#allocation58_spill] sm:$0xff] }
 0xacb   :  { %v5725_v59 = vpop.f32.mrb[56].mxu1 }
 0xacc   :  { %v13922_v25 = vadd.f32 %v15882_v12, %v5725_v59  ;;  %v5727_v5 = vpop.f32.mrb[57].mxu1  ;;  %5989 = vmatmul.mubr.f32.gmra.mrb[162].mxu1 %v4189_v0  ;;  %v6882_v0 = vld [vmem:[#allocation4 + $0x78] sm:$0xff]  ;;  %v6883_v12 = vld [vmem:[#allocation4 + $0x80] sm:$0xff] }
 0xacd   :  { %5993 = vmatprep.mubr.f32.mxu1 %v4254_v40 }
 0xacf   :  { %v5730_v29 = vpop.f32.mrb[58].mxu1 }
 0xad0   :  { %v13925_v28 = vadd.f32 %v15883_v62, %v5730_v29  ;;  %v5732_v57 = vpop.f32.mrb[59].mxu1  ;;  %5994 = vmatmul.mubr.f32.gmra.mrb[164].mxu1 %v13863_v34 }
 0xad1   :  { %5998 = vmatprep.mubr.f32.mxu1 %v4255_v15  ;;  %v15892_v15 = vld [vmem:[#allocation60_spill] sm:$0xff]  ;;  %v6884_v57 = vld [vmem:[#allocation4 + $0x88] sm:$0xff] }
 0xad3   :  { %v5735_v6 = vpop.f32.mrb[60].mxu1 }
 0xad4   :  { %v13929_v53 = vadd.f32 %v15884_v24, %v5735_v6  ;;  %v5737_v23 = vpop.f32.mrb[61].mxu1  ;;  %5999 = vmatmul.mubr.f32.gmra.mrb[166].mxu1 %v13863_v34  ;;  %v6872_v34 = vld [vmem:[#allocation4 + $0x28] sm:$0xff]  ;;  %v15893_v24 = vld [vmem:[#allocation59_spill] sm:$0xff] }
 0xad5   :  { %8085 = vmatprep.mubr.f32.mxu1 %v6867_v51  ;;  %v6885_v51 = vld [vmem:[#allocation4 + $0x90] sm:$0xff] }
 0xad7   :  { %v5740_v1 = vpop.f32.mrb[62].mxu1 }
 0xad8   :  { %v13933_v43 = vadd.f32 %v15885_v22, %v5740_v1  ;;  %v5742_v61 = vpop.f32.mrb[63].mxu1  ;;  %8086 = vmatmul.mubr.f32.vlgmr.msra.gmra.mrb[168].mxu1 %v6868_v9  ;;  %v6887_v1 = vld [vmem:[#allocation4 + $0xa0] sm:$0xff] }
 0xad9   :  { %8088 = vmatprep.mubr.f32.mxu1 %v6869_v20  ;;  %v6886_v20 = vld [vmem:[#allocation4 + $0x98] sm:$0xff]  ;;  %v15894_v61 = vld [vmem:[#allocation62_spill] sm:$0xff] }
 0xadb   :  { %v5745_v19 = vpop.f32.mrb[64].mxu1 }
 0xadc   :  { %v13936_v8 = vadd.f32 %v15886_v49, %v5745_v19  ;;  %v5747_v3 = vpop.f32.mrb[65].mxu1  ;;  %8089 = vmatmul.mubr.f32.gmra.mrb[170].mxu1 %v6870_v37  ;;  %v6888_v19 = vld [vmem:[#allocation4 + $0xa8] sm:$0xff]  ;;  %v6889_v49 = vld [vmem:[#allocation4 + $0xb0] sm:$0xff] }
 0xadd   :  { %8091 = vmatprep.mubr.f32.mxu1 %v6871_v38 }
 0xadf   :  { %v5750_v52 = vpop.f32.mrb[66].mxu1 }
 0xae0   :  { %v13939_v35 = vadd.f32 %v15887_v50, %v5750_v52  ;;  %v5752_v54 = vpop.f32.mrb[67].mxu1  ;;  %8092 = vmatmul.mubr.f32.gmra.mrb[172].mxu1 %v6872_v34  ;;  %v15895_v34 = vld [vmem:[#allocation61_spill] sm:$0xff]  ;;  %v6890_v50 = vld [vmem:[#allocation4 + $0xb8] sm:$0xff] }
 0xae1   :  { %8094 = vmatprep.mubr.f32.mxu1 %v6873_v21  ;;  %v6891_v54 = vld [vmem:[#allocation4 + $0xc0] sm:$0xff] }
 0xae3   :  { %v5755_v17 = vpop.f32.mrb[68].mxu1 }
 0xae4   :  { %v13942_v55 = vadd.f32 %v15888_v27, %v5755_v17  ;;  %v5757_v11 = vpop.f32.mrb[69].mxu1  ;;  %8095 = vmatmul.mubr.f32.gmra.mrb[174].mxu1 %v6874_v30 }
 0xae5   :  { %8097 = vmatprep.mubr.f32.mxu1 %v6875_v58  ;;  %v15896_v58 = vld [vmem:[#allocation64_spill] sm:$0xff]  ;;  %v6892_v11 = vld [vmem:[#allocation4 + $0xc8] sm:$0xff] }
 0xae7   :  { %v5760_v41 = vpop.f32.mrb[70].mxu1 }
 0xae8   :  { %v13945_v56 = vadd.f32 %v15889_v18, %v5760_v41  ;;  %v5762_v60 = vpop.f32.mrb[71].mxu1  ;;  %8098 = vmatmul.mubr.f32.gmra.mrb[176].mxu1 %v6876_v44  ;;  %v6893_v44 = vld [vmem:[#allocation4 + $0xd0] sm:$0xff] }
 0xae9   :  { %8100 = vmatprep.mubr.f32.mxu1 %v6877_v46  ;;  %v15897_v41 = vld [vmem:[#allocation63_spill] sm:$0xff] }
 0xaeb   :  { %v5765_v13 = vpop.f32.mrb[72].mxu1 }
 0xaec   :  { %v13948_v16 = vadd.f32 %v15890_v63, %v5765_v13  ;;  %v5767_v39 = vpop.f32.mrb[73].mxu1  ;;  %8101 = vmatmul.mubr.f32.gmra.mrb[178].mxu1 %v6878_v31  ;;  %v6894_v31 = vld [vmem:[#allocation4 + $0xd8] sm:$0xff]  ;;  %v15898_v63 = vld [vmem:[#allocation66_spill] sm:$0xff] }
 0xaed   :  { %8103 = vmatprep.mubr.f32.mxu1 %v6879_v4  ;;  %v6895_v4 = vld [vmem:[#allocation4 + $0xe0] sm:$0xff] }
 0xaef   :  { %v5770_v26 = vpop.f32.mrb[74].mxu1 }
 0xaf0   :  { %v13951_v40 = vadd.f32 %v15891_v36, %v5770_v26  ;;  %v5772_v59 = vpop.f32.mrb[75].mxu1  ;;  %8104 = vmatmul.mubr.f32.gmra.mrb[180].mxu1 %v6880_v14  ;;  %v6897_v26 = vld [vmem:[#allocation4 + $0xf0] sm:$0xff] }
 0xaf1   :  { %8106 = vmatprep.mubr.f32.mxu1 %v6881_v48  ;;  %v6896_v48 = vld [vmem:[#allocation4 + $0xe8] sm:$0xff] }
 0xaf2   :  { %v15899_v59 = vld [vmem:[#allocation65_spill] sm:$0xff] }
 0xaf3   :  { %v5775_v5 = vpop.f32.mrb[76].mxu1 }
 0xaf4   :  { %v13954_v29 = vadd.f32 %v15892_v15, %v5775_v5  ;;  %v5777_v62 = vpop.f32.mrb[77].mxu1  ;;  %8107 = vmatmul.mubr.f32.gmra.mrb[182].mxu1 %v6882_v0  ;;  %v6898_v5 = vld [vmem:[#allocation4 + $0xf8] sm:$0xff]  ;;  %v6899_v15 = vld [vmem:[#allocation4 + $0x100] sm:$0xff] }
 0xaf5   :  { %8109 = vmatprep.mubr.f32.mxu1 %v6883_v12 }
 0xaf7   :  { %v5780_v6 = vpop.f32.mrb[78].mxu1 }
 0xaf8   :  { %v13957_v23 = vadd.f32 %v15893_v24, %v5780_v6  ;;  %v5782_v9 = vpop.f32.mrb[79].mxu1  ;;  %8110 = vmatmul.mubr.f32.gmra.mrb[184].mxu1 %v6884_v57  ;;  %v15900_v57 = vld [vmem:[#allocation67_spill] sm:$0xff]  ;;  %v6900_v24 = vld [vmem:[#allocation4 + $0x108] sm:$0xff] }
 0xaf9   :  { %8112 = vmatprep.mubr.f32.mxu1 %v6885_v51  ;;  %v6901_v9 = vld [vmem:[#allocation4 + $0x110] sm:$0xff] }
 0xafb   :  { %v5785_v22 = vpop.f32.mrb[80].mxu1 }
 0xafc   :  { %v13960_v37 = vadd.f32 %v15894_v61, %v5785_v22  ;;  %v5787_v38 = vpop.f32.mrb[81].mxu1  ;;  %8113 = vmatmul.mubr.f32.gmra.mrb[186].mxu1 %v6886_v20 }
 0xafd   :  { %8115 = vmatprep.mubr.f32.mxu1 %v6887_v1  ;;  %v15901_v1 = vld [vmem:[#allocation47_spill] sm:$0xff] }
 0xafe   :  { %v6902_v38 = vld [vmem:[#allocation4 + $0x118] sm:$0xff] }
 0xaff   :  { %v5790_v3 = vpop.f32.mrb[82].mxu1 }
 0xb00   :  { %v13963_v21 = vadd.f32 %v15895_v34, %v5790_v3  ;;  %v5792_v52 = vpop.f32.mrb[83].mxu1  ;;  %8116 = vmatmul.mubr.f32.gmra.mrb[188].mxu1 %v6888_v19  ;;  %v6903_v19 = vld [vmem:[#allocation4 + $0x120] sm:$0xff] }
 0xb01   :  { %8118 = vmatprep.mubr.f32.mxu1 %v6889_v49  ;;  %v15902_v3 = vld [vmem:[#allocation68_spill] sm:$0xff] }
 0xb03   :  { %v5795_v30 = vpop.f32.mrb[84].mxu1 }
 0xb04   :  { %v13966_v17 = vadd.f32 %v15896_v58, %v5795_v30  ;;  %v5797_v27 = vpop.f32.mrb[85].mxu1  ;;  %8119 = vmatmul.mubr.f32.gmra.mrb[190].mxu1 %v6890_v50  ;;  %v6904_v50 = vld [vmem:[#allocation4 + $0x128] sm:$0xff]  ;;  %v6905_v30 = vld [vmem:[#allocation4 + $0x130] sm:$0xff] }
 0xb05   :  { %8121 = vmatprep.mubr.f32.mxu1 %v6891_v54  ;;  %v6462_v54 = vmul.f32 %v13894_v47, %v13894_v47  ;;  %v6461_v27 = vmul.f32 %v13890_v10, %v13890_v10 }
 0xb07   :  { %v5800_v46 = vpop.f32.mrb[86].mxu1 }
 0xb08   :  { %v13969_v18 = vadd.f32 %v15897_v41, %v5800_v46  ;;  %v5802_v60 = vpop.f32.mrb[87].mxu1  ;;  %8122 = vmatmul.mubr.f32.gmra.mrb[192].mxu1 %v6892_v11  ;;  %v6391_v11 = vadd.f32 %v13894_v47, %v13890_v10  ;;  %v15903_v46 = vld [vmem:[#allocation48_spill] sm:$0xff] }
 0xb09   :  { %8124 = vmatprep.mubr.f32.mxu1 %v6893_v44  ;;  %v6463_v44 = vmul.f32 %v13898_v7, %v13898_v7 }
 0xb0b   :  { %v5805_v13 = vpop.f32.mrb[88].mxu1 }
 0xb0c   :  { %v13972_v39 = vadd.f32 %v15898_v63, %v5805_v13  ;;  %v5807_v14 = vpop.f32.mrb[89].mxu1  ;;  %8125 = vmatmul.mubr.f32.gmra.mrb[194].mxu1 %v6894_v31  ;;  %v6906_v31 = vld [vmem:[#allocation4 + $0x138] sm:$0xff]  ;;  %v6392_v13 = vadd.f32 %v6391_v11, %v13898_v7  ;;  %v6464_v63 = vmul.f32 %v13902_v45, %v13902_v45  ;;  %v6911_v11 = vld [vmem:[#allocation4 + $0x160] sm:$0xff] }
 0xb0d   :  { %8127 = vmatprep.mubr.f32.mxu1 %v6895_v4  ;;  %v6525_v4 = vadd.f32 %v6462_v54, %v6461_v27  ;;  %v6907_v14 = vld [vmem:[#allocation4 + $0x140] sm:$0xff]  ;;  %v6468_v27 = vmul.f32 %v13918_v2, %v13918_v2 }
 0xb0f   :  { %v5810_v36 = vpop.f32.mrb[90].mxu1 }
 0xb10   :  { %v13975_v0 = vadd.f32 %v15899_v59, %v5810_v36  ;;  %v5812_v12 = vpop.f32.mrb[91].mxu1  ;;  %8128 = vmatmul.mubr.f32.gmra.mrb[196].mxu1 %v6896_v48  ;;  %v6393_v36 = vadd.f32 %v6392_v13, %v13902_v45  ;;  %v6465_v59 = vmul.f32 %v13906_v32, %v13906_v32 }
 0xb11   :  { %8130 = vmatprep.mubr.f32.mxu1 %v6897_v26  ;;  %v6526_v26 = vadd.f32 %v6525_v4, %v6463_v44  ;;  %v15904_v12 = vld [vmem:[#allocation69_spill] sm:$0xff]  ;;  %v15906_v4 = vld [vmem:[#allocation71_spill] sm:$0xff] }
 0xb13   :  { %v5815_v62 = vpop.f32.mrb[92].mxu1 }
 0xb14   :  { %v13978_v51 = vadd.f32 %v15900_v57, %v5815_v62  ;;  %v5817_v6 = vpop.f32.mrb[93].mxu1  ;;  %8131 = vmatmul.mubr.f32.gmra.mrb[198].mxu1 %v6898_v5  ;;  %v6908_v62 = vld [vmem:[#allocation4 + $0x148] sm:$0xff]  ;;  %v6527_v57 = vadd.f32 %v6526_v26, %v6464_v63 }
 0xb15   :  { %8133 = vmatprep.mubr.f32.mxu1 %v6899_v15  ;;  %v6394_v6 = vadd.f32 %v6393_v36, %v13906_v32  ;;  %v6470_v36 = vmul.f32 %v13925_v28, %v13925_v28 }
 0xb17   :  { %v5820_v20 = vpop.f32.mrb[94].mxu1 }
 0xb18   :  { %v13981_v22 = vadd.f32 %v15901_v1, %v5820_v20  ;;  %v5822_v61 = vpop.f32.mrb[95].mxu1  ;;  %8134 = vmatmul.mubr.f32.gmra.mrb[200].mxu1 %v6900_v24  ;;  %v6466_v24 = vmul.f32 %v13910_v42, %v13910_v42  ;;  %v6528_v1 = vadd.f32 %v6527_v57, %v6465_v59  ;;  %v6913_v59 = vld [vmem:[#allocation4 + $0x170] sm:$0xff]  ;;  %v6471_v57 = vmul.f32 %v13929_v53, %v13929_v53 }
 0xb19   :  { %8136 = vmatprep.mubr.f32.mxu1 %v6901_v9  ;;  %v6909_v9 = vld [vmem:[#allocation4 + $0x150] sm:$0xff]  ;;  %v6395_v61 = vadd.f32 %v6394_v6, %v13910_v42 }
 0xb1a   :  { %v15907_v6 = vld [vmem:[#allocation70_spill] sm:$0xff] }
 0xb1b   :  { %v5825_v49 = vpop.f32.mrb[96].mxu1 }
 0xb1c   :  { %v13984_v34 = vadd.f32 %v15902_v3, %v5825_v49  ;;  %v5827_v52 = vpop.f32.mrb[97].mxu1  ;;  %8137 = vmatmul.mubr.f32.gmra.mrb[202].mxu1 %v6902_v38  ;;  %v6467_v38 = vmul.f32 %v13914_v33, %v13914_v33 }
 0xb1d   :  { %8139 = vmatprep.mubr.f32.mxu1 %v6903_v19  ;;  %v15905_v19 = vld [vmem:[#allocation49_spill] sm:$0xff]  ;;  %v14015_v52 = vpop.f32.mrb[214].mxu0 }
 0xb1e   :  { %v14017_v54 = vpop.f32.mrb[215].mxu0 }
 0xb1f   :  { %v5830_v58 = vpop.f32.mrb[98].mxu1 }
 0xb20   :  { %v13995_v41 = vadd.f32 %v15903_v46, %v5830_v58  ;;  %v5832_v60 = vpop.f32.mrb[99].mxu1  ;;  %8140 = vmatmul.mubr.f32.gmra.mrb[204].mxu1 %v6904_v50  ;;  %v6910_v50 = vld [vmem:[#allocation4 + $0x158] sm:$0xff]  ;;  %v6396_v58 = vadd.f32 %v6395_v61, %v13914_v33 }
 0xb21   :  { %8142 = vmatprep.mubr.f32.mxu1 %v6905_v30  ;;  %v6529_v30 = vadd.f32 %v6528_v1, %v6466_v24 }
 0xb22   :  { %v6397_v60 = vadd.f32 %v6396_v58, %v13918_v2  ;;  %v6473_v58 = vmul.f32 %v13936_v8, %v13936_v8 }
 0xb23   :  { %v5835_v48 = vpop.f32.mrb[100].mxu1  ;;  %v6530_v46 = vadd.f32 %v6529_v30, %v6467_v38  ;;  %v6472_v38 = vmul.f32 %v13933_v43, %v13933_v43 }
 0xb24   :  { %v14004_v5 = vadd.f32 %v15904_v12, %v5835_v48  ;;  %v5837_v15 = vpop.f32.mrb[101].mxu1  ;;  %8143 = vmatmul.mubr.f32.gmra.mrb[206].mxu1 %v6906_v31  ;;  %v6469_v31 = vmul.f32 %v13922_v25, %v13922_v25  ;;  %v6398_v26 = vadd.f32 %v6397_v60, %v13922_v25 }
 0xb25   :  { %8145 = vmatprep.mubr.f32.mxu1 %v6907_v14  ;;  %v6912_v14 = vld [vmem:[#allocation4 + $0x168] sm:$0xff]  ;;  %v6531_v48 = vadd.f32 %v6530_v46, %v6468_v27 }
 0xb26   :  { %v15909_v27 = vld [vmem:[#allocation73_spill] sm:$0xff] }
 0xb27   :  { %v5840_v20 = vpop.f32.mrb[102].mxu1  ;;  %v6532_v15 = vadd.f32 %v6531_v48, %v6469_v31  ;;  %v6916_v46 = vld [vmem:[#allocation4 + $0x188] sm:$0xff] }
 0xb28   :  { %v14013_v49 = vadd.f32 %v15905_v19, %v5840_v20  ;;  %v5842_v3 = vpop.f32.mrb[103].mxu1  ;;  %8146 = vmatmul.mubr.f32.gmra.mrb[208].mxu1 %v6908_v62  ;;  %v6399_v62 = vadd.f32 %v6398_v26, %v13925_v28  ;;  %v6914_v20 = vld [vmem:[#allocation4 + $0x178] sm:$0xff]  ;;  %v6915_v19 = vld [vmem:[#allocation4 + $0x180] sm:$0xff] }
 0xb29   :  { %8148 = vmatprep.mubr.f32.mxu1 %v6909_v9  ;;  %v6533_v1 = vadd.f32 %v6532_v15, %v6470_v36  ;;  %v6475_v36 = vmul.f32 %v13942_v55, %v13942_v55 }
 0xb2a   :  { %v6400_v61 = vadd.f32 %v6399_v62, %v13929_v53  ;;  %v6918_v62 = vld [vmem:[#allocation4 + $0x198] sm:$0xff] }
 0xb2b   :  { %v5845_v44 = vpop.f32.mrb[104].mxu1 }
 0xb2c   :  { %v14026_v13 = vadd.f32 %v15906_v4, %v5845_v44  ;;  %v5847_v63 = vpop.f32.mrb[105].mxu1  ;;  %8149 = vmatmul.mubr.f32.gmra.mrb[210].mxu1 %v6910_v50  ;;  %v6534_v50 = vadd.f32 %v6533_v1, %v6471_v57  ;;  %v6401_v30 = vadd.f32 %v6400_v61, %v13933_v43  ;;  %v6474_v4 = vmul.f32 %v13939_v35, %v13939_v35 }
 0xb2d   :  { %8151 = vmatprep.mubr.f32.mxu1 %v6911_v11  ;;  %v6917_v63 = vld [vmem:[#allocation4 + $0x190] sm:$0xff] }
 0xb2e   :  { %v6535_v60 = vadd.f32 %v6534_v50, %v6472_v38  ;;  %v6402_v31 = vadd.f32 %v6401_v30, %v13936_v8 }
 0xb2f   :  { %v5850_v12 = vpop.f32.mrb[106].mxu1 }
 0xb30   :  { %v14035_v24 = vadd.f32 %v15907_v6, %v5850_v12  ;;  %v5852_v9 = vpop.f32.mrb[107].mxu1  ;;  %8152 = vmatmul.mubr.f32.gmra.mrb[212].mxu1 %v6912_v14  ;;  %v6536_v48 = vadd.f32 %v6535_v60, %v6473_v58  ;;  %v6403_v26 = vadd.f32 %v6402_v31, %v13939_v35  ;;  %v6920_v58 = vld [vmem:[#allocation4 + $0x1a8] sm:$0xff]  ;;  %v6921_v60 = vld [vmem:[#allocation4 + $0x1b0] sm:$0xff] }
 0xb31   :  { %8154 = vmatprep.mubr.f32.mxu1 %v6913_v59  ;;  %v15910_v59 = vld [vmem:[#allocation72_spill] sm:$0xff]  ;;  %v6476_v9 = vmul.f32 %v13945_v56, %v13945_v56 }
 0xb32   :  { %15908 = vst [vmem:[#allocation32_spill] sm:$0xff] %v14035_v24  ;;  %v6537_v57 = vadd.f32 %v6536_v48, %v6474_v4  ;;  %v6404_v6 = vadd.f32 %v6403_v26, %v13942_v55  ;;  %v15913_v48 = vld [vmem:[#allocation74_spill] sm:$0xff] }
 0xb33   :  { %v5855_v3 = vpop.f32.mrb[108].mxu1 }
 0xb34   :  { %v14044_v11 = vadd.f32 %v15909_v27, %v5855_v3  ;;  %v5857_v44 = vpop.f32.mrb[109].mxu1  ;;  %8155 = vmatmul.mubr.f32.gmra.mrb[214].mxu1 %v6914_v20  ;;  %v6919_v20 = vld [vmem:[#allocation4 + $0x1a0] sm:$0xff]  ;;  %v6538_v61 = vadd.f32 %v6537_v57, %v6475_v36  ;;  %v6405_v38 = vadd.f32 %v6404_v6, %v13945_v56  ;;  %v15912_v3 = vld [vmem:[#allocation75_spill] sm:$0xff]  ;;  %v6480_v57 = vmul.f32 %v13957_v23, %v13957_v23 }
 0xb35   :  { %8157 = vmatprep.mubr.f32.mxu1 %v6915_v19  ;;  %v6477_v19 = vmul.f32 %v13948_v16, %v13948_v16  ;;  %v6923_v6 = vld [vmem:[#allocation4 + $0x1c0] sm:$0xff] }
 0xb36   :  { %v6539_v27 = vadd.f32 %v6538_v61, %v6476_v9  ;;  %v6406_v44 = vadd.f32 %v6405_v38, %v13948_v16  ;;  %v6481_v61 = vmul.f32 %v13960_v37, %v13960_v37  ;;  %v15915_v38 = vld [vmem:[#allocation77_spill] sm:$0xff] }
 0xb37   :  { %v5860_v14 = vpop.f32.mrb[110].mxu1 }
 0xb38   :  { %v14053_v12 = vadd.f32 %v15910_v59, %v5860_v14  ;;  %v5862_v15 = vpop.f32.mrb[111].mxu1  ;;  %8158 = vmatmul.mubr.f32.gmra.mrb[216].mxu1 %v6916_v46  ;;  %v6478_v46 = vmul.f32 %v13951_v40, %v13951_v40  ;;  %v6540_v4 = vadd.f32 %v6539_v27, %v6477_v19  ;;  %v6479_v14 = vmul.f32 %v13954_v29, %v13954_v29  ;;  %v6922_v59 = vld [vmem:[#allocation4 + $0x1b8] sm:$0xff] }
 0xb39   :  { %8160 = vmatprep.mubr.f32.mxu1 %v6917_v63  ;;  %v6407_v63 = vadd.f32 %v6406_v44, %v13951_v40  ;;  %v6482_v44 = vmul.f32 %v13963_v21, %v13963_v21 }
 0xb3a   :  { %15911 = vst [vmem:[#allocation50_spill] sm:$0xff] %v14053_v12  ;;  %v6541_v15 = vadd.f32 %v6540_v4, %v6478_v46  ;;  %v6925_v46 = vld [vmem:[#allocation4 + $0x1d0] sm:$0xff] }
 0xb3b   :  { %v5865_v1 = vpop.f32.mrb[112].mxu1 }
 0xb3c   :  { %v14062_v50 = vadd.f32 %v15912_v3, %v5865_v1  ;;  %v5867_v30 = vpop.f32.mrb[113].mxu1  ;;  %8161 = vmatmul.mubr.f32.gmra.mrb[218].mxu1 %v6918_v62  ;;  %v6408_v62 = vadd.f32 %v6407_v63, %v13954_v29  ;;  %v6483_v63 = vmul.f32 %v13966_v17, %v13966_v17 }
 0xb3d   :  { %8163 = vmatprep.mubr.f32.mxu1 %v6919_v20  ;;  %v6542_v20 = vadd.f32 %v6541_v15, %v6479_v14  ;;  %v6924_v30 = vld [vmem:[#allocation4 + $0x1c8] sm:$0xff]  ;;  %v15916_v14 = vld [vmem:[#allocation76_spill] sm:$0xff] }
 0xb3e   :  { %v6409_v1 = vadd.f32 %v6408_v62, %v13957_v23 }
 0xb3f   :  { %v5870_v31 = vpop.f32.mrb[114].mxu1 }
 0xb40   :  { %v14071_v26 = vadd.f32 %v15913_v48, %v5870_v31  ;;  %v5872_v36 = vpop.f32.mrb[115].mxu1  ;;  %8164 = vmatmul.mubr.f32.gmra.mrb[220].mxu1 %v6920_v58  ;;  %v6543_v58 = vadd.f32 %v6542_v20, %v6480_v57  ;;  %v6410_v27 = vadd.f32 %v6409_v1, %v13960_v37  ;;  %v6484_v57 = vmul.f32 %v13969_v18, %v13969_v18 }
 0xb41   :  { %8166 = vmatprep.mubr.f32.mxu1 %v6921_v60 }
 0xb42   :  { %15914 = vst [vmem:[#allocation51_spill] sm:$0xff] %v14071_v26  ;;  %v6544_v31 = vadd.f32 %v6543_v58, %v6481_v61  ;;  %v6411_v4 = vadd.f32 %v6410_v27, %v13963_v21  ;;  %v6485_v61 = vmul.f32 %v13972_v39, %v13972_v39  ;;  %v6928_v58 = vld [vmem:[#allocation4 + $0x1e8] sm:$0xff] }
 0xb43   :  { %v5875_v9 = vpop.f32.mrb[116].mxu1 }
 0xb44   :  { %v14080_v19 = vadd.f32 %v15915_v38, %v5875_v9  ;;  %v5877_v3 = vpop.f32.mrb[117].mxu1  ;;  %8167 = vmatmul.mubr.f32.gmra.mrb[222].mxu1 %v6922_v59  ;;  %v6926_v59 = vld [vmem:[#allocation4 + $0x1d8] sm:$0xff]  ;;  %v6545_v15 = vadd.f32 %v6544_v31, %v6482_v44  ;;  %v6412_v62 = vadd.f32 %v6411_v4, %v13966_v17 }
 0xb45   :  { %8169 = vmatprep.mubr.f32.mxu1 %v6923_v6  ;;  %v6927_v6 = vld [vmem:[#allocation4 + $0x1e0] sm:$0xff]  ;;  %v15918_v38 = vld [vmem:[#allocation79_spill] sm:$0xff] }
 0xb46   :  { %v6546_v20 = vadd.f32 %v6545_v15, %v6483_v63  ;;  %v6413_v1 = vadd.f32 %v6412_v62, %v13969_v18  ;;  %v6930_v62 = vld [vmem:[#allocation4 + $0x1f8] sm:$0xff] }
 0xb47   :  { %v5880_v60 = vpop.f32.mrb[118].mxu1 }
 0xb48   :  { %v14089_v48 = vadd.f32 %v15916_v14, %v5880_v60  ;;  %v5882_v36 = vpop.f32.mrb[119].mxu1  ;;  %8170 = vmatmul.mubr.f32.gmra.mrb[224].mxu1 %v6924_v30  ;;  %v6547_v27 = vadd.f32 %v6546_v20, %v6484_v57  ;;  %v6414_v44 = vadd.f32 %v6413_v1, %v13972_v39  ;;  %v6929_v60 = vld [vmem:[#allocation4 + $0x1f0] sm:$0xff]  ;;  %v6487_v14 = vmul.f32 %v13978_v51, %v13978_v51 }
 0xb49   :  { %8172 = vmatprep.mubr.f32.mxu1 %v6925_v46  ;;  %v6486_v46 = vmul.f32 %v13975_v0, %v13975_v0  ;;  %v15919_v36 = vld [vmem:[#allocation78_spill] sm:$0xff] }
 0xb4a   :  { %15917 = vst [vmem:[#allocation52_spill] sm:$0xff] %v14089_v48  ;;  %v6548_v4 = vadd.f32 %v6547_v27, %v6485_v61  ;;  %v6415_v63 = vadd.f32 %v6414_v44, %v13975_v0 }
 0xb4b   :  { %v5885_v9 = vpop.f32.mrb[120].mxu1 }
 0xb4c   :  { %v14098_v3 = vadd.f32 %v15918_v38, %v5885_v9  ;;  %v5887_v30 = vpop.f32.mrb[121].mxu1  ;;  %8173 = vmatmul.mubr.f32.gmra.mrb[226].mxu1 %v6926_v59  ;;  %v6549_v57 = vadd.f32 %v6548_v4, %v6486_v46  ;;  %v6488_v9 = vmul.f32 %v13981_v22, %v13981_v22  ;;  %v6489_v38 = vmul.f32 %v13984_v34, %v13984_v34 }
 0xb4d   :  { %8175 = vmatprep.mubr.f32.mxu1 %v6927_v6  ;;  %v6416_v6 = vadd.f32 %v6415_v63, %v13978_v51  ;;  %v15921_v30 = vld [vmem:[#allocation81_spill] sm:$0xff] }
 0xb4e   :  { %v6550_v1 = vadd.f32 %v6549_v57, %v6487_v14  ;;  %v6491_v14 = vmul.f32 %v14004_v5, %v14004_v5 }
 0xb4f   :  { %v5890_v31 = vpop.f32.mrb[122].mxu1  ;;  %v6417_v61 = vadd.f32 %v6416_v6, %v13981_v22 }
 0xb50   :  { %v14107_v15 = vadd.f32 %v15919_v36, %v5890_v31  ;;  %v5892_v59 = vpop.f32.mrb[123].mxu1  ;;  %8176 = vmatmul.mubr.f32.gmra.mrb[228].mxu1 %v6928_v58  ;;  %v6551_v58 = vadd.f32 %v6550_v1, %v6488_v9  ;;  %v15922_v36 = vld [vmem:[#allocation80_spill] sm:$0xff]  ;;  %v6492_v9 = vmul.f32 %v14013_v49, %v14013_v49 }
 0xb51   :  { %8178 = vmatprep.mubr.f32.mxu1 %v6929_v60  ;;  %v6418_v46 = vadd.f32 %v6417_v61, %v13984_v34  ;;  %v6490_v60 = vmul.f32 %v13995_v41, %v13995_v41 }
 0xb52   :  { %15920 = vst [vmem:[#allocation56_spill] sm:$0xff] %v14107_v15  ;;  %v6552_v4 = vadd.f32 %v6551_v58, %v6489_v38  ;;  %v6493_v38 = vmul.f32 %v14026_v13, %v14026_v13 }
 0xb53   :  { %v5895_v20 = vpop.f32.mrb[124].mxu1  ;;  %v6419_v63 = vadd.f32 %v6418_v46, %v13995_v41 }
 0xb54   :  { %v14116_v27 = vadd.f32 %v15921_v30, %v5895_v20  ;;  %v5897_v44 = vpop.f32.mrb[125].mxu1  ;;  %8179 = vmatmul.mubr.f32.gmra.mrb[230].mxu1 %v6930_v62  ;;  %v6553_v6 = vadd.f32 %v6552_v4, %v6490_v60  ;;  %v15924_v30 = vld [vmem:[#allocation83_spill] sm:$0xff]  ;;  %v6494_v60 = vmul.f32 %v14035_v24, %v14035_v24 }
 0xb55   :  { %v6420_v62 = vadd.f32 %v6419_v63, %v14004_v5 }
 0xb56   :  { %v6554_v1 = vadd.f32 %v6553_v6, %v6491_v14  ;;  %v6495_v14 = vmul.f32 %v14044_v11, %v14044_v11 }
 0xb57   :  { %v5900_v31 = vpop.f32.mrb[126].mxu1  ;;  %v6421_v61 = vadd.f32 %v6420_v62, %v14013_v49 }
 0xb58   :  { %v14125_v59 = vadd.f32 %v15922_v36, %v5900_v31  ;;  %v5902_v57 = vpop.f32.mrb[127].mxu1  ;;  %v6555_v46 = vadd.f32 %v6554_v1, %v6492_v9  ;;  %v6496_v9 = vmul.f32 %v14053_v12, %v14053_v12 }
 0xb59   :  { %v6422_v31 = vadd.f32 %v6421_v61, %v14026_v13  ;;  %v15925_v57 = vld [vmem:[#allocation82_spill] sm:$0xff] }
 0xb5a   :  { %15923 = vst [vmem:[#allocation53_spill] sm:$0xff] %v14125_v59  ;;  %v6556_v63 = vadd.f32 %v6555_v46, %v6493_v38  ;;  %v6497_v38 = vmul.f32 %v14062_v50, %v14062_v50  ;;  %v15927_v46 = vld [vmem:[#allocation85_spill] sm:$0xff] }
 0xb5b   :  { %v5905_v20 = vpop.f32.mrb[128].mxu1  ;;  %v6423_v36 = vadd.f32 %v6422_v31, %v14035_v24 }
 0xb5c   :  { %v14134_v44 = vadd.f32 %v15924_v30, %v5905_v20  ;;  %v5907_v58 = vpop.f32.mrb[129].mxu1  ;;  %v6557_v20 = vadd.f32 %v6556_v63, %v6494_v60  ;;  %v6498_v60 = vmul.f32 %v14071_v26, %v14071_v26 }
 0xb5d   :  { %v6424_v30 = vadd.f32 %v6423_v36, %v14044_v11 }
 0xb5e   :  { %v6558_v61 = vadd.f32 %v6557_v20, %v6495_v14  ;;  %v6499_v14 = vmul.f32 %v14080_v19, %v14080_v19  ;;  %v15928_v20 = vld [vmem:[#allocation84_spill] sm:$0xff] }
 0xb5f   :  { %v5910_v4 = vpop.f32.mrb[130].mxu1  ;;  %v6425_v58 = vadd.f32 %v6424_v30, %v14053_v12 }
 0xb60   :  { %v14143_v6 = vadd.f32 %v15925_v57, %v5910_v4  ;;  %v5912_v62 = vpop.f32.mrb[131].mxu1  ;;  %v6559_v4 = vadd.f32 %v6558_v61, %v6496_v9  ;;  %v6500_v9 = vmul.f32 %v14089_v48, %v14089_v48 }
 0xb61   :  { %v6426_v57 = vadd.f32 %v6425_v58, %v14062_v50 }
 0xb62   :  { %15926 = vst [vmem:[#allocation54_spill] sm:$0xff] %v14143_v6  ;;  %v6560_v36 = vadd.f32 %v6559_v4, %v6497_v38  ;;  %v6501_v38 = vmul.f32 %v14098_v3, %v14098_v3  ;;  %v15930_v4 = vld [vmem:[#allocation87_spill] sm:$0xff] }
 0xb63   :  { %v5915_v1 = vpop.f32.mrb[132].mxu1  ;;  %v6427_v62 = vadd.f32 %v6426_v57, %v14071_v26 }
 0xb64   :  { %v14152_v31 = vadd.f32 %v15927_v46, %v5915_v1  ;;  %v5917_v24 = vpop.f32.mrb[133].mxu1  ;;  %v6561_v1 = vadd.f32 %v6560_v36, %v6498_v60  ;;  %v6502_v60 = vmul.f32 %v14107_v15, %v14107_v15 }
 0xb65   :  { %v6428_v24 = vadd.f32 %v6427_v62, %v14080_v19 }
 0xb66   :  { %v6562_v58 = vadd.f32 %v6561_v1, %v6499_v14  ;;  %v6503_v14 = vmul.f32 %v14116_v27, %v14116_v27  ;;  %v15932_v1 = vld [vmem:[#allocation86_spill] sm:$0xff] }
 0xb67   :  { %v5920_v63 = vpop.f32.mrb[134].mxu1  ;;  %v6429_v46 = vadd.f32 %v6428_v24, %v14089_v48 }
 0xb68   :  { %v14161_v30 = vadd.f32 %v15928_v20, %v5920_v63  ;;  %v5922_v12 = vpop.f32.mrb[135].mxu1  ;;  %v6563_v63 = vadd.f32 %v6562_v58, %v6500_v9  ;;  %v6504_v9 = vmul.f32 %v14125_v59, %v14125_v59 }
 0xb69   :  { %v6430_v12 = vadd.f32 %v6429_v46, %v14098_v3 }
 0xb6a   :  { %15929 = vst [vmem:[#allocation37_spill] sm:$0xff] %v14161_v30  ;;  %v6564_v62 = vadd.f32 %v6563_v63, %v6501_v38  ;;  %v6505_v38 = vmul.f32 %v14134_v44, %v14134_v44  ;;  %v15934_v63 = vld [vmem:[#allocation89_spill] sm:$0xff] }
 0xb6b   :  { %v5925_v61 = vpop.f32.mrb[136].mxu1  ;;  %v6431_v20 = vadd.f32 %v6430_v12, %v14107_v15 }
 0xb6c   :  { %v14170_v57 = vadd.f32 %v15930_v4, %v5925_v61  ;;  %v5927_v26 = vpop.f32.mrb[137].mxu1  ;;  %v6565_v61 = vadd.f32 %v6564_v62, %v6502_v60  ;;  %v6506_v60 = vmul.f32 %v14143_v6, %v14143_v6 }
 0xb6d   :  { %v6432_v26 = vadd.f32 %v6431_v20, %v14116_v27 }
 0xb6e   :  { %15931 = vst [vmem:[#allocation31_spill] sm:$0xff] %v14170_v57  ;;  %v6566_v46 = vadd.f32 %v6565_v61, %v6503_v14  ;;  %v6507_v14 = vmul.f32 %v14152_v31, %v14152_v31  ;;  %v15936_v61 = vld [vmem:[#allocation88_spill] sm:$0xff] }
 0xb6f   :  { %v5930_v36 = vpop.f32.mrb[138].mxu1  ;;  %v6433_v4 = vadd.f32 %v6432_v26, %v14125_v59 }
 0xb70   :  { %v14179_v24 = vadd.f32 %v15932_v1, %v5930_v36  ;;  %v5932_v48 = vpop.f32.mrb[139].mxu1  ;;  %v6567_v36 = vadd.f32 %v6566_v46, %v6504_v9  ;;  %v6508_v9 = vmul.f32 %v14161_v30, %v14161_v30 }
 0xb71   :  { %v6434_v48 = vadd.f32 %v6433_v4, %v14134_v44 }
 0xb72   :  { %15933 = vst [vmem:[#allocation33_spill] sm:$0xff] %v14179_v24  ;;  %v6568_v20 = vadd.f32 %v6567_v36, %v6505_v38  ;;  %v6509_v38 = vmul.f32 %v14170_v57, %v14170_v57  ;;  %v15938_v36 = vld [vmem:[#allocation91_spill] sm:$0xff] }
 0xb73   :  { %v5935_v58 = vpop.f32.mrb[140].mxu1  ;;  %v6435_v1 = vadd.f32 %v6434_v48, %v14143_v6 }
 0xb74   :  { %v14188_v12 = vadd.f32 %v15934_v63, %v5935_v58  ;;  %v5937_v15 = vpop.f32.mrb[141].mxu1  ;;  %v6569_v58 = vadd.f32 %v6568_v20, %v6506_v60  ;;  %v6510_v60 = vmul.f32 %v14179_v24, %v14179_v24 }
 0xb75   :  { %v6436_v15 = vadd.f32 %v6435_v1, %v14152_v31 }
 0xb76   :  { %15935 = vst [vmem:[#allocation36_spill] sm:$0xff] %v14188_v12  ;;  %v6570_v4 = vadd.f32 %v6569_v58, %v6507_v14  ;;  %v6511_v14 = vmul.f32 %v14188_v12, %v14188_v12  ;;  %v15940_v58 = vld [vmem:[#allocation90_spill] sm:$0xff] }
 0xb77   :  { %v5940_v62 = vpop.f32.mrb[142].mxu1  ;;  %v6437_v63 = vadd.f32 %v6436_v15, %v14161_v30 }
 0xb78   :  { %v14197_v26 = vadd.f32 %v15936_v61, %v5940_v62  ;;  %v5942_v59 = vpop.f32.mrb[143].mxu1  ;;  %v6571_v62 = vadd.f32 %v6570_v4, %v6508_v9 }
 0xb79   :  { %v6438_v59 = vadd.f32 %v6437_v63, %v14170_v57 }
 0xb7a   :  { %15937 = vst [vmem:[#allocation34_spill] sm:$0xff] %v14197_v26  ;;  %v6572_v1 = vadd.f32 %v6571_v62, %v6509_v38  ;;  %v6512_v9 = vmul.f32 %v14197_v26, %v14197_v26  ;;  %v15942_v62 = vld [vmem:[#allocation93_spill] sm:$0xff] }
 0xb7b   :  { %v5945_v46 = vpop.f32.mrb[144].mxu1  ;;  %v6439_v61 = vadd.f32 %v6438_v59, %v14179_v24 }
 0xb7c   :  { %v14206_v48 = vadd.f32 %v15938_v36, %v5945_v46  ;;  %v5947_v6 = vpop.f32.mrb[145].mxu1  ;;  %v6573_v46 = vadd.f32 %v6572_v1, %v6510_v60 }
 0xb7d   :  { %v6440_v6 = vadd.f32 %v6439_v61, %v14188_v12 }
 0xb7e   :  { %15939 = vst [vmem:[#allocation27_spill] sm:$0xff] %v14206_v48  ;;  %v6574_v63 = vadd.f32 %v6573_v46, %v6511_v14  ;;  %v6513_v38 = vmul.f32 %v14206_v48, %v14206_v48  ;;  %v15944_v46 = vld [vmem:[#allocation92_spill] sm:$0xff] }
 0xb7f   :  { %v5950_v20 = vpop.f32.mrb[146].mxu1  ;;  %v6441_v36 = vadd.f32 %v6440_v6, %v14197_v26 }
 0xb80   :  { %v14215_v15 = vadd.f32 %v15940_v58, %v5950_v20  ;;  %v5952_v30 = vpop.f32.mrb[147].mxu1  ;;  %v6575_v20 = vadd.f32 %v6574_v63, %v6512_v9 }
 0xb81   :  { %v6442_v30 = vadd.f32 %v6441_v36, %v14206_v48 }
 0xb82   :  { %15941 = vst [vmem:[#allocation57_spill] sm:$0xff] %v14215_v15  ;;  %v6514_v60 = vmul.f32 %v14215_v15, %v14215_v15  ;;  %v6576_v61 = vadd.f32 %v6575_v20, %v6513_v38  ;;  %v15946_v38 = vld [vmem:[#allocation95_spill] sm:$0xff] }
 0xb83   :  { %v5955_v4 = vpop.f32.mrb[148].mxu1  ;;  %v6443_v58 = vadd.f32 %v6442_v30, %v14215_v15 }
 0xb84   :  { %v14224_v59 = vadd.f32 %v15942_v62, %v5955_v4  ;;  %v5957_v24 = vpop.f32.mrb[149].mxu1  ;;  %v6577_v4 = vadd.f32 %v6576_v61, %v6514_v60  ;;  %v15948_v61 = vld [vmem:[#allocation94_spill] sm:$0xff] }
 0xb86   :  { %15943 = vst [vmem:[#allocation26_spill] sm:$0xff] %v14224_v59  ;;  %v6515_v14 = vmul.f32 %v14224_v59, %v14224_v59  ;;  %v6444_v24 = vadd.f32 %v6443_v58, %v14224_v59 }
 0xb87   :  { %v5960_v1 = vpop.f32.mrb[150].mxu1 }
 0xb88   :  { %v14233_v6 = vadd.f32 %v15944_v46, %v5960_v1  ;;  %v5962_v26 = vpop.f32.mrb[151].mxu1  ;;  %v6578_v36 = vadd.f32 %v6577_v4, %v6515_v14 }
 0xb8a   :  { %15945 = vst [vmem:[#allocation41_spill] sm:$0xff] %v14233_v6  ;;  %v6516_v9 = vmul.f32 %v14233_v6, %v14233_v6  ;;  %v6445_v62 = vadd.f32 %v6444_v24, %v14233_v6  ;;  %v14287_v6 = vld [vmem:[#allocation18] ss:$0 sm:$0xff] }
 0xb8b   :  { %v5965_v63 = vpop.f32.mrb[152].mxu1  ;;  %15959 = vst [vmem:[#allocation29_spill] sm:$0xff] %v14287_v6 }
 0xb8c   :  { %v14240_v20 = vadd.f32 %v15946_v38, %v5965_v63  ;;  %v5967_v30 = vpop.f32.mrb[153].mxu1  ;;  %v6579_v15 = vadd.f32 %v6578_v36, %v6516_v9  ;;  %v15950_v38 = vld [vmem:[#allocation97_spill] sm:$0xff] }
 0xb8e   :  { %15947 = vst [vmem:[#allocation39_spill] sm:$0xff] %v14240_v20  ;;  %v6446_v48 = vadd.f32 %v6445_v62, %v14240_v20  ;;  %v6517_v26 = vmul.f32 %v14240_v20, %v14240_v20 }
 0xb8f   :  { %v5970_v60 = vpop.f32.mrb[154].mxu1 }
 0xb90   :  { %v6580_v1 = vadd.f32 %v6579_v15, %v6517_v26  ;;  %v14246_v58 = vadd.f32 %v15948_v61, %v5970_v60  ;;  %v5972_v46 = vpop.f32.mrb[155].mxu1  ;;  %v15952_v60 = vld [vmem:[#allocation96_spill] sm:$0xff] }
 0xb92   :  { %15949 = vst [vmem:[#allocation45_spill] sm:$0xff] %v14246_v58  ;;  %v6447_v14 = vadd.f32 %v6446_v48, %v14246_v58  ;;  %v6518_v4 = vmul.f32 %v14246_v58, %v14246_v58 }
 0xb93   :  { %v5975_v24 = vpop.f32.mrb[156].mxu1 }
 0xb94   :  { %v6581_v63 = vadd.f32 %v6580_v1, %v6518_v4  ;;  %v14252_v9 = vadd.f32 %v15950_v38, %v5975_v24  ;;  %v5977_v36 = vpop.f32.mrb[157].mxu1  ;;  %v15954_v38 = vld [vmem:[#allocation99_spill] sm:$0xff] }
 0xb96   :  { %15951 = vst [vmem:[#allocation38_spill] sm:$0xff] %v14252_v9  ;;  %v6448_v62 = vadd.f32 %v6447_v14, %v14252_v9  ;;  %v6519_v15 = vmul.f32 %v14252_v9, %v14252_v9 }
 0xb97   :  { %v5980_v30 = vpop.f32.mrb[158].mxu1 }
 0xb98   :  { %v6582_v26 = vadd.f32 %v6581_v63, %v6519_v15  ;;  %v14258_v61 = vadd.f32 %v15952_v60, %v5980_v30  ;;  %v5982_v48 = vpop.f32.mrb[159].mxu1  ;;  %v15956_v60 = vld [vmem:[#allocation98_spill] sm:$0xff] }
 0xb9a   :  { %15953 = vst [vmem:[#allocation28_spill] sm:$0xff] %v14258_v61  ;;  %v6449_v46 = vadd.f32 %v6448_v62, %v14258_v61  ;;  %v6520_v1 = vmul.f32 %v14258_v61, %v14258_v61 }
 0xb9b   :  { %v5985_v4 = vpop.f32.mrb[160].mxu1 }
 0xb9c   :  { %v6583_v24 = vadd.f32 %v6582_v26, %v6520_v1  ;;  %v14264_v36 = vadd.f32 %v15954_v38, %v5985_v4  ;;  %v5987_v14 = vpop.f32.mrb[161].mxu1 }
 0xb9e   :  { %15955 = vst [vmem:[#allocation35_spill] sm:$0xff] %v14264_v36  ;;  %v6450_v58 = vadd.f32 %v6449_v46, %v14264_v36  ;;  %v6521_v63 = vmul.f32 %v14264_v36, %v14264_v36 }
 0xb9f   :  { %v5990_v15 = vpop.f32.mrb[162].mxu1 }
 0xba0   :  { %v6584_v30 = vadd.f32 %v6583_v24, %v6521_v63  ;;  %v14270_v48 = vadd.f32 %v15956_v60, %v5990_v15  ;;  %v5992_v62 = vpop.f32.mrb[163].mxu1 }
 0xba2   :  { %15957 = vst [vmem:[#allocation40_spill] sm:$0xff] %v14270_v48  ;;  %v6451_v9 = vadd.f32 %v6450_v58, %v14270_v48  ;;  %v6522_v26 = vmul.f32 %v14270_v48, %v14270_v48 }
 0xba3   :  { %v5995_v1 = vpop.f32.mrb[164].mxu1 }
 0xba4   :  { %v6585_v4 = vadd.f32 %v6584_v30, %v6522_v26  ;;  %v14276_v38 = vadd.f32 %v14017_v54, %v5995_v1  ;;  %v5997_v46 = vpop.f32.mrb[165].mxu1 }
 0xba6   :  { %15958 = vst [vmem:[#allocation30_spill] sm:$0xff] %v14276_v38  ;;  %v6452_v14 = vadd.f32 %v6451_v9, %v14276_v38  ;;  %v6523_v24 = vmul.f32 %v14276_v38, %v14276_v38 }
 0xba7   :  { %v6000_v63 = vpop.f32.mrb[166].mxu1 }
 0xba8   :  { %v6586_v15 = vadd.f32 %v6585_v4, %v6523_v24  ;;  %v14282_v60 = vadd.f32 %v14015_v52, %v6000_v63  ;;  %v6002_v58 = vpop.f32.mrb[167].mxu1 }
 0xbaa   :  { %v6453_v62 = vadd.f32 %v6452_v14, %v14282_v60  ;;  %v6524_v30 = vmul.f32 %v14282_v60, %v14282_v60 }
 0xbab   :  { %v8087_v26 = vpop.f32.mrb[168].mxu1 }
 0xbac   :  { %v6454_v54 = vrot.slane %v6453_v62, 4  ;;  %v6587_v1 = vadd.f32 %v6586_v15, %v6524_v30  ;;  %v7020_v46 = vpop.f32.mrb[169].mxu1  ;;  %v14290_v57 = vadd.f32 %v8087_v26, %v14287_v6 }
 0xbad   :  { %v14293_v15 = vadd.f32 %v14287_v6, %v7020_v46 }
 0xbae   :  { %v6455_v48 = vadd.f32 %v6454_v54, %v6453_v62  ;;  %v6588_v9 = vrot.slane %v6587_v1, 4  ;;  %15960 = vst [vmem:[#allocation44_spill] sm:$0xff] %v14290_v57 }
 0xbaf   :  { %v8090_v36 = vpop.f32.mrb[170].mxu1  ;;  %15961 = vst [vmem:[#allocation42_spill] sm:$0xff] %v14293_v15  ;;  %v15996_v15 = vld [vmem:[#allocation35_spill] sm:$0xff] }
 0xbb0   :  { %v6456_v61 = vrot.slane %v6455_v48, 2  ;;  %v6589_v38 = vadd.f32 %v6588_v9, %v6587_v1  ;;  %v7030_v20 = vpop.f32.mrb[171].mxu1  ;;  %v15977_v9 = vld [vmem:[#allocation52_spill] sm:$0xff] }
 0xbb2   :  { %v6457_v4 = vadd.f32 %v6456_v61, %v6455_v48  ;;  %v6590_v24 = vrot.slane %v6589_v38, 2  ;;  %v14298_v61 = vadd.f32 %v8090_v36, %v14287_v6  ;;  %v14301_v48 = vadd.f32 %v14287_v6, %v7030_v20 }
 0xbb3   :  { %v8093_v52 = vpop.f32.mrb[172].mxu1 }
 0xbb4   :  { %v6458_v63 = vrot.slane %v6457_v4, 1  ;;  %v6591_v58 = vadd.f32 %v6590_v24, %v6589_v38  ;;  %v7040_v14 = vpop.f32.mrb[173].mxu1  ;;  %15962 = vst [vmem:[#allocation55_spill] sm:$0xff] %v14298_v61  ;;  %15963 = vst [vmem:[#allocation46_spill] sm:$0xff] %v14301_v48  ;;  %v14304_v1 = vadd.f32 %v8093_v52, %v14287_v6  ;;  %v15972_v24 = vld [vmem:[#allocation32_spill] sm:$0xff]  ;;  %v15974_v52 = vld [vmem:[#allocation50_spill] sm:$0xff] }
 0xbb5   :  { %v14307_v26 = vadd.f32 %v14287_v6, %v7040_v14 }
 0xbb6   :  { %v6459_v59 = vadd.f32 %v6458_v63, %v6457_v4  ;;  %v6592_v12 = vrot.slane %v6591_v58, 1  ;;  %15964 = vst [vmem:[#allocation43_spill] sm:$0xff] %v14304_v1  ;;  %v15981_v63 = vld [vmem:[#allocation37_spill] sm:$0xff] }
 0xbb7   :  { %v8096_v62 = vpop.f32.mrb[174].mxu1  ;;  %15965 = vst [vmem:[#allocation58_spill] sm:$0xff] %v14307_v26  ;;  %v15991_v26 = vld [vmem:[#allocation41_spill] sm:$0xff] }
 0xbb8   :  { %v14295_v30 = vmul.f32 0.001953125, %v6459_v59  ;;  %v6593_v54 = vadd.f32 %v6592_v12, %v6591_v58  ;;  %v7050_v38 = vpop.f32.mrb[175].mxu1  ;;  %v14310_v46 = vadd.f32 %v8096_v62, %v14287_v6 }
 0xbb9   :  { %v14313_v59 = vadd.f32 %v14287_v6, %v7050_v38  ;;  %v15980_v38 = vld [vmem:[#allocation54_spill] sm:$0xff] }
 0xbba   :  { %15966 = vst [vmem:[#allocation60_spill] sm:$0xff] %v14310_v46  ;;  %v6594_v12 = vmul.f32 0.001953125, %v6593_v54  ;;  %v6595_v36 = vmul.f32 %v14295_v30, %v14295_v30  ;;  %v16000_v6 = vld [vmem:[#allocation30_spill] sm:$0xff]  ;;  %v16001_v61 = vsub.f32 %v13890_v10, %v14295_v30  ;;  %v16004_v10 = vsub.f32 %v13902_v45, %v14295_v30 }
 0xbbb   :  { %15967 = vst [vmem:[#allocation59_spill] sm:$0xff] %v14313_v59  ;;  %v14329_v58 = vpop.f32.mrb[176].mxu1  ;;  %v15995_v59 = vld [vmem:[#allocation28_spill] sm:$0xff]  ;;  %v16007_v45 = vsub.f32 %v13914_v33, %v14295_v30 }
 0xbbc   :  { %15968 = vst [vmem:[#allocation62_spill] sm:$0xff] %v14329_v58  ;;  %v6596_v14 = vsub.f32 %v6594_v12, %v6595_v36  ;;  %v14337_v4 = vpop.f32.mrb[177].mxu1  ;;  %v15979_v58 = vld [vmem:[#allocation53_spill] sm:$0xff]  ;;  %v16002_v12 = vsub.f32 %v13894_v47, %v14295_v30  ;;  %v16005_v47 = vsub.f32 %v13906_v32, %v14295_v30  ;;  %v16008_v32 = vsub.f32 %v13918_v2, %v14295_v30 }
 0xbbd   :  { %15969 = vst [vmem:[#allocation61_spill] sm:$0xff] %v14337_v4  ;;  %v15978_v4 = vld [vmem:[#allocation56_spill] sm:$0xff] }
 0xbbe   :  { %v6661_v62 = vadd.f32 1e-05, %v6596_v14 }
 0xbbf   :  { %v14361_v36 = vpop.f32.mrb[178].mxu1 }
 0xbc0   :  { %15970 = vst [vmem:[#allocation64_spill] sm:$0xff] %v14361_v36  ;;  %9461 = vrsqrt.f32 %v6661_v62  ;;  %v14369_v54 = vpop.f32.mrb[179].mxu1  ;;  %v16006_v62 = vsub.f32 %v13910_v42, %v14295_v30  ;;  %v16009_v42 = vsub.f32 %v13922_v25, %v14295_v30 }
 0xbc1   :  { %15971 = vst [vmem:[#allocation63_spill] sm:$0xff] %v14369_v54  ;;  %v15975_v54 = vld [vmem:[#allocation51_spill] sm:$0xff] }
 0xbc3   :  { %v14395_v20 = vpop.f32.mrb[180].mxu1 }
 0xbc4   :  { %15973 = vst [vmem:[#allocation66_spill] sm:$0xff] %v14395_v20  ;;  %v14405_v36 = vpop.f32.mrb[181].mxu1  ;;  %v15994_v20 = vld [vmem:[#allocation38_spill] sm:$0xff] }
 0xbc5   :  { %15976 = vst [vmem:[#allocation65_spill] sm:$0xff] %v14405_v36  ;;  %v15998_v36 = vsub.f32 %v14282_v60, %v14295_v30  ;;  %v16003_v60 = vsub.f32 %v13898_v7, %v14295_v30 }
 0xbc7   :  { %v14431_v1 = vpop.f32.mrb[182].mxu1 }
 0xbc8   :  { %15984 = vst [vmem:[#allocation67_spill] sm:$0xff] %v14431_v1  ;;  %v14441_v57 = vpop.f32.mrb[183].mxu1 }
 0xbc9   :  { %15989 = vst [vmem:[#allocation47_spill] sm:$0xff] %v14441_v57 }
 0xbca   :  { %v14451_v48 = vpop.eup %9461 }
 0xbcb   :  { %v14465_v14 = vmul.f32 %v14451_v48, %v15998_v36  ;;  %v14473_v57 = vmul.f32 %v14451_v48, %v16001_v61  ;;  %v14479_v1 = vmul.f32 %v14451_v48, %v16002_v12  ;;  %v14481_v46 = vpop.f32.mrb[184].mxu1  ;;  %v14487_v36 = vmul.f32 %v14451_v48, %v16003_v60 }
 0xbcc   :  { %v14493_v61 = vmul.f32 %v14451_v48, %v16004_v10  ;;  %v14499_v12 = vmul.f32 %v14451_v48, %v16005_v47  ;;  %v14505_v7 = vmul.f32 %v14451_v48, %v16006_v62  ;;  %v14507_v60 = vpop.f32.mrb[185].mxu1  ;;  %v14513_v10 = vmul.f32 %v14451_v48, %v16007_v45 }
 0xbcd   :  { %15999 = vst [vmem:[#allocation68_spill] sm:$0xff] %v14465_v14  ;;  %v14519_v47 = vmul.f32 %v14451_v48, %v16008_v32  ;;  %v14525_v62 = vmul.f32 %v14451_v48, %v16009_v42  ;;  %v16010_v14 = vsub.f32 %v13925_v28, %v14295_v30  ;;  %v16011_v45 = vsub.f32 %v13929_v53, %v14295_v30 }
 0xbce   :  { %v16012_v32 = vsub.f32 %v13933_v43, %v14295_v30  ;;  %v16013_v42 = vsub.f32 %v13936_v8, %v14295_v30 }
 0xbcf   :  { %v14531_v33 = vmul.f32 %v14451_v48, %v16010_v14  ;;  %v14537_v2 = vmul.f32 %v14451_v48, %v16011_v45  ;;  %v16014_v14 = vsub.f32 %v13939_v35, %v14295_v30  ;;  %v16015_v45 = vsub.f32 %v13942_v55, %v14295_v30 }
 0xbd0   :  { %v14543_v25 = vmul.f32 %v14451_v48, %v16012_v32  ;;  %v14549_v28 = vmul.f32 %v14451_v48, %v16013_v42  ;;  %v16016_v32 = vsub.f32 %v13945_v56, %v14295_v30  ;;  %v16017_v42 = vsub.f32 %v13948_v16, %v14295_v30 }
 0xbd1   :  { %v14555_v53 = vmul.f32 %v14451_v48, %v16014_v14  ;;  %v14561_v43 = vmul.f32 %v14451_v48, %v16015_v45  ;;  %v16018_v14 = vsub.f32 %v13951_v40, %v14295_v30  ;;  %v14581_v45 = vpop.f32.mrb[186].mxu1  ;;  %v16020_v56 = vsub.f32 %v13954_v29, %v14295_v30 }
 0xbd2   :  { %v14567_v8 = vmul.f32 %v14451_v48, %v16016_v32  ;;  %v14573_v35 = vmul.f32 %v14451_v48, %v16017_v42  ;;  %16019 = vst [vmem:[#allocation48_spill] sm:$0xff] %v14581_v45  ;;  %v16021_v16 = vsub.f32 %v13957_v23, %v14295_v30  ;;  %v16022_v40 = vsub.f32 %v13960_v37, %v14295_v30 }
 0xbd3   :  { %v14579_v55 = vmul.f32 %v14451_v48, %v16018_v14  ;;  %v14587_v32 = vmul.f32 %v14451_v48, %v16020_v56  ;;  %v16024_v45 = vsub.f32 %v13963_v21, %v14295_v30  ;;  %v14607_v56 = vpop.f32.mrb[187].mxu1  ;;  %v16025_v23 = vsub.f32 %v13966_v17, %v14295_v30 }
 0xbd4   :  { %v14593_v42 = vmul.f32 %v14451_v48, %v16021_v16  ;;  %v14599_v14 = vmul.f32 %v14451_v48, %v16022_v40  ;;  %v16026_v37 = vsub.f32 %v13969_v18, %v14295_v30  ;;  %v16027_v21 = vsub.f32 %v13972_v39, %v14295_v30 }
 0xbd5   :  { %v14605_v29 = vmul.f32 %v14451_v48, %v16024_v45  ;;  %v14613_v16 = vmul.f32 %v14451_v48, %v16025_v23  ;;  %v16029_v23 = vsub.f32 %v13978_v51, %v14295_v30 }
 0xbd6   :  { %16023 = vst [vmem:[#allocation69_spill] sm:$0xff] %v14599_v14  ;;  %v14619_v40 = vmul.f32 %v14451_v48, %v16026_v37  ;;  %v14625_v45 = vmul.f32 %v14451_v48, %v16027_v21  ;;  %v16028_v14 = vsub.f32 %v13975_v0, %v14295_v30  ;;  %v16030_v37 = vsub.f32 %v13981_v22, %v14295_v30 }
 0xbd7   :  { %v14637_v18 = vmul.f32 %v14451_v48, %v16029_v23  ;;  %v16031_v21 = vsub.f32 %v13984_v34, %v14295_v30  ;;  %v16033_v23 = vsub.f32 %v14004_v5, %v14295_v30 }
 0xbd8   :  { %v14631_v17 = vmul.f32 %v14451_v48, %v16028_v14  ;;  %v14643_v39 = vmul.f32 %v14451_v48, %v16030_v37  ;;  %v16032_v14 = vsub.f32 %v13995_v41, %v14295_v30  ;;  %v16034_v37 = vsub.f32 %v14013_v49, %v14295_v30 }
 0xbd9   :  { %v14649_v0 = vmul.f32 %v14451_v48, %v16031_v21  ;;  %v14661_v22 = vmul.f32 %v14451_v48, %v16033_v23  ;;  %v16035_v21 = vsub.f32 %v14026_v13, %v14295_v30  ;;  %v14681_v23 = vpop.f32.mrb[188].mxu1  ;;  %v16038_v49 = vsub.f32 %v14044_v11, %v14295_v30 }
 0xbda   :  { %v14655_v51 = vmul.f32 %v14451_v48, %v16032_v14  ;;  %v14667_v34 = vmul.f32 %v14451_v48, %v16034_v37  ;;  %v16037_v14 = vsub.f32 %v15972_v24, %v14295_v30  ;;  %v16039_v13 = vsub.f32 %v15974_v52, %v14295_v30 }
 0xbdb   :  { %v14673_v41 = vmul.f32 %v14451_v48, %v16035_v21  ;;  %v14687_v37 = vmul.f32 %v14451_v48, %v16038_v49  ;;  %v16040_v24 = vsub.f32 %v14062_v50, %v14295_v30  ;;  %v14707_v49 = vpop.f32.mrb[189].mxu1  ;;  %v16044_v52 = vsub.f32 %v14080_v19, %v14295_v30 }
 0xbdc   :  { %v14679_v5 = vmul.f32 %v14451_v48, %v16037_v14  ;;  %v14693_v21 = vmul.f32 %v14451_v48, %v16039_v13  ;;  %v16046_v50 = vsub.f32 %v15977_v9, %v14295_v30 }
 0xbdd   :  { %16036 = vst [vmem:[#allocation49_spill] sm:$0xff] %v14673_v41  ;;  %v14699_v14 = vmul.f32 %v14451_v48, %v16040_v24  ;;  %v16042_v41 = vsub.f32 %v15975_v54, %v14295_v30  ;;  %v14713_v13 = vmul.f32 %v14451_v48, %v16044_v52  ;;  %v16048_v54 = vsub.f32 %v14098_v3, %v14295_v30 }
 0xbde   :  { %v14719_v24 = vmul.f32 %v14451_v48, %v16046_v50  ;;  %v16052_v52 = vsub.f32 %v14116_v27, %v14295_v30  ;;  %v16054_v50 = vsub.f32 %v15979_v58, %v14295_v30 }
 0xbdf   :  { %16041 = vst [vmem:[#allocation71_spill] sm:$0xff] %v14699_v14  ;;  %v14705_v11 = vmul.f32 %v14451_v48, %v16042_v41  ;;  %16045 = vst [vmem:[#allocation73_spill] sm:$0xff] %v14713_v13  ;;  %v14725_v41 = vmul.f32 %v14451_v48, %v16048_v54  ;;  %v16050_v14 = vsub.f32 %v15978_v4, %v14295_v30  ;;  %v16110_v13 = vld [vmem:[#allocation60_spill] sm:$0xff] }
 0xbe0   :  { %16047 = vst [vmem:[#allocation72_spill] sm:$0xff] %v14719_v24  ;;  %v14737_v9 = vmul.f32 %v14451_v48, %v16052_v52  ;;  %v14743_v3 = vmul.f32 %v14451_v48, %v16054_v50  ;;  %v16056_v54 = vsub.f32 %v14134_v44, %v14295_v30  ;;  %v16060_v52 = vsub.f32 %v14152_v31, %v14295_v30 }
 0xbe1   :  { %16043 = vst [vmem:[#allocation70_spill] sm:$0xff] %v14705_v11  ;;  %16049 = vst [vmem:[#allocation75_spill] sm:$0xff] %v14725_v41  ;;  %v14731_v19 = vmul.f32 %v14451_v48, %v16050_v14  ;;  %v16058_v14 = vsub.f32 %v15980_v38, %v14295_v30  ;;  %v16062_v50 = vsub.f32 %v15981_v63, %v14295_v30  ;;  %v16108_v41 = vld [vmem:[#allocation43_spill] sm:$0xff] }
 0xbe2   :  { %16053 = vst [vmem:[#allocation77_spill] sm:$0xff] %v14737_v9  ;;  %16055 = vst [vmem:[#allocation76_spill] sm:$0xff] %v14743_v3  ;;  %v14749_v4 = vmul.f32 %v14451_v48, %v16056_v54  ;;  %v14761_v58 = vmul.f32 %v14451_v48, %v16060_v52  ;;  %v16064_v54 = vld [vmem:[#allocation31_spill] sm:$0xff]  ;;  %v14781_v52 = vpop.f32.mrb[190].mxu1 }
 0xbe3   :  { %16051 = vst [vmem:[#allocation74_spill] sm:$0xff] %v14731_v19  ;;  %v14755_v27 = vmul.f32 %v14451_v48, %v16058_v14  ;;  %v14767_v44 = vmul.f32 %v14451_v48, %v16062_v50  ;;  %v16067_v14 = vld [vmem:[#allocation33_spill] sm:$0xff]  ;;  %v16109_v19 = vld [vmem:[#allocation58_spill] sm:$0xff] }
 0xbe4   :  { %16057 = vst [vmem:[#allocation79_spill] sm:$0xff] %v14749_v4  ;;  %16061 = vst [vmem:[#allocation81_spill] sm:$0xff] %v14761_v58  ;;  %v16065_v4 = vsub.f32 %v16064_v54, %v14295_v30  ;;  %v16070_v58 = vld [vmem:[#allocation36_spill] sm:$0xff] }
 0xbe5   :  { %16059 = vst [vmem:[#allocation78_spill] sm:$0xff] %v14755_v27  ;;  %16063 = vst [vmem:[#allocation80_spill] sm:$0xff] %v14767_v44  ;;  %v16068_v27 = vsub.f32 %v16067_v14, %v14295_v30  ;;  %v16071_v63 = vsub.f32 %v16070_v58, %v14295_v30  ;;  %v16073_v44 = vld [vmem:[#allocation34_spill] sm:$0xff] }
 0xbe6   :  { %v14773_v38 = vmul.f32 %v14451_v48, %v16065_v4  ;;  %v16074_v54 = vsub.f32 %v16073_v44, %v14295_v30  ;;  %v16082_v44 = vld [vmem:[#allocation26_spill] sm:$0xff] }
 0xbe7   :  { %v14779_v31 = vmul.f32 %v14451_v48, %v16068_v27  ;;  %v14787_v50 = vmul.f32 %v14451_v48, %v16071_v63  ;;  %v14807_v63 = vld [vmem:[#allocation13] ss:$0 sm:$0xff] }
 0xbe8   :  { %16066 = vst [vmem:[#allocation83_spill] sm:$0xff] %v14773_v38  ;;  %v14793_v4 = vmul.f32 %v14451_v48, %v16074_v54  ;;  %v16076_v38 = vld [vmem:[#allocation27_spill] sm:$0xff]  ;;  %v16083_v54 = vsub.f32 %v16082_v44, %v14295_v30 }
 0xbe9   :  { %16069 = vst [vmem:[#allocation82_spill] sm:$0xff] %v14779_v31  ;;  %16072 = vst [vmem:[#allocation85_spill] sm:$0xff] %v14787_v50  ;;  %v16077_v14 = vsub.f32 %v16076_v38, %v14295_v30  ;;  %v16079_v31 = vld [vmem:[#allocation57_spill] sm:$0xff]  ;;  %v14809_v50 = vpop.f32.mrb[191].mxu1  ;;  %v16085_v38 = vsub.f32 %v15991_v26, %v14295_v30 }
 0xbea   :  { %16075 = vst [vmem:[#allocation84_spill] sm:$0xff] %v14793_v4  ;;  %v16080_v9 = vsub.f32 %v16079_v31, %v14295_v30  ;;  %v14815_v4 = vmul.f32 %v14451_v48, %v16083_v54  ;;  %v16087_v31 = vld [vmem:[#allocation39_spill] sm:$0xff]  ;;  %v16093_v54 = vsub.f32 %v15994_v20, %v14295_v30 }
 0xbeb   :  { %v14799_v27 = vmul.f32 %v14451_v48, %v16077_v14  ;;  %v14821_v14 = vmul.f32 %v14451_v48, %v16085_v38  ;;  %v16095_v38 = vsub.f32 %v15995_v59, %v14295_v30  ;;  %v16102_v59 = vsub.f32 %v16000_v6, %v14295_v30 }
 0xbec   :  { %v14805_v58 = vmul.f32 %v14451_v48, %v16080_v9  ;;  %16084 = vst [vmem:[#allocation89_spill] sm:$0xff] %v14815_v4  ;;  %v16088_v9 = vsub.f32 %v16087_v31, %v14295_v30  ;;  %v14839_v26 = vmul.f32 %v14451_v48, %v16093_v54  ;;  %v14859_v54 = vld [vmem:[#allocation15] ss:$0 sm:$0xff]  ;;  %v6738_v6 = vmul.f32 %v14807_v63, %v14505_v7 }
 0xbed   :  { %16078 = vst [vmem:[#allocation87_spill] sm:$0xff] %v14799_v27  ;;  %16086 = vst [vmem:[#allocation88_spill] sm:$0xff] %v14821_v14  ;;  %v14845_v31 = vmul.f32 %v14451_v48, %v16095_v38  ;;  %v14865_v38 = vmul.f32 %v14451_v48, %v16102_v59  ;;  %v16107_v14 = vld [vmem:[#allocation46_spill] sm:$0xff] }
 0xbee   :  { %16081 = vst [vmem:[#allocation86_spill] sm:$0xff] %v14805_v58  ;;  %v14827_v27 = vmul.f32 %v14451_v48, %v16088_v9  ;;  %v16090_v58 = vld [vmem:[#allocation45_spill] sm:$0xff]  ;;  %16094 = vst [vmem:[#allocation93_spill] sm:$0xff] %v14839_v26  ;;  %v16097_v9 = vsub.f32 %v15996_v15, %v14295_v30  ;;  %v6734_v15 = vmul.f32 %v14807_v63, %v14479_v1 }
 0xbef   :  { %v16091_v3 = vsub.f32 %v16090_v58, %v14295_v30  ;;  %16096 = vst [vmem:[#allocation92_spill] sm:$0xff] %v14845_v31  ;;  %16103 = vst [vmem:[#allocation97_spill] sm:$0xff] %v14865_v38  ;;  %v6808_v7 = vadd.f32 %v14859_v54, %v6738_v6  ;;  %v16105_v31 = vld [vmem:[#allocation42_spill] sm:$0xff] }
 0xbf0   :  { %16089 = vst [vmem:[#allocation91_spill] sm:$0xff] %v14827_v27  ;;  %v14851_v58 = vmul.f32 %v14451_v48, %v16097_v9  ;;  %v6733_v9 = vmul.f32 %v14807_v63, %v14473_v57  ;;  %v6804_v57 = vadd.f32 %v14859_v54, %v6734_v15  ;;  %v16106_v15 = vld [vmem:[#allocation55_spill] sm:$0xff] }
 0xbf1   :  { %v14833_v44 = vmul.f32 %v14451_v48, %v16091_v3  ;;  %v16099_v3 = vld [vmem:[#allocation40_spill] sm:$0xff] }
 0xbf2   :  { %16098 = vst [vmem:[#allocation95_spill] sm:$0xff] %v14851_v58  ;;  %v16100_v27 = vsub.f32 %v16099_v3, %v14295_v30  ;;  %v6736_v3 = vmul.f32 %v14807_v63, %v14493_v61  ;;  %v14873_v58 = vpop.f32.mrb[192].mxu1  ;;  %v6737_v30 = vmul.f32 %v14807_v63, %v14499_v12  ;;  %v6803_v61 = vadd.f32 %v14859_v54, %v6733_v9 }
 0xbf3   :  { %16092 = vst [vmem:[#allocation90_spill] sm:$0xff] %v14833_v44  ;;  %v14883_v1 = vpop.f32.mrb[193].mxu1 }
 0xbf4   :  { %v14857_v20 = vmul.f32 %v14451_v48, %v16100_v27  ;;  %v6735_v27 = vmul.f32 %v14807_v63, %v14487_v36  ;;  %v6740_v48 = vmul.f32 %v14807_v63, %v14519_v47  ;;  %v6806_v59 = vadd.f32 %v14859_v54, %v6736_v3  ;;  %v16104_v47 = vld [vmem:[#allocation44_spill] sm:$0xff]  ;;  %v14898_v3 = vpop.f32.mrb[194].mxu1 }
 0xbf5   :  { %v6739_v36 = vmul.f32 %v14807_v63, %v14513_v10  ;;  %v6807_v12 = vadd.f32 %v14859_v54, %v6737_v30  ;;  %v7340_v26 = vadd.f32 %v16104_v47, %v6804_v57  ;;  %v7339_v44 = vadd.f32 %v16105_v31, %v6803_v61  ;;  %v14904_v24 = vpop.f32.mrb[195].mxu1  ;;  %v16111_v31 = vld [vmem:[#allocation59_spill] sm:$0xff] }
 0xbf6   :  { %16101 = vst [vmem:[#allocation94_spill] sm:$0xff] %v14857_v20  ;;  %v6805_v38 = vadd.f32 %v14859_v54, %v6735_v27  ;;  %v6810_v20 = vadd.f32 %v14859_v54, %v6740_v48  ;;  %v7342_v4 = vadd.f32 %v16106_v15, %v6806_v59  ;;  %v7344_v27 = vadd.f32 %v16108_v41, %v6808_v7 }
 0xbf7   :  { %v6809_v9 = vadd.f32 %v14859_v54, %v6739_v36  ;;  %v7343_v6 = vadd.f32 %v16109_v19, %v6807_v12  ;;  %v7404_v48 = vmax.f32 %v7340_v26, 0.0  ;;  %v7403_v57 = vmax.f32 %v7339_v44, 0.0  ;;  %v16112_v19 = vld [vmem:[#allocation29_spill] sm:$0xff] }
 0xbf8   :  { %v7341_v10 = vadd.f32 %v16107_v14, %v6805_v38  ;;  %v7346_v30 = vadd.f32 %v16110_v13, %v6810_v20  ;;  %v7406_v47 = vmax.f32 %v7342_v4, 0.0  ;;  %v7408_v15 = vmax.f32 %v7344_v27, 0.0  ;;  %v16113_v13 = vld [vmem:[#allocation62_spill] sm:$0xff]  ;;  %v14913_v4 = vpop.f32.mrb[196].mxu1  ;;  %v16114_v26 = vld [vmem:[#allocation61_spill] sm:$0xff] }
 0xbf9   :  { %v7345_v61 = vadd.f32 %v16111_v31, %v6809_v9  ;;  %v7407_v36 = vmax.f32 %v7343_v6, 0.0  ;;  %7468 = vst [vmem:[#allocation19 + $0x8] sm:$0xff] %v7404_v48  ;;  %7467 = vst [vmem:[#allocation19] sm:$0xff] %v7403_v57  ;;  %v6742_v41 = vmul.f32 %v14807_v63, %v14531_v33  ;;  %v7066_v20 = vadd.f32 %v16113_v13, %v16112_v19  ;;  %v16115_v33 = vld [vmem:[#allocation64_spill] sm:$0xff]  ;;  %v16117_v57 = vld [vmem:[#allocation66_spill] sm:$0xff] }
 0xbfa   :  { %v7405_v59 = vmax.f32 %v7341_v10, 0.0  ;;  %v7410_v11 = vmax.f32 %v7346_v30, 0.0  ;;  %7470 = vst [vmem:[#allocation19 + $0x18] sm:$0xff] %v7406_v47  ;;  %v6741_v44 = vmul.f32 %v14807_v63, %v14525_v62  ;;  %7472 = vst [vmem:[#allocation19 + $0x28] sm:$0xff] %v7408_v15  ;;  %v7061_v38 = vadd.f32 %v16112_v19, %v16114_v26  ;;  %v14923_v10 = vpop.f32.mrb[197].mxu1  ;;  %v16118_v15 = vld [vmem:[#allocation65_spill] sm:$0xff] }
 0xbfb   :  { %v7409_v14 = vmax.f32 %v7345_v61, 0.0  ;;  %7471 = vst [vmem:[#allocation19 + $0x20] sm:$0xff] %v7407_v36  ;;  %v6744_v7 = vmul.f32 %v14807_v63, %v14543_v25  ;;  %v7076_v12 = vadd.f32 %v16115_v33, %v16112_v19  ;;  %v6743_v9 = vmul.f32 %v14807_v63, %v14537_v2 }
 0xbfc   :  { %7469 = vst [vmem:[#allocation19 + $0x10] sm:$0xff] %v7405_v59  ;;  %7474 = vst [vmem:[#allocation19 + $0x38] sm:$0xff] %v7410_v11  ;;  %v6812_v62 = vadd.f32 %v14859_v54, %v6742_v41  ;;  %v6811_v27 = vadd.f32 %v14859_v54, %v6741_v44  ;;  %v16116_v11 = vld [vmem:[#allocation63_spill] sm:$0xff]  ;;  %v6746_v30 = vmul.f32 %v14807_v63, %v14555_v53 }
 0xbfd   :  { %7473 = vst [vmem:[#allocation19 + $0x30] sm:$0xff] %v7409_v14  ;;  %v7071_v6 = vadd.f32 %v16112_v19, %v16116_v11  ;;  %v6814_v25 = vadd.f32 %v14859_v54, %v6744_v7  ;;  %v6813_v48 = vadd.f32 %v14859_v54, %v6743_v9  ;;  %v7086_v2 = vadd.f32 %v16117_v57, %v16112_v19  ;;  %v14940_v14 = vpop.f32.mrb[198].mxu1 }
 0xbfe   :  { %v6745_v47 = vmul.f32 %v14807_v63, %v14549_v28  ;;  %v7348_v31 = vadd.f32 %v7066_v20, %v6812_v62  ;;  %v7347_v61 = vadd.f32 %v7061_v38, %v6811_v27  ;;  %v6816_v59 = vadd.f32 %v14859_v54, %v6746_v30  ;;  %v14945_v26 = vpop.f32.mrb[199].mxu1  ;;  %v16119_v38 = vld [vmem:[#allocation67_spill] sm:$0xff] }
 0xbff   :  { %v7081_v36 = vadd.f32 %v16112_v19, %v16118_v15  ;;  %v7350_v53 = vadd.f32 %v7076_v12, %v6814_v25  ;;  %v7349_v41 = vadd.f32 %v7071_v6, %v6813_v48  ;;  %v6748_v44 = vmul.f32 %v14807_v63, %v14567_v8  ;;  %v16120_v8 = vld [vmem:[#allocation47_spill] sm:$0xff]  ;;  %v14956_v48 = vpop.f32.mrb[200].mxu1 }
 0xc00   :  { %v6815_v13 = vadd.f32 %v14859_v54, %v6745_v47  ;;  %v7412_v7 = vmax.f32 %v7348_v31, 0.0  ;;  %v7411_v28 = vmax.f32 %v7347_v61, 0.0  ;;  %v7352_v20 = vadd.f32 %v7086_v2, %v6816_v59  ;;  %v14962_v61 = vpop.f32.mrb[201].mxu1 }
 0xc01   :  { %v7096_v33 = vadd.f32 %v16119_v38, %v16112_v19  ;;  %v7414_v9 = vmax.f32 %v7350_v53, 0.0  ;;  %v7413_v62 = vmax.f32 %v7349_v41, 0.0  ;;  %v6818_v11 = vadd.f32 %v14859_v54, %v6748_v44  ;;  %v16121_v53 = vld [vmem:[#allocation48_spill] sm:$0xff] }
 0xc02   :  { %v7351_v27 = vadd.f32 %v7081_v36, %v6815_v13  ;;  %7476 = vst [vmem:[#allocation19 + $0x48] sm:$0xff] %v7412_v7  ;;  %7475 = vst [vmem:[#allocation19 + $0x40] sm:$0xff] %v7411_v28  ;;  %v7416_v12 = vmax.f32 %v7352_v20, 0.0  ;;  %v6747_v6 = vmul.f32 %v14807_v63, %v14561_v43  ;;  %v7091_v30 = vadd.f32 %v16112_v19, %v16120_v8  ;;  %v14978_v28 = vpop.f32.mrb[202].mxu1 }
 0xc03   :  { %v6750_v25 = vmul.f32 %v14807_v63, %v14579_v55  ;;  %7478 = vst [vmem:[#allocation19 + $0x58] sm:$0xff] %v7414_v9  ;;  %7477 = vst [vmem:[#allocation19 + $0x50] sm:$0xff] %v7413_v62  ;;  %v7354_v2 = vadd.f32 %v7096_v33, %v6818_v11  ;;  %v7106_v47 = vadd.f32 %v14481_v46, %v16112_v19  ;;  %v16122_v11 = vld [vmem:[#allocation69_spill] sm:$0xff] }
 0xc04   :  { %v7415_v57 = vmax.f32 %v7351_v27, 0.0  ;;  %v6749_v31 = vmul.f32 %v14807_v63, %v14573_v35  ;;  %7480 = vst [vmem:[#allocation19 + $0x68] sm:$0xff] %v7416_v12  ;;  %v6817_v43 = vadd.f32 %v14859_v54, %v6747_v6  ;;  %v7101_v55 = vadd.f32 %v16112_v19, %v14507_v60 }
 0xc05   :  { %v6820_v59 = vadd.f32 %v14859_v54, %v6750_v25  ;;  %v6752_v15 = vmul.f32 %v14807_v63, %v14593_v42  ;;  %v7418_v36 = vmax.f32 %v7354_v2, 0.0  ;;  %v7116_v35 = vadd.f32 %v16121_v53, %v16112_v19 }
 0xc06   :  { %7479 = vst [vmem:[#allocation19 + $0x60] sm:$0xff] %v7415_v57  ;;  %v6819_v46 = vadd.f32 %v14859_v54, %v6749_v31  ;;  %v6751_v41 = vmul.f32 %v14807_v63, %v14587_v32  ;;  %v7353_v13 = vadd.f32 %v7091_v30, %v6817_v43  ;;  %v7111_v60 = vadd.f32 %v16112_v19, %v14607_v56  ;;  %v14985_v32 = vpop.f32.mrb[203].mxu1 }
 0xc07   :  { %v7356_v44 = vadd.f32 %v7106_v47, %v6820_v59  ;;  %v6822_v7 = vadd.f32 %v14859_v54, %v6752_v15  ;;  %7482 = vst [vmem:[#allocation19 + $0x78] sm:$0xff] %v7418_v36  ;;  %v6754_v38 = vmul.f32 %v14807_v63, %v14605_v29  ;;  %v7126_v33 = vadd.f32 %v14681_v23, %v16112_v19  ;;  %v14997_v2 = vpop.f32.mrb[204].mxu1 }
 0xc08   :  { %v7355_v42 = vadd.f32 %v7101_v55, %v6819_v46  ;;  %v6821_v20 = vadd.f32 %v14859_v54, %v6751_v41  ;;  %v7417_v9 = vmax.f32 %v7353_v13, 0.0  ;;  %v6753_v56 = vmul.f32 %v14807_v63, %v16122_v11  ;;  %v15003_v59 = vpop.f32.mrb[205].mxu1 }
 0xc09   :  { %v7420_v62 = vmax.f32 %v7356_v44, 0.0  ;;  %v7358_v27 = vadd.f32 %v7116_v35, %v6822_v7  ;;  %v6824_v8 = vadd.f32 %v14859_v54, %v6754_v38  ;;  %v7121_v30 = vadd.f32 %v16112_v19, %v14707_v49  ;;  %v15018_v13 = vpop.f32.mrb[206].mxu1 }
 0xc0a   :  { %v7419_v12 = vmax.f32 %v7355_v42, 0.0  ;;  %v7357_v6 = vadd.f32 %v7111_v60, %v6821_v20  ;;  %7481 = vst [vmem:[#allocation19 + $0x70] sm:$0xff] %v7417_v9  ;;  %v6823_v23 = vadd.f32 %v14859_v54, %v6753_v56  ;;  %v6756_v25 = vmul.f32 %v14807_v63, %v14619_v40 }
 0xc0b   :  { %7484 = vst [vmem:[#allocation19 + $0x88] sm:$0xff] %v7420_v62  ;;  %v7422_v29 = vmax.f32 %v7358_v27, 0.0  ;;  %v7136_v57 = vadd.f32 %v14781_v52, %v16112_v19  ;;  %v7360_v31 = vadd.f32 %v7126_v33, %v6824_v8  ;;  %v6755_v43 = vmul.f32 %v14807_v63, %v14613_v16 }
 0xc0c   :  { %7483 = vst [vmem:[#allocation19 + $0x80] sm:$0xff] %v7419_v12  ;;  %v7421_v47 = vmax.f32 %v7357_v6, 0.0  ;;  %v7131_v49 = vadd.f32 %v16112_v19, %v14809_v50  ;;  %v7359_v55 = vadd.f32 %v7121_v30, %v6823_v23  ;;  %v6826_v40 = vadd.f32 %v14859_v54, %v6756_v25 }
 0xc0d   :  { %7486 = vst [vmem:[#allocation19 + $0x98] sm:$0xff] %v7422_v29  ;;  %v6758_v52 = vmul.f32 %v14807_v63, %v14631_v17  ;;  %v7146_v15 = vadd.f32 %v14873_v58, %v16112_v19  ;;  %v7424_v36 = vmax.f32 %v7360_v31, 0.0  ;;  %v6825_v46 = vadd.f32 %v14859_v54, %v6755_v43 }
 0xc0e   :  { %7485 = vst [vmem:[#allocation19 + $0x90] sm:$0xff] %v7421_v47  ;;  %v6757_v16 = vmul.f32 %v14807_v63, %v14625_v45  ;;  %v7141_v50 = vadd.f32 %v16112_v19, %v14883_v1  ;;  %v7423_v53 = vmax.f32 %v7359_v55, 0.0  ;;  %v7362_v35 = vadd.f32 %v7136_v57, %v6826_v40  ;;  %v15025_v1 = vpop.f32.mrb[207].mxu1 }
 0xc0f   :  { %v6828_v41 = vadd.f32 %v14859_v54, %v6758_v52  ;;  %v6760_v17 = vmul.f32 %v14807_v63, %v14643_v39  ;;  %7488 = vst [vmem:[#allocation19 + $0xa8] sm:$0xff] %v7424_v36  ;;  %v7361_v58 = vadd.f32 %v7131_v49, %v6825_v46  ;;  %v7156_v7 = vadd.f32 %v14898_v3, %v16112_v19  ;;  %v15037_v56 = vpop.f32.mrb[208].mxu1 }
 0xc10   :  { %v6827_v44 = vadd.f32 %v14859_v54, %v6757_v16  ;;  %v6759_v45 = vmul.f32 %v14807_v63, %v14637_v18  ;;  %7487 = vst [vmem:[#allocation19 + $0xa0] sm:$0xff] %v7423_v53  ;;  %v7426_v60 = vmax.f32 %v7362_v35, 0.0  ;;  %v7151_v39 = vadd.f32 %v16112_v19, %v14904_v24 }
 0xc11   :  { %v7364_v42 = vadd.f32 %v7146_v15, %v6828_v41  ;;  %v6830_v20 = vadd.f32 %v14859_v54, %v6760_v17  ;;  %v7425_v38 = vmax.f32 %v7361_v58, 0.0  ;;  %v6762_v3 = vmul.f32 %v14807_v63, %v14655_v51  ;;  %v15042_v51 = vpop.f32.mrb[209].mxu1 }
 0xc12   :  { %v7363_v33 = vadd.f32 %v7141_v50, %v6827_v44  ;;  %v6829_v9 = vadd.f32 %v14859_v54, %v6759_v45  ;;  %7490 = vst [vmem:[#allocation19 + $0xb8] sm:$0xff] %v7426_v60  ;;  %v7166_v27 = vadd.f32 %v14913_v4, %v16112_v19  ;;  %v6761_v11 = vmul.f32 %v14807_v63, %v14649_v0  ;;  %v16124_v45 = vld [vmem:[#allocation70_spill] sm:$0xff] }
 0xc13   :  { %v7428_v62 = vmax.f32 %v7364_v42, 0.0  ;;  %v7366_v18 = vadd.f32 %v7156_v7, %v6830_v20  ;;  %7489 = vst [vmem:[#allocation19 + $0xb0] sm:$0xff] %v7425_v38  ;;  %v6832_v6 = vadd.f32 %v14859_v54, %v6762_v3  ;;  %v7161_v8 = vadd.f32 %v16112_v19, %v14923_v10 }
 0xc14   :  { %v7427_v24 = vmax.f32 %v7363_v33, 0.0  ;;  %v7365_v12 = vadd.f32 %v7151_v39, %v6829_v9  ;;  %v6831_v29 = vadd.f32 %v14859_v54, %v6761_v11  ;;  %v6764_v4 = vmul.f32 %v14807_v63, %v14667_v34  ;;  %v16125_v39 = vld [vmem:[#allocation71_spill] sm:$0xff] }
 0xc15   :  { %7492 = vst [vmem:[#allocation19 + $0xc8] sm:$0xff] %v7428_v62  ;;  %v7430_v30 = vmax.f32 %v7366_v18, 0.0  ;;  %v7176_v0 = vadd.f32 %v14940_v14, %v16112_v19  ;;  %v7368_v25 = vadd.f32 %v7166_v27, %v6832_v6  ;;  %v6763_v57 = vmul.f32 %v14807_v63, %v14661_v22  ;;  %v15058_v14 = vpop.f32.mrb[210].mxu1  ;;  %v16123_v22 = vld [vmem:[#allocation49_spill] sm:$0xff]  ;;  %v16126_v27 = vld [vmem:[#allocation72_spill] sm:$0xff] }
 0xc16   :  { %7491 = vst [vmem:[#allocation19 + $0xc0] sm:$0xff] %v7427_v24  ;;  %v7429_v23 = vmax.f32 %v7365_v12, 0.0  ;;  %v7171_v10 = vadd.f32 %v16112_v19, %v14945_v26  ;;  %v7367_v47 = vadd.f32 %v7161_v8, %v6831_v29  ;;  %v6834_v31 = vadd.f32 %v14859_v54, %v6764_v4  ;;  %v15065_v52 = vpop.f32.mrb[211].mxu1  ;;  %v16127_v8 = vld [vmem:[#allocation73_spill] sm:$0xff] }
 0xc17   :  { %7494 = vst [vmem:[#allocation19 + $0xd8] sm:$0xff] %v7430_v30  ;;  %v6766_v43 = vmul.f32 %v14807_v63, %v14679_v5  ;;  %v7186_v34 = vadd.f32 %v14956_v48, %v16112_v19  ;;  %v7432_v49 = vmax.f32 %v7368_v25, 0.0  ;;  %v6833_v55 = vadd.f32 %v14859_v54, %v6763_v57  ;;  %v8153_v58 = vpop.f32.mrb[212].mxu1 }
 0xc18   :  { %7493 = vst [vmem:[#allocation19 + $0xd0] sm:$0xff] %v7429_v23  ;;  %v6765_v40 = vmul.f32 %v14807_v63, %v16123_v22  ;;  %v7181_v26 = vadd.f32 %v16112_v19, %v14962_v61  ;;  %v7431_v15 = vmax.f32 %v7367_v47, 0.0  ;;  %v7370_v36 = vadd.f32 %v7176_v0, %v6834_v31  ;;  %v16128_v23 = vld [vmem:[#allocation74_spill] sm:$0xff]  ;;  %v16129_v47 = vld [vmem:[#allocation75_spill] sm:$0xff] }
 0xc19   :  { %v6836_v5 = vadd.f32 %v14859_v54, %v6766_v43  ;;  %v6768_v48 = vmul.f32 %v14807_v63, %v14693_v21  ;;  %7496 = vst [vmem:[#allocation19 + $0xe8] sm:$0xff] %v7432_v49  ;;  %v7369_v46 = vadd.f32 %v7171_v10, %v6833_v55  ;;  %v7196_v50 = vadd.f32 %v14978_v28, %v16112_v19  ;;  %v15081_v28 = vpop.f32.mrb[213].mxu1  ;;  %v16130_v55 = vld [vmem:[#allocation76_spill] sm:$0xff] }
 0xc1a   :  { %v6835_v16 = vadd.f32 %v14859_v54, %v6765_v40  ;;  %v6767_v53 = vmul.f32 %v14807_v63, %v14687_v37  ;;  %7495 = vst [vmem:[#allocation19 + $0xe0] sm:$0xff] %v7431_v15  ;;  %v7434_v61 = vmax.f32 %v7370_v36, 0.0  ;;  %v7191_v17 = vadd.f32 %v16112_v19, %v14985_v32  ;;  %v8156_v24 = vpop.f32.mrb[214].mxu1  ;;  %v16131_v36 = vld [vmem:[#allocation77_spill] sm:$0xff] }
 0xc1b   :  { %v7372_v35 = vadd.f32 %v7186_v34, %v6836_v5  ;;  %v6838_v41 = vadd.f32 %v14859_v54, %v6768_v48  ;;  %v7433_v21 = vmax.f32 %v7369_v46, 0.0  ;;  %v6770_v60 = vmul.f32 %v14807_v63, %v16124_v45  ;;  %v7250_v29 = vpop.f32.mrb[215].mxu1 }
 0xc1c   :  { %v7371_v44 = vadd.f32 %v7181_v26, %v6835_v16  ;;  %v6837_v7 = vadd.f32 %v14859_v54, %v6767_v53  ;;  %7498 = vst [vmem:[#allocation19 + $0xf8] sm:$0xff] %v7434_v61  ;;  %v7206_v20 = vadd.f32 %v14997_v2, %v16112_v19  ;;  %v6769_v38 = vmul.f32 %v14807_v63, %v16125_v39  ;;  %v8159_v40 = vpop.f32.mrb[216].mxu1 }
 0xc1d   :  { %v7436_v37 = vmax.f32 %v7372_v35, 0.0  ;;  %v7374_v42 = vadd.f32 %v7196_v50, %v6838_v41  ;;  %7497 = vst [vmem:[#allocation19 + $0xf0] sm:$0xff] %v7433_v21  ;;  %v6840_v9 = vadd.f32 %v14859_v54, %v6770_v60  ;;  %v7201_v3 = vadd.f32 %v16112_v19, %v15003_v59  ;;  %v7260_v48 = vpop.f32.mrb[217].mxu1  ;;  %v16132_v41 = vld [vmem:[#allocation78_spill] sm:$0xff] }
 0xc1e   :  { %v7435_v32 = vmax.f32 %v7371_v44, 0.0  ;;  %v7373_v33 = vadd.f32 %v7191_v17, %v6837_v7  ;;  %v6839_v18 = vadd.f32 %v14859_v54, %v6769_v38  ;;  %v6772_v11 = vmul.f32 %v14807_v63, %v16126_v27  ;;  %v16133_v7 = vld [vmem:[#allocation79_spill] sm:$0xff]  ;;  %v8162_v60 = vpop.f32.mrb[218].mxu1 }
 0xc1f   :  { %7500 = vst [vmem:[#allocation19 + $0x108] sm:$0xff] %v7436_v37  ;;  %v7438_v62 = vmax.f32 %v7374_v42, 0.0  ;;  %v7216_v2 = vadd.f32 %v15018_v13, %v16112_v19  ;;  %v7376_v6 = vadd.f32 %v7206_v20, %v6840_v9  ;;  %v6771_v30 = vmul.f32 %v14807_v63, %v16127_v8  ;;  %v7270_v39 = vpop.f32.mrb[219].mxu1 }
 0xc20   :  { %7499 = vst [vmem:[#allocation19 + $0x100] sm:$0xff] %v7435_v32  ;;  %v7437_v12 = vmax.f32 %v7373_v33, 0.0  ;;  %v7211_v59 = vadd.f32 %v16112_v19, %v15025_v1  ;;  %v7375_v4 = vadd.f32 %v7201_v3, %v6839_v18  ;;  %v6842_v0 = vadd.f32 %v14859_v54, %v6772_v11  ;;  %v16134_v33 = vld [vmem:[#allocation80_spill] sm:$0xff]  ;;  %v16135_v18 = vld [vmem:[#allocation81_spill] sm:$0xff] }
 0xc21   :  { %7502 = vst [vmem:[#allocation19 + $0x118] sm:$0xff] %v7438_v62  ;;  %v6774_v25 = vmul.f32 %v14807_v63, %v16128_v23  ;;  %v7226_v13 = vadd.f32 %v15037_v56, %v16112_v19  ;;  %v7440_v57 = vmax.f32 %v7376_v6, 0.0  ;;  %v6841_v10 = vadd.f32 %v14859_v54, %v6771_v30  ;;  %v8165_v30 = vpop.f32.mrb[220].mxu1 }
 0xc22   :  { %7501 = vst [vmem:[#allocation19 + $0x110] sm:$0xff] %v7437_v12  ;;  %v6773_v31 = vmul.f32 %v14807_v63, %v16129_v47  ;;  %v7221_v1 = vadd.f32 %v16112_v19, %v15042_v51  ;;  %v7439_v43 = vmax.f32 %v7375_v4, 0.0  ;;  %v7378_v34 = vadd.f32 %v7216_v2, %v6842_v0  ;;  %v16136_v12 = vld [vmem:[#allocation82_spill] sm:$0xff]  ;;  %v16137_v4 = vld [vmem:[#allocation83_spill] sm:$0xff] }
 0xc23   :  { %v6844_v49 = vadd.f32 %v14859_v54, %v6774_v25  ;;  %v6776_v22 = vmul.f32 %v14807_v63, %v16130_v55  ;;  %7504 = vst [vmem:[#allocation19 + $0x128] sm:$0xff] %v7440_v57  ;;  %v7377_v56 = vadd.f32 %v7211_v59, %v6841_v10  ;;  %v7236_v15 = vadd.f32 %v15058_v14, %v16112_v19  ;;  %v16138_v10 = vld [vmem:[#allocation84_spill] sm:$0xff] }
 0xc24   :  { %v6843_v26 = vadd.f32 %v14859_v54, %v6773_v31  ;;  %v6775_v5 = vmul.f32 %v14807_v63, %v16131_v36  ;;  %7503 = vst [vmem:[#allocation19 + $0x120] sm:$0xff] %v7439_v43  ;;  %v7442_v51 = vmax.f32 %v7378_v34, 0.0  ;;  %v7231_v50 = vadd.f32 %v16112_v19, %v15065_v52  ;;  %v16139_v34 = vld [vmem:[#allocation85_spill] sm:$0xff] }
 0xc25   :  { %v7380_v46 = vadd.f32 %v7226_v13, %v6844_v49  ;;  %v6846_v16 = vadd.f32 %v14859_v54, %v6776_v22  ;;  %v7441_v53 = vmax.f32 %v7377_v56, 0.0  ;;  %v6778_v17 = vmul.f32 %v14807_v63, %v16132_v41 }
 0xc26   :  { %v7379_v61 = vadd.f32 %v7221_v1, %v6843_v26  ;;  %v6845_v35 = vadd.f32 %v14859_v54, %v6775_v5  ;;  %7506 = vst [vmem:[#allocation19 + $0x138] sm:$0xff] %v7442_v51  ;;  %v7246_v44 = vadd.f32 %v8153_v58, %v16112_v19  ;;  %v6777_v45 = vmul.f32 %v14807_v63, %v16133_v7 }
 0xc27   :  { %v7444_v14 = vmax.f32 %v7380_v46, 0.0  ;;  %v7382_v21 = vadd.f32 %v7236_v15, %v6846_v16  ;;  %7505 = vst [vmem:[#allocation19 + $0x130] sm:$0xff] %v7441_v53  ;;  %v6848_v52 = vadd.f32 %v14859_v54, %v6778_v17  ;;  %v7241_v20 = vadd.f32 %v16112_v19, %v15081_v28 }
 0xc28   :  { %v7443_v37 = vmax.f32 %v7379_v61, 0.0  ;;  %v7381_v42 = vadd.f32 %v7231_v50, %v6845_v35  ;;  %v6847_v32 = vadd.f32 %v14859_v54, %v6777_v45  ;;  %v6780_v58 = vmul.f32 %v14807_v63, %v16134_v33  ;;  %v16141_v61 = vld [vmem:[#allocation87_spill] sm:$0xff]  ;;  %v16142_v45 = vld [vmem:[#allocation88_spill] sm:$0xff] }
 0xc29   :  { %7508 = vst [vmem:[#allocation19 + $0x148] sm:$0xff] %v7444_v14  ;;  %v7446_v38 = vmax.f32 %v7382_v21, 0.0  ;;  %v7256_v9 = vadd.f32 %v8156_v24, %v16112_v19  ;;  %v7384_v62 = vadd.f32 %v7246_v44, %v6848_v52  ;;  %v6779_v27 = vmul.f32 %v14807_v63, %v16135_v18 }
 0xc2a   :  { %7507 = vst [vmem:[#allocation19 + $0x140] sm:$0xff] %v7443_v37  ;;  %v7445_v3 = vmax.f32 %v7381_v42, 0.0  ;;  %v7251_v11 = vadd.f32 %v16112_v19, %v7250_v29  ;;  %v7383_v28 = vadd.f32 %v7241_v20, %v6847_v32  ;;  %v6850_v2 = vadd.f32 %v14859_v54, %v6780_v58  ;;  %v7280_v29 = vpop.f32.mrb[221].mxu1  ;;  %v15167_v32 = vld [vmem:[#allocation18] ss:$0 sm:$0xff] }
 0xc2b   :  { %7510 = vst [vmem:[#allocation19 + $0x158] sm:$0xff] %v7446_v38  ;;  %v6782_v6 = vmul.f32 %v14807_v63, %v16136_v12  ;;  %v7266_v8 = vadd.f32 %v8159_v40, %v16112_v19  ;;  %v7448_v24 = vmax.f32 %v7384_v62, 0.0  ;;  %v6849_v59 = vadd.f32 %v14859_v54, %v6779_v27  ;;  %v8168_v26 = vpop.f32.mrb[222].mxu1  ;;  %v16144_v62 = vld [vmem:[#allocation90_spill] sm:$0xff] }
 0xc2c   :  { %7509 = vst [vmem:[#allocation19 + $0x150] sm:$0xff] %v7445_v3  ;;  %v6781_v0 = vmul.f32 %v14807_v63, %v16137_v4  ;;  %v7261_v23 = vadd.f32 %v16112_v19, %v7260_v48  ;;  %v7447_v25 = vmax.f32 %v7383_v28, 0.0  ;;  %v7386_v13 = vadd.f32 %v7256_v9, %v6850_v2  ;;  %v16140_v48 = vld [vmem:[#allocation86_spill] sm:$0xff]  ;;  %v7290_v46 = vpop.f32.mrb[223].mxu1  ;;  %v16145_v28 = vld [vmem:[#allocation91_spill] sm:$0xff] }
 0xc2d   :  { %v6852_v57 = vadd.f32 %v14859_v54, %v6782_v6  ;;  %v6784_v47 = vmul.f32 %v14807_v63, %v16138_v10  ;;  %7512 = vst [vmem:[#allocation19 + $0x168] sm:$0xff] %v7448_v24  ;;  %v7385_v31 = vadd.f32 %v7251_v11, %v6849_v59  ;;  %v7276_v43 = vadd.f32 %v8162_v60, %v16112_v19  ;;  %v8171_v42 = vpop.f32.mrb[224].mxu1  ;;  %v16146_v24 = vld [vmem:[#allocation92_spill] sm:$0xff] }
 0xc2e   :  { %v6851_v1 = vadd.f32 %v14859_v54, %v6781_v0  ;;  %v6783_v49 = vmul.f32 %v14807_v63, %v16139_v34  ;;  %7511 = vst [vmem:[#allocation19 + $0x160] sm:$0xff] %v7447_v25  ;;  %v7450_v55 = vmax.f32 %v7386_v13, 0.0  ;;  %v7271_v56 = vadd.f32 %v16112_v19, %v7270_v39  ;;  %v16143_v39 = vld [vmem:[#allocation89_spill] sm:$0xff]  ;;  %v7300_v58 = vpop.f32.mrb[225].mxu1 }
 0xc2f   :  { %v7388_v22 = vadd.f32 %v7266_v8, %v6852_v57  ;;  %v6854_v40 = vadd.f32 %v14859_v54, %v6784_v47  ;;  %v7449_v15 = vmax.f32 %v7385_v31, 0.0  ;;  %v6786_v51 = vmul.f32 %v14807_v63, %v16140_v48  ;;  %v8174_v4 = vpop.f32.mrb[226].mxu1  ;;  %v16147_v25 = vld [vmem:[#allocation93_spill] sm:$0xff] }
 0xc30   :  { %v7387_v36 = vadd.f32 %v7261_v23, %v6851_v1  ;;  %v6853_v5 = vadd.f32 %v14859_v54, %v6783_v49  ;;  %7514 = vst [vmem:[#allocation19 + $0x178] sm:$0xff] %v7450_v55  ;;  %v7286_v53 = vadd.f32 %v8165_v30, %v16112_v19  ;;  %v6785_v35 = vmul.f32 %v14807_v63, %v16141_v61  ;;  %v7310_v57 = vpop.f32.mrb[227].mxu1  ;;  %v16148_v55 = vld [vmem:[#allocation94_spill] sm:$0xff] }
 0xc31   :  { %v7452_v16 = vmax.f32 %v7388_v22, 0.0  ;;  %v7390_v50 = vadd.f32 %v7276_v43, %v6854_v40  ;;  %7513 = vst [vmem:[#allocation19 + $0x170] sm:$0xff] %v7449_v15  ;;  %v6856_v14 = vadd.f32 %v14859_v54, %v6786_v51  ;;  %v7281_v21 = vadd.f32 %v16112_v19, %v7280_v29  ;;  %v16149_v15 = vld [vmem:[#allocation95_spill] sm:$0xff] }
 0xc32   :  { %v7451_v41 = vmax.f32 %v7387_v36, 0.0  ;;  %v7389_v17 = vadd.f32 %v7271_v56, %v6853_v5  ;;  %v6855_v7 = vadd.f32 %v14859_v54, %v6785_v35  ;;  %v6788_v60 = vmul.f32 %v14807_v63, %v16142_v45  ;;  %v16150_v5 = vld [vmem:[#allocation68_spill] sm:$0xff] }
 0xc33   :  { %7516 = vst [vmem:[#allocation19 + $0x188] sm:$0xff] %v7452_v16  ;;  %v7454_v44 = vmax.f32 %v7390_v50, 0.0  ;;  %v7296_v37 = vadd.f32 %v8168_v26, %v16112_v19  ;;  %v7392_v20 = vadd.f32 %v7286_v53, %v6856_v14  ;;  %v6787_v38 = vmul.f32 %v14807_v63, %v16143_v39  ;;  %v8177_v26 = vpop.f32.mrb[228].mxu1 }
 0xc34   :  { %7515 = vst [vmem:[#allocation19 + $0x180] sm:$0xff] %v7451_v41  ;;  %v7453_v52 = vmax.f32 %v7389_v17, 0.0  ;;  %v7291_v33 = vadd.f32 %v15167_v32, %v7290_v46  ;;  %v7391_v9 = vadd.f32 %v7281_v21, %v6855_v7  ;;  %v6858_v3 = vadd.f32 %v14859_v54, %v6788_v60  ;;  %v7320_v53 = vpop.f32.mrb[229].mxu1  ;;  %v16151_v21 = vld [vmem:[#allocation97_spill] sm:$0xff] }
 0xc35   :  { %7518 = vst [vmem:[#allocation19 + $0x198] sm:$0xff] %v7454_v44  ;;  %v6790_v18 = vmul.f32 %v14807_v63, %v16144_v62  ;;  %v7306_v19 = vadd.f32 %v15167_v32, %v8171_v42  ;;  %v7456_v27 = vmax.f32 %v7392_v20, 0.0  ;;  %v6857_v11 = vadd.f32 %v14859_v54, %v6787_v38  ;;  %v8180_v45 = vpop.f32.mrb[230].mxu1 }
 0xc36   :  { %7517 = vst [vmem:[#allocation19 + $0x190] sm:$0xff] %v7453_v52  ;;  %v6789_v2 = vmul.f32 %v14807_v63, %v16145_v28  ;;  %v7301_v12 = vadd.f32 %v15167_v32, %v7300_v58  ;;  %v7455_v6 = vmax.f32 %v7391_v9, 0.0  ;;  %v7394_v8 = vadd.f32 %v7296_v37, %v6858_v3  ;;  %v7330_v52 = vpop.f32.mrb[231].mxu1 }
 0xc37   :  { %v6860_v30 = vadd.f32 %v14859_v54, %v6790_v18  ;;  %v6792_v59 = vmul.f32 %v14807_v63, %v16146_v24  ;;  %7520 = vst [vmem:[#allocation19 + $0x1a8] sm:$0xff] %v7456_v27  ;;  %v7393_v0 = vadd.f32 %v7291_v33, %v6857_v11  ;;  %v7316_v29 = vadd.f32 %v15167_v32, %v8174_v4 }
 0xc38   :  { %v6859_v23 = vadd.f32 %v14859_v54, %v6789_v2  ;;  %v6791_v13 = vmul.f32 %v14807_v63, %v16147_v25  ;;  %7519 = vst [vmem:[#allocation19 + $0x1a0] sm:$0xff] %v7455_v6  ;;  %v7458_v10 = vmax.f32 %v7394_v8, 0.0  ;;  %v7311_v1 = vadd.f32 %v15167_v32, %v7310_v57 }
 0xc39   :  { %v7396_v47 = vadd.f32 %v7306_v19, %v6860_v30  ;;  %v6862_v31 = vadd.f32 %v14859_v54, %v6792_v59  ;;  %v7457_v43 = vmax.f32 %v7393_v0, 0.0  ;;  %v6794_v22 = vmul.f32 %v14807_v63, %v16148_v55 }
 0xc3a   :  { %v7395_v34 = vadd.f32 %v7301_v12, %v6859_v23  ;;  %v6861_v49 = vadd.f32 %v14859_v54, %v6791_v13  ;;  %7522 = vst [vmem:[#allocation19 + $0x1b8] sm:$0xff] %v7458_v10  ;;  %v6793_v36 = vmul.f32 %v14807_v63, %v16149_v15  ;;  %v6796_v48 = vmul.f32 %v14807_v63, %v16150_v5 }
 0xc3b   :  { %v7460_v40 = vmax.f32 %v7396_v47, 0.0  ;;  %v7398_v56 = vadd.f32 %v7316_v29, %v6862_v31  ;;  %7521 = vst [vmem:[#allocation19 + $0x1b0] sm:$0xff] %v7457_v43  ;;  %v6864_v16 = vadd.f32 %v14859_v54, %v6794_v22  ;;  %v7326_v50 = vadd.f32 %v15167_v32, %v8177_v26 }
 0xc3c   :  { %v7459_v51 = vmax.f32 %v7395_v34, 0.0  ;;  %v7397_v46 = vadd.f32 %v7311_v1, %v6861_v49  ;;  %v6863_v35 = vadd.f32 %v14859_v54, %v6793_v36  ;;  %v7321_v41 = vadd.f32 %v15167_v32, %v7320_v53 }
 0xc3d   :  { %7524 = vst [vmem:[#allocation19 + $0x1c8] sm:$0xff] %v7460_v40  ;;  %v7462_v61 = vmax.f32 %v7398_v56, 0.0  ;;  %v7400_v14 = vadd.f32 %v7326_v50, %v6864_v16  ;;  %v6795_v44 = vmul.f32 %v14807_v63, %v16151_v21  ;;  %v6866_v37 = vadd.f32 %v14859_v54, %v6796_v48 }
 0xc3e   :  { %7523 = vst [vmem:[#allocation19 + $0x1c0] sm:$0xff] %v7459_v51  ;;  %v7461_v17 = vmax.f32 %v7397_v46, 0.0  ;;  %v7399_v7 = vadd.f32 %v7321_v41, %v6863_v35  ;;  %v7336_v42 = vadd.f32 %v15167_v32, %v8180_v45  ;;  %v7331_v38 = vadd.f32 %v15167_v32, %v7330_v52 }
 0xc3f   :  { %7526 = vst [vmem:[#allocation19 + $0x1d8] sm:$0xff] %v7462_v61  ;;  %v7464_v60 = vmax.f32 %v7400_v14, 0.0  ;;  %v6865_v39 = vadd.f32 %v14859_v54, %v6795_v44 }
 0xc40   :  { %7525 = vst [vmem:[#allocation19 + $0x1d0] sm:$0xff] %v7461_v17  ;;  %v7463_v20 = vmax.f32 %v7399_v7, 0.0  ;;  %v7402_v33 = vadd.f32 %v7336_v42, %v6866_v37 }
 0xc41   :  { %7528 = vst [vmem:[#allocation19 + $0x1e8] sm:$0xff] %v7464_v60  ;;  %v7401_v63 = vadd.f32 %v7331_v38, %v6865_v39 }
 0xc42   :  { %7527 = vst [vmem:[#allocation19 + $0x1e0] sm:$0xff] %v7463_v20  ;;  %v7466_v58 = vmax.f32 %v7402_v33, 0.0 }
 0xc43   :  { %v7465_v9 = vmax.f32 %v7401_v63, 0.0 }
 0xc44   :  { %7530 = vst [vmem:[#allocation19 + $0x1f8] sm:$0xff] %v7466_v58 }
 0xc45   :  { %7529 = vst [vmem:[#allocation19 + $0x1f0] sm:$0xff] %v7465_v9 }
 0xc46   :  { %9678 = shalt.err (!%p9675_p6)
}
 0xc47   :  { %s9679_s13 = scalar_lea.hbm %s15228_s9, 8192 }
 0xc48   :  { %p9680_p7 = scmp.ne.s32.totalorder %s15228_s9, %s9679_s13  ;;  %p9683_p8 = scmp.lt.u32.totalorder %s9679_s13, %s15228_s9 }
 0xc4a   :  { %p9685_p9 = pnand %p9683_p8, %p9680_p7 }
 0xc4c   :  { %9688 = shalt.err (!%p9685_p9)
}
 0xc4d   :  { %7542 = dma.vmem_to_hbm [thread:$0]  %s7537_s2, 8192, %s15228_s9, [#allocation6], %s9703_s21, %s9703_s21, %s9704_s22  }
 0xc4e   :  { %9699 = dma.done.wait [#allocation6], 8192  }
 0xc4f   :  { %9700 = vsyncadd [#allocation6], 4294959104 }
 0xc50   :  { %7546 = vsyncpa [#allocation5], 1 }
 0xc51   :  { %7547 = vsyncpa [#allocation8], 1 }
 0xc52   :  { %7548 = vsyncpa [#allocation11], 1 }
 0xc53   :  { %7549 = vsyncpa [#allocation14], 1 }
 0xc54   :  { %7550 = vsyncpa [#allocation17], 1 }
 0xc55   :  { %7551 = vsyncpa [#allocation6], 1 }

</bundles_post_ra>
